<compile_context>
chip_gen: v6e
topology: v6e:2x2x1
jax: 0.10.0
libtpu: 0.0.40
codegen_flags: <defaults>
</compile_context>

<pallas_src>
import functools

import numpy as np
import jax
import jax.numpy as jnp
from jax import lax
from jax.experimental import pallas as pl
from jax.experimental.pallas import tpu as pltpu

LRELU_SLOPE = 0.2
BN_EPS = 1e-5
F32 = jnp.float32
BF16 = jnp.bfloat16


# ---------------------------------------------------------------------------
# Pallas kernels
# ---------------------------------------------------------------------------
def _conv_bias_lrelu_kernel(p_ref, w_ref, b_ref, o_ref):
    """(tm, K)bf16 @ (K, Cp)bf16 -> f32, + bias, LeakyReLU, store bf16."""
    acc = jnp.dot(p_ref[...], w_ref[...], preferred_element_type=jnp.float32)
    acc = acc + b_ref[...]
    y = jnp.where(acc > 0, acc, LRELU_SLOPE * acc)
    o_ref[...] = y.astype(o_ref.dtype)


def _conv_bn_lrelu_kernel(p_ref, w_ref, g_ref, beta_ref, o_ref):
    """Fused conv + batch-stats BatchNorm + LeakyReLU (single grid step, no bias).

    The conv bias is mathematically cancelled by the mean subtraction, so it is
    not passed at all (saves one operand DMA and a full-tile VPU add).
    """
    acc = jnp.dot(p_ref[...], w_ref[...], preferred_element_type=jnp.float32)
    inv_m = jnp.float32(1.0 / acc.shape[0])
    mean = jnp.sum(acc, axis=0, keepdims=True) * inv_m
    cen = acc - mean
    var = jnp.sum(cen * cen, axis=0, keepdims=True) * inv_m   # biased var (PyTorch train BN)
    scale = g_ref[...] * lax.rsqrt(var + BN_EPS)
    y = cen * scale + beta_ref[...]
    o_ref[...] = jnp.where(y > 0, y, LRELU_SLOPE * y).astype(o_ref.dtype)


def _conv_bn_lrelu_head_kernel(p_ref, w3_ref, g_ref, beta_ref, w4_ref, sel_ref,
                               b4_ref, o_ref):
    """conv3 + BN + LeakyReLU with the final 4x4-valid conv (cout=1) folded in.

    Rows of the (m, C3) activation are ordered (n, ho, wo).  The head conv is an
    elementwise multiply by the per-(position, channel) weight followed by a
    per-sample reduction, done as a tiny (N, m) selection matmul + lane reduce,
    so the conv3 activation never leaves VMEM.
    """
    acc = jnp.dot(p_ref[...], w3_ref[...], preferred_element_type=jnp.float32)  # (m, C3) f32
    inv_m = jnp.float32(1.0 / acc.shape[0])
    mean = jnp.sum(acc, axis=0, keepdims=True) * inv_m
    cen = acc - mean
    var = jnp.sum(cen * cen, axis=0, keepdims=True) * inv_m
    scale = g_ref[...] * lax.rsqrt(var + BN_EPS)
    y = cen * scale + beta_ref[...]
    y = jnp.where(y > 0, y, LRELU_SLOPE * y)
    prod = y * w4_ref[...]                                                     # (m, C3) f32
    per_sample = jnp.dot(sel_ref[...], prod, preferred_element_type=jnp.float32)  # (N, C3)
    o_ref[...] = jnp.sum(per_sample, axis=1, keepdims=True) + b4_ref[...]      # (N, 1)


# ---------------------------------------------------------------------------
# Glue: im2col + weight packing
# ---------------------------------------------------------------------------
def _round_up(x, m):
    return (x + m - 1) // m * m


def _im2col(x_nhwc, kh, kw, stride, pad):
    n, h, w, c = x_nhwc.shape
    ho = (h + 2 * pad - kh) // stride + 1
    wo = (w + 2 * pad - kw) // stride + 1
    xp = jnp.pad(x_nhwc, ((0, 0), (pad, pad), (pad, pad), (0, 0)))
    cols = [xp[:, i:i + ho * stride:stride, j:j + wo * stride:stride, :]
            for i in range(kh) for j in range(kw)]
    patches = jnp.concatenate(cols, axis=-1)                 # (N, Ho, Wo, KH*KW*C)
    return patches.reshape(n * ho * wo, kh * kw * c).astype(BF16), ho, wo


def _weight_matrix(w_oihw, cout_padded):
    cout, cin, kh, kw = w_oihw.shape
    # (kh, kw, cin, cout) ordering matches the im2col column ordering above.
    w = jnp.transpose(w_oihw, (2, 3, 1, 0)).reshape(kh * kw * cin, cout)
    if cout_padded > cout:
        w = jnp.pad(w, ((0, 0), (0, cout_padded - cout)))
    return w.astype(BF16)


def _pad_row(v, cp):
    row = v.reshape(1, -1).astype(F32)
    if cp > row.shape[1]:
        row = jnp.pad(row, ((0, 0), (0, cp - row.shape[1])))
    return row


# ---------------------------------------------------------------------------
# Layer wrappers
# ---------------------------------------------------------------------------
def conv_lrelu_pallas(x_nhwc, w_oihw, b, stride, pad, *, m_splits=1):
    n = x_nhwc.shape[0]
    cout, _, kh, kw = w_oihw.shape
    patches, ho, wo = _im2col(x_nhwc, kh, kw, stride, pad)
    m, k = patches.shape
    if m % m_splits != 0 or (m // m_splits) % 8 != 0:
        m_splits = 1
    tm = m // m_splits
    cp = _round_up(cout, 128)                                 # lane-dense output
    w_mat = _weight_matrix(w_oihw, cp)
    b_row = _pad_row(b, cp)

    y2d = pl.pallas_call(
        _conv_bias_lrelu_kernel,
        grid=(m_splits,),
        in_specs=[pl.BlockSpec((tm, k), lambda i: (i, 0)),
                  pl.BlockSpec((k, cp), lambda i: (0, 0)),
                  pl.BlockSpec((1, cp), lambda i: (0, 0))],
        out_specs=pl.BlockSpec((tm, cp), lambda i: (i, 0)),
        out_shape=jax.ShapeDtypeStruct((m, cp), BF16),
        compiler_params=pltpu.CompilerParams(dimension_semantics=("parallel",)),
    )(patches, w_mat, b_row)
    return y2d.reshape(n, ho, wo, cp)[..., :cout]


def conv_bn_lrelu_pallas(x_nhwc, w_oihw, gamma, beta, stride, pad):
    n = x_nhwc.shape[0]
    cout, _, kh, kw = w_oihw.shape
    patches, ho, wo = _im2col(x_nhwc, kh, kw, stride, pad)
    m, k = patches.shape
    cp = _round_up(cout, 128)
    w_mat = _weight_matrix(w_oihw, cp)
    g_row = _pad_row(gamma, cp)
    beta_row = _pad_row(beta, cp)

    # Single grid step: the in-kernel mean/var must cover the full batch.
    y2d = pl.pallas_call(
        _conv_bn_lrelu_kernel,
        grid=(1,),
        in_specs=[pl.BlockSpec((m, k), lambda i: (0, 0)),
                  pl.BlockSpec((k, cp), lambda i: (0, 0)),
                  pl.BlockSpec((1, cp), lambda i: (0, 0)),
                  pl.BlockSpec((1, cp), lambda i: (0, 0))],
        out_specs=pl.BlockSpec((m, cp), lambda i: (0, 0)),
        out_shape=jax.ShapeDtypeStruct((m, cp), BF16),
        compiler_params=pltpu.CompilerParams(dimension_semantics=("arbitrary",)),
    )(patches, w_mat, g_row, beta_row)
    return y2d.reshape(n, ho, wo, cp)[..., :cout]


def conv3_bn_lrelu_conv4_pallas(x_nhwc, w3, gamma, beta, w4, b4, stride, pad):
    n = x_nhwc.shape[0]
    c3, _, kh, kw = w3.shape
    patches, ho, wo = _im2col(x_nhwc, kh, kw, stride, pad)
    m, k = patches.shape
    p_count = ho * wo
    # The head conv is 4x4 valid over exactly conv3's output.
    assert ho == w4.shape[2] and wo == w4.shape[3], (ho, wo, w4.shape)

    w3_mat = _weight_matrix(w3, c3)                           # no pad (never stored)
    g_row = gamma.reshape(1, c3).astype(F32)
    beta_row = beta.reshape(1, c3).astype(F32)
    # w4_b[p, c] with p = ho*Wo + wo matches the (n, ho, wo) row ordering; tiled per sample.
    w4_b = jnp.transpose(w4[0], (1, 2, 0)).reshape(p_count, c3).astype(F32)
    w4_full = jnp.tile(w4_b, (n, 1))                          # (m, c3)
    sel = ((jnp.arange(m) // p_count)[None, :] == jnp.arange(n)[:, None]).astype(F32)  # (n, m)
    b4_arr = b4.reshape(1, 1).astype(F32)

    out = pl.pallas_call(
        _conv_bn_lrelu_head_kernel,
        grid=(1,),
        in_specs=[pl.BlockSpec((m, k), lambda i: (0, 0)),
                  pl.BlockSpec((k, c3), lambda i: (0, 0)),
                  pl.BlockSpec((1, c3), lambda i: (0, 0)),
                  pl.BlockSpec((1, c3), lambda i: (0, 0)),
                  pl.BlockSpec((m, c3), lambda i: (0, 0)),
                  pl.BlockSpec((n, m), lambda i: (0, 0)),
                  pl.BlockSpec((1, 1), lambda i: (0, 0))],
        out_specs=pl.BlockSpec((n, 1), lambda i: (0, 0)),
        out_shape=jax.ShapeDtypeStruct((n, 1), F32),
        compiler_params=pltpu.CompilerParams(dimension_semantics=("arbitrary",)),
    )(patches, w3_mat, g_row, beta_row, w4_full, sel, b4_arr)
    return out.reshape(-1)


# ---------------------------------------------------------------------------
# Discriminator forward (Pallas path)
# ---------------------------------------------------------------------------
def discriminator_forward(x_nchw, params, *, m_splits_conv0=1):
    x = jnp.transpose(x_nchw, (0, 2, 3, 1)).astype(BF16)      # NCHW -> NHWC, bf16 glue

    # layer 0: SN-Conv(5, s=2, p=2) + LeakyReLU(0.2)
    w0, b0 = params["conv0"]
    x = conv_lrelu_pallas(x, w0, b0, 2, 2, m_splits=m_splits_conv0)

    # layers 1..2: SN-Conv(5, s=2, p=2) + BatchNorm(batch stats) + LeakyReLU(0.2)
    # (conv bias dropped: exactly cancelled by BN mean subtraction)
    for li in (1, 2):
        w, _b = params[f"conv{li}"]
        gamma, beta = params[f"bn{li}"]
        x = conv_bn_lrelu_pallas(x, w, gamma, beta, 2, 2)

    # layer 3 + head: SN-Conv(5,s2,p2) + BN + LReLU with SN-Conv(4,s1,p0) folded in.
    w3, _b3 = params["conv3"]
    g3, be3 = params["bn3"]
    w4, b4 = params["conv4"]
    return conv3_bn_lrelu_conv4_pallas(x, w3, g3, be3, w4, b4, 2, 2)  # (N,)


def _conv0_m_splits():
    """2-way parallel grid for conv0 only if the device has >1 TensorCore (v7x)."""
    try:
        dev = jax.devices()[0]
        cores = int(getattr(dev, "num_cores", getattr(dev, "core_count", 1)) or 1)
    except Exception:
        cores = 1
    return 2 if cores >= 2 else 1


# ---------------------------------------------------------------------------
# Pure-JAX reference (for verification, f32 highest precision, biases included)
# ---------------------------------------------------------------------------
def reference_forward(x_nchw, params):
    def conv(x, w, b, stride, pad):
        y = lax.conv_general_dilated(
            x, w, window_strides=(stride, stride),
            padding=((pad, pad), (pad, pad)),
            dimension_numbers=("NCHW", "OIHW", "NCHW"),
            precision=jax.lax.Precision.HIGHEST)
        return y + b.reshape(1, -1, 1, 1)

    def lrelu(v):
        return jnp.where(v > 0, v, LRELU_SLOPE * v)

    def bn(v, gamma, beta):
        mu = jnp.mean(v, axis=(0, 2, 3), keepdims=True)
        var = jnp.mean((v - mu) ** 2, axis=(0, 2, 3), keepdims=True)
        g = gamma.reshape(1, -1, 1, 1)
        be = beta.reshape(1, -1, 1, 1)
        return g * (v - mu) / jnp.sqrt(var + BN_EPS) + be

    y = lrelu(conv(x_nchw, *params["conv0"], 2, 2))
    for li in (1, 2, 3):
        w, b = params[f"conv{li}"]
        g, be = params[f"bn{li}"]
        y = lrelu(bn(conv(y, w, b, 2, 2), g, be))
    w, b = params["conv4"]
    return conv(y, w, b, 1, 0).reshape(-1)


# ---------------------------------------------------------------------------
# Deterministic parameter setup
# ---------------------------------------------------------------------------
def spectral_normalize(w_oihw):
    # TODO(synk): PyTorch spectral_norm does a 1-step power iteration from a random u;
    # here we normalize by the exact top singular value (its fixed point).
    w2d = np.asarray(w_oihw).reshape(w_oihw.shape[0], -1)
    sigma = np.linalg.svd(w2d, compute_uv=False)[0]
    return (w_oihw / jnp.float32(sigma)).astype(F32)


def make_params(key, in_dim, dim):
    conv_defs = [
        (dim, in_dim, 5),
        (dim * 2, dim, 5),
        (dim * 4, dim * 2, 5),
        (dim * 8, dim * 4, 5),
        (1, dim * 8, 4),
    ]
    keys = jax.random.split(key, 16)
    params = {}
    ki = 0
    for li, (co, ci, k) in enumerate(conv_defs):
        w = 0.02 * jax.random.normal(keys[ki], (co, ci, k, k), F32); ki += 1
        b = 0.01 * jax.random.normal(keys[ki], (co,), F32); ki += 1
        params[f"conv{li}"] = (spectral_normalize(w), b)
    for li in (1, 2, 3):
        co = conv_defs[li][0]
        gamma = 1.0 + 0.02 * jax.random.normal(keys[ki], (co,), F32); ki += 1
        beta = jnp.zeros((co,), F32)
        params[f"bn{li}"] = (gamma, beta)
    return params, keys[ki]


# ---------------------------------------------------------------------------
if __name__ == "__main__":
    # The conv stack (5,s2,p2) x4 then k4 valid requires 64x64 spatial input;
    # keep it small via batch=2, in_dim=3, dim=8.
    N, IN_DIM, DIM, SPATIAL = 2, 3, 8, 64

    key = jax.random.PRNGKey(0)
    params, x_key = make_params(key, IN_DIM, DIM)
    x = jax.random.normal(x_key, (N, IN_DIM, SPATIAL, SPATIAL), F32)

    fwd = jax.jit(functools.partial(discriminator_forward,
                                    m_splits_conv0=_conv0_m_splits()))
    y = fwd(x, params)
    jax.block_until_ready(y)

    y_ref = reference_forward(x, params)
    assert y.shape == (N,), y.shape
    # bf16 MXU operands / bf16 activations (f32 accumulation & BN stats) vs an f32
    # HIGHEST reference across 5 layers: slightly loose tolerance, still catches bugs.
    np.testing.assert_allclose(np.asarray(y), np.asarray(y_ref), rtol=2e-2, atol=3e-2)

    print("KERNEL_OK")
</pallas_src>

<mosaic_0001>
module attributes {stable_mosaic.version = 11 : i64} {
  func.func @_conv_bias_lrelu_kernel(%arg0: i32, %arg1: memref<2048x75xbf16, #tpu.memory_space<vmem>>, %arg2: memref<75x128xbf16, #tpu.memory_space<vmem>>, %arg3: memref<1x128xf32, #tpu.memory_space<vmem>>, %arg4: memref<2048x128xbf16, #tpu.memory_space<vmem>>) attributes {dimension_semantics = [#tpu.dimension_semantics<parallel>], iteration_bounds = array<i64: 1>, scalar_prefetch = 0 : i64, scratch_operands = 0 : i64, tpu.core_type = #tpu.core_type<tc>, window_params = [{transform_indices = @transform_0, window_bounds = array<i64: 2048, 75>}, {pipeline_mode = #tpu.pipeline_mode<synchronous>, transform_indices = @transform_1, window_bounds = array<i64: 75, 128>}, {pipeline_mode = #tpu.pipeline_mode<synchronous>, transform_indices = @transform_2, window_bounds = array<i64: 1, 128>}, {transform_indices = @transform_3, window_bounds = array<i64: 2048, 128>}]} {
    %c0 = arith.constant 0 : index
    %c0_0 = arith.constant 0 : index
    %0 = vector.load %arg1[%c0, %c0_0] : memref<2048x75xbf16, #tpu.memory_space<vmem>>, vector<2048x75xbf16>
    %c0_1 = arith.constant 0 : index
    %c0_2 = arith.constant 0 : index
    %1 = vector.load %arg2[%c0_1, %c0_2] : memref<75x128xbf16, #tpu.memory_space<vmem>>, vector<75x128xbf16>
    %cst = arith.constant dense<0.000000e+00> : vector<2048x128xf32>
    %2 = tpu.matmul %0, %1, %cst {dimension_numbers = #tpu.dot_dimension_numbers<[1], [0], [0], [1], [0, 0, 1, 1], [], []>} : vector<2048x75xbf16>, vector<75x128xbf16>, vector<2048x128xf32> -> vector<2048x128xf32>
    %c0_3 = arith.constant 0 : index
    %c0_4 = arith.constant 0 : index
    %3 = vector.load %arg3[%c0_3, %c0_4] : memref<1x128xf32, #tpu.memory_space<vmem>>, vector<1x128xf32>
    %4 = vector.broadcast %3 : vector<1x128xf32> to vector<2048x128xf32>
    %5 = arith.addf %2, %4 : vector<2048x128xf32>
    %cst_5 = arith.constant 0.000000e+00 : f32
    %6 = vector.broadcast %cst_5 : f32 to vector<2048x128xf32>
    %7 = arith.cmpf ogt, %5, %6 : vector<2048x128xf32>
    %cst_6 = arith.constant 2.000000e-01 : f32
    %8 = vector.broadcast %cst_6 : f32 to vector<2048x128xf32>
    %9 = arith.mulf %8, %5 : vector<2048x128xf32>
    %10 = arith.select %7, %5, %9 : vector<2048x128xi1>, vector<2048x128xf32>
    %11 = arith.truncf %10 : vector<2048x128xf32> to vector<2048x128xbf16>
    %c0_7 = arith.constant 0 : index
    %c0_8 = arith.constant 0 : index
    %12 = vector.load %arg4[%c0_7, %c0_8] : memref<2048x128xbf16, #tpu.memory_space<vmem>>, vector<2048x128xbf16>
    tpu.vector_store %arg4[%c0_7, %c0_8], %11 {strides = array<i32>} : memref<2048x128xbf16, #tpu.memory_space<vmem>>, vector<2048x128xbf16>,
    return
  }
  func.func @transform_0(%arg0: i32) -> (i32, i32) {
    %c0_i32 = arith.constant 0 : i32
    %c0_i32_0 = arith.constant 0 : i32
    return %arg0, %c0_i32 : i32, i32
  }
  func.func @transform_1(%arg0: i32) -> (i32, i32) {
    %c0_i32 = arith.constant 0 : i32
    %c0_i32_0 = arith.constant 0 : i32
    %c0_i32_1 = arith.constant 0 : i32
    return %c0_i32, %c0_i32_0 : i32, i32
  }
  func.func @transform_2(%arg0: i32) -> (i32, i32) {
    %c0_i32 = arith.constant 0 : i32
    %c0_i32_0 = arith.constant 0 : i32
    %c0_i32_1 = arith.constant 0 : i32
    return %c0_i32, %c0_i32_0 : i32, i32
  }
  func.func @transform_3(%arg0: i32) -> (i32, i32) {
    %c0_i32 = arith.constant 0 : i32
    %c0_i32_0 = arith.constant 0 : i32
    return %arg0, %c0_i32 : i32, i32
  }
}

module attributes {stable_mosaic.version = 11 : i64} {
  func.func @_conv_bn_lrelu_kernel(%arg0: i32, %arg1: memref<512x200xbf16, #tpu.memory_space<vmem>>, %arg2: memref<200x128xbf16, #tpu.memory_space<vmem>>, %arg3: memref<1x128xf32, #tpu.memory_space<vmem>>, %arg4: memref<1x128xf32, #tpu.memory_space<vmem>>, %arg5: memref<512x128xbf16, #tpu.memory_space<vmem>>) attributes {dimension_semantics = [#tpu.dimension_semantics<arbitrary>], iteration_bounds = array<i64: 1>, scalar_prefetch = 0 : i64, scratch_operands = 0 : i64, tpu.core_type = #tpu.core_type<tc>, window_params = [{pipeline_mode = #tpu.pipeline_mode<synchronous>, transform_indices = @transform_0, window_bounds = array<i64: 512, 200>}, {pipeline_mode = #tpu.pipeline_mode<synchronous>, transform_indices = @transform_1, window_bounds = array<i64: 200, 128>}, {pipeline_mode = #tpu.pipeline_mode<synchronous>, transform_indices = @transform_2, window_bounds = array<i64: 1, 128>}, {pipeline_mode = #tpu.pipeline_mode<synchronous>, transform_indices = @transform_3, window_bounds = array<i64: 1, 128>}, {pipeline_mode = #tpu.pipeline_mode<synchronous>, transform_indices = @transform_4, window_bounds = array<i64: 512, 128>}]} {
    %c0 = arith.constant 0 : index
    %c0_0 = arith.constant 0 : index
    %0 = vector.load %arg1[%c0, %c0_0] : memref<512x200xbf16, #tpu.memory_space<vmem>>, vector<512x200xbf16>
    %c0_1 = arith.constant 0 : index
    %c0_2 = arith.constant 0 : index
    %1 = vector.load %arg2[%c0_1, %c0_2] : memref<200x128xbf16, #tpu.memory_space<vmem>>, vector<200x128xbf16>
    %cst = arith.constant dense<0.000000e+00> : vector<512x128xf32>
    %2 = tpu.matmul %0, %1, %cst {dimension_numbers = #tpu.dot_dimension_numbers<[1], [0], [0], [1], [0, 0, 1, 1], [], []>} : vector<512x200xbf16>, vector<200x128xbf16>, vector<512x128xf32> -> vector<512x128xf32>
    %cst_3 = arith.constant dense<0.000000e+00> : vector<128xf32>
    %3 = vector.multi_reduction <add>, %2, %cst_3 [0] : vector<512x128xf32> to vector<128xf32>
    %4 = vector.shape_cast %3 : vector<128xf32> to vector<1x128xf32>
    %cst_4 = arith.constant 0.001953125 : f32
    %5 = vector.broadcast %cst_4 : f32 to vector<1x128xf32>
    %6 = arith.mulf %4, %5 : vector<1x128xf32>
    %7 = vector.broadcast %6 : vector<1x128xf32> to vector<512x128xf32>
    %8 = arith.subf %2, %7 : vector<512x128xf32>
    %9 = arith.mulf %8, %8 : vector<512x128xf32>
    %cst_5 = arith.constant dense<0.000000e+00> : vector<128xf32>
    %10 = vector.multi_reduction <add>, %9, %cst_5 [0] : vector<512x128xf32> to vector<128xf32>
    %11 = vector.shape_cast %10 : vector<128xf32> to vector<1x128xf32>
    %cst_6 = arith.constant 0.001953125 : f32
    %12 = vector.broadcast %cst_6 : f32 to vector<1x128xf32>
    %13 = arith.mulf %11, %12 : vector<1x128xf32>
    %c0_7 = arith.constant 0 : index
    %c0_8 = arith.constant 0 : index
    %14 = vector.load %arg3[%c0_7, %c0_8] : memref<1x128xf32, #tpu.memory_space<vmem>>, vector<1x128xf32>
    %cst_9 = arith.constant 9.99999974E-6 : f32
    %15 = vector.broadcast %cst_9 : f32 to vector<1x128xf32>
    %16 = arith.addf %13, %15 : vector<1x128xf32>
    %17 = math.rsqrt %16 : vector<1x128xf32>
    %18 = arith.mulf %14, %17 : vector<1x128xf32>
    %19 = vector.broadcast %18 : vector<1x128xf32> to vector<512x128xf32>
    %20 = arith.mulf %8, %19 : vector<512x128xf32>
    %c0_10 = arith.constant 0 : index
    %c0_11 = arith.constant 0 : index
    %21 = vector.load %arg4[%c0_10, %c0_11] : memref<1x128xf32, #tpu.memory_space<vmem>>, vector<1x128xf32>
    %22 = vector.broadcast %21 : vector<1x128xf32> to vector<512x128xf32>
    %23 = arith.addf %20, %22 : vector<512x128xf32>
    %cst_12 = arith.constant 0.000000e+00 : f32
    %24 = vector.broadcast %cst_12 : f32 to vector<512x128xf32>
    %25 = arith.cmpf ogt, %23, %24 : vector<512x128xf32>
    %cst_13 = arith.constant 2.000000e-01 : f32
    %26 = vector.broadcast %cst_13 : f32 to vector<512x128xf32>
    %27 = arith.mulf %26, %23 : vector<512x128xf32>
    %28 = arith.select %25, %23, %27 : vector<512x128xi1>, vector<512x128xf32>
    %29 = arith.truncf %28 : vector<512x128xf32> to vector<512x128xbf16>
    %c0_14 = arith.constant 0 : index
    %c0_15 = arith.constant 0 : index
    %30 = vector.load %arg5[%c0_14, %c0_15] : memref<512x128xbf16, #tpu.memory_space<vmem>>, vector<512x128xbf16>
    tpu.vector_store %arg5[%c0_14, %c0_15], %29 {strides = array<i32>} : memref<512x128xbf16, #tpu.memory_space<vmem>>, vector<512x128xbf16>,
    return
  }
  func.func @transform_0(%arg0: i32) -> (i32, i32) {
    %c0_i32 = arith.constant 0 : i32
    %c0_i32_0 = arith.constant 0 : i32
    %c0_i32_1 = arith.constant 0 : i32
    return %c0_i32, %c0_i32_0 : i32, i32
  }
  func.func @transform_1(%arg0: i32) -> (i32, i32) {
    %c0_i32 = arith.constant 0 : i32
    %c0_i32_0 = arith.constant 0 : i32
    %c0_i32_1 = arith.constant 0 : i32
    return %c0_i32, %c0_i32_0 : i32, i32
  }
  func.func @transform_2(%arg0: i32) -> (i32, i32) {
    %c0_i32 = arith.constant 0 : i32
    %c0_i32_0 = arith.constant 0 : i32
    %c0_i32_1 = arith.constant 0 : i32
    return %c0_i32, %c0_i32_0 : i32, i32
  }
  func.func @transform_3(%arg0: i32) -> (i32, i32) {
    %c0_i32 = arith.constant 0 : i32
    %c0_i32_0 = arith.constant 0 : i32
    %c0_i32_1 = arith.constant 0 : i32
    return %c0_i32, %c0_i32_0 : i32, i32
  }
  func.func @transform_4(%arg0: i32) -> (i32, i32) {
    %c0_i32 = arith.constant 0 : i32
    %c0_i32_0 = arith.constant 0 : i32
    %c0_i32_1 = arith.constant 0 : i32
    return %c0_i32, %c0_i32_0 : i32, i32
  }
}

module attributes {stable_mosaic.version = 11 : i64} {
  func.func @_conv_bn_lrelu_kernel(%arg0: i32, %arg1: memref<128x400xbf16, #tpu.memory_space<vmem>>, %arg2: memref<400x128xbf16, #tpu.memory_space<vmem>>, %arg3: memref<1x128xf32, #tpu.memory_space<vmem>>, %arg4: memref<1x128xf32, #tpu.memory_space<vmem>>, %arg5: memref<128x128xbf16, #tpu.memory_space<vmem>>) attributes {dimension_semantics = [#tpu.dimension_semantics<arbitrary>], iteration_bounds = array<i64: 1>, scalar_prefetch = 0 : i64, scratch_operands = 0 : i64, tpu.core_type = #tpu.core_type<tc>, window_params = [{pipeline_mode = #tpu.pipeline_mode<synchronous>, transform_indices = @transform_0, window_bounds = array<i64: 128, 400>}, {pipeline_mode = #tpu.pipeline_mode<synchronous>, transform_indices = @transform_1, window_bounds = array<i64: 400, 128>}, {pipeline_mode = #tpu.pipeline_mode<synchronous>, transform_indices = @transform_2, window_bounds = array<i64: 1, 128>}, {pipeline_mode = #tpu.pipeline_mode<synchronous>, transform_indices = @transform_3, window_bounds = array<i64: 1, 128>}, {pipeline_mode = #tpu.pipeline_mode<synchronous>, transform_indices = @transform_4, window_bounds = array<i64: 128, 128>}]} {
    %c0 = arith.constant 0 : index
    %c0_0 = arith.constant 0 : index
    %0 = vector.load %arg1[%c0, %c0_0] : memref<128x400xbf16, #tpu.memory_space<vmem>>, vector<128x400xbf16>
    %c0_1 = arith.constant 0 : index
    %c0_2 = arith.constant 0 : index
    %1 = vector.load %arg2[%c0_1, %c0_2] : memref<400x128xbf16, #tpu.memory_space<vmem>>, vector<400x128xbf16>
    %cst = arith.constant dense<0.000000e+00> : vector<128x128xf32>
    %2 = tpu.matmul %0, %1, %cst {dimension_numbers = #tpu.dot_dimension_numbers<[1], [0], [0], [1], [0, 0, 1, 1], [], []>} : vector<128x400xbf16>, vector<400x128xbf16>, vector<128x128xf32> -> vector<128x128xf32>
    %cst_3 = arith.constant dense<0.000000e+00> : vector<128xf32>
    %3 = vector.multi_reduction <add>, %2, %cst_3 [0] : vector<128x128xf32> to vector<128xf32>
    %4 = vector.shape_cast %3 : vector<128xf32> to vector<1x128xf32>
    %cst_4 = arith.constant 7.812500e-03 : f32
    %5 = vector.broadcast %cst_4 : f32 to vector<1x128xf32>
    %6 = arith.mulf %4, %5 : vector<1x128xf32>
    %7 = vector.broadcast %6 : vector<1x128xf32> to vector<128x128xf32>
    %8 = arith.subf %2, %7 : vector<128x128xf32>
    %9 = arith.mulf %8, %8 : vector<128x128xf32>
    %cst_5 = arith.constant dense<0.000000e+00> : vector<128xf32>
    %10 = vector.multi_reduction <add>, %9, %cst_5 [0] : vector<128x128xf32> to vector<128xf32>
    %11 = vector.shape_cast %10 : vector<128xf32> to vector<1x128xf32>
    %cst_6 = arith.constant 7.812500e-03 : f32
    %12 = vector.broadcast %cst_6 : f32 to vector<1x128xf32>
    %13 = arith.mulf %11, %12 : vector<1x128xf32>
    %c0_7 = arith.constant 0 : index
    %c0_8 = arith.constant 0 : index
    %14 = vector.load %arg3[%c0_7, %c0_8] : memref<1x128xf32, #tpu.memory_space<vmem>>, vector<1x128xf32>
    %cst_9 = arith.constant 9.99999974E-6 : f32
    %15 = vector.broadcast %cst_9 : f32 to vector<1x128xf32>
    %16 = arith.addf %13, %15 : vector<1x128xf32>
    %17 = math.rsqrt %16 : vector<1x128xf32>
    %18 = arith.mulf %14, %17 : vector<1x128xf32>
    %19 = vector.broadcast %18 : vector<1x128xf32> to vector<128x128xf32>
    %20 = arith.mulf %8, %19 : vector<128x128xf32>
    %c0_10 = arith.constant 0 : index
    %c0_11 = arith.constant 0 : index
    %21 = vector.load %arg4[%c0_10, %c0_11] : memref<1x128xf32, #tpu.memory_space<vmem>>, vector<1x128xf32>
    %22 = vector.broadcast %21 : vector<1x128xf32> to vector<128x128xf32>
    %23 = arith.addf %20, %22 : vector<128x128xf32>
    %cst_12 = arith.constant 0.000000e+00 : f32
    %24 = vector.broadcast %cst_12 : f32 to vector<128x128xf32>
    %25 = arith.cmpf ogt, %23, %24 : vector<128x128xf32>
    %cst_13 = arith.constant 2.000000e-01 : f32
    %26 = vector.broadcast %cst_13 : f32 to vector<128x128xf32>
    %27 = arith.mulf %26, %23 : vector<128x128xf32>
    %28 = arith.select %25, %23, %27 : vector<128x128xi1>, vector<128x128xf32>
    %29 = arith.truncf %28 : vector<128x128xf32> to vector<128x128xbf16>
    %c0_14 = arith.constant 0 : index
    %c0_15 = arith.constant 0 : index
    %30 = vector.load %arg5[%c0_14, %c0_15] : memref<128x128xbf16, #tpu.memory_space<vmem>>, vector<128x128xbf16>
    tpu.vector_store %arg5[%c0_14, %c0_15], %29 {strides = array<i32>} : memref<128x128xbf16, #tpu.memory_space<vmem>>, vector<128x128xbf16>,
    return
  }
  func.func @transform_0(%arg0: i32) -> (i32, i32) {
    %c0_i32 = arith.constant 0 : i32
    %c0_i32_0 = arith.constant 0 : i32
    %c0_i32_1 = arith.constant 0 : i32
    return %c0_i32, %c0_i32_0 : i32, i32
  }
  func.func @transform_1(%arg0: i32) -> (i32, i32) {
    %c0_i32 = arith.constant 0 : i32
    %c0_i32_0 = arith.constant 0 : i32
    %c0_i32_1 = arith.constant 0 : i32
    return %c0_i32, %c0_i32_0 : i32, i32
  }
  func.func @transform_2(%arg0: i32) -> (i32, i32) {
    %c0_i32 = arith.constant 0 : i32
    %c0_i32_0 = arith.constant 0 : i32
    %c0_i32_1 = arith.constant 0 : i32
    return %c0_i32, %c0_i32_0 : i32, i32
  }
  func.func @transform_3(%arg0: i32) -> (i32, i32) {
    %c0_i32 = arith.constant 0 : i32
    %c0_i32_0 = arith.constant 0 : i32
    %c0_i32_1 = arith.constant 0 : i32
    return %c0_i32, %c0_i32_0 : i32, i32
  }
  func.func @transform_4(%arg0: i32) -> (i32, i32) {
    %c0_i32 = arith.constant 0 : i32
    %c0_i32_0 = arith.constant 0 : i32
    %c0_i32_1 = arith.constant 0 : i32
    return %c0_i32, %c0_i32_0 : i32, i32
  }
}

module attributes {stable_mosaic.version = 11 : i64} {
  func.func @_conv_bn_lrelu_head_kernel(%arg0: i32, %arg1: memref<32x800xbf16, #tpu.memory_space<vmem>>, %arg2: memref<800x64xbf16, #tpu.memory_space<vmem>>, %arg3: memref<1x64xf32, #tpu.memory_space<vmem>>, %arg4: memref<1x64xf32, #tpu.memory_space<vmem>>, %arg5: memref<32x64xf32, #tpu.memory_space<vmem>>, %arg6: memref<2x32xf32, #tpu.memory_space<vmem>>, %arg7: memref<1x1xf32, #tpu.memory_space<vmem>>, %arg8: memref<2x1xf32, #tpu.memory_space<vmem>>) attributes {dimension_semantics = [#tpu.dimension_semantics<arbitrary>], iteration_bounds = array<i64: 1>, scalar_prefetch = 0 : i64, scratch_operands = 0 : i64, tpu.core_type = #tpu.core_type<tc>, window_params = [{pipeline_mode = #tpu.pipeline_mode<synchronous>, transform_indices = @transform_0, window_bounds = array<i64: 32, 800>}, {pipeline_mode = #tpu.pipeline_mode<synchronous>, transform_indices = @transform_1, window_bounds = array<i64: 800, 64>}, {pipeline_mode = #tpu.pipeline_mode<synchronous>, transform_indices = @transform_2, window_bounds = array<i64: 1, 64>}, {pipeline_mode = #tpu.pipeline_mode<synchronous>, transform_indices = @transform_3, window_bounds = array<i64: 1, 64>}, {pipeline_mode = #tpu.pipeline_mode<synchronous>, transform_indices = @transform_4, window_bounds = array<i64: 32, 64>}, {pipeline_mode = #tpu.pipeline_mode<synchronous>, transform_indices = @transform_5, window_bounds = array<i64: 2, 32>}, {pipeline_mode = #tpu.pipeline_mode<synchronous>, transform_indices = @transform_6, window_bounds = array<i64: 1, 1>}, {pipeline_mode = #tpu.pipeline_mode<synchronous>, transform_indices = @transform_7, window_bounds = array<i64: 2, 1>}]} {
    %c0 = arith.constant 0 : index
    %c0_0 = arith.constant 0 : index
    %0 = vector.load %arg1[%c0, %c0_0] : memref<32x800xbf16, #tpu.memory_space<vmem>>, vector<32x800xbf16>
    %c0_1 = arith.constant 0 : index
    %c0_2 = arith.constant 0 : index
    %1 = vector.load %arg2[%c0_1, %c0_2] : memref<800x64xbf16, #tpu.memory_space<vmem>>, vector<800x64xbf16>
    %cst = arith.constant dense<0.000000e+00> : vector<32x64xf32>
    %2 = tpu.matmul %0, %1, %cst {dimension_numbers = #tpu.dot_dimension_numbers<[1], [0], [0], [1], [0, 0, 1, 1], [], []>} : vector<32x800xbf16>, vector<800x64xbf16>, vector<32x64xf32> -> vector<32x64xf32>
    %cst_3 = arith.constant dense<0.000000e+00> : vector<64xf32>
    %3 = vector.multi_reduction <add>, %2, %cst_3 [0] : vector<32x64xf32> to vector<64xf32>
    %4 = vector.shape_cast %3 : vector<64xf32> to vector<1x64xf32>
    %cst_4 = arith.constant 3.125000e-02 : f32
    %5 = vector.broadcast %cst_4 : f32 to vector<1x64xf32>
    %6 = arith.mulf %4, %5 : vector<1x64xf32>
    %7 = vector.broadcast %6 : vector<1x64xf32> to vector<32x64xf32>
    %8 = arith.subf %2, %7 : vector<32x64xf32>
    %9 = arith.mulf %8, %8 : vector<32x64xf32>
    %cst_5 = arith.constant dense<0.000000e+00> : vector<64xf32>
    %10 = vector.multi_reduction <add>, %9, %cst_5 [0] : vector<32x64xf32> to vector<64xf32>
    %11 = vector.shape_cast %10 : vector<64xf32> to vector<1x64xf32>
    %cst_6 = arith.constant 3.125000e-02 : f32
    %12 = vector.broadcast %cst_6 : f32 to vector<1x64xf32>
    %13 = arith.mulf %11, %12 : vector<1x64xf32>
    %c0_7 = arith.constant 0 : index
    %c0_8 = arith.constant 0 : index
    %14 = vector.load %arg3[%c0_7, %c0_8] : memref<1x64xf32, #tpu.memory_space<vmem>>, vector<1x64xf32>
    %cst_9 = arith.constant 9.99999974E-6 : f32
    %15 = vector.broadcast %cst_9 : f32 to vector<1x64xf32>
    %16 = arith.addf %13, %15 : vector<1x64xf32>
    %17 = math.rsqrt %16 : vector<1x64xf32>
    %18 = arith.mulf %14, %17 : vector<1x64xf32>
    %19 = vector.broadcast %18 : vector<1x64xf32> to vector<32x64xf32>
    %20 = arith.mulf %8, %19 : vector<32x64xf32>
    %c0_10 = arith.constant 0 : index
    %c0_11 = arith.constant 0 : index
    %21 = vector.load %arg4[%c0_10, %c0_11] : memref<1x64xf32, #tpu.memory_space<vmem>>, vector<1x64xf32>
    %22 = vector.broadcast %21 : vector<1x64xf32> to vector<32x64xf32>
    %23 = arith.addf %20, %22 : vector<32x64xf32>
    %cst_12 = arith.constant 0.000000e+00 : f32
    %24 = vector.broadcast %cst_12 : f32 to vector<32x64xf32>
    %25 = arith.cmpf ogt, %23, %24 : vector<32x64xf32>
    %cst_13 = arith.constant 2.000000e-01 : f32
    %26 = vector.broadcast %cst_13 : f32 to vector<32x64xf32>
    %27 = arith.mulf %26, %23 : vector<32x64xf32>
    %28 = arith.select %25, %23, %27 : vector<32x64xi1>, vector<32x64xf32>
    %c0_14 = arith.constant 0 : index
    %c0_15 = arith.constant 0 : index
    %29 = vector.load %arg5[%c0_14, %c0_15] : memref<32x64xf32, #tpu.memory_space<vmem>>, vector<32x64xf32>
    %30 = arith.mulf %28, %29 : vector<32x64xf32>
    %c0_16 = arith.constant 0 : index
    %c0_17 = arith.constant 0 : index
    %31 = vector.load %arg6[%c0_16, %c0_17] : memref<2x32xf32, #tpu.memory_space<vmem>>, vector<2x32xf32>
    %cst_18 = arith.constant dense<0.000000e+00> : vector<2x64xf32>
    %32 = tpu.matmul %31, %30, %cst_18 {dimension_numbers = #tpu.dot_dimension_numbers<[1], [0], [0], [1], [0, 0, 1, 1], [], []>} : vector<2x32xf32>, vector<32x64xf32>, vector<2x64xf32> -> vector<2x64xf32>
    %cst_19 = arith.constant dense<0.000000e+00> : vector<2xf32>
    %33 = vector.multi_reduction <add>, %32, %cst_19 [1] : vector<2x64xf32> to vector<2xf32>
    %34 = vector.shape_cast %33 : vector<2xf32> to vector<2x1xf32>
    %c0_20 = arith.constant 0 : index
    %c0_21 = arith.constant 0 : index
    %35 = vector.load %arg7[%c0_20, %c0_21] : memref<1x1xf32, #tpu.memory_space<vmem>>, vector<1x1xf32>
    %36 = vector.broadcast %35 : vector<1x1xf32> to vector<2x1xf32>
    %37 = arith.addf %34, %36 : vector<2x1xf32>
    %c0_22 = arith.constant 0 : index
    %c0_23 = arith.constant 0 : index
    %38 = vector.load %arg8[%c0_22, %c0_23] : memref<2x1xf32, #tpu.memory_space<vmem>>, vector<2x1xf32>
    tpu.vector_store %arg8[%c0_22, %c0_23], %37 {strides = array<i32>} : memref<2x1xf32, #tpu.memory_space<vmem>>, vector<2x1xf32>,
    return
  }
  func.func @transform_0(%arg0: i32) -> (i32, i32) {
    %c0_i32 = arith.constant 0 : i32
    %c0_i32_0 = arith.constant 0 : i32
    %c0_i32_1 = arith.constant 0 : i32
    return %c0_i32, %c0_i32_0 : i32, i32
  }
  func.func @transform_1(%arg0: i32) -> (i32, i32) {
    %c0_i32 = arith.constant 0 : i32
    %c0_i32_0 = arith.constant 0 : i32
    %c0_i32_1 = arith.constant 0 : i32
    return %c0_i32, %c0_i32_0 : i32, i32
  }
  func.func @transform_2(%arg0: i32) -> (i32, i32) {
    %c0_i32 = arith.constant 0 : i32
    %c0_i32_0 = arith.constant 0 : i32
    %c0_i32_1 = arith.constant 0 : i32
    return %c0_i32, %c0_i32_0 : i32, i32
  }
  func.func @transform_3(%arg0: i32) -> (i32, i32) {
    %c0_i32 = arith.constant 0 : i32
    %c0_i32_0 = arith.constant 0 : i32
    %c0_i32_1 = arith.constant 0 : i32
    return %c0_i32, %c0_i32_0 : i32, i32
  }
  func.func @transform_4(%arg0: i32) -> (i32, i32) {
    %c0_i32 = arith.constant 0 : i32
    %c0_i32_0 = arith.constant 0 : i32
    %c0_i32_1 = arith.constant 0 : i32
    return %c0_i32, %c0_i32_0 : i32, i32
  }
  func.func @transform_5(%arg0: i32) -> (i32, i32) {
    %c0_i32 = arith.constant 0 : i32
    %c0_i32_0 = arith.constant 0 : i32
    %c0_i32_1 = arith.constant 0 : i32
    return %c0_i32, %c0_i32_0 : i32, i32
  }
  func.func @transform_6(%arg0: i32) -> (i32, i32) {
    %c0_i32 = arith.constant 0 : i32
    %c0_i32_0 = arith.constant 0 : i32
    %c0_i32_1 = arith.constant 0 : i32
    return %c0_i32, %c0_i32_0 : i32, i32
  }
  func.func @transform_7(%arg0: i32) -> (i32, i32) {
    %c0_i32 = arith.constant 0 : i32
    %c0_i32_0 = arith.constant 0 : i32
    %c0_i32_1 = arith.constant 0 : i32
    return %c0_i32, %c0_i32_0 : i32, i32
  }
}

</mosaic_0001>

<bundles_post_ra>
// kernel: discriminator_forward.4
= control target key start
LH: loop header
LB: loop body
LE: loop exit
PB: predicated region body
PF: predicated region fallthrough
CT: control target
= control target key end

     0   :  { %vm1342_vm0 = vcmask 1044480   ;;  %vm1343_vm1 = vcmask 1045504   ;;  %v6545_v1 = vmov 65535   ;;  %vm957_vm2 = vcmask 613376   ;;  %s8235_s1 = inlined_call_operand.vmem [shape: bf16[75,128], index: 1, kind: input, shape index: {}]   ;;  %s8236_s0 = inlined_call_operand.vmem [shape: bf16[2048,75], index: 0, kind: input, shape index: {}]   ;;  %s8237_s2 = inlined_call_operand.vmem [shape: f32[1,128], index: 2, kind: input, shape index: {}]   ;;  %s8238_s3 = inlined_call_operand.vmem [shape: bf16[2048,128], index: 3, kind: output, shape index: {}]  }
   0x1   :  { %v6409_v0 = vld [vmem:[%s8235_s1 + $0x20] sm:$0x3f]   ;;  %v1344_v2 = vsel %vm1342_vm0, 4294967295, %v6545_v1  ;;  %v6410_v5 = vld [vmem:[%s8235_s1 + $0x18] sm:$0xff]   ;;  %v6411_v8 = vld [vmem:[%s8235_s1 + $0x10] sm:$0xff]  }
   0x2   :  { %v1345_v3 = vsel %vm1343_vm1, %v1344_v2, 0  ;;  %v6414_v6 = vld [vmem:[%s8236_s0] sm:$0xff]   ;;  %v6412_v9 = vld [vmem:[%s8235_s1 + $0x8] sm:$0xff]   ;;  %v6418_v13 = vld [vmem:[%s8236_s0 + $0x10] sm:$0xff]  }
   0x3   :  { %v1347_v4 = vand.u32 %v6409_v0, %v1345_v3  ;;  %v6415_v7 = vld [vmem:[%s8236_s0 + $0x200] sm:$0xff]   ;;  %6142 = vmatprep.mubr.msk.bf16.mxu0 %vm957_vm2, %v6414_v6  ;;  %v6416_v11 = vld [vmem:[%s8236_s0 + $0x8] sm:$0xff]   ;;  %v6419_v14 = vld [vmem:[%s8236_s0 + $0x210] sm:$0xff]  }
   0x4   :  { %6270 = vmatprep.mubr.msk.bf16.mxu1 %vm957_vm2, %v6415_v7  ;;  %v6413_v10 = vld [vmem:[%s8235_s1] sm:$0xff]   ;;  %v6417_v12 = vld [vmem:[%s8236_s0 + $0x208] sm:$0xff]   ;;  %v6420_v15 = vld [vmem:[%s8236_s0 + $0x18] sm:$0xff]  }
   0x5   :  { %6132 = vmatprep.subr.bf16.mxu0 %v1347_v4  ;;  %6398 = vmatprep.subr.bf16.mxu1 %v1347_v4  ;;  %v6421_v16 = vld [vmem:[%s8236_s0 + $0x218] sm:$0xff]   ;;  %v6422_v17 = vld [vmem:[%s8236_s0 + $0x20] sm:$0xff]   ;;  %v6424_v19 = vld [vmem:[%s8236_s0 + $0x28] sm:$0xff]  }
   0x6   :  { %6133 = vmatpush3.bf16.msra.mxu0 %v1347_v4  ;;  %6403 = vmatpush3.bf16.msra.mxu1 %v1347_v4  ;;  %v6423_v18 = vld [vmem:[%s8236_s0 + $0x220] sm:$0xff]   ;;  %v6425_v20 = vld [vmem:[%s8236_s0 + $0x228] sm:$0xff]   ;;  %v6426_v21 = vld [vmem:[%s8236_s0 + $0x30] sm:$0xff]  }
   0x7   :  { %6134 = vmatprep.subr.bf16.mxu0 %v6410_v5  ;;  %6399 = vmatprep.subr.bf16.mxu1 %v6410_v5  ;;  %v6427_v22 = vld [vmem:[%s8236_s0 + $0x230] sm:$0xff]   ;;  %v6428_v23 = vld [vmem:[%s8236_s0 + $0x38] sm:$0xff]   ;;  %v6430_v25 = vld [vmem:[%s8236_s0 + $0x40] sm:$0xff]  }
   0x8   :  { %v6429_v24 = vld [vmem:[%s8236_s0 + $0x238] sm:$0xff]   ;;  %v6431_v26 = vld [vmem:[%s8236_s0 + $0x240] sm:$0xff]   ;;  %v6432_v27 = vld [vmem:[%s8236_s0 + $0x48] sm:$0xff]  }
   0x9   :  { %v6433_v28 = vld [vmem:[%s8236_s0 + $0x248] sm:$0xff]   ;;  %v6434_v29 = vld [vmem:[%s8236_s0 + $0x50] sm:$0xff]   ;;  %v6436_v31 = vld [vmem:[%s8236_s0 + $0x58] sm:$0xff]  }
   0xa   :  { %6135 = vmatpush3.bf16.msra.mxu0 %v6410_v5  ;;  %6404 = vmatpush3.bf16.msra.mxu1 %v6410_v5  ;;  %v6435_v30 = vld [vmem:[%s8236_s0 + $0x250] sm:$0xff]   ;;  %v6437_v32 = vld [vmem:[%s8236_s0 + $0x258] sm:$0xff]   ;;  %v6438_v33 = vld [vmem:[%s8236_s0 + $0x60] sm:$0xff]  }
   0xb   :  { %6136 = vmatprep.subr.bf16.mxu0 %v6411_v8  ;;  %6400 = vmatprep.subr.bf16.mxu1 %v6411_v8  ;;  %v6439_v34 = vld [vmem:[%s8236_s0 + $0x260] sm:$0xff]   ;;  %v6440_v35 = vld [vmem:[%s8236_s0 + $0x68] sm:$0xff]   ;;  %v6442_v37 = vld [vmem:[%s8236_s0 + $0x70] sm:$0xff]  }
   0xc   :  { %v6441_v36 = vld [vmem:[%s8236_s0 + $0x268] sm:$0xff]   ;;  %v6443_v38 = vld [vmem:[%s8236_s0 + $0x270] sm:$0xff]   ;;  %v6444_v39 = vld [vmem:[%s8236_s0 + $0x78] sm:$0xff]  }
   0xd   :  { %v6445_v40 = vld [vmem:[%s8236_s0 + $0x278] sm:$0xff]   ;;  %v6446_v41 = vld [vmem:[%s8236_s0 + $0x80] sm:$0xff]   ;;  %v6448_v43 = vld [vmem:[%s8236_s0 + $0x88] sm:$0xff]  }
   0xe   :  { %6137 = vmatpush3.bf16.msra.mxu0 %v6411_v8  ;;  %6405 = vmatpush3.bf16.msra.mxu1 %v6411_v8  ;;  %v6447_v42 = vld [vmem:[%s8236_s0 + $0x280] sm:$0xff]   ;;  %v6449_v44 = vld [vmem:[%s8236_s0 + $0x288] sm:$0xff]   ;;  %v6450_v45 = vld [vmem:[%s8236_s0 + $0x90] sm:$0xff]  }
   0xf   :  { %6138 = vmatprep.subr.bf16.mxu0 %v6412_v9  ;;  %6401 = vmatprep.subr.bf16.mxu1 %v6412_v9  ;;  %v6451_v46 = vld [vmem:[%s8236_s0 + $0x290] sm:$0xff]   ;;  %v6452_v47 = vld [vmem:[%s8236_s0 + $0x98] sm:$0xff]   ;;  %v6454_v49 = vld [vmem:[%s8236_s0 + $0xa0] sm:$0xff]  }
  0x10   :  { %v6453_v48 = vld [vmem:[%s8236_s0 + $0x298] sm:$0xff]   ;;  %v6455_v50 = vld [vmem:[%s8236_s0 + $0x2a0] sm:$0xff]   ;;  %v6456_v51 = vld [vmem:[%s8236_s0 + $0xa8] sm:$0xff]  }
  0x11   :  { %v6457_v52 = vld [vmem:[%s8236_s0 + $0x2a8] sm:$0xff]   ;;  %v6458_v53 = vld [vmem:[%s8236_s0 + $0xb0] sm:$0xff]   ;;  %v6460_v55 = vld [vmem:[%s8236_s0 + $0xb8] sm:$0xff]  }
  0x12   :  { %6139 = vmatpush3.bf16.msra.mxu0 %v6412_v9  ;;  %6406 = vmatpush3.bf16.msra.mxu1 %v6412_v9  ;;  %v6459_v54 = vld [vmem:[%s8236_s0 + $0x2b0] sm:$0xff]   ;;  %v6461_v56 = vld [vmem:[%s8236_s0 + $0x2b8] sm:$0xff]   ;;  %v6462_v57 = vld [vmem:[%s8236_s0 + $0xc0] sm:$0xff]  }
  0x13   :  { %6140 = vmatprep.subr.bf16.mxu0 %v6413_v10  ;;  %6402 = vmatprep.subr.bf16.mxu1 %v6413_v10  ;;  %v6463_v58 = vld [vmem:[%s8236_s0 + $0x2c0] sm:$0xff]   ;;  %v6464_v59 = vld [vmem:[%s8236_s0 + $0xc8] sm:$0xff]   ;;  %v6466_v61 = vld [vmem:[%s8236_s0 + $0xd0] sm:$0xff]  }
  0x14   :  { %v6465_v60 = vld [vmem:[%s8236_s0 + $0x2c8] sm:$0xff]   ;;  %v6467_v62 = vld [vmem:[%s8236_s0 + $0x2d0] sm:$0xff]   ;;  %v6468_v63 = vld [vmem:[%s8236_s0 + $0xd8] sm:$0xff]  }
  0x15   :  { %v6469_v0 = vld [vmem:[%s8236_s0 + $0x2d8] sm:$0xff]   ;;  %v6470_v1 = vld [vmem:[%s8236_s0 + $0xe0] sm:$0xff]   ;;  %v6472_v3 = vld [vmem:[%s8236_s0 + $0xe8] sm:$0xff]  }
  0x16   :  { %6141 = vmatpush3.bf16.msra.mxu0 %v6413_v10  ;;  %6407 = vmatpush3.bf16.msra.mxu1 %v6413_v10  ;;  %v6471_v2 = vld [vmem:[%s8236_s0 + $0x2e0] sm:$0xff]   ;;  %v6473_v4 = vld [vmem:[%s8236_s0 + $0x2e8] sm:$0xff]   ;;  %v6474_v5 = vld [vmem:[%s8236_s0 + $0xf0] sm:$0xff]  }
  0x17   :  { %v6475_v6 = vld [vmem:[%s8236_s0 + $0x2f0] sm:$0xff]   ;;  %v6476_v7 = vld [vmem:[%s8236_s0 + $0xf8] sm:$0xff]   ;;  %v6478_v9 = vld [vmem:[%s8236_s0 + $0x100] sm:$0xff]  }
  0x18   :  { %v6477_v8 = vld [vmem:[%s8236_s0 + $0x2f8] sm:$0xff]   ;;  %v6479_v10 = vld [vmem:[%s8236_s0 + $0x300] sm:$0xff]  }
  0x19   :  { %6143 = vmatmul.mubr.msk.bf16.vlgmr.msra.gmra.mxu0 %vm957_vm2, %v6416_v11  ;;  %6271 = vmatmul.mubr.msk.bf16.vlgmr.msra.gmra.mxu1 %vm957_vm2, %v6417_v12  ;;  %v6480_v11 = vld [vmem:[%s8236_s0 + $0x108] sm:$0xff]  }
  0x1a   :  { %6146 = vmatprep.mubr.msk.bf16.mxu0 %vm957_vm2, %v6418_v13  ;;  %6274 = vmatprep.mubr.msk.bf16.mxu1 %vm957_vm2, %v6419_v14  ;;  %v6481_v12 = vld [vmem:[%s8236_s0 + $0x308] sm:$0xff]   ;;  %v6482_v13 = vld [vmem:[%s8236_s0 + $0x110] sm:$0xff]  }
  0x1b   :  { %v6483_v14 = vld [vmem:[%s8236_s0 + $0x310] sm:$0xff]  }
  0x21   :  { %6147 = vmatmul.mubr.msk.bf16.gmra.mxu0 %vm957_vm2, %v6420_v15  ;;  %6275 = vmatmul.mubr.msk.bf16.gmra.mxu1 %vm957_vm2, %v6421_v16  ;;  %v6484_v15 = vld [vmem:[%s8236_s0 + $0x118] sm:$0xff]  }
  0x22   :  { %6150 = vmatprep.mubr.msk.bf16.mxu0 %vm957_vm2, %v6422_v17  ;;  %6278 = vmatprep.mubr.msk.bf16.mxu1 %vm957_vm2, %v6423_v18  ;;  %v6485_v16 = vld [vmem:[%s8236_s0 + $0x318] sm:$0xff]   ;;  %v6486_v17 = vld [vmem:[%s8236_s0 + $0x120] sm:$0xff]  }
  0x23   :  { %v6487_v18 = vld [vmem:[%s8236_s0 + $0x320] sm:$0xff]  }
  0x29   :  { %6151 = vmatmul.mubr.msk.bf16.gmra.mxu0 %vm957_vm2, %v6424_v19  ;;  %6279 = vmatmul.mubr.msk.bf16.gmra.mxu1 %vm957_vm2, %v6425_v20  ;;  %v6488_v19 = vld [vmem:[%s8236_s0 + $0x128] sm:$0xff]  }
  0x2a   :  { %6154 = vmatprep.mubr.msk.bf16.mxu0 %vm957_vm2, %v6426_v21  ;;  %6282 = vmatprep.mubr.msk.bf16.mxu1 %vm957_vm2, %v6427_v22  ;;  %v6489_v20 = vld [vmem:[%s8236_s0 + $0x328] sm:$0xff]   ;;  %v6490_v21 = vld [vmem:[%s8236_s0 + $0x130] sm:$0xff]  }
  0x2b   :  { %v6491_v22 = vld [vmem:[%s8236_s0 + $0x330] sm:$0xff]  }
  0x31   :  { %6155 = vmatmul.mubr.msk.bf16.gmra.mxu0 %vm957_vm2, %v6428_v23  ;;  %6283 = vmatmul.mubr.msk.bf16.gmra.mxu1 %vm957_vm2, %v6429_v24  ;;  %v6492_v23 = vld [vmem:[%s8236_s0 + $0x138] sm:$0xff]  }
  0x32   :  { %6158 = vmatprep.mubr.msk.bf16.mxu0 %vm957_vm2, %v6430_v25  ;;  %6286 = vmatprep.mubr.msk.bf16.mxu1 %vm957_vm2, %v6431_v26  ;;  %v6493_v24 = vld [vmem:[%s8236_s0 + $0x338] sm:$0xff]   ;;  %v6494_v25 = vld [vmem:[%s8236_s0 + $0x140] sm:$0xff]  }
  0x33   :  { %v6495_v26 = vld [vmem:[%s8236_s0 + $0x340] sm:$0xff]  }
  0x39   :  { %6159 = vmatmul.mubr.msk.bf16.gmra.mxu0 %vm957_vm2, %v6432_v27  ;;  %6287 = vmatmul.mubr.msk.bf16.gmra.mxu1 %vm957_vm2, %v6433_v28  ;;  %v6496_v27 = vld [vmem:[%s8236_s0 + $0x148] sm:$0xff]  }
  0x3a   :  { %6162 = vmatprep.mubr.msk.bf16.mxu0 %vm957_vm2, %v6434_v29  ;;  %6290 = vmatprep.mubr.msk.bf16.mxu1 %vm957_vm2, %v6435_v30  ;;  %v6497_v28 = vld [vmem:[%s8236_s0 + $0x348] sm:$0xff]   ;;  %v6498_v29 = vld [vmem:[%s8236_s0 + $0x150] sm:$0xff]  }
  0x3b   :  { %v6499_v30 = vld [vmem:[%s8236_s0 + $0x350] sm:$0xff]  }
  0x41   :  { %6163 = vmatmul.mubr.msk.bf16.gmra.mxu0 %vm957_vm2, %v6436_v31  ;;  %6291 = vmatmul.mubr.msk.bf16.gmra.mxu1 %vm957_vm2, %v6437_v32  ;;  %v6500_v31 = vld [vmem:[%s8236_s0 + $0x158] sm:$0xff]  }
  0x42   :  { %6166 = vmatprep.mubr.msk.bf16.mxu0 %vm957_vm2, %v6438_v33  ;;  %6294 = vmatprep.mubr.msk.bf16.mxu1 %vm957_vm2, %v6439_v34  ;;  %v6501_v32 = vld [vmem:[%s8236_s0 + $0x358] sm:$0xff]   ;;  %v6502_v33 = vld [vmem:[%s8236_s0 + $0x160] sm:$0xff]  }
  0x43   :  { %v6503_v34 = vld [vmem:[%s8236_s0 + $0x360] sm:$0xff]  }
  0x49   :  { %6167 = vmatmul.mubr.msk.bf16.gmra.mxu0 %vm957_vm2, %v6440_v35  ;;  %6295 = vmatmul.mubr.msk.bf16.gmra.mxu1 %vm957_vm2, %v6441_v36  ;;  %v6504_v35 = vld [vmem:[%s8236_s0 + $0x168] sm:$0xff]  }
  0x4a   :  { %6170 = vmatprep.mubr.msk.bf16.mxu0 %vm957_vm2, %v6442_v37  ;;  %6298 = vmatprep.mubr.msk.bf16.mxu1 %vm957_vm2, %v6443_v38  ;;  %v6505_v36 = vld [vmem:[%s8236_s0 + $0x368] sm:$0xff]   ;;  %v6506_v37 = vld [vmem:[%s8236_s0 + $0x170] sm:$0xff]  }
  0x4b   :  { %v6507_v38 = vld [vmem:[%s8236_s0 + $0x370] sm:$0xff]  }
  0x51   :  { %6171 = vmatmul.mubr.msk.bf16.gmra.mxu0 %vm957_vm2, %v6444_v39  ;;  %6299 = vmatmul.mubr.msk.bf16.gmra.mxu1 %vm957_vm2, %v6445_v40  ;;  %v6508_v39 = vld [vmem:[%s8236_s0 + $0x178] sm:$0xff]  }
  0x52   :  { %6174 = vmatprep.mubr.msk.bf16.mxu0 %vm957_vm2, %v6446_v41  ;;  %6302 = vmatprep.mubr.msk.bf16.mxu1 %vm957_vm2, %v6447_v42  ;;  %v6509_v40 = vld [vmem:[%s8236_s0 + $0x378] sm:$0xff]   ;;  %v6510_v41 = vld [vmem:[%s8236_s0 + $0x180] sm:$0xff]  }
  0x53   :  { %v6511_v42 = vld [vmem:[%s8236_s0 + $0x380] sm:$0xff]  }
  0x59   :  { %6175 = vmatmul.mubr.msk.bf16.gmra.mxu0 %vm957_vm2, %v6448_v43  ;;  %6303 = vmatmul.mubr.msk.bf16.gmra.mxu1 %vm957_vm2, %v6449_v44  ;;  %v6512_v43 = vld [vmem:[%s8236_s0 + $0x188] sm:$0xff]  }
  0x5a   :  { %6178 = vmatprep.mubr.msk.bf16.mxu0 %vm957_vm2, %v6450_v45  ;;  %6306 = vmatprep.mubr.msk.bf16.mxu1 %vm957_vm2, %v6451_v46  ;;  %v6513_v44 = vld [vmem:[%s8236_s0 + $0x388] sm:$0xff]   ;;  %v6514_v45 = vld [vmem:[%s8236_s0 + $0x190] sm:$0xff]  }
  0x5b   :  { %v6515_v46 = vld [vmem:[%s8236_s0 + $0x390] sm:$0xff]  }
  0x61   :  { %6179 = vmatmul.mubr.msk.bf16.gmra.mxu0 %vm957_vm2, %v6452_v47  ;;  %6307 = vmatmul.mubr.msk.bf16.gmra.mxu1 %vm957_vm2, %v6453_v48  ;;  %v6988_v47 = vld [vmem:[%s8237_s2] ss:$0 sm:$0xff] }
  0x62   :  { %6182 = vmatprep.mubr.msk.bf16.mxu0 %vm957_vm2, %v6454_v49  ;;  %6310 = vmatprep.mubr.msk.bf16.mxu1 %vm957_vm2, %v6455_v50 }
  0x69   :  { %6183 = vmatmul.mubr.msk.bf16.gmra.mxu0 %vm957_vm2, %v6456_v51  ;;  %6311 = vmatmul.mubr.msk.bf16.gmra.mxu1 %vm957_vm2, %v6457_v52 }
  0x6a   :  { %6186 = vmatprep.mubr.msk.bf16.mxu0 %vm957_vm2, %v6458_v53  ;;  %6314 = vmatprep.mubr.msk.bf16.mxu1 %vm957_vm2, %v6459_v54 }
  0x71   :  { %6187 = vmatmul.mubr.msk.bf16.gmra.mxu0 %vm957_vm2, %v6460_v55  ;;  %6315 = vmatmul.mubr.msk.bf16.gmra.mxu1 %vm957_vm2, %v6461_v56 }
  0x72   :  { %6190 = vmatprep.mubr.msk.bf16.mxu0 %vm957_vm2, %v6462_v57  ;;  %6318 = vmatprep.mubr.msk.bf16.mxu1 %vm957_vm2, %v6463_v58 }
  0x79   :  { %6191 = vmatmul.mubr.msk.bf16.gmra.mxu0 %vm957_vm2, %v6464_v59  ;;  %6319 = vmatmul.mubr.msk.bf16.gmra.mxu1 %vm957_vm2, %v6465_v60  ;;  %v6516_v60 = vld [vmem:[%s8236_s0 + $0x198] sm:$0xff]  }
  0x7a   :  { %6194 = vmatprep.mubr.msk.bf16.mxu0 %vm957_vm2, %v6466_v61  ;;  %6322 = vmatprep.mubr.msk.bf16.mxu1 %vm957_vm2, %v6467_v62 }
  0x81   :  { %6195 = vmatmul.mubr.msk.bf16.gmra.mxu0 %vm957_vm2, %v6468_v63  ;;  %6323 = vmatmul.mubr.msk.bf16.gmra.mxu1 %vm957_vm2, %v6469_v0  ;;  %v6517_v0 = vld [vmem:[%s8236_s0 + $0x398] sm:$0xff]  }
  0x82   :  { %6198 = vmatprep.mubr.msk.bf16.mxu0 %vm957_vm2, %v6470_v1  ;;  %6326 = vmatprep.mubr.msk.bf16.mxu1 %vm957_vm2, %v6471_v2 }
  0x89   :  { %6199 = vmatmul.mubr.msk.bf16.gmra.mxu0 %vm957_vm2, %v6472_v3  ;;  %6327 = vmatmul.mubr.msk.bf16.gmra.mxu1 %vm957_vm2, %v6473_v4 }
  0x8a   :  { %6202 = vmatprep.mubr.msk.bf16.mxu0 %vm957_vm2, %v6474_v5  ;;  %6330 = vmatprep.mubr.msk.bf16.mxu1 %vm957_vm2, %v6475_v6  ;;  %v6518_v5 = vld [vmem:[%s8236_s0 + $0x1a0] sm:$0xff]  }
  0x8b   :  { %v6519_v6 = vld [vmem:[%s8236_s0 + $0x3a0] sm:$0xff]  }
  0x91   :  { %6203 = vmatmul.mubr.msk.bf16.gmra.mxu0 %vm957_vm2, %v6476_v7  ;;  %6331 = vmatmul.mubr.msk.bf16.gmra.mxu1 %vm957_vm2, %v6477_v8 }
  0x92   :  { %6206 = vmatprep.mubr.msk.bf16.mxu0 %vm957_vm2, %v6478_v9  ;;  %6334 = vmatprep.mubr.msk.bf16.mxu1 %vm957_vm2, %v6479_v10 }
  0x99   :  { %6207 = vmatmul.mubr.msk.bf16.gmra.mxu0 %vm957_vm2, %v6480_v11  ;;  %6335 = vmatmul.mubr.msk.bf16.gmra.mxu1 %vm957_vm2, %v6481_v12 }
  0x9a   :  { %6210 = vmatprep.mubr.msk.bf16.mxu0 %vm957_vm2, %v6482_v13  ;;  %6338 = vmatprep.mubr.msk.bf16.mxu1 %vm957_vm2, %v6483_v14 }
  0xa1   :  { %6211 = vmatmul.mubr.msk.bf16.gmra.mxu0 %vm957_vm2, %v6484_v15  ;;  %6339 = vmatmul.mubr.msk.bf16.gmra.mxu1 %vm957_vm2, %v6485_v16 }
  0xa2   :  { %6214 = vmatprep.mubr.msk.bf16.mxu0 %vm957_vm2, %v6486_v17  ;;  %6342 = vmatprep.mubr.msk.bf16.mxu1 %vm957_vm2, %v6487_v18 }
  0xa9   :  { %6215 = vmatmul.mubr.msk.bf16.gmra.mxu0 %vm957_vm2, %v6488_v19  ;;  %6343 = vmatmul.mubr.msk.bf16.gmra.mxu1 %vm957_vm2, %v6489_v20 }
  0xaa   :  { %6218 = vmatprep.mubr.msk.bf16.mxu0 %vm957_vm2, %v6490_v21  ;;  %6346 = vmatprep.mubr.msk.bf16.mxu1 %vm957_vm2, %v6491_v22 }
  0xb1   :  { %6219 = vmatmul.mubr.msk.bf16.gmra.mxu0 %vm957_vm2, %v6492_v23  ;;  %6347 = vmatmul.mubr.msk.bf16.gmra.mxu1 %vm957_vm2, %v6493_v24 }
  0xb2   :  { %6222 = vmatprep.mubr.msk.bf16.mxu0 %vm957_vm2, %v6494_v25  ;;  %6350 = vmatprep.mubr.msk.bf16.mxu1 %vm957_vm2, %v6495_v26 }
  0xb9   :  { %6223 = vmatmul.mubr.msk.bf16.gmra.mxu0 %vm957_vm2, %v6496_v27  ;;  %6351 = vmatmul.mubr.msk.bf16.gmra.mxu1 %vm957_vm2, %v6497_v28 }
  0xba   :  { %6226 = vmatprep.mubr.msk.bf16.mxu0 %vm957_vm2, %v6498_v29  ;;  %6354 = vmatprep.mubr.msk.bf16.mxu1 %vm957_vm2, %v6499_v30 }
  0xc1   :  { %6227 = vmatmul.mubr.msk.bf16.gmra.mxu0 %vm957_vm2, %v6500_v31  ;;  %6355 = vmatmul.mubr.msk.bf16.gmra.mxu1 %vm957_vm2, %v6501_v32  ;;  %v6520_v32 = vld [vmem:[%s8236_s0 + $0x1a8] sm:$0xff]  }
  0xc2   :  { %6230 = vmatprep.mubr.msk.bf16.mxu0 %vm957_vm2, %v6502_v33  ;;  %6358 = vmatprep.mubr.msk.bf16.mxu1 %vm957_vm2, %v6503_v34 }
  0xc9   :  { %6231 = vmatmul.mubr.msk.bf16.gmra.mxu0 %vm957_vm2, %v6504_v35  ;;  %6359 = vmatmul.mubr.msk.bf16.gmra.mxu1 %vm957_vm2, %v6505_v36  ;;  %v6521_v36 = vld [vmem:[%s8236_s0 + $0x3a8] sm:$0xff]  }
  0xca   :  { %6234 = vmatprep.mubr.msk.bf16.mxu0 %vm957_vm2, %v6506_v37  ;;  %6362 = vmatprep.mubr.msk.bf16.mxu1 %vm957_vm2, %v6507_v38  ;;  %v6522_v37 = vld [vmem:[%s8236_s0 + $0x1b0] sm:$0xff]  }
  0xd1   :  { %6235 = vmatmul.mubr.msk.bf16.gmra.mxu0 %vm957_vm2, %v6508_v39  ;;  %6363 = vmatmul.mubr.msk.bf16.gmra.mxu1 %vm957_vm2, %v6509_v40 }
  0xd2   :  { %6238 = vmatprep.mubr.msk.bf16.mxu0 %vm957_vm2, %v6510_v41  ;;  %6366 = vmatprep.mubr.msk.bf16.mxu1 %vm957_vm2, %v6511_v42 }
  0xd9   :  { %v6144_v48 = vpop.f32.mrf.mxu0  ;;  %6239 = vmatmul.mubr.msk.bf16.gmra.mxu0 %vm957_vm2, %v6512_v43  ;;  %v6272_v49 = vpop.f32.mrf.mxu1  ;;  %6367 = vmatmul.mubr.msk.bf16.gmra.mxu1 %vm957_vm2, %v6513_v44  ;;  %v6523_v43 = vld [vmem:[%s8236_s0 + $0x3b0] sm:$0xff]  }
  0xda   :  { %v1392_v50 = vadd.f32 %v6144_v48, %v6988_v47  ;;  %v1904_v51 = vadd.f32 %v6272_v49, %v6988_v47  ;;  %6242 = vmatprep.mubr.msk.bf16.mxu0 %vm957_vm2, %v6514_v45  ;;  %6370 = vmatprep.mubr.msk.bf16.mxu1 %vm957_vm2, %v6515_v46 }
  0xdb   :  { %v1383_v52 = vpop.f32.mrf.mxu0  ;;  %v1895_v53 = vpop.f32.mrf.mxu1 }
  0xdc   :  { %vm2408_vm3 = vcmp.gt.f32.partialorder %v1392_v50, 0.0  ;;  %v2664_v54 = vmul.f32 0.2, %v1392_v50  ;;  %vm2536_vm4 = vcmp.gt.f32.partialorder %v1904_v51, 0.0  ;;  %v2792_v55 = vmul.f32 0.2, %v1904_v51 }
  0xdd   :  { %v1384_v56 = vadd.f32 %v6988_v47, %v1383_v52  ;;  %v1896_v57 = vadd.f32 %v6988_v47, %v1895_v53  ;;  %v6145_v58 = vpop.f32.mrf.mxu0  ;;  %v6273_v59 = vpop.f32.mrf.mxu1 }
  0xde   :  { %v2920_v61 = vsel %vm2408_vm3, %v1392_v50, %v2664_v54  ;;  %v1395_v62 = vadd.f32 %v6145_v58, %v6988_v47  ;;  %v1907_v63 = vadd.f32 %v6273_v59, %v6988_v47  ;;  %v3048_v1 = vsel %vm2536_vm4, %v1904_v51, %v2792_v55 }
  0xdf   :  { %vm2406_vm5 = vcmp.gt.f32.partialorder %v1384_v56, 0.0  ;;  %v2662_v2 = vmul.f32 0.2, %v1384_v56  ;;  %vm2534_vm6 = vcmp.gt.f32.partialorder %v1896_v57, 0.0  ;;  %v1386_v3 = vpop.f32.mrf.mxu0  ;;  %v1898_v4 = vpop.f32.mrf.mxu1  ;;  %v2790_v10 = vmul.f32 0.2, %v1896_v57 }
  0xe0   :  { %vm2409_vm7 = vcmp.gt.f32.partialorder %v1395_v62, 0.0  ;;  %v2665_v7 = vmul.f32 0.2, %v1395_v62  ;;  %vm2537_vm8 = vcmp.gt.f32.partialorder %v1907_v63, 0.0  ;;  %v2793_v8 = vmul.f32 0.2, %v1907_v63 }
  0xe1   :  { %v2918_v9 = vsel %vm2406_vm5, %v1384_v56, %v2662_v2  ;;  %v1387_v11 = vadd.f32 %v6988_v47, %v1386_v3  ;;  %v1899_v12 = vadd.f32 %v6988_v47, %v1898_v4  ;;  %v6148_v13 = vpop.f32.mrf.mxu0  ;;  %6243 = vmatmul.mubr.msk.bf16.gmra.mxu0 %vm957_vm2, %v6516_v60  ;;  %v6276_v14 = vpop.f32.mrf.mxu1  ;;  %6371 = vmatmul.mubr.msk.bf16.gmra.mxu1 %vm957_vm2, %v6517_v0 }
  0xe2   :  { %v2921_v15 = vsel %vm2409_vm7, %v1395_v62, %v2665_v7  ;;  %v3049_v16 = vsel %vm2537_vm8, %v1907_v63, %v2793_v8  ;;  %v1408_v17 = vadd.f32 %v6148_v13, %v6988_v47  ;;  %v1920_v18 = vadd.f32 %v6276_v14, %v6988_v47  ;;  %6246 = vmatprep.mubr.msk.bf16.mxu0 %vm957_vm2, %v6518_v5 }
  0xe3   :  { %v5240_v19 = vpack.c.bf16 %v2921_v15, %v2920_v61  ;;  %v5560_v20 = vpack.c.bf16 %v3049_v16, %v3048_v1  ;;  %vm2407_vm9 = vcmp.gt.f32.partialorder %v1387_v11, 0.0  ;;  %v2663_v21 = vmul.f32 0.2, %v1387_v11  ;;  %v1399_v22 = vpop.f32.mrf.mxu0  ;;  %v1911_v23 = vpop.f32.mrf.mxu1  ;;  %6374 = vmatprep.mubr.msk.bf16.mxu1 %vm957_vm2, %v6519_v6  ;;  %v6524_v6 = vld [vmem:[%s8236_s0 + $0x1b8] sm:$0xff]  }
  0xe4   :  { %vm2535_vm10 = vcmp.gt.f32.partialorder %v1899_v12, 0.0  ;;  %v2791_v24 = vmul.f32 0.2, %v1899_v12  ;;  %vm2412_vm11 = vcmp.gt.f32.partialorder %v1408_v17, 0.0  ;;  %v2668_v25 = vmul.f32 0.2, %v1408_v17 }
  0xe5   :  { %v3046_v26 = vsel %vm2534_vm6, %v1896_v57, %v2790_v10  ;;  %5872 = vst [vmem:[%s8238_s3 + $0x8] sm:$0xff] %v5240_v19   ;;  %5936 = vst [vmem:[%s8238_s3 + $0x208] sm:$0xff] %v5560_v20   ;;  %v2919_v27 = vsel %vm2407_vm9, %v1387_v11, %v2663_v21  ;;  %v2796_v28 = vmul.f32 0.2, %v1920_v18  ;;  %v1400_v29 = vadd.f32 %v6988_v47, %v1399_v22  ;;  %v6149_v30 = vpop.f32.mrf.mxu0  ;;  %v6277_v31 = vpop.f32.mrf.mxu1  ;;  %v6525_v10 = vld [vmem:[%s8236_s0 + $0x3b8] sm:$0xff]   ;;  %v6526_v11 = vld [vmem:[%s8236_s0 + $0x1c0] sm:$0xff]  }
  0xe6   :  { %v5235_v33 = vpack.c.bf16 %v2919_v27, %v2918_v9  ;;  %v3047_v34 = vsel %vm2535_vm10, %v1899_v12, %v2791_v24  ;;  %vm2540_vm12 = vcmp.gt.f32.partialorder %v1920_v18, 0.0  ;;  %v1912_v35 = vadd.f32 %v6988_v47, %v1911_v23 }
  0xe7   :  { %v5555_v38 = vpack.c.bf16 %v3047_v34, %v3046_v26  ;;  %v2924_v39 = vsel %vm2412_vm11, %v1408_v17, %v2668_v25  ;;  %vm2410_vm13 = vcmp.gt.f32.partialorder %v1400_v29, 0.0  ;;  %v2666_v40 = vmul.f32 0.2, %v1400_v29  ;;  %v1402_v41 = vpop.f32.mrf.mxu0  ;;  %v1914_v42 = vpop.f32.mrf.mxu1  ;;  %v6527_v17 = vld [vmem:[%s8236_s0 + $0x3c0] sm:$0xff]  }
  0xe8   :  { %5236 = vst [vmem:[%s8238_s3] sm:$0xff] %v5235_v33   ;;  %vm2538_vm14 = vcmp.gt.f32.partialorder %v1912_v35, 0.0  ;;  %v2794_v44 = vmul.f32 0.2, %v1912_v35  ;;  %v1411_v45 = vadd.f32 %v6149_v30, %v6988_v47  ;;  %v1923_v46 = vadd.f32 %v6277_v31, %v6988_v47 }
  0xe9   :  { %5935 = vst [vmem:[%s8238_s3 + $0x200] sm:$0xff] %v5555_v38   ;;  %v3052_v48 = vsel %vm2540_vm12, %v1920_v18, %v2796_v28  ;;  %v2922_v49 = vsel %vm2410_vm13, %v1400_v29, %v2666_v40  ;;  %v1403_v50 = vadd.f32 %v6988_v47, %v1402_v41  ;;  %v1915_v51 = vadd.f32 %v6988_v47, %v1914_v42  ;;  %v6152_v52 = vpop.f32.mrf.mxu0  ;;  %v6280_v53 = vpop.f32.mrf.mxu1 }
  0xea   :  { %6247 = vmatmul.mubr.msk.bf16.gmra.mxu0 %vm957_vm2, %v6520_v32  ;;  %v3050_v54 = vsel %vm2538_vm14, %v1912_v35, %v2794_v44  ;;  %vm2413_vm15 = vcmp.gt.f32.partialorder %v1411_v45, 0.0  ;;  %v2669_v55 = vmul.f32 0.2, %v1411_v45  ;;  %vm2541_vm0 = vcmp.gt.f32.partialorder %v1923_v46, 0.0  ;;  %6375 = vmatmul.mubr.msk.bf16.gmra.mxu1 %vm957_vm2, %v6521_v36 }
  0xeb   :  { %6250 = vmatprep.mubr.msk.bf16.mxu0 %vm957_vm2, %v6522_v37  ;;  %v2797_v56 = vmul.f32 0.2, %v1923_v46  ;;  %vm2411_vm1 = vcmp.gt.f32.partialorder %v1403_v50, 0.0  ;;  %v2667_v57 = vmul.f32 0.2, %v1403_v50  ;;  %vm2539_vm3 = vcmp.gt.f32.partialorder %v1915_v51, 0.0  ;;  %v1415_v58 = vpop.f32.mrf.mxu0  ;;  %v1927_v59 = vpop.f32.mrf.mxu1  ;;  %6378 = vmatprep.mubr.msk.bf16.mxu1 %vm957_vm2, %v6523_v43 }
  0xec   :  { %v2925_v60 = vsel %vm2413_vm15, %v1411_v45, %v2669_v55  ;;  %v2795_v61 = vmul.f32 0.2, %v1915_v51  ;;  %v1424_v62 = vadd.f32 %v6152_v52, %v6988_v47  ;;  %v1936_v63 = vadd.f32 %v6280_v53, %v6988_v47  ;;  %v6528_v43 = vld [vmem:[%s8236_s0 + $0x1c8] sm:$0xff]   ;;  %v6531_v55 = vld [vmem:[%s8236_s0 + $0x3d0] sm:$0xff]  }
  0xed   :  { %v5250_v0 = vpack.c.bf16 %v2925_v60, %v2924_v39  ;;  %v3053_v1 = vsel %vm2541_vm0, %v1923_v46, %v2797_v56  ;;  %v2923_v2 = vsel %vm2411_vm1, %v1403_v50, %v2667_v57  ;;  %v1416_v3 = vadd.f32 %v6988_v47, %v1415_v58  ;;  %v6153_v4 = vpop.f32.mrf.mxu0  ;;  %v6281_v5 = vpop.f32.mrf.mxu1 }
  0xee   :  { %v5570_v7 = vpack.c.bf16 %v3053_v1, %v3052_v48  ;;  %v5245_v8 = vpack.c.bf16 %v2923_v2, %v2922_v49  ;;  %v3051_v9 = vsel %vm2539_vm3, %v1915_v51, %v2795_v61  ;;  %vm2416_vm4 = vcmp.gt.f32.partialorder %v1424_v62, 0.0  ;;  %v6529_v48 = vld [vmem:[%s8236_s0 + $0x3c8] sm:$0xff]   ;;  %v6530_v49 = vld [vmem:[%s8236_s0 + $0x1d0] sm:$0xff]  }
  0xef   :  { %5874 = vst [vmem:[%s8238_s3 + $0x18] sm:$0xff] %v5250_v0   ;;  %v5565_v12 = vpack.c.bf16 %v3051_v9, %v3050_v54  ;;  %v2672_v13 = vmul.f32 0.2, %v1424_v62  ;;  %vm2544_vm5 = vcmp.gt.f32.partialorder %v1936_v63, 0.0  ;;  %v2800_v14 = vmul.f32 0.2, %v1936_v63  ;;  %v1418_v15 = vpop.f32.mrf.mxu0  ;;  %v1930_v16 = vpop.f32.mrf.mxu1 }
  0xf0   :  { %5938 = vst [vmem:[%s8238_s3 + $0x218] sm:$0xff] %v5570_v7   ;;  %5873 = vst [vmem:[%s8238_s3 + $0x10] sm:$0xff] %v5245_v8   ;;  %vm2414_vm6 = vcmp.gt.f32.partialorder %v1416_v3, 0.0  ;;  %v2670_v18 = vmul.f32 0.2, %v1416_v3  ;;  %v1928_v19 = vadd.f32 %v6988_v47, %v1927_v59  ;;  %v1427_v20 = vadd.f32 %v6153_v4, %v6988_v47 }
  0xf1   :  { %5937 = vst [vmem:[%s8238_s3 + $0x210] sm:$0xff] %v5565_v12   ;;  %v2928_v21 = vsel %vm2416_vm4, %v1424_v62, %v2672_v13  ;;  %v3056_v22 = vsel %vm2544_vm5, %v1936_v63, %v2800_v14  ;;  %v1939_v23 = vadd.f32 %v6281_v5, %v6988_v47  ;;  %v1419_v24 = vadd.f32 %v6988_v47, %v1418_v15  ;;  %v6156_v25 = vpop.f32.mrf.mxu0  ;;  %v6284_v26 = vpop.f32.mrf.mxu1 }
  0xf2   :  { %6251 = vmatmul.mubr.msk.bf16.gmra.mxu0 %vm957_vm2, %v6524_v6  ;;  %v2926_v27 = vsel %vm2414_vm6, %v1416_v3, %v2670_v18  ;;  %vm2542_vm7 = vcmp.gt.f32.partialorder %v1928_v19, 0.0  ;;  %v2798_v28 = vmul.f32 0.2, %v1928_v19  ;;  %vm2417_vm8 = vcmp.gt.f32.partialorder %v1427_v20, 0.0  ;;  %6379 = vmatmul.mubr.msk.bf16.gmra.mxu1 %vm957_vm2, %v6525_v10 }
  0xf3   :  { %6254 = vmatprep.mubr.msk.bf16.mxu0 %vm957_vm2, %v6526_v11  ;;  %v2673_v29 = vmul.f32 0.2, %v1427_v20  ;;  %vm2545_vm9 = vcmp.gt.f32.partialorder %v1939_v23, 0.0  ;;  %v2801_v30 = vmul.f32 0.2, %v1939_v23  ;;  %vm2415_vm10 = vcmp.gt.f32.partialorder %v1419_v24, 0.0  ;;  %v1431_v31 = vpop.f32.mrf.mxu0  ;;  %v1943_v32 = vpop.f32.mrf.mxu1  ;;  %6382 = vmatprep.mubr.msk.bf16.mxu1 %vm957_vm2, %v6527_v17 }
  0xf4   :  { %v3054_v33 = vsel %vm2542_vm7, %v1928_v19, %v2798_v28  ;;  %v2671_v34 = vmul.f32 0.2, %v1419_v24  ;;  %v1931_v35 = vadd.f32 %v6988_v47, %v1930_v16  ;;  %v1440_v36 = vadd.f32 %v6156_v25, %v6988_v47  ;;  %v6532_v17 = vld [vmem:[%s8236_s0 + $0x1d8] sm:$0xff]  }
  0xf5   :  { %v2929_v37 = vsel %vm2417_vm8, %v1427_v20, %v2673_v29  ;;  %v3057_v38 = vsel %vm2545_vm9, %v1939_v23, %v2801_v30  ;;  %v1952_v39 = vadd.f32 %v6284_v26, %v6988_v47  ;;  %v1432_v40 = vadd.f32 %v6988_v47, %v1431_v31  ;;  %v6157_v41 = vpop.f32.mrf.mxu0  ;;  %v6285_v42 = vpop.f32.mrf.mxu1  ;;  %v6534_v26 = vld [vmem:[%s8236_s0 + $0x1e0] sm:$0xff]  }
  0xf6   :  { %v5260_v44 = vpack.c.bf16 %v2929_v37, %v2928_v21  ;;  %v5580_v45 = vpack.c.bf16 %v3057_v38, %v3056_v22  ;;  %v2927_v46 = vsel %vm2415_vm10, %v1419_v24, %v2671_v34  ;;  %vm2543_vm11 = vcmp.gt.f32.partialorder %v1931_v35, 0.0  ;;  %v6533_v21 = vld [vmem:[%s8236_s0 + $0x3d8] sm:$0xff]  }
  0xf7   :  { %v5255_v50 = vpack.c.bf16 %v2927_v46, %v2926_v27  ;;  %v2799_v51 = vmul.f32 0.2, %v1931_v35  ;;  %vm2420_vm12 = vcmp.gt.f32.partialorder %v1440_v36, 0.0  ;;  %v2676_v52 = vmul.f32 0.2, %v1440_v36  ;;  %v1434_v53 = vpop.f32.mrf.mxu0  ;;  %v1946_v54 = vpop.f32.mrf.mxu1  ;;  %v6535_v27 = vld [vmem:[%s8236_s0 + $0x3e0] sm:$0xff]  }
  0xf8   :  { %5876 = vst [vmem:[%s8238_s3 + $0x28] sm:$0xff] %v5260_v44   ;;  %5940 = vst [vmem:[%s8238_s3 + $0x228] sm:$0xff] %v5580_v45   ;;  %vm2548_vm13 = vcmp.gt.f32.partialorder %v1952_v39, 0.0  ;;  %v2804_v56 = vmul.f32 0.2, %v1952_v39  ;;  %vm2418_vm14 = vcmp.gt.f32.partialorder %v1432_v40, 0.0  ;;  %v1944_v60 = vadd.f32 %v6988_v47, %v1943_v32 }
  0xf9   :  { %v2674_v57 = vmul.f32 0.2, %v1432_v40  ;;  %5875 = vst [vmem:[%s8238_s3 + $0x20] sm:$0xff] %v5255_v50   ;;  %v3055_v58 = vsel %vm2543_vm11, %v1931_v35, %v2799_v51  ;;  %v2932_v59 = vsel %vm2420_vm12, %v1440_v36, %v2676_v52  ;;  %v1443_v61 = vadd.f32 %v6157_v41, %v6988_v47  ;;  %v6160_v62 = vpop.f32.mrf.mxu0  ;;  %v6288_v63 = vpop.f32.mrf.mxu1 }
  0xfa   :  { %6255 = vmatmul.mubr.msk.bf16.gmra.mxu0 %vm957_vm2, %v6528_v43  ;;  %v5575_v0 = vpack.c.bf16 %v3055_v58, %v3054_v33  ;;  %v3060_v1 = vsel %vm2548_vm13, %v1952_v39, %v2804_v56  ;;  %v1955_v3 = vadd.f32 %v6285_v42, %v6988_v47  ;;  %6383 = vmatmul.mubr.msk.bf16.gmra.mxu1 %vm957_vm2, %v6529_v48  ;;  %vm2546_vm15 = vcmp.gt.f32.partialorder %v1944_v60, 0.0  ;;  %v6537_v58 = vld [vmem:[%s8236_s0 + $0x3e8] sm:$0xff]  }
  0xfb   :  { %v2930_v2 = vsel %vm2418_vm14, %v1432_v40, %v2674_v57  ;;  %v2802_v4 = vmul.f32 0.2, %v1944_v60  ;;  %vm2421_vm0 = vcmp.gt.f32.partialorder %v1443_v61, 0.0  ;;  %v2677_v5 = vmul.f32 0.2, %v1443_v61  ;;  %v1447_v6 = vpop.f32.mrf.mxu0  ;;  %v1959_v7 = vpop.f32.mrf.mxu1  ;;  %6258 = vmatprep.mubr.msk.bf16.mxu0 %vm957_vm2, %v6530_v49  ;;  %6386 = vmatprep.mubr.msk.bf16.mxu1 %vm957_vm2, %v6531_v55  ;;  %v6536_v55 = vld [vmem:[%s8236_s0 + $0x1e8] sm:$0xff]  }
  0xfc   :  { %5939 = vst [vmem:[%s8238_s3 + $0x220] sm:$0xff] %v5575_v0   ;;  %vm2549_vm1 = vcmp.gt.f32.partialorder %v1955_v3, 0.0  ;;  %v2805_v8 = vmul.f32 0.2, %v1955_v3  ;;  %v1435_v9 = vadd.f32 %v6988_v47, %v1434_v53  ;;  %v1947_v10 = vadd.f32 %v6988_v47, %v1946_v54 }
  0xfd   :  { %v3058_v11 = vsel %vm2546_vm15, %v1944_v60, %v2802_v4  ;;  %v2933_v12 = vsel %vm2421_vm0, %v1443_v61, %v2677_v5  ;;  %v1456_v13 = vadd.f32 %v6160_v62, %v6988_v47  ;;  %v1968_v14 = vadd.f32 %v6288_v63, %v6988_v47  ;;  %v6161_v15 = vpop.f32.mrf.mxu0  ;;  %v6289_v16 = vpop.f32.mrf.mxu1 }
  0xfe   :  { %v5270_v18 = vpack.c.bf16 %v2933_v12, %v2932_v59  ;;  %v3061_v19 = vsel %vm2549_vm1, %v1955_v3, %v2805_v8  ;;  %vm2419_vm3 = vcmp.gt.f32.partialorder %v1435_v9, 0.0  ;;  %v2675_v20 = vmul.f32 0.2, %v1435_v9  ;;  %v6538_v59 = vld [vmem:[%s8236_s0 + $0x1f0] sm:$0xff]  }
  0xff   :  { %v5590_v22 = vpack.c.bf16 %v3061_v19, %v3060_v1  ;;  %vm2547_vm4 = vcmp.gt.f32.partialorder %v1947_v10, 0.0  ;;  %v2803_v23 = vmul.f32 0.2, %v1947_v10  ;;  %vm2424_vm5 = vcmp.gt.f32.partialorder %v1456_v13, 0.0  ;;  %v1450_v24 = vpop.f32.mrf.mxu0  ;;  %v1962_v25 = vpop.f32.mrf.mxu1  ;;  %v6539_v1 = vld [vmem:[%s8236_s0 + $0x3f0] sm:$0xff]  }
 0x100   :  { %5878 = vst [vmem:[%s8238_s3 + $0x38] sm:$0xff] %v5270_v18   ;;  %v2931_v28 = vsel %vm2419_vm3, %v1435_v9, %v2675_v20  ;;  %v2680_v29 = vmul.f32 0.2, %v1456_v13  ;;  %vm2552_vm6 = vcmp.gt.f32.partialorder %v1968_v14, 0.0  ;;  %v2808_v30 = vmul.f32 0.2, %v1968_v14 }
 0x101   :  { %5942 = vst [vmem:[%s8238_s3 + $0x238] sm:$0xff] %v5590_v22   ;;  %v5265_v31 = vpack.c.bf16 %v2931_v28, %v2930_v2  ;;  %v3059_v32 = vsel %vm2547_vm4, %v1947_v10, %v2803_v23  ;;  %v1448_v33 = vadd.f32 %v6988_v47, %v1447_v6  ;;  %v1960_v34 = vadd.f32 %v6988_v47, %v1959_v7  ;;  %v6164_v35 = vpop.f32.mrf.mxu0  ;;  %v6292_v36 = vpop.f32.mrf.mxu1  ;;  %v6540_v28 = vld [vmem:[%s8236_s0 + $0x1f8] sm:$0xff]  }
 0x102   :  { %6259 = vmatmul.mubr.msk.bf16.gmra.mxu0 %vm957_vm2, %v6532_v17  ;;  %v5585_v37 = vpack.c.bf16 %v3059_v32, %v3058_v11  ;;  %v2936_v38 = vsel %vm2424_vm5, %v1456_v13, %v2680_v29  ;;  %v3064_v39 = vsel %vm2552_vm6, %v1968_v14, %v2808_v30  ;;  %v1459_v40 = vadd.f32 %v6161_v15, %v6988_v47  ;;  %v6541_v29 = vld [vmem:[%s8236_s0 + $0x3f8] sm:$0xff]  }
 0x103   :  { %6387 = vmatmul.mubr.msk.bf16.gmra.mxu1 %vm957_vm2, %v6533_v21  ;;  %5877 = vst [vmem:[%s8238_s3 + $0x30] sm:$0xff] %v5265_v31   ;;  %vm2422_vm7 = vcmp.gt.f32.partialorder %v1448_v33, 0.0  ;;  %v2678_v41 = vmul.f32 0.2, %v1448_v33  ;;  %vm2550_vm8 = vcmp.gt.f32.partialorder %v1960_v34, 0.0  ;;  %v1463_v43 = vpop.f32.mrf.mxu0  ;;  %v1975_v44 = vpop.f32.mrf.mxu1  ;;  %6262 = vmatprep.mubr.msk.bf16.mxu0 %vm957_vm2, %v6534_v26  ;;  %v1971_v46 = vadd.f32 %v6289_v16, %v6988_v47 }
 0x104   :  { %v2806_v42 = vmul.f32 0.2, %v1960_v34  ;;  %6390 = vmatprep.mubr.msk.bf16.mxu1 %vm957_vm2, %v6535_v27  ;;  %5941 = vst [vmem:[%s8238_s3 + $0x230] sm:$0xff] %v5585_v37   ;;  %vm2425_vm9 = vcmp.gt.f32.partialorder %v1459_v40, 0.0  ;;  %v2681_v45 = vmul.f32 0.2, %v1459_v40  ;;  %v1451_v48 = vadd.f32 %v6988_v47, %v1450_v24 }
 0x105   :  { %v2934_v49 = vsel %vm2422_vm7, %v1448_v33, %v2678_v41  ;;  %v1963_v51 = vadd.f32 %v6988_v47, %v1962_v25  ;;  %v1472_v52 = vadd.f32 %v6164_v35, %v6988_v47  ;;  %v6165_v53 = vpop.f32.mrf.mxu0  ;;  %v6293_v54 = vpop.f32.mrf.mxu1  ;;  %vm2553_vm10 = vcmp.gt.f32.partialorder %v1971_v46, 0.0 }
 0x106   :  { %v3062_v50 = vsel %vm2550_vm8, %v1960_v34, %v2806_v42  ;;  %v2937_v56 = vsel %vm2425_vm9, %v1459_v40, %v2681_v45  ;;  %v2809_v57 = vmul.f32 0.2, %v1971_v46  ;;  %vm2423_vm11 = vcmp.gt.f32.partialorder %v1451_v48, 0.0 }
 0x107   :  { %v5280_v60 = vpack.c.bf16 %v2937_v56, %v2936_v38  ;;  %v2679_v61 = vmul.f32 0.2, %v1451_v48  ;;  %vm2551_vm12 = vcmp.gt.f32.partialorder %v1963_v51, 0.0  ;;  %v2807_v62 = vmul.f32 0.2, %v1963_v51  ;;  %v1466_v63 = vpop.f32.mrf.mxu0  ;;  %v1978_v0 = vpop.f32.mrf.mxu1 }
 0x108   :  { %v3065_v2 = vsel %vm2553_vm10, %v1971_v46, %v2809_v57  ;;  %vm2428_vm13 = vcmp.gt.f32.partialorder %v1472_v52, 0.0  ;;  %v2684_v3 = vmul.f32 0.2, %v1472_v52  ;;  %v1984_v4 = vadd.f32 %v6292_v36, %v6988_v47 }
 0x109   :  { %5880 = vst [vmem:[%s8238_s3 + $0x48] sm:$0xff] %v5280_v60   ;;  %v5600_v5 = vpack.c.bf16 %v3065_v2, %v3064_v39  ;;  %v2935_v6 = vsel %vm2423_vm11, %v1451_v48, %v2679_v61  ;;  %v3063_v7 = vsel %vm2551_vm12, %v1963_v51, %v2807_v62  ;;  %v1464_v8 = vadd.f32 %v6988_v47, %v1463_v43  ;;  %v6168_v9 = vpop.f32.mrf.mxu0  ;;  %v6296_v10 = vpop.f32.mrf.mxu1 }
 0x10a   :  { %6263 = vmatmul.mubr.msk.bf16.gmra.mxu0 %vm957_vm2, %v6536_v55  ;;  %v5275_v11 = vpack.c.bf16 %v2935_v6, %v2934_v49  ;;  %v5595_v12 = vpack.c.bf16 %v3063_v7, %v3062_v50  ;;  %v2940_v13 = vsel %vm2428_vm13, %v1472_v52, %v2684_v3  ;;  %vm2556_vm14 = vcmp.gt.f32.partialorder %v1984_v4, 0.0 }
 0x10b   :  { %6391 = vmatmul.mubr.msk.bf16.gmra.mxu1 %vm957_vm2, %v6537_v58  ;;  %6266 = vmatprep.mubr.msk.bf16.mxu0 %vm957_vm2, %v6538_v59  ;;  %5944 = vst [vmem:[%s8238_s3 + $0x248] sm:$0xff] %v5600_v5   ;;  %v2812_v14 = vmul.f32 0.2, %v1984_v4  ;;  %vm2426_vm15 = vcmp.gt.f32.partialorder %v1464_v8, 0.0  ;;  %v2682_v15 = vmul.f32 0.2, %v1464_v8  ;;  %v1976_v16 = vadd.f32 %v6988_v47, %v1975_v44  ;;  %v1479_v17 = vpop.f32.mrf.mxu0  ;;  %v1991_v18 = vpop.f32.mrf.mxu1 }
 0x10c   :  { %6394 = vmatprep.mubr.msk.bf16.mxu1 %vm957_vm2, %v6539_v1  ;;  %5879 = vst [vmem:[%s8238_s3 + $0x40] sm:$0xff] %v5275_v11   ;;  %5943 = vst [vmem:[%s8238_s3 + $0x240] sm:$0xff] %v5595_v12   ;;  %v1475_v19 = vadd.f32 %v6165_v53, %v6988_v47  ;;  %v1987_v20 = vadd.f32 %v6293_v54, %v6988_v47  ;;  %v1467_v21 = vadd.f32 %v6988_v47, %v1466_v63 }
 0x10d   :  { %v1979_v22 = vadd.f32 %v6988_v47, %v1978_v0  ;;  %v3068_v23 = vsel %vm2556_vm14, %v1984_v4, %v2812_v14  ;;  %v2938_v24 = vsel %vm2426_vm15, %v1464_v8, %v2682_v15  ;;  %vm2554_vm0 = vcmp.gt.f32.partialorder %v1976_v16, 0.0  ;;  %v6169_v26 = vpop.f32.mrf.mxu0  ;;  %v6297_v27 = vpop.f32.mrf.mxu1 }
 0x10e   :  { %v2810_v25 = vmul.f32 0.2, %v1976_v16  ;;  %vm2429_vm1 = vcmp.gt.f32.partialorder %v1475_v19, 0.0  ;;  %v2685_v30 = vmul.f32 0.2, %v1475_v19  ;;  %vm2557_vm3 = vcmp.gt.f32.partialorder %v1987_v20, 0.0 }
 0x10f   :  { %v2813_v31 = vmul.f32 0.2, %v1987_v20  ;;  %vm2427_vm4 = vcmp.gt.f32.partialorder %v1467_v21, 0.0  ;;  %v2683_v33 = vmul.f32 0.2, %v1467_v21  ;;  %vm2555_vm5 = vcmp.gt.f32.partialorder %v1979_v22, 0.0  ;;  %v1482_v34 = vpop.f32.mrf.mxu0  ;;  %v1994_v35 = vpop.f32.mrf.mxu1 }
 0x110   :  { %v3066_v32 = vsel %vm2554_vm0, %v1976_v16, %v2810_v25  ;;  %v2941_v36 = vsel %vm2429_vm1, %v1475_v19, %v2685_v30  ;;  %v2811_v38 = vmul.f32 0.2, %v1979_v22  ;;  %v1488_v39 = vadd.f32 %v6168_v9, %v6988_v47 }
 0x111   :  { %v3069_v37 = vsel %vm2557_vm3, %v1987_v20, %v2813_v31  ;;  %v5290_v40 = vpack.c.bf16 %v2941_v36, %v2940_v13  ;;  %v2939_v42 = vsel %vm2427_vm4, %v1467_v21, %v2683_v33  ;;  %v2000_v43 = vadd.f32 %v6296_v10, %v6988_v47  ;;  %v6172_v44 = vpop.f32.mrf.mxu0  ;;  %v6300_v45 = vpop.f32.mrf.mxu1 }
 0x112   :  { %v5610_v41 = vpack.c.bf16 %v3069_v37, %v3068_v23  ;;  %6267 = vmatmul.mubr.msk.bf16.gmra.mxu0 %vm957_vm2, %v6540_v28  ;;  %v5285_v46 = vpack.c.bf16 %v2939_v42, %v2938_v24  ;;  %v3067_v48 = vsel %vm2555_vm5, %v1979_v22, %v2811_v38  ;;  %vm2432_vm6 = vcmp.gt.f32.partialorder %v1488_v39, 0.0 }
 0x113   :  { %v2688_v49 = vmul.f32 0.2, %v1488_v39  ;;  %6395 = vmatmul.mubr.msk.bf16.gmra.mxu1 %vm957_vm2, %v6541_v29  ;;  %5882 = vst [vmem:[%s8238_s3 + $0x58] sm:$0xff] %v5290_v40   ;;  %v5605_v50 = vpack.c.bf16 %v3067_v48, %v3066_v32  ;;  %vm2560_vm7 = vcmp.gt.f32.partialorder %v2000_v43, 0.0  ;;  %v2816_v51 = vmul.f32 0.2, %v2000_v43  ;;  %v1495_v53 = vpop.f32.mrf.mxu0  ;;  %v2007_v54 = vpop.f32.mrf.mxu1 }
 0x114   :  { %5946 = vst [vmem:[%s8238_s3 + $0x258] sm:$0xff] %v5610_v41   ;;  %v1480_v52 = vadd.f32 %v6988_v47, %v1479_v17  ;;  %5881 = vst [vmem:[%s8238_s3 + $0x50] sm:$0xff] %v5285_v46   ;;  %v1992_v56 = vadd.f32 %v6988_v47, %v1991_v18  ;;  %v1491_v57 = vadd.f32 %v6169_v26, %v6988_v47 }
 0x115   :  { %v2944_v55 = vsel %vm2432_vm6, %v1488_v39, %v2688_v49  ;;  %v2003_v58 = vadd.f32 %v6297_v27, %v6988_v47  ;;  %5945 = vst [vmem:[%s8238_s3 + $0x250] sm:$0xff] %v5605_v50   ;;  %v3072_v59 = vsel %vm2560_vm7, %v2000_v43, %v2816_v51  ;;  %v1483_v61 = vadd.f32 %v6988_v47, %v1482_v34  ;;  %v6173_v62 = vpop.f32.mrf.mxu0  ;;  %v6301_v63 = vpop.f32.mrf.mxu1 }
 0x116   :  { %vm2430_vm2 = vcmp.gt.f32.partialorder %v1480_v52, 0.0  ;;  %v2686_v60 = vmul.f32 0.2, %v1480_v52  ;;  %vm2558_vm8 = vcmp.gt.f32.partialorder %v1992_v56, 0.0  ;;  %v2814_v0 = vmul.f32 0.2, %v1992_v56 }
 0x117   :  { %vm2433_vm9 = vcmp.gt.f32.partialorder %v1491_v57, 0.0  ;;  %v2689_v1 = vmul.f32 0.2, %v1491_v57  ;;  %vm2561_vm10 = vcmp.gt.f32.partialorder %v2003_v58, 0.0  ;;  %v2817_v3 = vmul.f32 0.2, %v2003_v58  ;;  %v1498_v4 = vpop.f32.mrf.mxu0  ;;  %v2010_v5 = vpop.f32.mrf.mxu1 }
 0x118   :  { %v2942_v2 = vsel %vm2430_vm2, %v1480_v52, %v2686_v60  ;;  %vm2431_vm11 = vcmp.gt.f32.partialorder %v1483_v61, 0.0  ;;  %v3070_v6 = vsel %vm2558_vm8, %v1992_v56, %v2814_v0  ;;  %v2687_v8 = vmul.f32 0.2, %v1483_v61 }
 0x119   :  { %v2945_v7 = vsel %vm2433_vm9, %v1491_v57, %v2689_v1  ;;  %v1995_v9 = vadd.f32 %v6988_v47, %v1994_v35  ;;  %v3073_v11 = vsel %vm2561_vm10, %v2003_v58, %v2817_v3  ;;  %v1504_v12 = vadd.f32 %v6172_v44, %v6988_v47  ;;  %v6176_v14 = vpop.f32.mrf.mxu0  ;;  %v6304_v15 = vpop.f32.mrf.mxu1 }
 0x11a   :  { %v5300_v10 = vpack.c.bf16 %v2945_v7, %v2944_v55  ;;  %v2016_v13 = vadd.f32 %v6300_v45, %v6988_v47  ;;  %v5620_v16 = vpack.c.bf16 %v3073_v11, %v3072_v59  ;;  %v2943_v17 = vsel %vm2431_vm11, %v1483_v61, %v2687_v8 }
 0x11b   :  { %vm2559_vm12 = vcmp.gt.f32.partialorder %v1995_v9, 0.0  ;;  %v2815_v18 = vmul.f32 0.2, %v1995_v9  ;;  %v5295_v19 = vpack.c.bf16 %v2943_v17, %v2942_v2  ;;  %vm2436_vm13 = vcmp.gt.f32.partialorder %v1504_v12, 0.0  ;;  %v1511_v21 = vpop.f32.mrf.mxu0  ;;  %v2023_v22 = vpop.f32.mrf.mxu1 }
 0x11c   :  { %5884 = vst [vmem:[%s8238_s3 + $0x68] sm:$0xff] %v5300_v10   ;;  %v2692_v20 = vmul.f32 0.2, %v1504_v12  ;;  %vm2564_vm14 = vcmp.gt.f32.partialorder %v2016_v13, 0.0  ;;  %5948 = vst [vmem:[%s8238_s3 + $0x268] sm:$0xff] %v5620_v16   ;;  %v1496_v25 = vadd.f32 %v6988_v47, %v1495_v53  ;;  %v2008_v26 = vadd.f32 %v6988_v47, %v2007_v54 }
 0x11d   :  { %v3071_v23 = vsel %vm2559_vm12, %v1995_v9, %v2815_v18  ;;  %v2820_v24 = vmul.f32 0.2, %v2016_v13  ;;  %5883 = vst [vmem:[%s8238_s3 + $0x60] sm:$0xff] %v5295_v19   ;;  %v1507_v29 = vadd.f32 %v6173_v62, %v6988_v47  ;;  %v2019_v30 = vadd.f32 %v6301_v63, %v6988_v47  ;;  %v6177_v31 = vpop.f32.mrf.mxu0  ;;  %v6305_v32 = vpop.f32.mrf.mxu1 }
 0x11e   :  { %v5615_v27 = vpack.c.bf16 %v3071_v23, %v3070_v6  ;;  %v2948_v28 = vsel %vm2436_vm13, %v1504_v12, %v2692_v20  ;;  %vm2434_vm15 = vcmp.gt.f32.partialorder %v1496_v25, 0.0  ;;  %v2690_v34 = vmul.f32 0.2, %v1496_v25 }
 0x11f   :  { %v3076_v33 = vsel %vm2564_vm14, %v2016_v13, %v2820_v24  ;;  %vm2562_vm0 = vcmp.gt.f32.partialorder %v2008_v26, 0.0  ;;  %v2818_v35 = vmul.f32 0.2, %v2008_v26  ;;  %vm2437_vm1 = vcmp.gt.f32.partialorder %v1507_v29, 0.0  ;;  %v1514_v37 = vpop.f32.mrf.mxu0  ;;  %v2026_v38 = vpop.f32.mrf.mxu1 }
 0x120   :  { %5947 = vst [vmem:[%s8238_s3 + $0x260] sm:$0xff] %v5615_v27   ;;  %v2693_v36 = vmul.f32 0.2, %v1507_v29  ;;  %vm2565_vm3 = vcmp.gt.f32.partialorder %v2019_v30, 0.0  ;;  %v2946_v39 = vsel %vm2434_vm15, %v1496_v25, %v2690_v34  ;;  %v2821_v40 = vmul.f32 0.2, %v2019_v30 }
 0x121   :  { %v1499_v41 = vadd.f32 %v6988_v47, %v1498_v4  ;;  %v2011_v42 = vadd.f32 %v6988_v47, %v2010_v5  ;;  %v3074_v43 = vsel %vm2562_vm0, %v2008_v26, %v2818_v35  ;;  %v1520_v45 = vadd.f32 %v6176_v14, %v6988_v47  ;;  %v6180_v48 = vpop.f32.mrf.mxu0  ;;  %v6308_v49 = vpop.f32.mrf.mxu1 }
 0x122   :  { %v2949_v44 = vsel %vm2437_vm1, %v1507_v29, %v2693_v36  ;;  %v2032_v46 = vadd.f32 %v6304_v15, %v6988_v47  ;;  %v3077_v51 = vsel %vm2565_vm3, %v2019_v30, %v2821_v40  ;;  %v1512_v62 = vadd.f32 %v6988_v47, %v1511_v21  ;;  %v7297_v40 = vld [vmem:[%s8237_s2] ss:$0 sm:$0xff] }
 0x123   :  { %v5310_v50 = vpack.c.bf16 %v2949_v44, %v2948_v28  ;;  %vm2435_vm4 = vcmp.gt.f32.partialorder %v1499_v41, 0.0  ;;  %v2691_v52 = vmul.f32 0.2, %v1499_v41  ;;  %v5630_v53 = vpack.c.bf16 %v3077_v51, %v3076_v33  ;;  %v1527_v55 = vpop.f32.mrf.mxu0  ;;  %v7258_v56 = vpop.f32.mrf.mxu1 }
 0x124   :  { %vm2563_vm5 = vcmp.gt.f32.partialorder %v2011_v42, 0.0  ;;  %v2819_v54 = vmul.f32 0.2, %v2011_v42  ;;  %vm2440_vm6 = vcmp.gt.f32.partialorder %v1520_v45, 0.0  ;;  %v2696_v58 = vmul.f32 0.2, %v1520_v45 }
 0x125   :  { %5886 = vst [vmem:[%s8238_s3 + $0x78] sm:$0xff] %v5310_v50   ;;  %v2947_v57 = vsel %vm2435_vm4, %v1499_v41, %v2691_v52  ;;  %vm2568_vm7 = vcmp.gt.f32.partialorder %v2032_v46, 0.0  ;;  %v2824_v59 = vmul.f32 0.2, %v2032_v46  ;;  %5950 = vst [vmem:[%s8238_s3 + $0x278] sm:$0xff] %v5630_v53   ;;  %v2024_v63 = vadd.f32 %v6988_v47, %v2023_v22  ;;  %v6181_v0 = vpop.f32.mrf.mxu0  ;;  %v6309_v1 = vpop.f32.mrf.mxu1 }
 0x126   :  { %v5305_v60 = vpack.c.bf16 %v2947_v57, %v2946_v39  ;;  %v3075_v61 = vsel %vm2563_vm5, %v2011_v42, %v2819_v54  ;;  %v2952_v3 = vsel %vm2440_vm6, %v1520_v45, %v2696_v58  ;;  %v1523_v5 = vadd.f32 %v6177_v31, %v6988_v47 }
 0x127   :  { %v5625_v2 = vpack.c.bf16 %v3075_v61, %v3074_v43  ;;  %v3080_v4 = vsel %vm2568_vm7, %v2032_v46, %v2824_v59  ;;  %vm2438_vm2 = vcmp.gt.f32.partialorder %v1512_v62, 0.0  ;;  %v2694_v6 = vmul.f32 0.2, %v1512_v62  ;;  %v1530_v8 = vpop.f32.mrf.mxu0  ;;  %v2042_v9 = vpop.f32.mrf.mxu1 }
 0x128   :  { %5885 = vst [vmem:[%s8238_s3 + $0x70] sm:$0xff] %v5305_v60   ;;  %vm2566_vm8 = vcmp.gt.f32.partialorder %v2024_v63, 0.0  ;;  %v2822_v7 = vmul.f32 0.2, %v2024_v63  ;;  %vm2441_vm9 = vcmp.gt.f32.partialorder %v1523_v5, 0.0  ;;  %v2035_v11 = vadd.f32 %v6305_v32, %v6988_v47 }
 0x129   :  { %5949 = vst [vmem:[%s8238_s3 + $0x270] sm:$0xff] %v5625_v2   ;;  %v2697_v10 = vmul.f32 0.2, %v1523_v5  ;;  %v1515_v12 = vadd.f32 %v6988_v47, %v1514_v37  ;;  %v2950_v13 = vsel %vm2438_vm2, %v1512_v62, %v2694_v6  ;;  %v2027_v15 = vadd.f32 %v6988_v47, %v2026_v38  ;;  %v6184_v17 = vpop.f32.mrf.mxu0  ;;  %v7280_v18 = vpop.f32.mrf.mxu1 }
 0x12a   :  { %v3078_v14 = vsel %vm2566_vm8, %v2024_v63, %v2822_v7  ;;  %v1536_v16 = vadd.f32 %v6180_v48, %v6988_v47  ;;  %vm2569_vm10 = vcmp.gt.f32.partialorder %v2035_v11, 0.0  ;;  %v2825_v20 = vmul.f32 0.2, %v2035_v11 }
 0x12b   :  { %v2953_v19 = vsel %vm2441_vm9, %v1523_v5, %v2697_v10  ;;  %vm2439_vm11 = vcmp.gt.f32.partialorder %v1515_v12, 0.0  ;;  %v2695_v22 = vmul.f32 0.2, %v1515_v12  ;;  %vm2567_vm12 = vcmp.gt.f32.partialorder %v2027_v15, 0.0  ;;  %v7282_v24 = vpop.f32.mrf.mxu0  ;;  %v7284_v25 = vpop.f32.mrf.mxu1 }
 0x12c   :  { %v5320_v21 = vpack.c.bf16 %v2953_v19, %v2952_v3  ;;  %v2823_v23 = vmul.f32 0.2, %v2027_v15  ;;  %v3081_v26 = vsel %vm2569_vm10, %v2035_v11, %v2825_v20  ;;  %vm2444_vm13 = vcmp.gt.f32.partialorder %v1536_v16, 0.0 }
 0x12d   :  { %v2700_v27 = vmul.f32 0.2, %v1536_v16  ;;  %v2048_v28 = vadd.f32 %v6308_v49, %v6988_v47  ;;  %v5640_v29 = vpack.c.bf16 %v3081_v26, %v3080_v4  ;;  %v2951_v30 = vsel %vm2439_vm11, %v1515_v12, %v2695_v22  ;;  %v6185_v33 = vpop.f32.mrf.mxu0  ;;  %v6313_v34 = vpop.f32.mrf.mxu1 }
 0x12e   :  { %5888 = vst [vmem:[%s8238_s3 + $0x88] sm:$0xff] %v5320_v21   ;;  %v3079_v31 = vsel %vm2567_vm12, %v2027_v15, %v2823_v23  ;;  %v1528_v32 = vadd.f32 %v6988_v47, %v1527_v55  ;;  %v5315_v35 = vpack.c.bf16 %v2951_v30, %v2950_v13  ;;  %v2040_v47 = vadd.f32 %v7297_v40, %v7258_v56 }
 0x12f   :  { %v5635_v36 = vpack.c.bf16 %v3079_v31, %v3078_v14  ;;  %v2956_v37 = vsel %vm2444_vm13, %v1536_v16, %v2700_v27  ;;  %vm2572_vm14 = vcmp.gt.f32.partialorder %v2048_v28, 0.0  ;;  %5952 = vst [vmem:[%s8238_s3 + $0x288] sm:$0xff] %v5640_v29   ;;  %v2828_v38 = vmul.f32 0.2, %v2048_v28  ;;  %v1546_v41 = vpop.f32.mrf.mxu0  ;;  %v7301_v42 = vpop.f32.mrf.mxu1 }
 0x130   :  { %vm2442_vm15 = vcmp.gt.f32.partialorder %v1528_v32, 0.0  ;;  %v2698_v39 = vmul.f32 0.2, %v1528_v32  ;;  %5887 = vst [vmem:[%s8238_s3 + $0x80] sm:$0xff] %v5315_v35   ;;  %v1539_v43 = vadd.f32 %v7297_v40, %v6181_v0  ;;  %v2051_v44 = vadd.f32 %v7297_v40, %v6309_v1 }
 0x131   :  { %5951 = vst [vmem:[%s8238_s3 + $0x280] sm:$0xff] %v5635_v36   ;;  %v1531_v45 = vadd.f32 %v7297_v40, %v1530_v8  ;;  %v2043_v46 = vadd.f32 %v7297_v40, %v2042_v9  ;;  %v3084_v48 = vsel %vm2572_vm14, %v2048_v28, %v2828_v38  ;;  %vm2570_vm0 = vcmp.gt.f32.partialorder %v2040_v47, 0.0  ;;  %v7313_v51 = vpop.f32.mrf.mxu0  ;;  %v6316_v52 = vpop.f32.mrf.mxu1 }
 0x132   :  { %v2954_v49 = vsel %vm2442_vm15, %v1528_v32, %v2698_v39  ;;  %v2826_v50 = vmul.f32 0.2, %v2040_v47  ;;  %vm2445_vm1 = vcmp.gt.f32.partialorder %v1539_v43, 0.0  ;;  %v2701_v53 = vmul.f32 0.2, %v1539_v43 }
 0x133   :  { %vm2573_vm3 = vcmp.gt.f32.partialorder %v2051_v44, 0.0  ;;  %v2829_v54 = vmul.f32 0.2, %v2051_v44  ;;  %vm2443_vm4 = vcmp.gt.f32.partialorder %v1531_v45, 0.0  ;;  %v2699_v56 = vmul.f32 0.2, %v1531_v45  ;;  %v7315_v57 = vpop.f32.mrf.mxu0  ;;  %v7317_v58 = vpop.f32.mrf.mxu1 }
 0x134   :  { %v3082_v55 = vsel %vm2570_vm0, %v2040_v47, %v2826_v50  ;;  %vm2571_vm5 = vcmp.gt.f32.partialorder %v2043_v46, 0.0  ;;  %v2957_v59 = vsel %vm2445_vm1, %v1539_v43, %v2701_v53  ;;  %v2827_v61 = vmul.f32 0.2, %v2043_v46 }
 0x135   :  { %v3085_v60 = vsel %vm2573_vm3, %v2051_v44, %v2829_v54  ;;  %v1552_v62 = vadd.f32 %v7297_v40, %v6184_v17  ;;  %v5330_v63 = vpack.c.bf16 %v2957_v59, %v2956_v37  ;;  %v2955_v1 = vsel %vm2443_vm4, %v1531_v45, %v2699_v56  ;;  %v7322_v3 = vpop.f32.mrf.mxu0  ;;  %v7324_v4 = vpop.f32.mrf.mxu1 }
 0x136   :  { %v5650_v0 = vpack.c.bf16 %v3085_v60, %v3084_v48  ;;  %v2064_v2 = vadd.f32 %v7297_v40, %v7280_v18  ;;  %v5325_v5 = vpack.c.bf16 %v2955_v1, %v2954_v49  ;;  %v3083_v6 = vsel %vm2571_vm5, %v2043_v46, %v2827_v61 }
 0x137   :  { %vm2448_vm6 = vcmp.gt.f32.partialorder %v1552_v62, 0.0  ;;  %v2704_v7 = vmul.f32 0.2, %v1552_v62  ;;  %5890 = vst [vmem:[%s8238_s3 + $0x98] sm:$0xff] %v5330_v63   ;;  %v5645_v8 = vpack.c.bf16 %v3083_v6, %v3082_v55  ;;  %v1544_v10 = vadd.f32 %v7297_v40, %v7282_v24  ;;  %v7334_v11 = vpop.f32.mrf.mxu0  ;;  %v7336_v12 = vpop.f32.mrf.mxu1 }
 0x138   :  { %5954 = vst [vmem:[%s8238_s3 + $0x298] sm:$0xff] %v5650_v0   ;;  %vm2576_vm7 = vcmp.gt.f32.partialorder %v2064_v2, 0.0  ;;  %v2832_v9 = vmul.f32 0.2, %v2064_v2  ;;  %5889 = vst [vmem:[%s8238_s3 + $0x90] sm:$0xff] %v5325_v5   ;;  %v2056_v14 = vadd.f32 %v7297_v40, %v7284_v25  ;;  %v1555_v15 = vadd.f32 %v7297_v40, %v6185_v33 }
 0x139   :  { %v2960_v13 = vsel %vm2448_vm6, %v1552_v62, %v2704_v7  ;;  %v2067_v16 = vadd.f32 %v7297_v40, %v6313_v34  ;;  %5953 = vst [vmem:[%s8238_s3 + $0x290] sm:$0xff] %v5645_v8   ;;  %vm2446_vm2 = vcmp.gt.f32.partialorder %v1544_v10, 0.0  ;;  %v2702_v18 = vmul.f32 0.2, %v1544_v10  ;;  %v7349_v20 = vpop.f32.mrf.mxu0  ;;  %v6320_v21 = vpop.f32.mrf.mxu1 }
 0x13a   :  { %v3088_v17 = vsel %vm2576_vm7, %v2064_v2, %v2832_v9  ;;  %v1547_v19 = vadd.f32 %v7297_v40, %v1546_v41  ;;  %vm2574_vm8 = vcmp.gt.f32.partialorder %v2056_v14, 0.0  ;;  %v2830_v22 = vmul.f32 0.2, %v2056_v14 }
 0x13b   :  { %vm2449_vm9 = vcmp.gt.f32.partialorder %v1555_v15, 0.0  ;;  %v2705_v23 = vmul.f32 0.2, %v1555_v15  ;;  %v2958_v24 = vsel %vm2446_vm2, %v1544_v10, %v2702_v18  ;;  %vm2577_vm10 = vcmp.gt.f32.partialorder %v2067_v16, 0.0  ;;  %v7351_v26 = vpop.f32.mrf.mxu0  ;;  %v7353_v27 = vpop.f32.mrf.mxu1 }
 0x13c   :  { %v2833_v25 = vmul.f32 0.2, %v2067_v16  ;;  %vm2447_vm11 = vcmp.gt.f32.partialorder %v1547_v19, 0.0  ;;  %v3086_v28 = vsel %vm2574_vm8, %v2056_v14, %v2830_v22  ;;  %v2703_v30 = vmul.f32 0.2, %v1547_v19 }
 0x13d   :  { %v2961_v29 = vsel %vm2449_vm9, %v1555_v15, %v2705_v23  ;;  %v2059_v31 = vadd.f32 %v7297_v40, %v7301_v42  ;;  %v1568_v34 = vadd.f32 %v7297_v40, %v7313_v51  ;;  %v2080_v35 = vadd.f32 %v7297_v40, %v6316_v52  ;;  %v7360_v36 = vpop.f32.mrf.mxu0  ;;  %v7362_v37 = vpop.f32.mrf.mxu1 }
 0x13e   :  { %v5340_v32 = vpack.c.bf16 %v2961_v29, %v2960_v13  ;;  %v3089_v33 = vsel %vm2577_vm10, %v2067_v16, %v2833_v25  ;;  %v2959_v39 = vsel %vm2447_vm11, %v1547_v19, %v2703_v30  ;;  %v1560_v48 = vadd.f32 %v7297_v40, %v7315_v57 }
 0x13f   :  { %v5660_v38 = vpack.c.bf16 %v3089_v33, %v3088_v17  ;;  %vm2575_vm12 = vcmp.gt.f32.partialorder %v2059_v31, 0.0  ;;  %v2831_v47 = vmul.f32 0.2, %v2059_v31  ;;  %v5335_v41 = vpack.c.bf16 %v2959_v39, %v2958_v24  ;;  %v7367_v43 = vpop.f32.mrf.mxu0  ;;  %v7369_v44 = vpop.f32.mrf.mxu1 }
 0x140   :  { %5892 = vst [vmem:[%s8238_s3 + $0xa8] sm:$0xff] %v5340_v32   ;;  %vm2452_vm13 = vcmp.gt.f32.partialorder %v1568_v34, 0.0  ;;  %v2708_v42 = vmul.f32 0.2, %v1568_v34  ;;  %vm2580_vm14 = vcmp.gt.f32.partialorder %v2080_v35, 0.0  ;;  %v2072_v49 = vadd.f32 %v7297_v40, %v7317_v58 }
 0x141   :  { %5956 = vst [vmem:[%s8238_s3 + $0x2a8] sm:$0xff] %v5660_v38   ;;  %v3087_v45 = vsel %vm2575_vm12, %v2059_v31, %v2831_v47  ;;  %v2836_v46 = vmul.f32 0.2, %v2080_v35  ;;  %5891 = vst [vmem:[%s8238_s3 + $0xa0] sm:$0xff] %v5335_v41   ;;  %v1571_v52 = vadd.f32 %v7297_v40, %v7322_v3  ;;  %v2083_v53 = vadd.f32 %v7297_v40, %v7324_v4  ;;  %v7385_v54 = vpop.f32.mrf.mxu0  ;;  %v7387_v55 = vpop.f32.mrf.mxu1 }
 0x142   :  { %v5655_v50 = vpack.c.bf16 %v3087_v45, %v3086_v28  ;;  %v2964_v51 = vsel %vm2452_vm13, %v1568_v34, %v2708_v42  ;;  %vm2450_vm15 = vcmp.gt.f32.partialorder %v1560_v48, 0.0  ;;  %v2706_v57 = vmul.f32 0.2, %v1560_v48 }
 0x143   :  { %v3092_v56 = vsel %vm2580_vm14, %v2080_v35, %v2836_v46  ;;  %vm2578_vm0 = vcmp.gt.f32.partialorder %v2072_v49, 0.0  ;;  %v2834_v58 = vmul.f32 0.2, %v2072_v49  ;;  %vm2453_vm1 = vcmp.gt.f32.partialorder %v1571_v52, 0.0  ;;  %v7392_v60 = vpop.f32.mrf.mxu0  ;;  %v7394_v61 = vpop.f32.mrf.mxu1 }
 0x144   :  { %5955 = vst [vmem:[%s8238_s3 + $0x2a0] sm:$0xff] %v5655_v50   ;;  %v2709_v59 = vmul.f32 0.2, %v1571_v52  ;;  %vm2581_vm3 = vcmp.gt.f32.partialorder %v2083_v53, 0.0  ;;  %v2962_v62 = vsel %vm2450_vm15, %v1560_v48, %v2706_v57  ;;  %v2837_v63 = vmul.f32 0.2, %v2083_v53 }
 0x145   :  { %v1563_v0 = vadd.f32 %v7297_v40, %v7334_v11  ;;  %v2075_v1 = vadd.f32 %v7297_v40, %v7336_v12  ;;  %v3090_v2 = vsel %vm2578_vm0, %v2072_v49, %v2834_v58  ;;  %v1584_v4 = vadd.f32 %v7297_v40, %v7349_v20  ;;  %v7403_v6 = vpop.f32.mrf.mxu0  ;;  %v7405_v7 = vpop.f32.mrf.mxu1 }
 0x146   :  { %v2965_v3 = vsel %vm2453_vm1, %v1571_v52, %v2709_v59  ;;  %v2096_v5 = vadd.f32 %v7297_v40, %v6320_v21  ;;  %v3093_v9 = vsel %vm2581_vm3, %v2083_v53, %v2837_v63  ;;  %v1576_v20 = vadd.f32 %v7297_v40, %v7351_v26 }
 0x147   :  { %v5350_v8 = vpack.c.bf16 %v2965_v3, %v2964_v51  ;;  %vm2451_vm4 = vcmp.gt.f32.partialorder %v1563_v0, 0.0  ;;  %v2707_v10 = vmul.f32 0.2, %v1563_v0  ;;  %v5670_v13 = vpack.c.bf16 %v3093_v9, %v3092_v56  ;;  %v7407_v12 = vpop.f32.mrf.mxu0  ;;  %v7409_v14 = vpop.f32.mrf.mxu1 }
 0x148   :  { %vm2579_vm5 = vcmp.gt.f32.partialorder %v2075_v1, 0.0  ;;  %v2835_v11 = vmul.f32 0.2, %v2075_v1  ;;  %vm2456_vm6 = vcmp.gt.f32.partialorder %v1584_v4, 0.0  ;;  %v2712_v16 = vmul.f32 0.2, %v1584_v4 }
 0x149   :  { %5894 = vst [vmem:[%s8238_s3 + $0xb8] sm:$0xff] %v5350_v8   ;;  %v2963_v15 = vsel %vm2451_vm4, %v1563_v0, %v2707_v10  ;;  %vm2584_vm7 = vcmp.gt.f32.partialorder %v2096_v5, 0.0  ;;  %v2840_v17 = vmul.f32 0.2, %v2096_v5  ;;  %5958 = vst [vmem:[%s8238_s3 + $0x2b8] sm:$0xff] %v5670_v13   ;;  %v2088_v21 = vadd.f32 %v7297_v40, %v7353_v27  ;;  %v7421_v22 = vpop.f32.mrf.mxu0  ;;  %v7423_v23 = vpop.f32.mrf.mxu1 }
 0x14a   :  { %v5345_v18 = vpack.c.bf16 %v2963_v15, %v2962_v62  ;;  %v3091_v19 = vsel %vm2579_vm5, %v2075_v1, %v2835_v11  ;;  %v2968_v25 = vsel %vm2456_vm6, %v1584_v4, %v2712_v16  ;;  %v1587_v29 = vadd.f32 %v7297_v40, %v7360_v36 }
 0x14b   :  { %v5665_v24 = vpack.c.bf16 %v3091_v19, %v3090_v2  ;;  %v3096_v28 = vsel %vm2584_vm7, %v2096_v5, %v2840_v17  ;;  %vm2454_vm2 = vcmp.gt.f32.partialorder %v1576_v20, 0.0  ;;  %v2710_v26 = vmul.f32 0.2, %v1576_v20  ;;  %v7431_v27 = vpop.f32.mrf.mxu0  ;;  %v7433_v31 = vpop.f32.mrf.mxu1 }
 0x14c   :  { %5893 = vst [vmem:[%s8238_s3 + $0xb0] sm:$0xff] %v5345_v18   ;;  %vm2582_vm8 = vcmp.gt.f32.partialorder %v2088_v21, 0.0  ;;  %v2838_v30 = vmul.f32 0.2, %v2088_v21  ;;  %vm2457_vm9 = vcmp.gt.f32.partialorder %v1587_v29, 0.0  ;;  %v2099_v33 = vadd.f32 %v7297_v40, %v7362_v37 }
 0x14d   :  { %5957 = vst [vmem:[%s8238_s3 + $0x2b0] sm:$0xff] %v5665_v24   ;;  %v2713_v32 = vmul.f32 0.2, %v1587_v29  ;;  %v1579_v34 = vadd.f32 %v7297_v40, %v7367_v43  ;;  %v2966_v35 = vsel %vm2454_vm2, %v1576_v20, %v2710_v26  ;;  %v2091_v38 = vadd.f32 %v7297_v40, %v7369_v44  ;;  %v7446_v47 = vpop.f32.mrf.mxu0  ;;  %v7448_v41 = vpop.f32.mrf.mxu1 }
 0x14e   :  { %v3094_v36 = vsel %vm2582_vm8, %v2088_v21, %v2838_v30  ;;  %v1600_v39 = vadd.f32 %v7297_v40, %v7385_v54  ;;  %vm2585_vm10 = vcmp.gt.f32.partialorder %v2099_v33, 0.0  ;;  %v2841_v45 = vmul.f32 0.2, %v2099_v33 }
 0x14f   :  { %v2969_v42 = vsel %vm2457_vm9, %v1587_v29, %v2713_v32  ;;  %vm2455_vm11 = vcmp.gt.f32.partialorder %v1579_v34, 0.0  ;;  %v2711_v46 = vmul.f32 0.2, %v1579_v34  ;;  %vm2583_vm12 = vcmp.gt.f32.partialorder %v2091_v38, 0.0  ;;  %v7450_v48 = vpop.f32.mrf.mxu0  ;;  %v7452_v49 = vpop.f32.mrf.mxu1 }
 0x150   :  { %v5360_v37 = vpack.c.bf16 %v2969_v42, %v2968_v25  ;;  %v2839_v43 = vmul.f32 0.2, %v2091_v38  ;;  %v3097_v44 = vsel %vm2585_vm10, %v2099_v33, %v2841_v45  ;;  %vm2460_vm13 = vcmp.gt.f32.partialorder %v1600_v39, 0.0 }
 0x151   :  { %v2716_v50 = vmul.f32 0.2, %v1600_v39  ;;  %v2112_v51 = vadd.f32 %v7297_v40, %v7387_v55  ;;  %v5680_v52 = vpack.c.bf16 %v3097_v44, %v3096_v28  ;;  %v2967_v53 = vsel %vm2455_vm11, %v1579_v34, %v2711_v46  ;;  %v7461_v57 = vpop.f32.mrf.mxu0  ;;  %v7463_v58 = vpop.f32.mrf.mxu1 }
 0x152   :  { %5896 = vst [vmem:[%s8238_s3 + $0xc8] sm:$0xff] %v5360_v37   ;;  %v3095_v54 = vsel %vm2583_vm12, %v2091_v38, %v2839_v43  ;;  %v1592_v56 = vadd.f32 %v7297_v40, %v7392_v60  ;;  %v5355_v59 = vpack.c.bf16 %v2967_v53, %v2966_v35  ;;  %v2104_v1 = vadd.f32 %v7297_v40, %v7394_v61 }
 0x153   :  { %v5675_v62 = vpack.c.bf16 %v3095_v54, %v3094_v36  ;;  %v2972_v63 = vsel %vm2460_vm13, %v1600_v39, %v2716_v50  ;;  %vm2588_vm14 = vcmp.gt.f32.partialorder %v2112_v51, 0.0  ;;  %5960 = vst [vmem:[%s8238_s3 + $0x2c8] sm:$0xff] %v5680_v52   ;;  %v2844_v55 = vmul.f32 0.2, %v2112_v51  ;;  %v7470_v2 = vpop.f32.mrf.mxu0  ;;  %v7472_v60 = vpop.f32.mrf.mxu1 }
 0x154   :  { %vm2458_vm15 = vcmp.gt.f32.partialorder %v1592_v56, 0.0  ;;  %v2714_v0 = vmul.f32 0.2, %v1592_v56  ;;  %5895 = vst [vmem:[%s8238_s3 + $0xc0] sm:$0xff] %v5355_v59   ;;  %v1603_v3 = vadd.f32 %v7297_v40, %v7403_v6  ;;  %v2115_v4 = vadd.f32 %v7297_v40, %v7405_v7 }
 0x155   :  { %5959 = vst [vmem:[%s8238_s3 + $0x2c0] sm:$0xff] %v5675_v62   ;;  %v1595_v61 = vadd.f32 %v7297_v40, %v7407_v12  ;;  %v2107_v5 = vadd.f32 %v7297_v40, %v7409_v14  ;;  %v3100_v8 = vsel %vm2588_vm14, %v2112_v51, %v2844_v55  ;;  %vm2586_vm0 = vcmp.gt.f32.partialorder %v2104_v1, 0.0  ;;  %v7488_v13 = vpop.f32.mrf.mxu0  ;;  %v7490_v11 = vpop.f32.mrf.mxu1 }
 0x156   :  { %v2970_v9 = vsel %vm2458_vm15, %v1592_v56, %v2714_v0  ;;  %v2842_v10 = vmul.f32 0.2, %v2104_v1  ;;  %vm2461_vm1 = vcmp.gt.f32.partialorder %v1603_v3, 0.0  ;;  %v2717_v15 = vmul.f32 0.2, %v1603_v3 }
 0x157   :  { %vm2589_vm3 = vcmp.gt.f32.partialorder %v2115_v4, 0.0  ;;  %v2845_v6 = vmul.f32 0.2, %v2115_v4  ;;  %vm2459_vm4 = vcmp.gt.f32.partialorder %v1595_v61, 0.0  ;;  %v2715_v7 = vmul.f32 0.2, %v1595_v61  ;;  %v7492_v12 = vpop.f32.mrf.mxu0  ;;  %v7494_v17 = vpop.f32.mrf.mxu1 }
 0x158   :  { %v3098_v16 = vsel %vm2586_vm0, %v2104_v1, %v2842_v10  ;;  %vm2587_vm5 = vcmp.gt.f32.partialorder %v2107_v5, 0.0  ;;  %v2973_v14 = vsel %vm2461_vm1, %v1603_v3, %v2717_v15  ;;  %v2843_v19 = vmul.f32 0.2, %v2107_v5 }
 0x159   :  { %v3101_v18 = vsel %vm2589_vm3, %v2115_v4, %v2845_v6  ;;  %v1616_v20 = vadd.f32 %v7297_v40, %v7421_v22  ;;  %v5370_v21 = vpack.c.bf16 %v2973_v14, %v2972_v63  ;;  %v2971_v25 = vsel %vm2459_vm4, %v1595_v61, %v2715_v7  ;;  %v7500_v29 = vpop.f32.mrf.mxu0  ;;  %v7502_v26 = vpop.f32.mrf.mxu1 }
 0x15a   :  { %v5690_v24 = vpack.c.bf16 %v3101_v18, %v3100_v8  ;;  %v2128_v28 = vadd.f32 %v7297_v40, %v7423_v23  ;;  %v5365_v30 = vpack.c.bf16 %v2971_v25, %v2970_v9  ;;  %v3099_v32 = vsel %vm2587_vm5, %v2107_v5, %v2843_v19 }
 0x15b   :  { %vm2464_vm6 = vcmp.gt.f32.partialorder %v1616_v20, 0.0  ;;  %v2720_v33 = vmul.f32 0.2, %v1616_v20  ;;  %5898 = vst [vmem:[%s8238_s3 + $0xd8] sm:$0xff] %v5370_v21   ;;  %v5685_v22 = vpack.c.bf16 %v3099_v32, %v3098_v16  ;;  %v1608_v23 = vadd.f32 %v7297_v40, %v7431_v27  ;;  %v7512_v35 = vpop.f32.mrf.mxu0  ;;  %v7514_v36 = vpop.f32.mrf.mxu1 }
 0x15c   :  { %5962 = vst [vmem:[%s8238_s3 + $0x2d8] sm:$0xff] %v5690_v24   ;;  %vm2592_vm7 = vcmp.gt.f32.partialorder %v2128_v28, 0.0  ;;  %v2848_v34 = vmul.f32 0.2, %v2128_v28  ;;  %5897 = vst [vmem:[%s8238_s3 + $0xd0] sm:$0xff] %v5365_v30   ;;  %v2120_v39 = vadd.f32 %v7297_v40, %v7433_v31  ;;  %v1619_v42 = vadd.f32 %v7297_v40, %v7446_v47 }
 0x15d   :  { %v2976_v38 = vsel %vm2464_vm6, %v1616_v20, %v2720_v33  ;;  %v2131_v45 = vadd.f32 %v7297_v40, %v7448_v41  ;;  %5961 = vst [vmem:[%s8238_s3 + $0x2d0] sm:$0xff] %v5685_v22   ;;  %vm2462_vm2 = vcmp.gt.f32.partialorder %v1608_v23, 0.0  ;;  %v2718_v37 = vmul.f32 0.2, %v1608_v23  ;;  %v7530_v43 = vpop.f32.mrf.mxu0  ;;  %v7532_v44 = vpop.f32.mrf.mxu1 }
 0x15e   :  { %v3104_v27 = vsel %vm2592_vm7, %v2128_v28, %v2848_v34  ;;  %v1611_v46 = vadd.f32 %v7297_v40, %v7450_v48  ;;  %vm2590_vm8 = vcmp.gt.f32.partialorder %v2120_v39, 0.0  ;;  %v2846_v31 = vmul.f32 0.2, %v2120_v39 }
 0x15f   :  { %vm2465_vm9 = vcmp.gt.f32.partialorder %v1619_v42, 0.0  ;;  %v2721_v47 = vmul.f32 0.2, %v1619_v42  ;;  %v2974_v50 = vsel %vm2462_vm2, %v1608_v23, %v2718_v37  ;;  %vm2593_vm10 = vcmp.gt.f32.partialorder %v2131_v45, 0.0  ;;  %v7534_v51 = vpop.f32.mrf.mxu0  ;;  %v7536_v52 = vpop.f32.mrf.mxu1 }
 0x160   :  { %v2849_v41 = vmul.f32 0.2, %v2131_v45  ;;  %vm2463_vm11 = vcmp.gt.f32.partialorder %v1611_v46, 0.0  ;;  %v3102_v53 = vsel %vm2590_vm8, %v2120_v39, %v2846_v31  ;;  %v2719_v56 = vmul.f32 0.2, %v1611_v46 }
 0x161   :  { %v2977_v54 = vsel %vm2465_vm9, %v1619_v42, %v2721_v47  ;;  %v2123_v48 = vadd.f32 %v7297_v40, %v7452_v49  ;;  %v1632_v63 = vadd.f32 %v7297_v40, %v7461_v57  ;;  %v2144_v55 = vadd.f32 %v7297_v40, %v7463_v58  ;;  %v7544_v0 = vpop.f32.mrf.mxu0  ;;  %v7546_v1 = vpop.f32.mrf.mxu1 }
 0x162   :  { %v5380_v59 = vpack.c.bf16 %v2977_v54, %v2976_v38  ;;  %v3105_v62 = vsel %vm2593_vm10, %v2131_v45, %v2849_v41  ;;  %v2975_v4 = vsel %vm2463_vm11, %v1611_v46, %v2719_v56  ;;  %v1624_v10 = vadd.f32 %v7297_v40, %v7470_v2 }
 0x163   :  { %v5700_v3 = vpack.c.bf16 %v3105_v62, %v3104_v27  ;;  %vm2591_vm12 = vcmp.gt.f32.partialorder %v2123_v48, 0.0  ;;  %v2847_v61 = vmul.f32 0.2, %v2123_v48  ;;  %v5375_v49 = vpack.c.bf16 %v2975_v4, %v2974_v50  ;;  %v7551_v57 = vpop.f32.mrf.mxu0  ;;  %v7553_v8 = vpop.f32.mrf.mxu1 }
 0x164   :  { %5900 = vst [vmem:[%s8238_s3 + $0xe8] sm:$0xff] %v5380_v59   ;;  %vm2468_vm13 = vcmp.gt.f32.partialorder %v1632_v63, 0.0  ;;  %v2724_v5 = vmul.f32 0.2, %v1632_v63  ;;  %vm2596_vm14 = vcmp.gt.f32.partialorder %v2144_v55, 0.0  ;;  %v2136_v15 = vadd.f32 %v7297_v40, %v7472_v60 }
 0x165   :  { %5964 = vst [vmem:[%s8238_s3 + $0x2e8] sm:$0xff] %v5700_v3   ;;  %v3103_v58 = vsel %vm2591_vm12, %v2123_v48, %v2847_v61  ;;  %v2852_v9 = vmul.f32 0.2, %v2144_v55  ;;  %5899 = vst [vmem:[%s8238_s3 + $0xe0] sm:$0xff] %v5375_v49   ;;  %v1635_v7 = vadd.f32 %v7297_v40, %v7488_v13  ;;  %v2147_v14 = vadd.f32 %v7297_v40, %v7490_v11  ;;  %v7569_v18 = vpop.f32.mrf.mxu0  ;;  %v7571_v19 = vpop.f32.mrf.mxu1 }
 0x166   :  { %v5695_v6 = vpack.c.bf16 %v3103_v58, %v3102_v53  ;;  %v2980_v16 = vsel %vm2468_vm13, %v1632_v63, %v2724_v5  ;;  %vm2466_vm15 = vcmp.gt.f32.partialorder %v1624_v10, 0.0  ;;  %v2722_v20 = vmul.f32 0.2, %v1624_v10 }
 0x167   :  { %v3108_v2 = vsel %vm2596_vm14, %v2144_v55, %v2852_v9  ;;  %vm2594_vm0 = vcmp.gt.f32.partialorder %v2136_v15, 0.0  ;;  %v2850_v60 = vmul.f32 0.2, %v2136_v15  ;;  %vm2469_vm1 = vcmp.gt.f32.partialorder %v1635_v7, 0.0  ;;  %v7576_v13 = vpop.f32.mrf.mxu0  ;;  %v7578_v24 = vpop.f32.mrf.mxu1 }
 0x168   :  { %5963 = vst [vmem:[%s8238_s3 + $0x2e0] sm:$0xff] %v5695_v6   ;;  %v2725_v21 = vmul.f32 0.2, %v1635_v7  ;;  %vm2597_vm3 = vcmp.gt.f32.partialorder %v2147_v14, 0.0  ;;  %v2978_v11 = vsel %vm2466_vm15, %v1624_v10, %v2722_v20  ;;  %v2853_v25 = vmul.f32 0.2, %v2147_v14 }
 0x169   :  { %v1627_v28 = vadd.f32 %v7297_v40, %v7492_v12  ;;  %v2139_v30 = vadd.f32 %v7297_v40, %v7494_v17  ;;  %v3106_v32 = vsel %vm2594_vm0, %v2136_v15, %v2850_v60  ;;  %v1648_v22 = vadd.f32 %v7297_v40, %v7500_v29  ;;  %v7588_v23 = vpop.f32.mrf.mxu0  ;;  %v7590_v38 = vpop.f32.mrf.mxu1 }
 0x16a   :  { %v2981_v33 = vsel %vm2469_vm1, %v1635_v7, %v2725_v21  ;;  %v2160_v34 = vadd.f32 %v7297_v40, %v7502_v26  ;;  %v3109_v42 = vsel %vm2597_vm3, %v2147_v14, %v2853_v25  ;;  %v1640_v50 = vadd.f32 %v7297_v40, %v7512_v35 }
 0x16b   :  { %v5390_v39 = vpack.c.bf16 %v2981_v33, %v2980_v16  ;;  %vm2467_vm4 = vcmp.gt.f32.partialorder %v1627_v28, 0.0  ;;  %v2723_v45 = vmul.f32 0.2, %v1627_v28  ;;  %v5710_v12 = vpack.c.bf16 %v3109_v42, %v3108_v2  ;;  %v7592_v17 = vpop.f32.mrf.mxu0  ;;  %v7594_v37 = vpop.f32.mrf.mxu1 }
 0x16c   :  { %vm2595_vm5 = vcmp.gt.f32.partialorder %v2139_v30, 0.0  ;;  %v2851_v27 = vmul.f32 0.2, %v2139_v30  ;;  %vm2472_vm6 = vcmp.gt.f32.partialorder %v1648_v22, 0.0  ;;  %v2728_v26 = vmul.f32 0.2, %v1648_v22 }
 0x16d   :  { %5902 = vst [vmem:[%s8238_s3 + $0xf8] sm:$0xff] %v5390_v39   ;;  %v2979_v29 = vsel %vm2467_vm4, %v1627_v28, %v2723_v45  ;;  %vm2600_vm7 = vcmp.gt.f32.partialorder %v2160_v34, 0.0  ;;  %v2856_v46 = vmul.f32 0.2, %v2160_v34  ;;  %5966 = vst [vmem:[%s8238_s3 + $0x2f8] sm:$0xff] %v5710_v12   ;;  %v2152_v41 = vadd.f32 %v7297_v40, %v7514_v36  ;;  %v7606_v53 = vpop.f32.mrf.mxu0  ;;  %v7608_v54 = vpop.f32.mrf.mxu1 }
 0x16e   :  { %v5385_v31 = vpack.c.bf16 %v2979_v29, %v2978_v11  ;;  %v3107_v47 = vsel %vm2595_vm5, %v2139_v30, %v2851_v27  ;;  %v2984_v48 = vsel %vm2472_vm6, %v1648_v22, %v2728_v26  ;;  %v1651_v62 = vadd.f32 %v7297_v40, %v7530_v43 }
 0x16f   :  { %v5705_v56 = vpack.c.bf16 %v3107_v47, %v3106_v32  ;;  %v3112_v59 = vsel %vm2600_vm7, %v2160_v34, %v2856_v46  ;;  %vm2470_vm2 = vcmp.gt.f32.partialorder %v1640_v50, 0.0  ;;  %v2726_v35 = vmul.f32 0.2, %v1640_v50  ;;  %v7616_v36 = vpop.f32.mrf.mxu0  ;;  %v7618_v55 = vpop.f32.mrf.mxu1 }
 0x170   :  { %5901 = vst [vmem:[%s8238_s3 + $0xf0] sm:$0xff] %v5385_v31   ;;  %vm2598_vm8 = vcmp.gt.f32.partialorder %v2152_v41, 0.0  ;;  %v2854_v63 = vmul.f32 0.2, %v2152_v41  ;;  %vm2473_vm9 = vcmp.gt.f32.partialorder %v1651_v62, 0.0  ;;  %v2163_v43 = vadd.f32 %v7297_v40, %v7532_v44 }
 0x171   :  { %5965 = vst [vmem:[%s8238_s3 + $0x2f0] sm:$0xff] %v5705_v56   ;;  %v2729_v3 = vmul.f32 0.2, %v1651_v62  ;;  %v1643_v4 = vadd.f32 %v7297_v40, %v7534_v51  ;;  %v2982_v61 = vsel %vm2470_vm2, %v1640_v50, %v2726_v35  ;;  %v2155_v5 = vadd.f32 %v7297_v40, %v7536_v52  ;;  %v7631_v9 = vpop.f32.mrf.mxu0  ;;  %v7633_v10 = vpop.f32.mrf.mxu1 }
 0x172   :  { %v3110_v49 = vsel %vm2598_vm8, %v2152_v41, %v2854_v63  ;;  %v1664_v58 = vadd.f32 %v7297_v40, %v7544_v0  ;;  %vm2601_vm10 = vcmp.gt.f32.partialorder %v2163_v43, 0.0  ;;  %v2857_v6 = vmul.f32 0.2, %v2163_v43 }
 0x173   :  { %v2985_v15 = vsel %vm2473_vm9, %v1651_v62, %v2729_v3  ;;  %vm2471_vm11 = vcmp.gt.f32.partialorder %v1643_v4, 0.0  ;;  %v2727_v16 = vmul.f32 0.2, %v1643_v4  ;;  %vm2599_vm12 = vcmp.gt.f32.partialorder %v2155_v5, 0.0  ;;  %v7635_v7 = vpop.f32.mrf.mxu0  ;;  %v7637_v14 = vpop.f32.mrf.mxu1 }
 0x174   :  { %v5400_v44 = vpack.c.bf16 %v2985_v15, %v2984_v48  ;;  %v2855_v51 = vmul.f32 0.2, %v2155_v5  ;;  %v3113_v52 = vsel %vm2601_vm10, %v2163_v43, %v2857_v6  ;;  %vm2476_vm13 = vcmp.gt.f32.partialorder %v1664_v58, 0.0 }
 0x175   :  { %v2732_v2 = vmul.f32 0.2, %v1664_v58  ;;  %v2176_v0 = vadd.f32 %v7297_v40, %v7546_v1  ;;  %v5720_v20 = vpack.c.bf16 %v3113_v52, %v3112_v59  ;;  %v2983_v60 = vsel %vm2471_vm11, %v1643_v4, %v2727_v16  ;;  %v7646_v25 = vpop.f32.mrf.mxu0  ;;  %v7648_v28 = vpop.f32.mrf.mxu1 }
 0x176   :  { %5904 = vst [vmem:[%s8238_s3 + $0x108] sm:$0xff] %v5400_v44   ;;  %v3111_v21 = vsel %vm2599_vm12, %v2155_v5, %v2855_v51  ;;  %v1656_v11 = vadd.f32 %v7297_v40, %v7551_v57  ;;  %v5395_v30 = vpack.c.bf16 %v2983_v60, %v2982_v61  ;;  %v2168_v34 = vadd.f32 %v7297_v40, %v7553_v8 }
 0x177   :  { %v5715_v32 = vpack.c.bf16 %v3111_v21, %v3110_v49  ;;  %v2988_v33 = vsel %vm2476_vm13, %v1664_v58, %v2732_v2  ;;  %vm2604_vm14 = vcmp.gt.f32.partialorder %v2176_v0, 0.0  ;;  %5968 = vst [vmem:[%s8238_s3 + $0x308] sm:$0xff] %v5720_v20   ;;  %v2860_v1 = vmul.f32 0.2, %v2176_v0  ;;  %v7655_v39 = vpop.f32.mrf.mxu0  ;;  %v7657_v57 = vpop.f32.mrf.mxu1 }
 0x178   :  { %vm2474_vm15 = vcmp.gt.f32.partialorder %v1656_v11, 0.0  ;;  %v2730_v22 = vmul.f32 0.2, %v1656_v11  ;;  %5903 = vst [vmem:[%s8238_s3 + $0x100] sm:$0xff] %v5395_v30   ;;  %v1667_v42 = vadd.f32 %v7297_v40, %v7569_v18  ;;  %v2179_v45 = vadd.f32 %v7297_v40, %v7571_v19 }
 0x179   :  { %5967 = vst [vmem:[%s8238_s3 + $0x300] sm:$0xff] %v5715_v32   ;;  %v1659_v8 = vadd.f32 %v7297_v40, %v7576_v13  ;;  %v2171_v12 = vadd.f32 %v7297_v40, %v7578_v24  ;;  %v3116_v27 = vsel %vm2604_vm14, %v2176_v0, %v2860_v1  ;;  %vm2602_vm0 = vcmp.gt.f32.partialorder %v2168_v34, 0.0  ;;  %v7673_v46 = vpop.f32.mrf.mxu0  ;;  %v7675_v31 = vpop.f32.mrf.mxu1 }
 0x17a   :  { %v2986_v29 = vsel %vm2474_vm15, %v1656_v11, %v2730_v22  ;;  %v2858_v26 = vmul.f32 0.2, %v2168_v34  ;;  %vm2477_vm1 = vcmp.gt.f32.partialorder %v1667_v42, 0.0  ;;  %v2733_v47 = vmul.f32 0.2, %v1667_v42 }
 0x17b   :  { %vm2605_vm3 = vcmp.gt.f32.partialorder %v2179_v45, 0.0  ;;  %v2861_v18 = vmul.f32 0.2, %v2179_v45  ;;  %vm2475_vm4 = vcmp.gt.f32.partialorder %v1659_v8, 0.0  ;;  %v2731_v19 = vmul.f32 0.2, %v1659_v8  ;;  %v7677_v13 = vpop.f32.mrf.mxu0  ;;  %v7679_v41 = vpop.f32.mrf.mxu1 }
 0x17c   :  { %v3114_v50 = vsel %vm2602_vm0, %v2168_v34, %v2858_v26  ;;  %vm2603_vm5 = vcmp.gt.f32.partialorder %v2171_v12, 0.0  ;;  %v2989_v24 = vsel %vm2477_vm1, %v1667_v42, %v2733_v47  ;;  %v2859_v48 = vmul.f32 0.2, %v2171_v12 }
 0x17d   :  { %v3117_v56 = vsel %vm2605_vm3, %v2179_v45, %v2861_v18  ;;  %v1680_v59 = vadd.f32 %v7297_v40, %v7588_v23  ;;  %v5410_v62 = vpack.c.bf16 %v2989_v24, %v2988_v33  ;;  %v2987_v63 = vsel %vm2475_vm4, %v1659_v8, %v2731_v19  ;;  %v7685_v43 = vpop.f32.mrf.mxu0  ;;  %v7687_v4 = vpop.f32.mrf.mxu1 }
 0x17e   :  { %v5730_v35 = vpack.c.bf16 %v3117_v56, %v3116_v27  ;;  %v2192_v3 = vadd.f32 %v7297_v40, %v7590_v38  ;;  %v5405_v61 = vpack.c.bf16 %v2987_v63, %v2986_v29  ;;  %v3115_v49 = vsel %vm2603_vm5, %v2171_v12, %v2859_v48 }
 0x17f   :  { %vm2480_vm6 = vcmp.gt.f32.partialorder %v1680_v59, 0.0  ;;  %v2736_v5 = vmul.f32 0.2, %v1680_v59  ;;  %5906 = vst [vmem:[%s8238_s3 + $0x118] sm:$0xff] %v5410_v62   ;;  %v5725_v23 = vpack.c.bf16 %v3115_v49, %v3114_v50  ;;  %v1672_v38 = vadd.f32 %v7297_v40, %v7592_v17  ;;  %v7697_v15 = vpop.f32.mrf.mxu0  ;;  %v7699_v6 = vpop.f32.mrf.mxu1 }
 0x180   :  { %5970 = vst [vmem:[%s8238_s3 + $0x318] sm:$0xff] %v5730_v35   ;;  %vm2608_vm7 = vcmp.gt.f32.partialorder %v2192_v3, 0.0  ;;  %v2864_v58 = vmul.f32 0.2, %v2192_v3  ;;  %5905 = vst [vmem:[%s8238_s3 + $0x110] sm:$0xff] %v5405_v61   ;;  %v2184_v16 = vadd.f32 %v7297_v40, %v7594_v37  ;;  %v1683_v51 = vadd.f32 %v7297_v40, %v7606_v53 }
 0x181   :  { %v2992_v44 = vsel %vm2480_vm6, %v1680_v59, %v2736_v5  ;;  %v2195_v52 = vadd.f32 %v7297_v40, %v7608_v54  ;;  %5969 = vst [vmem:[%s8238_s3 + $0x310] sm:$0xff] %v5725_v23   ;;  %vm2478_vm2 = vcmp.gt.f32.partialorder %v1672_v38, 0.0  ;;  %v2734_v2 = vmul.f32 0.2, %v1672_v38  ;;  %v7715_v20 = vpop.f32.mrf.mxu0  ;;  %v7717_v60 = vpop.f32.mrf.mxu1 }
 0x182   :  { %v3120_v17 = vsel %vm2608_vm7, %v2192_v3, %v2864_v58  ;;  %v1675_v0 = vadd.f32 %v7297_v40, %v7616_v36  ;;  %vm2606_vm8 = vcmp.gt.f32.partialorder %v2184_v16, 0.0  ;;  %v2862_v37 = vmul.f32 0.2, %v2184_v16 }
 0x183   :  { %vm2481_vm9 = vcmp.gt.f32.partialorder %v1683_v51, 0.0  ;;  %v2737_v53 = vmul.f32 0.2, %v1683_v51  ;;  %v2990_v21 = vsel %vm2478_vm2, %v1672_v38, %v2734_v2  ;;  %vm2609_vm10 = vcmp.gt.f32.partialorder %v2195_v52, 0.0  ;;  %v7719_v11 = vpop.f32.mrf.mxu0  ;;  %v7721_v30 = vpop.f32.mrf.mxu1 }
 0x184   :  { %v2865_v54 = vmul.f32 0.2, %v2195_v52  ;;  %vm2479_vm11 = vcmp.gt.f32.partialorder %v1675_v0, 0.0  ;;  %v3118_v32 = vsel %vm2606_vm8, %v2184_v16, %v2862_v37  ;;  %v2735_v1 = vmul.f32 0.2, %v1675_v0 }
 0x185   :  { %v2993_v33 = vsel %vm2481_vm9, %v1683_v51, %v2737_v53  ;;  %v2187_v36 = vadd.f32 %v7297_v40, %v7618_v55  ;;  %v1696_v42 = vadd.f32 %v7297_v40, %v7631_v9  ;;  %v2208_v45 = vadd.f32 %v7297_v40, %v7633_v10  ;;  %v7729_v8 = vpop.f32.mrf.mxu0  ;;  %v7731_v12 = vpop.f32.mrf.mxu1  ;;  %v7774_v51 = vld [vmem:[%s8237_s2] ss:$0 sm:$0xff] }
 0x186   :  { %v5420_v22 = vpack.c.bf16 %v2993_v33, %v2992_v44  ;;  %v3121_v34 = vsel %vm2609_vm10, %v2195_v52, %v2865_v54  ;;  %v2991_v29 = vsel %vm2479_vm11, %v1675_v0, %v2735_v1  ;;  %v1688_v19 = vadd.f32 %v7297_v40, %v7635_v7 }
 0x187   :  { %v5740_v27 = vpack.c.bf16 %v3121_v34, %v3120_v17  ;;  %vm2607_vm12 = vcmp.gt.f32.partialorder %v2187_v36, 0.0  ;;  %v2863_v26 = vmul.f32 0.2, %v2187_v36  ;;  %v5415_v55 = vpack.c.bf16 %v2991_v29, %v2990_v21  ;;  %v7736_v9 = vpop.f32.mrf.mxu0  ;;  %v7738_v18 = vpop.f32.mrf.mxu1 }
 0x188   :  { %5908 = vst [vmem:[%s8238_s3 + $0x128] sm:$0xff] %v5420_v22   ;;  %vm2484_vm13 = vcmp.gt.f32.partialorder %v1696_v42, 0.0  ;;  %v2740_v47 = vmul.f32 0.2, %v1696_v42  ;;  %vm2612_vm14 = vcmp.gt.f32.partialorder %v2208_v45, 0.0  ;;  %v2200_v24 = vadd.f32 %v7297_v40, %v7637_v14 }
 0x189   :  { %5972 = vst [vmem:[%s8238_s3 + $0x328] sm:$0xff] %v5740_v27   ;;  %v3119_v10 = vsel %vm2607_vm12, %v2187_v36, %v2863_v26  ;;  %v2868_v50 = vmul.f32 0.2, %v2208_v45  ;;  %5907 = vst [vmem:[%s8238_s3 + $0x120] sm:$0xff] %v5415_v55   ;;  %v1699_v59 = vadd.f32 %v7297_v40, %v7646_v25  ;;  %v2211_v62 = vadd.f32 %v7297_v40, %v7648_v28  ;;  %v7754_v35 = vpop.f32.mrf.mxu0  ;;  %v7756_v63 = vpop.f32.mrf.mxu1 }
 0x18a   :  { %v5735_v56 = vpack.c.bf16 %v3119_v10, %v3118_v32  ;;  %v2996_v48 = vsel %vm2484_vm13, %v1696_v42, %v2740_v47  ;;  %vm2482_vm15 = vcmp.gt.f32.partialorder %v1688_v19, 0.0  ;;  %v2738_v3 = vmul.f32 0.2, %v1688_v19 }
 0x18b   :  { %v3124_v7 = vsel %vm2612_vm14, %v2208_v45, %v2868_v50  ;;  %vm2610_vm0 = vcmp.gt.f32.partialorder %v2200_v24, 0.0  ;;  %v2866_v14 = vmul.f32 0.2, %v2200_v24  ;;  %vm2485_vm1 = vcmp.gt.f32.partialorder %v1699_v59, 0.0  ;;  %v7761_v25 = vpop.f32.mrf.mxu0  ;;  %v7763_v49 = vpop.f32.mrf.mxu1 }
 0x18c   :  { %5971 = vst [vmem:[%s8238_s3 + $0x320] sm:$0xff] %v5735_v56   ;;  %v2741_v61 = vmul.f32 0.2, %v1699_v59  ;;  %vm2613_vm3 = vcmp.gt.f32.partialorder %v2211_v62, 0.0  ;;  %v2994_v28 = vsel %vm2482_vm15, %v1688_v19, %v2738_v3  ;;  %v2869_v5 = vmul.f32 0.2, %v2211_v62 }
 0x18d   :  { %v1691_v23 = vadd.f32 %v7297_v40, %v7655_v39  ;;  %v2203_v58 = vadd.f32 %v7297_v40, %v7657_v57  ;;  %v3122_v38 = vsel %vm2610_vm0, %v2200_v24, %v2866_v14  ;;  %v1712_v16 = vadd.f32 %v7297_v40, %v7673_v46  ;;  %v7778_v17 = vpop.f32.mrf.mxu0  ;;  %v7780_v2 = vpop.f32.mrf.mxu1 }
 0x18e   :  { %v2997_v44 = vsel %vm2485_vm1, %v1699_v59, %v2741_v61  ;;  %v2224_v52 = vadd.f32 %v7774_v51, %v7675_v31  ;;  %v3125_v0 = vsel %vm2613_vm3, %v2211_v62, %v2869_v5  ;;  %v1704_v1 = vadd.f32 %v7774_v51, %v7677_v13 }
 0x18f   :  { %v5430_v39 = vpack.c.bf16 %v2997_v44, %v2996_v48  ;;  %vm2483_vm4 = vcmp.gt.f32.partialorder %v1691_v23, 0.0  ;;  %v2739_v57 = vmul.f32 0.2, %v1691_v23  ;;  %v5750_v37 = vpack.c.bf16 %v3125_v0, %v3124_v7  ;;  %v7782_v40 = vpop.f32.mrf.mxu0  ;;  %v7784_v46 = vpop.f32.mrf.mxu1 }
 0x190   :  { %vm2611_vm5 = vcmp.gt.f32.partialorder %v2203_v58, 0.0  ;;  %v2867_v53 = vmul.f32 0.2, %v2203_v58  ;;  %vm2488_vm6 = vcmp.gt.f32.partialorder %v1712_v16, 0.0  ;;  %v2744_v21 = vmul.f32 0.2, %v1712_v16 }
 0x191   :  { %5910 = vst [vmem:[%s8238_s3 + $0x138] sm:$0xff] %v5430_v39   ;;  %v2995_v31 = vsel %vm2483_vm4, %v1691_v23, %v2739_v57  ;;  %vm2616_vm7 = vcmp.gt.f32.partialorder %v2224_v52, 0.0  ;;  %v2872_v54 = vmul.f32 0.2, %v2224_v52  ;;  %5974 = vst [vmem:[%s8238_s3 + $0x338] sm:$0xff] %v5750_v37   ;;  %v2216_v36 = vadd.f32 %v7774_v51, %v7679_v41  ;;  %v7796_v22 = vpop.f32.mrf.mxu0  ;;  %v7798_v34 = vpop.f32.mrf.mxu1 }
 0x192   :  { %v5425_v32 = vpack.c.bf16 %v2995_v31, %v2994_v28  ;;  %v3123_v33 = vsel %vm2611_vm5, %v2203_v58, %v2867_v53  ;;  %v3000_v45 = vsel %vm2488_vm6, %v1712_v16, %v2744_v21  ;;  %v1715_v29 = vadd.f32 %v7774_v51, %v7685_v43 }
 0x193   :  { %v5745_v42 = vpack.c.bf16 %v3123_v33, %v3122_v38  ;;  %v3128_v27 = vsel %vm2616_vm7, %v2224_v52, %v2872_v54  ;;  %vm2486_vm2 = vcmp.gt.f32.partialorder %v1704_v1, 0.0  ;;  %v2742_v13 = vmul.f32 0.2, %v1704_v1  ;;  %v7806_v41 = vpop.f32.mrf.mxu0  ;;  %v7808_v55 = vpop.f32.mrf.mxu1 }
 0x194   :  { %5909 = vst [vmem:[%s8238_s3 + $0x130] sm:$0xff] %v5425_v32   ;;  %vm2614_vm8 = vcmp.gt.f32.partialorder %v2216_v36, 0.0  ;;  %v2870_v26 = vmul.f32 0.2, %v2216_v36  ;;  %vm2489_vm9 = vcmp.gt.f32.partialorder %v1715_v29, 0.0  ;;  %v2227_v43 = vadd.f32 %v7774_v51, %v7687_v4 }
 0x195   :  { %5973 = vst [vmem:[%s8238_s3 + $0x330] sm:$0xff] %v5745_v42   ;;  %v2745_v47 = vmul.f32 0.2, %v1715_v29  ;;  %v1707_v10 = vadd.f32 %v7774_v51, %v7697_v15  ;;  %v2998_v50 = vsel %vm2486_vm2, %v1704_v1, %v2742_v13  ;;  %v2219_v24 = vadd.f32 %v7774_v51, %v7699_v6  ;;  %v7821_v48 = vpop.f32.mrf.mxu0  ;;  %v7823_v59 = vpop.f32.mrf.mxu1 }
 0x196   :  { %v3126_v19 = vsel %vm2614_vm8, %v2216_v36, %v2870_v26  ;;  %v1728_v56 = vadd.f32 %v7774_v51, %v7715_v20  ;;  %vm2617_vm10 = vcmp.gt.f32.partialorder %v2227_v43, 0.0  ;;  %v2873_v7 = vmul.f32 0.2, %v2227_v43 }
 0x197   :  { %v3001_v62 = vsel %vm2489_vm9, %v1715_v29, %v2745_v47  ;;  %vm2487_vm11 = vcmp.gt.f32.partialorder %v1707_v10, 0.0  ;;  %v2743_v3 = vmul.f32 0.2, %v1707_v10  ;;  %vm2615_vm12 = vcmp.gt.f32.partialorder %v2219_v24, 0.0  ;;  %v7825_v14 = vpop.f32.mrf.mxu0  ;;  %v7827_v61 = vpop.f32.mrf.mxu1 }
 0x198   :  { %v5440_v4 = vpack.c.bf16 %v3001_v62, %v3000_v45  ;;  %v2871_v15 = vmul.f32 0.2, %v2219_v24  ;;  %v3129_v6 = vsel %vm2617_vm10, %v2227_v43, %v2873_v7  ;;  %vm2492_vm13 = vcmp.gt.f32.partialorder %v1728_v56, 0.0 }
 0x199   :  { %v2748_v28 = vmul.f32 0.2, %v1728_v56  ;;  %v2240_v20 = vadd.f32 %v7774_v51, %v7717_v60  ;;  %v5760_v5 = vpack.c.bf16 %v3129_v6, %v3128_v27  ;;  %v2999_v23 = vsel %vm2487_vm11, %v1707_v10, %v2743_v3  ;;  %v7836_v44 = vpop.f32.mrf.mxu0  ;;  %v7838_v16 = vpop.f32.mrf.mxu1 }
 0x19a   :  { %5912 = vst [vmem:[%s8238_s3 + $0x148] sm:$0xff] %v5440_v4   ;;  %v3127_v58 = vsel %vm2615_vm12, %v2219_v24, %v2871_v15  ;;  %v1720_v38 = vadd.f32 %v7774_v51, %v7719_v11  ;;  %v5435_v52 = vpack.c.bf16 %v2999_v23, %v2998_v50  ;;  %v2232_v37 = vadd.f32 %v7774_v51, %v7721_v30 }
 0x19b   :  { %v5755_v39 = vpack.c.bf16 %v3127_v58, %v3126_v19  ;;  %v3004_v0 = vsel %vm2492_vm13, %v1728_v56, %v2748_v28  ;;  %vm2620_vm14 = vcmp.gt.f32.partialorder %v2240_v20, 0.0  ;;  %5976 = vst [vmem:[%s8238_s3 + $0x348] sm:$0xff] %v5760_v5   ;;  %v2876_v60 = vmul.f32 0.2, %v2240_v20  ;;  %v7845_v53 = vpop.f32.mrf.mxu0  ;;  %v7847_v11 = vpop.f32.mrf.mxu1 }
 0x19c   :  { %vm2490_vm15 = vcmp.gt.f32.partialorder %v1720_v38, 0.0  ;;  %v2746_v57 = vmul.f32 0.2, %v1720_v38  ;;  %5911 = vst [vmem:[%s8238_s3 + $0x140] sm:$0xff] %v5435_v52   ;;  %v1731_v31 = vadd.f32 %v7774_v51, %v7729_v8  ;;  %v2243_v21 = vadd.f32 %v7774_v51, %v7731_v12 }
 0x19d   :  { %5975 = vst [vmem:[%s8238_s3 + $0x340] sm:$0xff] %v5755_v39   ;;  %v1723_v30 = vadd.f32 %v7774_v51, %v7736_v9  ;;  %v2235_v54 = vadd.f32 %v7774_v51, %v7738_v18  ;;  %v3132_v32 = vsel %vm2620_vm14, %v2240_v20, %v2876_v60  ;;  %vm2618_vm0 = vcmp.gt.f32.partialorder %v2232_v37, 0.0  ;;  %v7863_v36 = vpop.f32.mrf.mxu0  ;;  %v7865_v42 = vpop.f32.mrf.mxu1 }
 0x19e   :  { %v3002_v33 = vsel %vm2490_vm15, %v1720_v38, %v2746_v57  ;;  %v2874_v1 = vmul.f32 0.2, %v2232_v37  ;;  %vm2493_vm1 = vcmp.gt.f32.partialorder %v1731_v31, 0.0  ;;  %v2749_v45 = vmul.f32 0.2, %v1731_v31 }
 0x19f   :  { %vm2621_vm3 = vcmp.gt.f32.partialorder %v2243_v21, 0.0  ;;  %v2877_v8 = vmul.f32 0.2, %v2243_v21  ;;  %vm2491_vm4 = vcmp.gt.f32.partialorder %v1723_v30, 0.0  ;;  %v2747_v12 = vmul.f32 0.2, %v1723_v30  ;;  %v7867_v9 = vpop.f32.mrf.mxu0  ;;  %v7869_v29 = vpop.f32.mrf.mxu1 }
 0x1a0   :  { %v3130_v27 = vsel %vm2618_vm0, %v2232_v37, %v2874_v1  ;;  %vm2619_vm5 = vcmp.gt.f32.partialorder %v2235_v54, 0.0  ;;  %v3005_v18 = vsel %vm2493_vm1, %v1731_v31, %v2749_v45  ;;  %v2875_v26 = vmul.f32 0.2, %v2235_v54 }
 0x1a1   :  { %v3133_v13 = vsel %vm2621_vm3, %v2243_v21, %v2877_v8  ;;  %v1744_v47 = vadd.f32 %v7774_v51, %v7754_v35  ;;  %v5450_v43 = vpack.c.bf16 %v3005_v18, %v3004_v0  ;;  %v3003_v50 = vsel %vm2491_vm4, %v1723_v30, %v2747_v12  ;;  %v7875_v24 = vpop.f32.mrf.mxu0  ;;  %v7877_v4 = vpop.f32.mrf.mxu1 }
 0x1a2   :  { %v5770_v10 = vpack.c.bf16 %v3133_v13, %v3132_v32  ;;  %v2256_v19 = vadd.f32 %v7774_v51, %v7756_v63  ;;  %v5445_v56 = vpack.c.bf16 %v3003_v50, %v3002_v33  ;;  %v3131_v62 = vsel %vm2619_vm5, %v2235_v54, %v2875_v26 }
 0x1a3   :  { %vm2496_vm6 = vcmp.gt.f32.partialorder %v1744_v47, 0.0  ;;  %v2752_v7 = vmul.f32 0.2, %v1744_v47  ;;  %5914 = vst [vmem:[%s8238_s3 + $0x158] sm:$0xff] %v5450_v43   ;;  %v5765_v35 = vpack.c.bf16 %v3131_v62, %v3130_v27  ;;  %v1736_v63 = vadd.f32 %v7774_v51, %v7761_v25  ;;  %v7887_v15 = vpop.f32.mrf.mxu0  ;;  %v7898_v23 = vpop.f32.mrf.mxu1 }
 0x1a4   :  { %5978 = vst [vmem:[%s8238_s3 + $0x358] sm:$0xff] %v5770_v10   ;;  %vm2624_vm7 = vcmp.gt.f32.partialorder %v2256_v19, 0.0  ;;  %v2880_v3 = vmul.f32 0.2, %v2256_v19  ;;  %5913 = vst [vmem:[%s8238_s3 + $0x150] sm:$0xff] %v5445_v56   ;;  %v2248_v28 = vadd.f32 %v7774_v51, %v7763_v49  ;;  %v1747_v20 = vadd.f32 %v7774_v51, %v7778_v17 }
 0x1a5   :  { %v3008_v6 = vsel %vm2496_vm6, %v1744_v47, %v2752_v7  ;;  %v2259_v5 = vadd.f32 %v7774_v51, %v7780_v2  ;;  %5977 = vst [vmem:[%s8238_s3 + $0x350] sm:$0xff] %v5765_v35   ;;  %vm2494_vm2 = vcmp.gt.f32.partialorder %v1736_v63, 0.0  ;;  %v2750_v58 = vmul.f32 0.2, %v1736_v63  ;;  %v7905_v52 = vpop.f32.mrf.mxu0  ;;  %v7907_v39 = vpop.f32.mrf.mxu1 }
 0x1a6   :  { %v3136_v25 = vsel %vm2624_vm7, %v2256_v19, %v2880_v3  ;;  %v1739_v38 = vadd.f32 %v7774_v51, %v7782_v40  ;;  %vm2622_vm8 = vcmp.gt.f32.partialorder %v2248_v28, 0.0  ;;  %v2878_v49 = vmul.f32 0.2, %v2248_v28 }
 0x1a7   :  { %vm2497_vm9 = vcmp.gt.f32.partialorder %v1747_v20, 0.0  ;;  %v2753_v17 = vmul.f32 0.2, %v1747_v20  ;;  %v3006_v2 = vsel %vm2494_vm2, %v1736_v63, %v2750_v58  ;;  %vm2625_vm10 = vcmp.gt.f32.partialorder %v2259_v5, 0.0  ;;  %v7909_v60 = vpop.f32.mrf.mxu0  ;;  %v7913_v21 = vpop.f32.mrf.mxu1 }
 0x1a8   :  { %v2881_v0 = vmul.f32 0.2, %v2259_v5  ;;  %vm2495_vm11 = vcmp.gt.f32.partialorder %v1739_v38, 0.0  ;;  %v3134_v57 = vsel %vm2622_vm8, %v2248_v28, %v2878_v49  ;;  %v2751_v31 = vmul.f32 0.2, %v1739_v38 }
 0x1a9   :  { %v3009_v37 = vsel %vm2497_vm9, %v1747_v20, %v2753_v17  ;;  %v2251_v40 = vadd.f32 %v7774_v51, %v7784_v46  ;;  %v1760_v32 = vadd.f32 %v7774_v51, %v7796_v22  ;;  %v2272_v33 = vadd.f32 %v7774_v51, %v7798_v34 }
 0x1aa   :  { %v5460_v30 = vpack.c.bf16 %v3009_v37, %v3008_v6  ;;  %v3137_v54 = vsel %vm2625_vm10, %v2259_v5, %v2881_v0  ;;  %v7919_v1 = vpop.f32.mrf.mxu0  ;;  %v3007_v8 = vsel %vm2495_vm11, %v1739_v38, %v2751_v31  ;;  %v7921_v12 = vpop.f32.mrf.mxu1  ;;  %v1752_v26 = vadd.f32 %v7774_v51, %v7806_v41 }
 0x1ab   :  { %v5780_v45 = vpack.c.bf16 %v3137_v54, %v3136_v25  ;;  %vm2623_vm12 = vcmp.gt.f32.partialorder %v2251_v40, 0.0  ;;  %v2879_v27 = vmul.f32 0.2, %v2251_v40  ;;  %v5455_v46 = vpack.c.bf16 %v3007_v8, %v3006_v2 }
 0x1ac   :  { %5916 = vst [vmem:[%s8238_s3 + $0x168] sm:$0xff] %v5460_v30   ;;  %vm2500_vm13 = vcmp.gt.f32.partialorder %v1760_v32, 0.0  ;;  %v2756_v18 = vmul.f32 0.2, %v1760_v32  ;;  %vm2628_vm14 = vcmp.gt.f32.partialorder %v2272_v33, 0.0  ;;  %v7926_v22 = vpop.f32.mrf.mxu0  ;;  %v2264_v47 = vadd.f32 %v7774_v51, %v7808_v55  ;;  %v7935_v43 = vpop.f32.mrf.mxu1 }
 0x1ad   :  { %5980 = vst [vmem:[%s8238_s3 + $0x368] sm:$0xff] %v5780_v45   ;;  %v3135_v34 = vsel %vm2623_vm12, %v2251_v40, %v2879_v27  ;;  %v2884_v13 = vmul.f32 0.2, %v2272_v33  ;;  %5915 = vst [vmem:[%s8238_s3 + $0x160] sm:$0xff] %v5455_v46   ;;  %v1763_v19 = vadd.f32 %v7774_v51, %v7821_v48  ;;  %v2275_v56 = vadd.f32 %v7774_v51, %v7823_v59 }
 0x1ae   :  { %v5775_v10 = vpack.c.bf16 %v3135_v34, %v3134_v57  ;;  %v3012_v50 = vsel %vm2500_vm13, %v1760_v32, %v2756_v18  ;;  %v7944_v62 = vpop.f32.mrf.mxu0  ;;  %vm2498_vm15 = vcmp.gt.f32.partialorder %v1752_v26, 0.0  ;;  %v2754_v7 = vmul.f32 0.2, %v1752_v26  ;;  %v7946_v55 = vpop.f32.mrf.mxu1 }
 0x1af   :  { %v3140_v41 = vsel %vm2628_vm14, %v2272_v33, %v2884_v13  ;;  %vm2626_vm0 = vcmp.gt.f32.partialorder %v2264_v47, 0.0  ;;  %v2882_v35 = vmul.f32 0.2, %v2264_v47  ;;  %vm2501_vm1 = vcmp.gt.f32.partialorder %v1763_v19, 0.0 }
 0x1b0   :  { %5979 = vst [vmem:[%s8238_s3 + $0x360] sm:$0xff] %v5775_v10   ;;  %v2757_v3 = vmul.f32 0.2, %v1763_v19  ;;  %vm2629_vm3 = vcmp.gt.f32.partialorder %v2275_v56, 0.0  ;;  %v7951_v48 = vpop.f32.mrf.mxu0  ;;  %v3010_v63 = vsel %vm2498_vm15, %v1752_v26, %v2754_v7  ;;  %v2885_v59 = vmul.f32 0.2, %v2275_v56  ;;  %v7957_v20 = vpop.f32.mrf.mxu1 }
 0x1b1   :  { %v1755_v6 = vadd.f32 %v7774_v51, %v7825_v14  ;;  %v2267_v28 = vadd.f32 %v7774_v51, %v7827_v61  ;;  %v3138_v5 = vsel %vm2626_vm0, %v2264_v47, %v2882_v35  ;;  %v1776_v58 = vadd.f32 %v7774_v51, %v7836_v44 }
 0x1b2   :  { %v3013_v25 = vsel %vm2501_vm1, %v1763_v19, %v2757_v3  ;;  %v2288_v38 = vadd.f32 %v7774_v51, %v7838_v16  ;;  %v7963_v49 = vpop.f32.mrf.mxu0  ;;  %v3141_v2 = vsel %vm2629_vm3, %v2275_v56, %v2885_v59  ;;  %v7965_v14 = vpop.f32.mrf.mxu1  ;;  %v1768_v32 = vadd.f32 %v7774_v51, %v7845_v53 }
 0x1b3   :  { %v5470_v17 = vpack.c.bf16 %v3013_v25, %v3012_v50  ;;  %vm2499_vm4 = vcmp.gt.f32.partialorder %v1755_v6, 0.0  ;;  %v2755_v0 = vmul.f32 0.2, %v1755_v6  ;;  %v5790_v57 = vpack.c.bf16 %v3141_v2, %v3140_v41 }
 0x1b4   :  { %vm2627_vm5 = vcmp.gt.f32.partialorder %v2267_v28, 0.0  ;;  %v2883_v61 = vmul.f32 0.2, %v2267_v28  ;;  %vm2504_vm6 = vcmp.gt.f32.partialorder %v1776_v58, 0.0  ;;  %v7967_v37 = vpop.f32.mrf.mxu0  ;;  %v2760_v16 = vmul.f32 0.2, %v1776_v58  ;;  %v7972_v40 = vpop.f32.mrf.mxu1 }
 0x1b5   :  { %5918 = vst [vmem:[%s8238_s3 + $0x178] sm:$0xff] %v5470_v17   ;;  %v3011_v44 = vsel %vm2499_vm4, %v1755_v6, %v2755_v0  ;;  %vm2632_vm7 = vcmp.gt.f32.partialorder %v2288_v38, 0.0  ;;  %v2888_v31 = vmul.f32 0.2, %v2288_v38  ;;  %5982 = vst [vmem:[%s8238_s3 + $0x378] sm:$0xff] %v5790_v57   ;;  %v2280_v33 = vadd.f32 %v7774_v51, %v7847_v11 }
 0x1b6   :  { %v5465_v30 = vpack.c.bf16 %v3011_v44, %v3010_v63  ;;  %v3139_v54 = vsel %vm2627_vm5, %v2267_v28, %v2883_v61  ;;  %v7981_v45 = vpop.f32.mrf.mxu0  ;;  %v3016_v27 = vsel %vm2504_vm6, %v1776_v58, %v2760_v16  ;;  %v1779_v18 = vadd.f32 %v7774_v51, %v7863_v36  ;;  %v7985_v34 = vpop.f32.mrf.mxu1 }
 0x1b7   :  { %v5785_v8 = vpack.c.bf16 %v3139_v54, %v3138_v5  ;;  %v3144_v46 = vsel %vm2632_vm7, %v2288_v38, %v2888_v31  ;;  %vm2502_vm2 = vcmp.gt.f32.partialorder %v1768_v32, 0.0  ;;  %v2758_v13 = vmul.f32 0.2, %v1768_v32 }
 0x1b8   :  { %5917 = vst [vmem:[%s8238_s3 + $0x170] sm:$0xff] %v5465_v30   ;;  %vm2630_vm8 = vcmp.gt.f32.partialorder %v2280_v33, 0.0  ;;  %v2886_v53 = vmul.f32 0.2, %v2280_v33  ;;  %v7990_v26 = vpop.f32.mrf.mxu0  ;;  %vm2505_vm9 = vcmp.gt.f32.partialorder %v1779_v18, 0.0  ;;  %v2291_v36 = vadd.f32 %v7774_v51, %v7865_v42  ;;  %v7999_v10 = vpop.f32.mrf.mxu1 }
 0x1b9   :  { %5981 = vst [vmem:[%s8238_s3 + $0x370] sm:$0xff] %v5785_v8   ;;  %v2761_v11 = vmul.f32 0.2, %v1779_v18  ;;  %v1771_v47 = vadd.f32 %v7774_v51, %v7867_v9  ;;  %v3014_v50 = vsel %vm2502_vm2, %v1768_v32, %v2758_v13  ;;  %v2283_v56 = vadd.f32 %v7774_v51, %v7869_v29 }
 0x1ba   :  { %v3142_v19 = vsel %vm2630_vm8, %v2280_v33, %v2886_v53  ;;  %v1792_v41 = vadd.f32 %v7774_v51, %v7875_v24  ;;  %v8005_v7 = vpop.f32.mrf.mxu0  ;;  %vm2633_vm10 = vcmp.gt.f32.partialorder %v2291_v36, 0.0  ;;  %v2889_v3 = vmul.f32 0.2, %v2291_v36  ;;  %v8007_v42 = vpop.f32.mrf.mxu1 }
 0x1bb   :  { %v3017_v35 = vsel %vm2505_vm9, %v1779_v18, %v2761_v11  ;;  %vm2503_vm11 = vcmp.gt.f32.partialorder %v1771_v47, 0.0  ;;  %v2759_v9 = vmul.f32 0.2, %v1771_v47  ;;  %vm2631_vm12 = vcmp.gt.f32.partialorder %v2283_v56, 0.0 }
 0x1bc   :  { %v5480_v63 = vpack.c.bf16 %v3017_v35, %v3016_v27  ;;  %v2887_v59 = vmul.f32 0.2, %v2283_v56  ;;  %v3145_v6 = vsel %vm2633_vm10, %v2291_v36, %v2889_v3  ;;  %vm2508_vm13 = vcmp.gt.f32.partialorder %v1792_v41, 0.0  ;;  %v8016_v38 = vpop.f32.mrf.mxu0  ;;  %v8018_v17 = vpop.f32.mrf.mxu1 }
 0x1bd   :  { %v2764_v28 = vmul.f32 0.2, %v1792_v41  ;;  %v2304_v29 = vadd.f32 %v7774_v51, %v7877_v4  ;;  %v5800_v24 = vpack.c.bf16 %v3145_v6, %v3144_v46  ;;  %v3015_v5 = vsel %vm2503_vm11, %v1771_v47, %v2759_v9 }
 0x1be   :  { %5920 = vst [vmem:[%s8238_s3 + $0x188] sm:$0xff] %v5480_v63   ;;  %v3143_v25 = vsel %vm2631_vm12, %v2283_v56, %v2887_v59  ;;  %v1784_v58 = vadd.f32 %v7774_v51, %v7887_v15  ;;  %v5475_v2 = vpack.c.bf16 %v3015_v5, %v3014_v50  ;;  %v2296_v44 = vadd.f32 %v7774_v51, %v7898_v23  ;;  %v8039_v33 = vpop.f32.mrf.mxu0  ;;  %v8041_v8 = vpop.f32.mrf.mxu1 }
 0x1bf   :  { %v5795_v0 = vpack.c.bf16 %v3143_v25, %v3142_v19  ;;  %v3020_v57 = vsel %vm2508_vm13, %v1792_v41, %v2764_v28  ;;  %vm2636_vm14 = vcmp.gt.f32.partialorder %v2304_v29, 0.0  ;;  %5984 = vst [vmem:[%s8238_s3 + $0x388] sm:$0xff] %v5800_v24   ;;  %v2892_v4 = vmul.f32 0.2, %v2304_v29 }
 0x1c0   :  { %vm2506_vm15 = vcmp.gt.f32.partialorder %v1784_v58, 0.0  ;;  %v2762_v61 = vmul.f32 0.2, %v1784_v58  ;;  %5919 = vst [vmem:[%s8238_s3 + $0x180] sm:$0xff] %v5475_v2   ;;  %v1795_v15 = vadd.f32 %v7774_v51, %v7905_v52  ;;  %v2307_v16 = vadd.f32 %v7774_v51, %v7907_v39  ;;  %v8047_v50 = vpop.f32.mrf.mxu0  ;;  %v8049_v19 = vpop.f32.mrf.mxu1 }
 0x1c1   :  { %5983 = vst [vmem:[%s8238_s3 + $0x380] sm:$0xff] %v5795_v0   ;;  %v1787_v31 = vadd.f32 %v7774_v51, %v7909_v60  ;;  %v2299_v23 = vadd.f32 %v7774_v51, %v7913_v21  ;;  %v3148_v30 = vsel %vm2636_vm14, %v2304_v29, %v2892_v4  ;;  %vm2634_vm0 = vcmp.gt.f32.partialorder %v2296_v44, 0.0 }
 0x1c2   :  { %v3018_v54 = vsel %vm2506_vm15, %v1784_v58, %v2762_v61  ;;  %v2890_v32 = vmul.f32 0.2, %v2296_v44  ;;  %vm2509_vm1 = vcmp.gt.f32.partialorder %v1795_v15, 0.0  ;;  %v2765_v27 = vmul.f32 0.2, %v1795_v15  ;;  %v8073_v24 = vpop.f32.mrf.mxu0 }
 0x1c3   :  { %vm2637_vm3 = vcmp.gt.f32.partialorder %v2307_v16, 0.0  ;;  %v2893_v52 = vmul.f32 0.2, %v2307_v16  ;;  %vm2507_vm4 = vcmp.gt.f32.partialorder %v1787_v31, 0.0  ;;  %v2763_v39 = vmul.f32 0.2, %v1787_v31  ;;  %v8075_v5 = vpop.f32.mrf.mxu1 }
 0x1c4   :  { %v3146_v46 = vsel %vm2634_vm0, %v2296_v44, %v2890_v32  ;;  %vm2635_vm5 = vcmp.gt.f32.partialorder %v2299_v23, 0.0  ;;  %v3021_v60 = vsel %vm2509_vm1, %v1795_v15, %v2765_v27  ;;  %v2891_v13 = vmul.f32 0.2, %v2299_v23  ;;  %v8083_v15 = vpop.f32.mrf.mxu0 }
 0x1c5   :  { %v3149_v18 = vsel %vm2637_vm3, %v2307_v16, %v2893_v52  ;;  %v1808_v21 = vadd.f32 %v7774_v51, %v7919_v1  ;;  %v5490_v53 = vpack.c.bf16 %v3021_v60, %v3020_v57  ;;  %v3019_v36 = vsel %vm2507_vm4, %v1787_v31, %v2763_v39  ;;  %v8085_v16 = vpop.f32.mrf.mxu1 }
 0x1c6   :  { %v5810_v11 = vpack.c.bf16 %v3149_v18, %v3148_v30  ;;  %v2320_v47 = vadd.f32 %v7774_v51, %v7921_v12  ;;  %v5485_v56 = vpack.c.bf16 %v3019_v36, %v3018_v54  ;;  %v3147_v41 = vsel %vm2635_vm5, %v2299_v23, %v2891_v13  ;;  %v8104_v18 = vpop.f32.mrf.mxu0 }
 0x1c7   :  { %vm2512_vm6 = vcmp.gt.f32.partialorder %v1808_v21, 0.0  ;;  %v2768_v35 = vmul.f32 0.2, %v1808_v21  ;;  %5922 = vst [vmem:[%s8238_s3 + $0x198] sm:$0xff] %v5490_v53   ;;  %v5805_v1 = vpack.c.bf16 %v3147_v41, %v3146_v46  ;;  %v1800_v12 = vadd.f32 %v7774_v51, %v7926_v22  ;;  %v8106_v13 = vpop.f32.mrf.mxu1 }
 0x1c8   :  { %5986 = vst [vmem:[%s8238_s3 + $0x398] sm:$0xff] %v5810_v11   ;;  %vm2640_vm7 = vcmp.gt.f32.partialorder %v2320_v47, 0.0  ;;  %v2896_v3 = vmul.f32 0.2, %v2320_v47  ;;  %5921 = vst [vmem:[%s8238_s3 + $0x190] sm:$0xff] %v5485_v56   ;;  %v2312_v9 = vadd.f32 %v7774_v51, %v7935_v43  ;;  %v1811_v59 = vadd.f32 %v7774_v51, %v7944_v62 }
 0x1c9   :  { %v3024_v63 = vsel %vm2512_vm6, %v1808_v21, %v2768_v35  ;;  %v2323_v6 = vadd.f32 %v7774_v51, %v7946_v55  ;;  %5985 = vst [vmem:[%s8238_s3 + $0x390] sm:$0xff] %v5805_v1   ;;  %vm2510_vm2 = vcmp.gt.f32.partialorder %v1800_v12, 0.0  ;;  %v2766_v22 = vmul.f32 0.2, %v1800_v12  ;;  %v8119_v1 = vpop.f32.mrf.mxu0 }
 0x1ca   :  { %v3152_v28 = vsel %vm2640_vm7, %v2320_v47, %v2896_v3  ;;  %v1803_v29 = vadd.f32 %v7774_v51, %v7951_v48  ;;  %vm2638_vm8 = vcmp.gt.f32.partialorder %v2312_v9, 0.0  ;;  %v2894_v43 = vmul.f32 0.2, %v2312_v9  ;;  %v8121_v3 = vpop.f32.mrf.mxu1 }
 0x1cb   :  { %vm2513_vm9 = vcmp.gt.f32.partialorder %v1811_v59, 0.0  ;;  %v2769_v62 = vmul.f32 0.2, %v1811_v59  ;;  %v3022_v25 = vsel %vm2510_vm2, %v1800_v12, %v2766_v22  ;;  %vm2641_vm10 = vcmp.gt.f32.partialorder %v2323_v6, 0.0 }
 0x1cc   :  { %v2897_v55 = vmul.f32 0.2, %v2323_v6  ;;  %vm2511_vm11 = vcmp.gt.f32.partialorder %v1803_v29, 0.0  ;;  %v3150_v58 = vsel %vm2638_vm8, %v2312_v9, %v2894_v43  ;;  %v2767_v0 = vmul.f32 0.2, %v1803_v29  ;;  %v8133_v43 = vpop.f32.mrf.mxu0 }
 0x1cd   :  { %v3025_v2 = vsel %vm2513_vm9, %v1811_v59, %v2769_v62  ;;  %v2315_v57 = vadd.f32 %v7774_v51, %v7957_v20  ;;  %v1824_v61 = vadd.f32 %v7774_v51, %v7963_v49  ;;  %v2336_v44 = vadd.f32 %v7774_v51, %v7965_v14  ;;  %v8135_v62 = vpop.f32.mrf.mxu1 }
 0x1ce   :  { %v5500_v4 = vpack.c.bf16 %v3025_v2, %v3024_v63  ;;  %v3153_v48 = vsel %vm2641_vm10, %v2323_v6, %v2897_v55  ;;  %v3023_v23 = vsel %vm2511_vm11, %v1803_v29, %v2767_v0  ;;  %v1816_v32 = vadd.f32 %v7774_v51, %v7967_v37 }
 0x1cf   :  { %v5820_v31 = vpack.c.bf16 %v3153_v48, %v3152_v28  ;;  %vm2639_vm12 = vcmp.gt.f32.partialorder %v2315_v57, 0.0  ;;  %v2895_v30 = vmul.f32 0.2, %v2315_v57  ;;  %v5495_v20 = vpack.c.bf16 %v3023_v23, %v3022_v25  ;;  %v8155_v23 = vpop.f32.mrf.mxu1 }
 0x1d0   :  { %5924 = vst [vmem:[%s8238_s3 + $0x1a8] sm:$0xff] %v5500_v4   ;;  %vm2516_vm13 = vcmp.gt.f32.partialorder %v1824_v61, 0.0  ;;  %v2772_v54 = vmul.f32 0.2, %v1824_v61  ;;  %vm2644_vm14 = vcmp.gt.f32.partialorder %v2336_v44, 0.0  ;;  %v2328_v27 = vadd.f32 %v7774_v51, %v7972_v40 }
 0x1d1   :  { %5988 = vst [vmem:[%s8238_s3 + $0x3a8] sm:$0xff] %v5820_v31   ;;  %v3151_v49 = vsel %vm2639_vm12, %v2315_v57, %v2895_v30  ;;  %v2900_v14 = vmul.f32 0.2, %v2336_v44  ;;  %5923 = vst [vmem:[%s8238_s3 + $0x1a0] sm:$0xff] %v5495_v20   ;;  %v1827_v39 = vadd.f32 %v7774_v51, %v7981_v45  ;;  %v2339_v60 = vadd.f32 %v7774_v51, %v7985_v34  ;;  %v8153_v31 = vpop.f32.mrf.mxu0 }
 0x1d2   :  { %v5815_v52 = vpack.c.bf16 %v3151_v49, %v3150_v58  ;;  %v3028_v46 = vsel %vm2516_vm13, %v1824_v61, %v2772_v54  ;;  %vm2514_vm15 = vcmp.gt.f32.partialorder %v1816_v32, 0.0  ;;  %v2770_v21 = vmul.f32 0.2, %v1816_v32 }
 0x1d3   :  { %v3156_v37 = vsel %vm2644_vm14, %v2336_v44, %v2900_v14  ;;  %vm2642_vm0 = vcmp.gt.f32.partialorder %v2328_v27, 0.0  ;;  %v2898_v40 = vmul.f32 0.2, %v2328_v27  ;;  %vm2517_vm1 = vcmp.gt.f32.partialorder %v1827_v39, 0.0 }
 0x1d4   :  { %5987 = vst [vmem:[%s8238_s3 + $0x3a0] sm:$0xff] %v5815_v52   ;;  %v2773_v53 = vmul.f32 0.2, %v1827_v39  ;;  %vm2645_vm3 = vcmp.gt.f32.partialorder %v2339_v60, 0.0  ;;  %v3026_v45 = vsel %vm2514_vm15, %v1816_v32, %v2770_v21  ;;  %v2901_v11 = vmul.f32 0.2, %v2339_v60 }
 0x1d5   :  { %v1819_v34 = vadd.f32 %v7774_v51, %v7990_v26  ;;  %v2331_v36 = vadd.f32 %v7774_v51, %v7999_v10  ;;  %v3154_v47 = vsel %vm2642_vm0, %v2328_v27, %v2898_v40  ;;  %v1840_v41 = vadd.f32 %v7774_v51, %v8005_v7 }
 0x1d6   :  { %v3029_v56 = vsel %vm2517_vm1, %v1827_v39, %v2773_v53  ;;  %v2352_v35 = vadd.f32 %v7774_v51, %v8007_v42  ;;  %v3157_v63 = vsel %vm2645_vm3, %v2339_v60, %v2901_v11  ;;  %v1832_v22 = vadd.f32 %v7774_v51, %v8016_v38  ;;  %v6393_v39 = vpop.f32.mrf.mxu1 }
 0x1d7   :  { %v5510_v12 = vpack.c.bf16 %v3029_v56, %v3028_v46  ;;  %vm2515_vm4 = vcmp.gt.f32.partialorder %v1819_v34, 0.0  ;;  %v2771_v9 = vmul.f32 0.2, %v1819_v34  ;;  %v5830_v26 = vpack.c.bf16 %v3157_v63, %v3156_v37  ;;  %v6265_v46 = vpop.f32.mrf.mxu0 }
 0x1d8   :  { %vm2643_vm5 = vcmp.gt.f32.partialorder %v2331_v36, 0.0  ;;  %v2899_v59 = vmul.f32 0.2, %v2331_v36  ;;  %vm2520_vm6 = vcmp.gt.f32.partialorder %v1840_v41, 0.0  ;;  %v2776_v7 = vmul.f32 0.2, %v1840_v41 }
 0x1d9   :  { %5926 = vst [vmem:[%s8238_s3 + $0x1b8] sm:$0xff] %v5510_v12   ;;  %v3027_v10 = vsel %vm2515_vm4, %v1819_v34, %v2771_v9  ;;  %vm2648_vm7 = vcmp.gt.f32.partialorder %v2352_v35, 0.0  ;;  %v2904_v42 = vmul.f32 0.2, %v2352_v35  ;;  %5990 = vst [vmem:[%s8238_s3 + $0x3b8] sm:$0xff] %v5830_v26   ;;  %v2344_v29 = vadd.f32 %v7774_v51, %v8018_v17  ;;  %v1866_v56 = vpop.f32.mrf.mxu0 }
 0x1da   :  { %v5505_v6 = vpack.c.bf16 %v3027_v10, %v3026_v45  ;;  %v3155_v28 = vsel %vm2643_vm5, %v2331_v36, %v2899_v59  ;;  %v3032_v55 = vsel %vm2520_vm6, %v1840_v41, %v2776_v7  ;;  %v1843_v2 = vadd.f32 %v7774_v51, %v8039_v33  ;;  %v2378_v41 = vpop.f32.mrf.mxu1 }
 0x1db   :  { %v5825_v25 = vpack.c.bf16 %v3155_v28, %v3154_v47  ;;  %v3160_v58 = vsel %vm2648_vm7, %v2352_v35, %v2904_v42  ;;  %vm2518_vm2 = vcmp.gt.f32.partialorder %v1832_v22, 0.0  ;;  %v2774_v0 = vmul.f32 0.2, %v1832_v22  ;;  %v6268_v42 = vpop.f32.mrf.mxu0 }
 0x1dc   :  { %5925 = vst [vmem:[%s8238_s3 + $0x1b0] sm:$0xff] %v5505_v6   ;;  %vm2646_vm8 = vcmp.gt.f32.partialorder %v2344_v29, 0.0  ;;  %v2902_v38 = vmul.f32 0.2, %v2344_v29  ;;  %vm2521_vm9 = vcmp.gt.f32.partialorder %v1843_v2, 0.0  ;;  %v2355_v57 = vadd.f32 %v7774_v51, %v8041_v8  ;;  %v6396_v6 = vpop.f32.mrf.mxu1 }
 0x1dd   :  { %5989 = vst [vmem:[%s8238_s3 + $0x3b0] sm:$0xff] %v5825_v25   ;;  %v2777_v17 = vmul.f32 0.2, %v1843_v2  ;;  %v1835_v33 = vadd.f32 %v7774_v51, %v8047_v50  ;;  %v3030_v4 = vsel %vm2518_vm2, %v1832_v22, %v2774_v0  ;;  %v2347_v61 = vadd.f32 %v7774_v51, %v8049_v19 }
 0x1de   :  { %v3158_v48 = vsel %vm2646_vm8, %v2344_v29, %v2902_v38  ;;  %v1856_v44 = vadd.f32 %v7774_v51, %v8073_v24  ;;  %vm2649_vm10 = vcmp.gt.f32.partialorder %v2355_v57, 0.0  ;;  %v2905_v20 = vmul.f32 0.2, %v2355_v57 }
 0x1df   :  { %v3033_v30 = vsel %vm2521_vm9, %v1843_v2, %v2777_v17  ;;  %vm2519_vm11 = vcmp.gt.f32.partialorder %v1835_v33, 0.0  ;;  %v2775_v54 = vmul.f32 0.2, %v1835_v33  ;;  %vm2647_vm12 = vcmp.gt.f32.partialorder %v2347_v61, 0.0 }
 0x1e0   :  { %v5520_v8 = vpack.c.bf16 %v3033_v30, %v3032_v55  ;;  %v2903_v50 = vmul.f32 0.2, %v2347_v61  ;;  %v3161_v49 = vsel %vm2649_vm10, %v2355_v57, %v2905_v20  ;;  %vm2524_vm13 = vcmp.gt.f32.partialorder %v1856_v44, 0.0  ;;  %v1879_v57 = vpop.f32.mrf.mxu0 }
 0x1e1   :  { %v2780_v14 = vmul.f32 0.2, %v1856_v44  ;;  %v2368_v19 = vadd.f32 %v7774_v51, %v8075_v5  ;;  %v5840_v24 = vpack.c.bf16 %v3161_v49, %v3160_v58  ;;  %v3031_v32 = vsel %vm2519_vm11, %v1835_v33, %v2775_v54  ;;  %v2391_v33 = vpop.f32.mrf.mxu1 }
 0x1e2   :  { %5928 = vst [vmem:[%s8238_s3 + $0x1c8] sm:$0xff] %v5520_v8   ;;  %v3159_v27 = vsel %vm2647_vm12, %v2347_v61, %v2903_v50  ;;  %v1848_v52 = vadd.f32 %v7774_v51, %v8083_v15  ;;  %v5515_v60 = vpack.c.bf16 %v3031_v32, %v3030_v4  ;;  %v2360_v53 = vadd.f32 %v7774_v51, %v8085_v16  ;;  %v6544_v50 = vld [vmem:[%s8237_s2] ss:$0 sm:$0xff] }
 0x1e3   :  { %v5835_v37 = vpack.c.bf16 %v3159_v27, %v3158_v48  ;;  %v3036_v21 = vsel %vm2524_vm13, %v1856_v44, %v2780_v14  ;;  %vm2652_vm14 = vcmp.gt.f32.partialorder %v2368_v19, 0.0  ;;  %5992 = vst [vmem:[%s8238_s3 + $0x3c8] sm:$0xff] %v5840_v24   ;;  %v2908_v5 = vmul.f32 0.2, %v2368_v19  ;;  %v6397_v24 = vpop.f32.mrf.mxu1 }
 0x1e4   :  { %vm2522_vm15 = vcmp.gt.f32.partialorder %v1848_v52, 0.0  ;;  %v2778_v40 = vmul.f32 0.2, %v1848_v52  ;;  %5927 = vst [vmem:[%s8238_s3 + $0x1c0] sm:$0xff] %v5515_v60   ;;  %v1859_v15 = vadd.f32 %v7774_v51, %v8104_v18  ;;  %v2371_v45 = vadd.f32 %v7774_v51, %v8106_v13 }
 0x1e5   :  { %5991 = vst [vmem:[%s8238_s3 + $0x3c0] sm:$0xff] %v5835_v37   ;;  %v1851_v11 = vadd.f32 %v7774_v51, %v8119_v1  ;;  %v2363_v16 = vadd.f32 %v7774_v51, %v8121_v3  ;;  %v3164_v34 = vsel %vm2652_vm14, %v2368_v19, %v2908_v5  ;;  %vm2650_vm0 = vcmp.gt.f32.partialorder %v2360_v53, 0.0  ;;  %v6269_v19 = vpop.f32.mrf.mxu0 }
 0x1e6   :  { %v3034_v36 = vsel %vm2522_vm15, %v1848_v52, %v2778_v40  ;;  %v2906_v47 = vmul.f32 0.2, %v2360_v53  ;;  %vm2525_vm1 = vcmp.gt.f32.partialorder %v1859_v15, 0.0  ;;  %v2781_v35 = vmul.f32 0.2, %v1859_v15 }
 0x1e7   :  { %vm2653_vm3 = vcmp.gt.f32.partialorder %v2371_v45, 0.0  ;;  %v2909_v12 = vmul.f32 0.2, %v2371_v45  ;;  %vm2523_vm4 = vcmp.gt.f32.partialorder %v1851_v11, 0.0  ;;  %v2779_v63 = vmul.f32 0.2, %v1851_v11 }
 0x1e8   :  { %v3162_v18 = vsel %vm2650_vm0, %v2360_v53, %v2906_v47  ;;  %vm2651_vm5 = vcmp.gt.f32.partialorder %v2363_v16, 0.0  ;;  %v3037_v13 = vsel %vm2525_vm1, %v1859_v15, %v2781_v35  ;;  %v2907_v1 = vmul.f32 0.2, %v2363_v16 }
 0x1e9   :  { %v3165_v9 = vsel %vm2653_vm3, %v2371_v45, %v2909_v12  ;;  %v1872_v3 = vadd.f32 %v7774_v51, %v8133_v43  ;;  %v5530_v26 = vpack.c.bf16 %v3037_v13, %v3036_v21  ;;  %v3035_v10 = vsel %vm2523_vm4, %v1851_v11, %v2779_v63  ;;  %v1882_v45 = vpop.f32.mrf.mxu0  ;;  %v2394_v11 = vpop.f32.mrf.mxu1 }
 0x1ea   :  { %v5850_v59 = vpack.c.bf16 %v3165_v9, %v3164_v34  ;;  %v2384_v7 = vadd.f32 %v7774_v51, %v8135_v62  ;;  %v5525_v28 = vpack.c.bf16 %v3035_v10, %v3034_v36  ;;  %v3163_v22 = vsel %vm2651_vm5, %v2363_v16, %v2907_v1 }
 0x1eb   :  { %vm2528_vm6 = vcmp.gt.f32.partialorder %v1872_v3, 0.0  ;;  %v2784_v29 = vmul.f32 0.2, %v1872_v3  ;;  %5930 = vst [vmem:[%s8238_s3 + $0x1d8] sm:$0xff] %v5530_v26   ;;  %v5845_v43 = vpack.c.bf16 %v3163_v22, %v3162_v18  ;;  %v1864_v62 = vadd.f32 %v7774_v51, %v8153_v31 }
 0x1ec   :  { %5994 = vst [vmem:[%s8238_s3 + $0x3d8] sm:$0xff] %v5850_v59   ;;  %vm2656_vm7 = vcmp.gt.f32.partialorder %v2384_v7, 0.0  ;;  %v2912_v25 = vmul.f32 0.2, %v2384_v7  ;;  %5929 = vst [vmem:[%s8238_s3 + $0x1d0] sm:$0xff] %v5525_v28   ;;  %v2376_v55 = vadd.f32 %v7774_v51, %v8155_v23  ;;  %v1875_v58 = vadd.f32 %v7774_v51, %v6265_v46 }
 0x1ed   :  { %v2387_v2 = vadd.f32 %v7774_v51, %v6393_v39  ;;  %5993 = vst [vmem:[%s8238_s3 + $0x3d0] sm:$0xff] %v5845_v43   ;;  %v3040_v0 = vsel %vm2528_vm6, %v1872_v3, %v2784_v29  ;;  %vm2526_vm2 = vcmp.gt.f32.partialorder %v1864_v62, 0.0  ;;  %v2782_v38 = vmul.f32 0.2, %v1864_v62 }
 0x1ee   :  { %v1867_v17 = vadd.f32 %v7774_v51, %v1866_v56  ;;  %v3168_v4 = vsel %vm2656_vm7, %v2384_v7, %v2912_v25  ;;  %vm2654_vm8 = vcmp.gt.f32.partialorder %v2376_v55, 0.0  ;;  %vm2529_vm9 = vcmp.gt.f32.partialorder %v1875_v58, 0.0 }
 0x1ef   :  { %v2785_v48 = vmul.f32 0.2, %v1875_v58  ;;  %v2910_v61 = vmul.f32 0.2, %v2376_v55  ;;  %vm2657_vm10 = vcmp.gt.f32.partialorder %v2387_v2, 0.0  ;;  %v3038_v31 = vsel %vm2526_vm2, %v1864_v62, %v2782_v38 }
 0x1f0   :  { %v2913_v44 = vmul.f32 0.2, %v2387_v2  ;;  %vm2527_vm11 = vcmp.gt.f32.partialorder %v1867_v17, 0.0  ;;  %v2783_v30 = vmul.f32 0.2, %v1867_v17  ;;  %v2379_v20 = vadd.f32 %v7774_v51, %v2378_v41 }
 0x1f1   :  { %v3041_v23 = vsel %vm2529_vm9, %v1875_v58, %v2785_v48  ;;  %v1888_v49 = vadd.f32 %v6544_v50, %v6268_v42  ;;  %v2400_v14 = vadd.f32 %v6544_v50, %v6396_v6  ;;  %v3166_v46 = vsel %vm2654_vm8, %v2376_v55, %v2910_v61 }
 0x1f2   :  { %v5540_v8 = vpack.c.bf16 %v3041_v23, %v3040_v0  ;;  %v3169_v54 = vsel %vm2657_vm10, %v2387_v2, %v2913_v44  ;;  %v3039_v27 = vsel %vm2527_vm11, %v1867_v17, %v2783_v30  ;;  %vm2655_vm12 = vcmp.gt.f32.partialorder %v2379_v20, 0.0 }
 0x1f3   :  { %v5860_v32 = vpack.c.bf16 %v3169_v54, %v3168_v4  ;;  %v2911_v52 = vmul.f32 0.2, %v2379_v20  ;;  %v5535_v51 = vpack.c.bf16 %v3039_v27, %v3038_v31  ;;  %vm2532_vm13 = vcmp.gt.f32.partialorder %v1888_v49, 0.0 }
 0x1f4   :  { %5932 = vst [vmem:[%s8238_s3 + $0x1e8] sm:$0xff] %v5540_v8   ;;  %v2788_v39 = vmul.f32 0.2, %v1888_v49  ;;  %vm2660_vm14 = vcmp.gt.f32.partialorder %v2400_v14, 0.0  ;;  %v2916_v37 = vmul.f32 0.2, %v2400_v14  ;;  %v1880_v21 = vadd.f32 %v6544_v50, %v1879_v57 }
 0x1f5   :  { %5996 = vst [vmem:[%s8238_s3 + $0x3e8] sm:$0xff] %v5860_v32   ;;  %v3167_v60 = vsel %vm2655_vm12, %v2379_v20, %v2911_v52  ;;  %5931 = vst [vmem:[%s8238_s3 + $0x1e0] sm:$0xff] %v5535_v51   ;;  %v2392_v40 = vadd.f32 %v6544_v50, %v2391_v33  ;;  %v1891_v53 = vadd.f32 %v6544_v50, %v6269_v19 }
 0x1f6   :  { %v5855_v5 = vpack.c.bf16 %v3167_v60, %v3166_v46  ;;  %v2403_v15 = vadd.f32 %v6544_v50, %v6397_v24  ;;  %v3044_v16 = vsel %vm2532_vm13, %v1888_v49, %v2788_v39  ;;  %v3172_v34 = vsel %vm2660_vm14, %v2400_v14, %v2916_v37 }
 0x1f7   :  { %vm2533_vm15 = vcmp.gt.f32.partialorder %v1891_v53, 0.0  ;;  %v2789_v36 = vmul.f32 0.2, %v1891_v53  ;;  %v2786_v47 = vmul.f32 0.2, %v1880_v21  ;;  %v1883_v41 = vadd.f32 %v6544_v50, %v1882_v45 }
 0x1f8   :  { %5995 = vst [vmem:[%s8238_s3 + $0x3e0] sm:$0xff] %v5855_v5   ;;  %vm2661_vm0 = vcmp.gt.f32.partialorder %v2403_v15, 0.0  ;;  %v2917_v56 = vmul.f32 0.2, %v2403_v15  ;;  %v2395_v35 = vadd.f32 %v6544_v50, %v2394_v11  ;;  %vm2530_vm1 = vcmp.gt.f32.partialorder %v1880_v21, 0.0 }
 0x1f9   :  { %vm2658_vm3 = vcmp.gt.f32.partialorder %v2392_v40, 0.0  ;;  %v2914_v12 = vmul.f32 0.2, %v2392_v40  ;;  %v3045_v18 = vsel %vm2533_vm15, %v1891_v53, %v2789_v36  ;;  %vm2531_vm4 = vcmp.gt.f32.partialorder %v1883_v41, 0.0 }
 0x1fa   :  { %v5550_v63 = vpack.c.bf16 %v3045_v18, %v3044_v16  ;;  %v3173_v13 = vsel %vm2661_vm0, %v2403_v15, %v2917_v56  ;;  %v2787_v9 = vmul.f32 0.2, %v1883_v41  ;;  %vm2659_vm5 = vcmp.gt.f32.partialorder %v2395_v35, 0.0 }
 0x1fb   :  { %v5870_v1 = vpack.c.bf16 %v3173_v13, %v3172_v34  ;;  %v2915_v3 = vmul.f32 0.2, %v2395_v35  ;;  %v3042_v26 = vsel %vm2530_vm1, %v1880_v21, %v2786_v47  ;;  %v3170_v10 = vsel %vm2658_vm3, %v2392_v40, %v2914_v12 }
 0x1fc   :  { %5934 = vst [vmem:[%s8238_s3 + $0x1f8] sm:$0xff] %v5550_v63   ;;  %v3043_v59 = vsel %vm2531_vm4, %v1883_v41, %v2787_v9 }
 0x1fd   :  { %5998 = vst [vmem:[%s8238_s3 + $0x3f8] sm:$0xff] %v5870_v1   ;;  %v5545_v7 = vpack.c.bf16 %v3043_v59, %v3042_v26  ;;  %v3171_v42 = vsel %vm2659_vm5, %v2395_v35, %v2915_v3 }
 0x1fe   :  { %v5865_v6 = vpack.c.bf16 %v3171_v42, %v3170_v10 }
 0x1ff   :  { %5933 = vst [vmem:[%s8238_s3 + $0x1f0] sm:$0xff] %v5545_v7  }
 0x200   :  { %5997 = vst [vmem:[%s8238_s3 + $0x3f0] sm:$0xff] %v5865_v6  }

// kernel: discriminator_forward.5
= control target key start
LH: loop header
LB: loop body
LE: loop exit
PB: predicated region body
PF: predicated region fallthrough
CT: control target
= control target key end

     0   :  { %v2356_v0 = vmov 0   ;;  %vm470_vm0 = vcmask 588800   ;;  %vm567_vm1 = vcmask 1043456   ;;  %s4503_s1 = inlined_call_operand.vmem [shape: bf16[200,128], index: 1, kind: input, shape index: {}]   ;;  %s4504_s0 = inlined_call_operand.vmem [shape: bf16[512,200], index: 0, kind: input, shape index: {}]   ;;  %s4505_s2 = inlined_call_operand.vmem [shape: f32[1,128], index: 2, kind: input, shape index: {}]   ;;  %s4506_s3 = inlined_call_operand.vmem [shape: f32[1,128], index: 3, kind: input, shape index: {}]   ;;  %s4507_s4 = inlined_call_operand.vmem [shape: bf16[512,128], index: 4, kind: output, shape index: {}]  }
   0x1   :  { %571 = vmatprep.subr.bf16.mxu0 %v2356_v0  ;;  %v2245_v1 = vld [vmem:[%s4503_s1 + $0x38] sm:$0xff]   ;;  %2218 = vmatprep.subr.bf16.mxu1 %v2356_v0  ;;  %v2246_v2 = vld [vmem:[%s4503_s1 + $0x30] sm:$0xff]   ;;  %v2247_v3 = vld [vmem:[%s4503_s1 + $0x28] sm:$0xff]  }
   0x2   :  { %572 = vmatpush1.bf16.msra.mxu0 %v2245_v1  ;;  %2231 = vmatpush1.bf16.msra.mxu1 %v2245_v1  ;;  %v2248_v4 = vld [vmem:[%s4503_s1 + $0x20] sm:$0xff]   ;;  %v2249_v6 = vld [vmem:[%s4503_s1 + $0x18] sm:$0xff]   ;;  %v2250_v7 = vld [vmem:[%s4503_s1 + $0x10] sm:$0xff]  }
   0x3   :  { %573 = vmatprep.subr.bf16.mxu0 %v2356_v0  ;;  %2219 = vmatprep.subr.bf16.mxu1 %v2356_v0  ;;  %v2260_v5 = vld [vmem:[%s4504_s0 + $0x4] ss:$8 sps:$4 sm:$0xff]   ;;  %v2253_v11 = vld [vmem:[%s4503_s1 + $0x60] ss:$0 sps:$4 sm:$0xff]   ;;  %v2254_v13 = vld [vmem:[%s4503_s1 + $0x58] sm:$0xff]  }
   0x4   :  { %1866 = vmatprep.mubr.msk.bf16.mxu0 %vm470_vm0, %v2260_v5  ;;  %v2251_v8 = vld [vmem:[%s4503_s1 + $0x8] sm:$0xff]   ;;  %v2252_v10 = vld [vmem:[%s4503_s1] sm:$0xff]   ;;  %v569_v12 = vsel %vm567_vm1, %v2253_v11, 0  ;;  %v2255_v14 = vld [vmem:[%s4503_s1 + $0x50] sm:$0xff]  }
   0x5   :  { %v2284_v9 = vld [vmem:[%s4504_s0 + $0x104] ss:$8 sps:$4 sm:$0xff]   ;;  %v2258_v17 = vld [vmem:[%s4504_s0] ss:$8 sps:$4 sm:$0xff]   ;;  %v2261_v18 = vld [vmem:[%s4504_s0 + $0x14] ss:$8 sps:$4 sm:$0xff]  }
   0x6   :  { %574 = vmatpush1.bf16.msra.mxu0 %v2246_v2  ;;  %2232 = vmatpush1.bf16.msra.mxu1 %v2246_v2  ;;  %v2256_v15 = vld [vmem:[%s4503_s1 + $0x48] sm:$0xff]   ;;  %v2257_v16 = vld [vmem:[%s4503_s1 + $0x40] sm:$0xff]   ;;  %v2288_v20 = vld [vmem:[%s4504_s0 + $0x114] ss:$8 sps:$4 sm:$0xff]  }
   0x7   :  { %575 = vmatprep.subr.bf16.mxu0 %v2356_v0  ;;  %2220 = vmatprep.subr.bf16.mxu1 %v2356_v0  ;;  %v2282_v19 = vld [vmem:[%s4504_s0 + $0x100] ss:$8 sps:$4 sm:$0xff]   ;;  %v2263_v21 = vld [vmem:[%s4504_s0 + $0x10] ss:$8 sps:$4 sm:$0xff]   ;;  %v2264_v23 = vld [vmem:[%s4504_s0 + $0x24] ss:$8 sps:$4 sm:$0xff]  }
   0x8   :  { %1882 = vmatprep.mubr.msk.bf16.mxu1 %vm470_vm0, %v2284_v9  ;;  %v2290_v22 = vld [vmem:[%s4504_s0 + $0x110] ss:$8 sps:$4 sm:$0xff]   ;;  %v2294_v24 = vld [vmem:[%s4504_s0 + $0x124] ss:$8 sps:$4 sm:$0xff]   ;;  %v2266_v25 = vld [vmem:[%s4504_s0 + $0x20] ss:$8 sps:$4 sm:$0xff]  }
   0x9   :  { %v2296_v26 = vld [vmem:[%s4504_s0 + $0x120] ss:$8 sps:$4 sm:$0xff]   ;;  %v2267_v27 = vld [vmem:[%s4504_s0 + $0x34] ss:$8 sps:$4 sm:$0xff]   ;;  %v2269_v29 = vld [vmem:[%s4504_s0 + $0x30] ss:$8 sps:$4 sm:$0xff]  }
   0xa   :  { %576 = vmatpush1.bf16.msra.mxu0 %v2247_v3  ;;  %2233 = vmatpush1.bf16.msra.mxu1 %v2247_v3  ;;  %v2300_v28 = vld [vmem:[%s4504_s0 + $0x134] ss:$8 sps:$4 sm:$0xff]   ;;  %v2302_v30 = vld [vmem:[%s4504_s0 + $0x130] ss:$8 sps:$4 sm:$0xff]   ;;  %v2270_v31 = vld [vmem:[%s4504_s0 + $0x44] ss:$8 sps:$4 sm:$0xff]  }
   0xb   :  { %577 = vmatprep.subr.bf16.mxu0 %v2356_v0  ;;  %2221 = vmatprep.subr.bf16.mxu1 %v2356_v0  ;;  %v2306_v32 = vld [vmem:[%s4504_s0 + $0x144] ss:$8 sps:$4 sm:$0xff]   ;;  %v2272_v33 = vld [vmem:[%s4504_s0 + $0x40] ss:$8 sps:$4 sm:$0xff]   ;;  %v2273_v35 = vld [vmem:[%s4504_s0 + $0x54] ss:$8 sps:$4 sm:$0xff]  }
   0xc   :  { %v2308_v34 = vld [vmem:[%s4504_s0 + $0x140] ss:$8 sps:$4 sm:$0xff]   ;;  %v2312_v36 = vld [vmem:[%s4504_s0 + $0x154] ss:$8 sps:$4 sm:$0xff]   ;;  %v2275_v37 = vld [vmem:[%s4504_s0 + $0x50] ss:$8 sps:$4 sm:$0xff]  }
   0xd   :  { %v2314_v38 = vld [vmem:[%s4504_s0 + $0x150] ss:$8 sps:$4 sm:$0xff]   ;;  %v2276_v39 = vld [vmem:[%s4504_s0 + $0x64] ss:$8 sps:$4 sm:$0xff]   ;;  %v2278_v41 = vld [vmem:[%s4504_s0 + $0x60] ss:$8 sps:$4 sm:$0xff]  }
   0xe   :  { %578 = vmatpush1.bf16.msra.mxu0 %v2248_v4  ;;  %2234 = vmatpush1.bf16.msra.mxu1 %v2248_v4  ;;  %v2318_v40 = vld [vmem:[%s4504_s0 + $0x164] ss:$8 sps:$4 sm:$0xff]   ;;  %v2320_v42 = vld [vmem:[%s4504_s0 + $0x160] ss:$8 sps:$4 sm:$0xff]   ;;  %v2279_v43 = vld [vmem:[%s4504_s0 + $0x74] ss:$8 sps:$4 sm:$0xff]  }
   0xf   :  { %579 = vmatprep.subr.bf16.mxu0 %v2356_v0  ;;  %2222 = vmatprep.subr.bf16.mxu1 %v2356_v0  ;;  %v2324_v44 = vld [vmem:[%s4504_s0 + $0x174] ss:$8 sps:$4 sm:$0xff]   ;;  %v2281_v45 = vld [vmem:[%s4504_s0 + $0x70] ss:$8 sps:$4 sm:$0xff]   ;;  %v2285_v47 = vld [vmem:[%s4504_s0 + $0x84] ss:$8 sps:$4 sm:$0xff]  }
  0x10   :  { %v2326_v46 = vld [vmem:[%s4504_s0 + $0x170] ss:$8 sps:$4 sm:$0xff]   ;;  %v2330_v48 = vld [vmem:[%s4504_s0 + $0x184] ss:$8 sps:$4 sm:$0xff]   ;;  %v2287_v49 = vld [vmem:[%s4504_s0 + $0x80] ss:$8 sps:$4 sm:$0xff]  }
  0x11   :  { %v2332_v50 = vld [vmem:[%s4504_s0 + $0x180] ss:$8 sps:$4 sm:$0xff]   ;;  %v2291_v51 = vld [vmem:[%s4504_s0 + $0x94] ss:$8 sps:$4 sm:$0xff]   ;;  %v2293_v53 = vld [vmem:[%s4504_s0 + $0x90] ss:$8 sps:$4 sm:$0xff]  }
  0x12   :  { %580 = vmatpush1.bf16.msra.mxu0 %v2249_v6  ;;  %2235 = vmatpush1.bf16.msra.mxu1 %v2249_v6  ;;  %v2333_v52 = vld [vmem:[%s4504_s0 + $0x194] ss:$8 sps:$4 sm:$0xff]   ;;  %v2335_v54 = vld [vmem:[%s4504_s0 + $0x190] ss:$8 sps:$4 sm:$0xff]   ;;  %v2297_v55 = vld [vmem:[%s4504_s0 + $0xa4] ss:$8 sps:$4 sm:$0xff]  }
  0x13   :  { %581 = vmatprep.subr.bf16.mxu0 %v2356_v0  ;;  %2223 = vmatprep.subr.bf16.mxu1 %v2356_v0  ;;  %v2336_v56 = vld [vmem:[%s4504_s0 + $0x1a4] ss:$8 sps:$4 sm:$0xff]   ;;  %v2299_v57 = vld [vmem:[%s4504_s0 + $0xa0] ss:$8 sps:$4 sm:$0xff]   ;;  %v2303_v59 = vld [vmem:[%s4504_s0 + $0xb4] ss:$8 sps:$4 sm:$0xff]  }
  0x14   :  { %v2338_v58 = vld [vmem:[%s4504_s0 + $0x1a0] ss:$8 sps:$4 sm:$0xff]   ;;  %v2339_v60 = vld [vmem:[%s4504_s0 + $0x1b4] ss:$8 sps:$4 sm:$0xff]   ;;  %v2305_v61 = vld [vmem:[%s4504_s0 + $0xb0] ss:$8 sps:$4 sm:$0xff]  }
  0x15   :  { %v2341_v62 = vld [vmem:[%s4504_s0 + $0x1b0] ss:$8 sps:$4 sm:$0xff]   ;;  %v2309_v63 = vld [vmem:[%s4504_s0 + $0xc4] ss:$8 sps:$4 sm:$0xff]   ;;  %v2311_v1 = vld [vmem:[%s4504_s0 + $0xc0] ss:$8 sps:$4 sm:$0xff]  }
  0x16   :  { %582 = vmatpush1.bf16.msra.mxu0 %v2250_v7  ;;  %2236 = vmatpush1.bf16.msra.mxu1 %v2250_v7  ;;  %v2344_v2 = vld [vmem:[%s4504_s0 + $0x1c0] ss:$8 sps:$4 sm:$0xff]   ;;  %v2315_v3 = vld [vmem:[%s4504_s0 + $0xd4] ss:$8 sps:$4 sm:$0xff]   ;;  %v2317_v5 = vld [vmem:[%s4504_s0 + $0xd0] ss:$8 sps:$4 sm:$0xff]  }
  0x17   :  { %583 = vmatprep.subr.bf16.mxu0 %v2356_v0  ;;  %2224 = vmatprep.subr.bf16.mxu1 %v2356_v0  ;;  %v2345_v4 = vld [vmem:[%s4504_s0 + $0x1d4] ss:$8 sps:$4 sm:$0xff]   ;;  %v2347_v6 = vld [vmem:[%s4504_s0 + $0x1d0] ss:$8 sps:$4 sm:$0xff]   ;;  %v2321_v7 = vld [vmem:[%s4504_s0 + $0xe4] ss:$8 sps:$4 sm:$0xff]  }
  0x18   :  { %v2323_v9 = vld [vmem:[%s4504_s0 + $0xe0] ss:$8 sps:$4 sm:$0xff]   ;;  %v2327_v11 = vld [vmem:[%s4504_s0 + $0xf4] ss:$8 sps:$4 sm:$0xff]  }
  0x1a   :  { %584 = vmatpush1.bf16.msra.mxu0 %v2251_v8  ;;  %2237 = vmatpush1.bf16.msra.mxu1 %v2251_v8  ;;  %v2348_v8 = vld [vmem:[%s4504_s0 + $0x1e4] ss:$8 sps:$4 sm:$0xff]  }
  0x1b   :  { %585 = vmatprep.subr.bf16.mxu0 %v2356_v0  ;;  %2225 = vmatprep.subr.bf16.mxu1 %v2356_v0 }
  0x1e   :  { %586 = vmatpush1.bf16.msra.mxu0 %v2252_v10  ;;  %2238 = vmatpush1.bf16.msra.mxu1 %v2252_v10  ;;  %v2350_v10 = vld [vmem:[%s4504_s0 + $0x1e0] ss:$8 sps:$4 sm:$0xff]  }
  0x1f   :  { %593 = vmatprep.subr.bf16.mxu0 %v2356_v0  ;;  %2226 = vmatprep.subr.bf16.mxu1 %v2356_v0 }
  0x22   :  { %594 = vmatpush2.bf16.msra.mxu0 %v569_v12  ;;  %2239 = vmatpush2.bf16.msra.mxu1 %v569_v12  ;;  %v2351_v12 = vld [vmem:[%s4504_s0 + $0x1f4] ss:$8 sps:$4 sm:$0xff]  }
  0x23   :  { %595 = vmatprep.subr.bf16.mxu0 %v2356_v0  ;;  %2227 = vmatprep.subr.bf16.mxu1 %v2356_v0 }
  0x26   :  { %596 = vmatpush2.bf16.msra.mxu0 %v2254_v13  ;;  %2240 = vmatpush2.bf16.msra.mxu1 %v2254_v13  ;;  %v2329_v13 = vld [vmem:[%s4504_s0 + $0xf0] ss:$8 sps:$4 sm:$0xff]  }
  0x27   :  { %597 = vmatprep.subr.bf16.mxu0 %v2356_v0  ;;  %2228 = vmatprep.subr.bf16.mxu1 %v2356_v0 }
  0x2a   :  { %598 = vmatpush2.bf16.msra.mxu0 %v2255_v14  ;;  %2241 = vmatpush2.bf16.msra.mxu1 %v2255_v14  ;;  %v2353_v14 = vld [vmem:[%s4504_s0 + $0x1f0] ss:$8 sps:$4 sm:$0xff]  }
  0x2b   :  { %599 = vmatprep.subr.bf16.mxu0 %v2356_v0  ;;  %2229 = vmatprep.subr.bf16.mxu1 %v2356_v0 }
  0x2e   :  { %600 = vmatpush2.bf16.msra.mxu0 %v2256_v15  ;;  %2242 = vmatpush2.bf16.msra.mxu1 %v2256_v15 }
  0x2f   :  { %601 = vmatprep.subr.bf16.mxu0 %v2356_v0  ;;  %2230 = vmatprep.subr.bf16.mxu1 %v2356_v0  ;;  %v2342_v0 = vld [vmem:[%s4504_s0 + $0x1c4] ss:$8 sps:$4 sm:$0xff]  }
  0x32   :  { %602 = vmatpush2.bf16.msra.mxu0 %v2257_v16  ;;  %2243 = vmatpush2.bf16.msra.mxu1 %v2257_v16 }
  0x35   :  { %604 = vmatmul.mubr.bf16.vlgmr.msra.gmra.mxu0 %v2258_v17  ;;  %732 = vmatmul.mubr.bf16.vlgmr.msra.gmra.mxu1 %v2282_v19 }
  0x36   :  { %1867 = vmatprep.mubr.msk.bf16.mxu0 %vm470_vm0, %v2261_v18  ;;  %1883 = vmatprep.mubr.msk.bf16.mxu1 %vm470_vm0, %v2288_v20 }
  0x3d   :  { %612 = vmatmul.mubr.bf16.gmra.mxu0 %v2263_v21  ;;  %740 = vmatmul.mubr.bf16.gmra.mxu1 %v2290_v22 }
  0x3e   :  { %1868 = vmatprep.mubr.msk.bf16.mxu0 %vm470_vm0, %v2264_v23  ;;  %1884 = vmatprep.mubr.msk.bf16.mxu1 %vm470_vm0, %v2294_v24 }
  0x45   :  { %620 = vmatmul.mubr.bf16.gmra.mxu0 %v2266_v25  ;;  %748 = vmatmul.mubr.bf16.gmra.mxu1 %v2296_v26 }
  0x46   :  { %1869 = vmatprep.mubr.msk.bf16.mxu0 %vm470_vm0, %v2267_v27  ;;  %1885 = vmatprep.mubr.msk.bf16.mxu1 %vm470_vm0, %v2300_v28 }
  0x4d   :  { %628 = vmatmul.mubr.bf16.gmra.mxu0 %v2269_v29  ;;  %756 = vmatmul.mubr.bf16.gmra.mxu1 %v2302_v30 }
  0x4e   :  { %1870 = vmatprep.mubr.msk.bf16.mxu0 %vm470_vm0, %v2270_v31  ;;  %1886 = vmatprep.mubr.msk.bf16.mxu1 %vm470_vm0, %v2306_v32 }
  0x55   :  { %636 = vmatmul.mubr.bf16.gmra.mxu0 %v2272_v33  ;;  %764 = vmatmul.mubr.bf16.gmra.mxu1 %v2308_v34 }
  0x56   :  { %1871 = vmatprep.mubr.msk.bf16.mxu0 %vm470_vm0, %v2273_v35  ;;  %1887 = vmatprep.mubr.msk.bf16.mxu1 %vm470_vm0, %v2312_v36 }
  0x5d   :  { %644 = vmatmul.mubr.bf16.gmra.mxu0 %v2275_v37  ;;  %772 = vmatmul.mubr.bf16.gmra.mxu1 %v2314_v38 }
  0x5e   :  { %1872 = vmatprep.mubr.msk.bf16.mxu0 %vm470_vm0, %v2276_v39  ;;  %1888 = vmatprep.mubr.msk.bf16.mxu1 %vm470_vm0, %v2318_v40 }
  0x65   :  { %652 = vmatmul.mubr.bf16.gmra.mxu0 %v2278_v41  ;;  %780 = vmatmul.mubr.bf16.gmra.mxu1 %v2320_v42 }
  0x66   :  { %1873 = vmatprep.mubr.msk.bf16.mxu0 %vm470_vm0, %v2279_v43  ;;  %1889 = vmatprep.mubr.msk.bf16.mxu1 %vm470_vm0, %v2324_v44 }
  0x6d   :  { %660 = vmatmul.mubr.bf16.gmra.mxu0 %v2281_v45  ;;  %788 = vmatmul.mubr.bf16.gmra.mxu1 %v2326_v46 }
  0x6e   :  { %1874 = vmatprep.mubr.msk.bf16.mxu0 %vm470_vm0, %v2285_v47  ;;  %1890 = vmatprep.mubr.msk.bf16.mxu1 %vm470_vm0, %v2330_v48 }
  0x75   :  { %668 = vmatmul.mubr.bf16.gmra.mxu0 %v2287_v49  ;;  %796 = vmatmul.mubr.bf16.gmra.mxu1 %v2332_v50 }
  0x76   :  { %1875 = vmatprep.mubr.msk.bf16.mxu0 %vm470_vm0, %v2291_v51  ;;  %1891 = vmatprep.mubr.msk.bf16.mxu1 %vm470_vm0, %v2333_v52 }
  0x7d   :  { %676 = vmatmul.mubr.bf16.gmra.mxu0 %v2293_v53  ;;  %804 = vmatmul.mubr.bf16.gmra.mxu1 %v2335_v54 }
  0x7e   :  { %1876 = vmatprep.mubr.msk.bf16.mxu0 %vm470_vm0, %v2297_v55  ;;  %1892 = vmatprep.mubr.msk.bf16.mxu1 %vm470_vm0, %v2336_v56 }
  0x85   :  { %684 = vmatmul.mubr.bf16.gmra.mxu0 %v2299_v57  ;;  %812 = vmatmul.mubr.bf16.gmra.mxu1 %v2338_v58 }
  0x86   :  { %1877 = vmatprep.mubr.msk.bf16.mxu0 %vm470_vm0, %v2303_v59  ;;  %1893 = vmatprep.mubr.msk.bf16.mxu1 %vm470_vm0, %v2339_v60 }
  0x8d   :  { %692 = vmatmul.mubr.bf16.gmra.mxu0 %v2305_v61  ;;  %820 = vmatmul.mubr.bf16.gmra.mxu1 %v2341_v62 }
  0x8e   :  { %1878 = vmatprep.mubr.msk.bf16.mxu0 %vm470_vm0, %v2309_v63  ;;  %1894 = vmatprep.mubr.msk.bf16.mxu1 %vm470_vm0, %v2342_v0 }
  0x95   :  { %700 = vmatmul.mubr.bf16.gmra.mxu0 %v2311_v1  ;;  %828 = vmatmul.mubr.bf16.gmra.mxu1 %v2344_v2 }
  0x96   :  { %1879 = vmatprep.mubr.msk.bf16.mxu0 %vm470_vm0, %v2315_v3  ;;  %1895 = vmatprep.mubr.msk.bf16.mxu1 %vm470_vm0, %v2345_v4 }
  0x9d   :  { %708 = vmatmul.mubr.bf16.gmra.mxu0 %v2317_v5  ;;  %836 = vmatmul.mubr.bf16.gmra.mxu1 %v2347_v6 }
  0x9e   :  { %1880 = vmatprep.mubr.msk.bf16.mxu0 %vm470_vm0, %v2321_v7  ;;  %1896 = vmatprep.mubr.msk.bf16.mxu1 %vm470_vm0, %v2348_v8 }
  0xa5   :  { %716 = vmatmul.mubr.bf16.gmra.mxu0 %v2323_v9  ;;  %844 = vmatmul.mubr.bf16.gmra.mxu1 %v2350_v10 }
  0xa6   :  { %1881 = vmatprep.mubr.msk.bf16.mxu0 %vm470_vm0, %v2327_v11  ;;  %1897 = vmatprep.mubr.msk.bf16.mxu1 %vm470_vm0, %v2351_v12 }
  0xad   :  { %724 = vmatmul.mubr.bf16.gmra.mxu0 %v2329_v13  ;;  %852 = vmatmul.mubr.bf16.gmra.mxu1 %v2353_v14 }
  0xf5   :  { %v2671_v15 = vpop.f32.mrf.mxu0  ;;  %v2673_v16 = vpop.f32.mrf.mxu1 }
  0xf7   :  { %v607_v17 = vpop.f32.mrf.mxu0  ;;  %v735_v18 = vpop.f32.mrf.mxu1 }
  0xf9   :  { %v2675_v19 = vpop.f32.mrf.mxu0  ;;  %v2677_v20 = vpop.f32.mrf.mxu1 }
  0xfb   :  { %v610_v21 = vpop.f32.mrf.mxu0  ;;  %v738_v22 = vpop.f32.mrf.mxu1 }
  0xfc   :  { %v860_v21 = vadd.f32 %v2675_v19, %v2671_v15 }
  0xfd   :  { %v2679_v23 = vpop.f32.mrf.mxu0  ;;  %v2681_v24 = vpop.f32.mrf.mxu1 }
  0xff   :  { %v615_v25 = vpop.f32.mrf.mxu0  ;;  %v743_v26 = vpop.f32.mrf.mxu1 }
 0x100   :  { %v861_v26 = vadd.f32 %v860_v21, %v2679_v23 }
 0x101   :  { %v2683_v27 = vpop.f32.mrf.mxu0  ;;  %v2685_v28 = vpop.f32.mrf.mxu1 }
 0x103   :  { %v618_v29 = vpop.f32.mrf.mxu0  ;;  %v746_v30 = vpop.f32.mrf.mxu1 }
 0x105   :  { %v2687_v31 = vpop.f32.mrf.mxu0  ;;  %v2689_v32 = vpop.f32.mrf.mxu1 }
 0x107   :  { %v623_v33 = vpop.f32.mrf.mxu0  ;;  %v751_v34 = vpop.f32.mrf.mxu1 }
 0x108   :  { %v862_v33 = vadd.f32 %v861_v26, %v2683_v27 }
 0x109   :  { %v2691_v35 = vpop.f32.mrf.mxu0  ;;  %v2693_v36 = vpop.f32.mrf.mxu1 }
 0x10b   :  { %v626_v37 = vpop.f32.mrf.mxu0  ;;  %v754_v38 = vpop.f32.mrf.mxu1 }
 0x10c   :  { %v863_v38 = vadd.f32 %v862_v33, %v2687_v31 }
 0x10d   :  { %v2695_v39 = vpop.f32.mrf.mxu0  ;;  %v2697_v40 = vpop.f32.mrf.mxu1 }
 0x10f   :  { %v631_v41 = vpop.f32.mrf.mxu0  ;;  %v759_v42 = vpop.f32.mrf.mxu1 }
 0x111   :  { %v2699_v43 = vpop.f32.mrf.mxu0  ;;  %v2701_v44 = vpop.f32.mrf.mxu1 }
 0x113   :  { %v634_v45 = vpop.f32.mrf.mxu0  ;;  %v762_v46 = vpop.f32.mrf.mxu1 }
 0x114   :  { %v864_v45 = vadd.f32 %v863_v38, %v2691_v35 }
 0x115   :  { %v2703_v47 = vpop.f32.mrf.mxu0  ;;  %v2705_v48 = vpop.f32.mrf.mxu1 }
 0x117   :  { %v639_v49 = vpop.f32.mrf.mxu0  ;;  %v767_v50 = vpop.f32.mrf.mxu1 }
 0x118   :  { %v865_v50 = vadd.f32 %v864_v45, %v2695_v39 }
 0x119   :  { %v2707_v51 = vpop.f32.mrf.mxu0  ;;  %v2709_v52 = vpop.f32.mrf.mxu1 }
 0x11b   :  { %v642_v53 = vpop.f32.mrf.mxu0  ;;  %v770_v54 = vpop.f32.mrf.mxu1 }
 0x11d   :  { %v2711_v55 = vpop.f32.mrf.mxu0  ;;  %v2713_v56 = vpop.f32.mrf.mxu1 }
 0x11f   :  { %v647_v57 = vpop.f32.mrf.mxu0  ;;  %v775_v58 = vpop.f32.mrf.mxu1 }
 0x120   :  { %v866_v57 = vadd.f32 %v865_v50, %v2699_v43 }
 0x121   :  { %v2715_v59 = vpop.f32.mrf.mxu0  ;;  %v2717_v60 = vpop.f32.mrf.mxu1 }
 0x123   :  { %v650_v61 = vpop.f32.mrf.mxu0  ;;  %v778_v62 = vpop.f32.mrf.mxu1 }
 0x124   :  { %v867_v62 = vadd.f32 %v866_v57, %v2703_v47 }
 0x125   :  { %v2719_v63 = vpop.f32.mrf.mxu0  ;;  %v2721_v0 = vpop.f32.mrf.mxu1 }
 0x127   :  { %v655_v1 = vpop.f32.mrf.mxu0  ;;  %v783_v2 = vpop.f32.mrf.mxu1 }
 0x129   :  { %v2723_v3 = vpop.f32.mrf.mxu0  ;;  %v2725_v4 = vpop.f32.mrf.mxu1 }
 0x12b   :  { %v658_v5 = vpop.f32.mrf.mxu0  ;;  %v786_v6 = vpop.f32.mrf.mxu1 }
 0x12c   :  { %v868_v5 = vadd.f32 %v867_v62, %v2707_v51 }
 0x12d   :  { %v2727_v7 = vpop.f32.mrf.mxu0  ;;  %v2729_v8 = vpop.f32.mrf.mxu1 }
 0x12f   :  { %v663_v9 = vpop.f32.mrf.mxu0  ;;  %v791_v10 = vpop.f32.mrf.mxu1 }
 0x130   :  { %v869_v10 = vadd.f32 %v868_v5, %v2711_v55 }
 0x131   :  { %v2731_v11 = vpop.f32.mrf.mxu0  ;;  %v2733_v12 = vpop.f32.mrf.mxu1 }
 0x132   :  { %v870_v21 = vadd.f32 %v869_v10, %v2715_v59 }
 0x133   :  { %v666_v13 = vpop.f32.mrf.mxu0  ;;  %v794_v14 = vpop.f32.mrf.mxu1 }
 0x134   :  { %v871_v26 = vadd.f32 %v870_v21, %v2719_v63 }
 0x135   :  { %v2735_v17 = vpop.f32.mrf.mxu0  ;;  %v2737_v18 = vpop.f32.mrf.mxu1 }
 0x137   :  { %v671_v22 = vpop.f32.mrf.mxu0  ;;  %v799_v25 = vpop.f32.mrf.mxu1 }
 0x139   :  { %v2742_v29 = vpop.f32.mrf.mxu0  ;;  %v2744_v30 = vpop.f32.mrf.mxu1 }
 0x13b   :  { %v674_v34 = vpop.f32.mrf.mxu0  ;;  %v802_v37 = vpop.f32.mrf.mxu1 }
 0x13c   :  { %v872_v37 = vadd.f32 %v871_v26, %v2723_v3 }
 0x13d   :  { %v2748_v41 = vpop.f32.mrf.mxu0  ;;  %v2750_v42 = vpop.f32.mrf.mxu1 }
 0x13e   :  { %4574 = vst [vmem:[#allocation2_spill] sm:$0xff] %v2748_v41 }
 0x13f   :  { %v679_v46 = vpop.f32.mrf.mxu0  ;;  %v807_v49 = vpop.f32.mrf.mxu1 }
 0x140   :  { %v873_v46 = vadd.f32 %v872_v37, %v2727_v7 }
 0x141   :  { %v2754_v53 = vpop.f32.mrf.mxu0  ;;  %v2756_v54 = vpop.f32.mrf.mxu1 }
 0x142   :  { %4575 = vst [vmem:[#allocation3_spill] sm:$0xff] %v2754_v53  ;;  %v874_v57 = vadd.f32 %v873_v46, %v2731_v11 }
 0x143   :  { %v682_v58 = vpop.f32.mrf.mxu0  ;;  %v810_v61 = vpop.f32.mrf.mxu1 }
 0x144   :  { %v875_v62 = vadd.f32 %v874_v57, %v2735_v17 }
 0x145   :  { %v2760_v1 = vpop.f32.mrf.mxu0  ;;  %v2762_v2 = vpop.f32.mrf.mxu1 }
 0x146   :  { %4576 = vst [vmem:[#allocation4_spill] sm:$0xff] %v2760_v1 }
 0x147   :  { %v687_v6 = vpop.f32.mrf.mxu0  ;;  %v815_v9 = vpop.f32.mrf.mxu1 }
 0x148   :  { %v876_v9 = vadd.f32 %v875_v62, %v2742_v29 }
 0x149   :  { %v2766_v13 = vpop.f32.mrf.mxu0  ;;  %v2768_v14 = vpop.f32.mrf.mxu1 }
 0x14a   :  { %4577 = vst [vmem:[#allocation5_spill] sm:$0xff] %v2766_v13 }
 0x14b   :  { %v690_v22 = vpop.f32.mrf.mxu0  ;;  %v818_v25 = vpop.f32.mrf.mxu1 }
 0x14c   :  { %v877_v22 = vadd.f32 %v876_v9, %v2748_v41 }
 0x14d   :  { %v2772_v33 = vpop.f32.mrf.mxu0  ;;  %v2774_v34 = vpop.f32.mrf.mxu1 }
 0x14e   :  { %4578 = vst [vmem:[#allocation6_spill] sm:$0xff] %v2772_v33  ;;  %4579 = vst [vmem:[#allocation7_spill] sm:$0xff] %v2774_v34  ;;  %v878_v37 = vadd.f32 %v877_v22, %v2754_v53 }
 0x14f   :  { %v695_v38 = vpop.f32.mrf.mxu0  ;;  %v823_v45 = vpop.f32.mrf.mxu1 }
 0x150   :  { %v879_v46 = vadd.f32 %v878_v37, %v2760_v1 }
 0x151   :  { %v2778_v49 = vpop.f32.mrf.mxu0  ;;  %v2780_v50 = vpop.f32.mrf.mxu1 }
 0x152   :  { %4580 = vst [vmem:[#allocation8_spill] sm:$0xff] %v2778_v49  ;;  %4581 = vst [vmem:[#allocation9_spill] sm:$0xff] %v2780_v50 }
 0x153   :  { %v698_v58 = vpop.f32.mrf.mxu0  ;;  %v826_v61 = vpop.f32.mrf.mxu1 }
 0x154   :  { %v880_v61 = vadd.f32 %v879_v46, %v2766_v13 }
 0x155   :  { %v2784_v5 = vpop.f32.mrf.mxu0  ;;  %v2786_v6 = vpop.f32.mrf.mxu1 }
 0x156   :  { %4582 = vst [vmem:[#allocation10_spill] sm:$0xff] %v2784_v5  ;;  %4583 = vst [vmem:[#allocation11_spill] sm:$0xff] %v2786_v6  ;;  %v881_v9 = vadd.f32 %v880_v61, %v2772_v33 }
 0x157   :  { %v703_v10 = vpop.f32.mrf.mxu0  ;;  %v831_v21 = vpop.f32.mrf.mxu1 }
 0x158   :  { %v882_v22 = vadd.f32 %v881_v9, %v2778_v49 }
 0x159   :  { %v2790_v25 = vpop.f32.mrf.mxu0  ;;  %v2792_v26 = vpop.f32.mrf.mxu1 }
 0x15a   :  { %4584 = vst [vmem:[#allocation12_spill] sm:$0xff] %v2790_v25  ;;  %v883_v37 = vadd.f32 %v882_v22, %v2784_v5 }
 0x15b   :  { %v706_v38 = vpop.f32.mrf.mxu0  ;;  %v834_v45 = vpop.f32.mrf.mxu1 }
 0x15c   :  { %v884_v46 = vadd.f32 %v883_v37, %v2790_v25 }
 0x15d   :  { %v2796_v57 = vpop.f32.mrf.mxu0  ;;  %v2798_v58 = vpop.f32.mrf.mxu1 }
 0x15e   :  { %4585 = vst [vmem:[#allocation13_spill] sm:$0xff] %v2796_v57  ;;  %v885_v61 = vadd.f32 %v884_v46, %v2796_v57 }
 0x15f   :  { %v711_v62 = vpop.f32.mrf.mxu0  ;;  %v839_v10 = vpop.f32.mrf.mxu1 }
 0x161   :  { %v2802_v21 = vpop.f32.mrf.mxu0  ;;  %v2804_v41 = vpop.f32.mrf.mxu1 }
 0x162   :  { %4586 = vst [vmem:[#allocation14_spill] sm:$0xff] %v2802_v21  ;;  %v886_v9 = vadd.f32 %v885_v61, %v2802_v21 }
 0x163   :  { %v714_v38 = vpop.f32.mrf.mxu0  ;;  %v842_v45 = vpop.f32.mrf.mxu1 }
 0x165   :  { %v2808_v1 = vpop.f32.mrf.mxu0  ;;  %v2810_v53 = vpop.f32.mrf.mxu1 }
 0x166   :  { %4587 = vst [vmem:[#allocation15_spill] sm:$0xff] %v2808_v1  ;;  %v887_v22 = vadd.f32 %v886_v9, %v2808_v1 }
 0x167   :  { %v719_v62 = vpop.f32.mrf.mxu0  ;;  %v847_v10 = vpop.f32.mrf.mxu1 }
 0x169   :  { %v2814_v33 = vpop.f32.mrf.mxu0  ;;  %v2816_v13 = vpop.f32.mrf.mxu1 }
 0x16a   :  { %v888_v37 = vadd.f32 %v887_v22, %v2814_v33 }
 0x16b   :  { %v722_v38 = vpop.f32.mrf.mxu0  ;;  %v850_v45 = vpop.f32.mrf.mxu1 }
 0x16d   :  { %v2820_v5 = vpop.f32.mrf.mxu0  ;;  %v2822_v49 = vpop.f32.mrf.mxu1 }
 0x16e   :  { %4588 = vst [vmem:[#allocation16_spill] sm:$0xff] %v2820_v5  ;;  %v889_v46 = vadd.f32 %v888_v37, %v2820_v5 }
 0x16f   :  { %v727_v62 = vpop.f32.mrf.mxu0  ;;  %v855_v10 = vpop.f32.mrf.mxu1 }
 0x171   :  { %v2826_v57 = vpop.f32.mrf.mxu0  ;;  %v2828_v25 = vpop.f32.mrf.mxu1 }
 0x172   :  { %v890_v61 = vadd.f32 %v889_v46, %v2826_v57 }
 0x173   :  { %v730_v38 = vpop.f32.mrf.mxu0  ;;  %v858_v45 = vpop.f32.mrf.mxu1 }
 0x174   :  { %v891_v9 = vadd.f32 %v890_v61, %v2673_v16 }
 0x176   :  { %v892_v1 = vadd.f32 %v891_v9, %v2677_v20 }
 0x178   :  { %v893_v21 = vadd.f32 %v892_v1, %v2681_v24 }
 0x17a   :  { %v894_v22 = vadd.f32 %v893_v21, %v2685_v28 }
 0x17c   :  { %v895_v62 = vadd.f32 %v894_v22, %v2689_v32 }
 0x17e   :  { %v896_v37 = vadd.f32 %v895_v62, %v2693_v36 }
 0x180   :  { %v897_v10 = vadd.f32 %v896_v37, %v2697_v40 }
 0x182   :  { %v898_v5 = vadd.f32 %v897_v10, %v2701_v44 }
 0x184   :  { %v899_v46 = vadd.f32 %v898_v5, %v2705_v48 }
 0x186   :  { %v900_v38 = vadd.f32 %v899_v46, %v2709_v52 }
 0x188   :  { %v901_v61 = vadd.f32 %v900_v38, %v2713_v56 }
 0x18a   :  { %v902_v45 = vadd.f32 %v901_v61, %v2717_v60 }
 0x18c   :  { %v903_v1 = vadd.f32 %v902_v45, %v2721_v0 }
 0x18e   :  { %v904_v21 = vadd.f32 %v903_v1, %v2725_v4 }
 0x190   :  { %v905_v9 = vadd.f32 %v904_v21, %v2729_v8 }
 0x192   :  { %v906_v22 = vadd.f32 %v905_v9, %v2733_v12 }
 0x194   :  { %v907_v62 = vadd.f32 %v906_v22, %v2737_v18 }
 0x196   :  { %v908_v37 = vadd.f32 %v907_v62, %v2744_v30 }
 0x198   :  { %v909_v5 = vadd.f32 %v908_v37, %v2750_v42 }
 0x19a   :  { %v910_v10 = vadd.f32 %v909_v5, %v2756_v54 }
 0x19c   :  { %v911_v46 = vadd.f32 %v910_v10, %v2762_v2 }
 0x19e   :  { %v912_v38 = vadd.f32 %v911_v46, %v2768_v14 }
 0x1a0   :  { %v913_v61 = vadd.f32 %v912_v38, %v2774_v34 }
 0x1a2   :  { %v914_v45 = vadd.f32 %v913_v61, %v2780_v50 }
 0x1a4   :  { %v915_v1 = vadd.f32 %v914_v45, %v2786_v6 }
 0x1a6   :  { %v916_v21 = vadd.f32 %v915_v1, %v2792_v26 }
 0x1a8   :  { %v917_v9 = vadd.f32 %v916_v21, %v2798_v58 }
 0x1aa   :  { %v918_v22 = vadd.f32 %v917_v9, %v2804_v41 }
 0x1ac   :  { %v919_v62 = vadd.f32 %v918_v22, %v2810_v53 }
 0x1ae   :  { %v920_v37 = vadd.f32 %v919_v62, %v2816_v13 }
 0x1b0   :  { %v921_v5 = vadd.f32 %v920_v37, %v2822_v49 }
 0x1b2   :  { %v922_v10 = vadd.f32 %v921_v5, %v2828_v25 }
 0x1b4   :  { %v923_v46 = vrot.slane %v922_v10, 4 }
 0x1b6   :  { %v924_v38 = vadd.f32 %v923_v46, %v922_v10 }
 0x1b8   :  { %v925_v34 = vrot.slane %v924_v38, 2 }
 0x1ba   :  { %v926_v61 = vadd.f32 %v925_v34, %v924_v38 }
 0x1bc   :  { %v927_v50 = vrot.slane %v926_v61, 1 }
 0x1be   :  { %v928_v45 = vadd.f32 %v927_v50, %v926_v61 }
 0x1c0   :  { %v2863_v6 = vmul.f32 0.001953125, %v928_v45 }
 0x1c2   :  { %v2867_v1 = vsub.f32 %v2671_v15, %v2863_v6  ;;  %v2871_v21 = vsub.f32 %v2675_v19, %v2863_v6  ;;  %v2875_v9 = vsub.f32 %v2679_v23, %v2863_v6  ;;  %v2883_v50 = vsub.f32 %v2683_v27, %v2863_v6 }
 0x1c3   :  { %v2887_v15 = vsub.f32 %v2687_v31, %v2863_v6  ;;  %v2893_v23 = vsub.f32 %v2691_v35, %v2863_v6  ;;  %v2899_v27 = vsub.f32 %v2695_v39, %v2863_v6  ;;  %v2905_v46 = vsub.f32 %v2699_v43, %v2863_v6 }
 0x1c4   :  { %v994_v22 = vmul.f32 %v2867_v1, %v2867_v1  ;;  %v995_v34 = vmul.f32 %v2871_v21, %v2871_v21  ;;  %v996_v19 = vmul.f32 %v2875_v9, %v2875_v9  ;;  %v997_v37 = vmul.f32 %v2883_v50, %v2883_v50 }
 0x1c5   :  { %v998_v31 = vmul.f32 %v2887_v15, %v2887_v15  ;;  %v999_v35 = vmul.f32 %v2893_v23, %v2893_v23  ;;  %v2911_v61 = vsub.f32 %v2703_v47, %v2863_v6  ;;  %v1000_v39 = vmul.f32 %v2899_v27, %v2899_v27 }
 0x1c6   :  { %v1058_v62 = vadd.f32 %v995_v34, %v994_v22  ;;  %v2917_v22 = vsub.f32 %v2707_v51, %v2863_v6  ;;  %v1001_v43 = vmul.f32 %v2905_v46, %v2905_v46 }
 0x1c7   :  { %v1002_v47 = vmul.f32 %v2911_v61, %v2911_v61 }
 0x1c8   :  { %v1059_v5 = vadd.f32 %v1058_v62, %v996_v19  ;;  %v2923_v19 = vsub.f32 %v2711_v55, %v2863_v6  ;;  %v1003_v51 = vmul.f32 %v2917_v22, %v2917_v22 }
 0x1ca   :  { %v1060_v10 = vadd.f32 %v1059_v5, %v997_v37  ;;  %v2929_v37 = vsub.f32 %v2715_v59, %v2863_v6  ;;  %v1004_v55 = vmul.f32 %v2923_v19, %v2923_v19 }
 0x1cc   :  { %v1061_v38 = vadd.f32 %v1060_v10, %v998_v31  ;;  %v2935_v31 = vsub.f32 %v2719_v63, %v2863_v6  ;;  %v1005_v59 = vmul.f32 %v2929_v37, %v2929_v37 }
 0x1ce   :  { %v1062_v45 = vadd.f32 %v1061_v38, %v999_v35  ;;  %v2941_v35 = vsub.f32 %v2723_v3, %v2863_v6  ;;  %v1006_v63 = vmul.f32 %v2935_v31, %v2935_v31 }
 0x1d0   :  { %v1063_v34 = vadd.f32 %v1062_v45, %v1000_v39  ;;  %v2947_v39 = vsub.f32 %v2727_v7, %v2863_v6  ;;  %v1007_v3 = vmul.f32 %v2941_v35, %v2941_v35 }
 0x1d2   :  { %v1064_v62 = vadd.f32 %v1063_v34, %v1001_v43  ;;  %v2953_v43 = vsub.f32 %v2731_v11, %v2863_v6  ;;  %v1008_v7 = vmul.f32 %v2947_v39, %v2947_v39 }
 0x1d4   :  { %v1065_v5 = vadd.f32 %v1064_v62, %v1002_v47  ;;  %v2959_v47 = vsub.f32 %v2735_v17, %v2863_v6  ;;  %v1009_v11 = vmul.f32 %v2953_v43, %v2953_v43 }
 0x1d6   :  { %v1066_v10 = vadd.f32 %v1065_v5, %v1003_v51  ;;  %4589 = vst [vmem:[#allocation17_spill] sm:$0xff] %v2959_v47  ;;  %v2965_v51 = vsub.f32 %v2742_v29, %v2863_v6  ;;  %v1010_v17 = vmul.f32 %v2959_v47, %v2959_v47 }
 0x1d8   :  { %v1067_v38 = vadd.f32 %v1066_v10, %v1004_v55  ;;  %4590 = vst [vmem:[#allocation18_spill] sm:$0xff] %v2965_v51  ;;  %v4591_v55 = vld [vmem:[#allocation2_spill] sm:$0xff]  ;;  %v1011_v29 = vmul.f32 %v2965_v51, %v2965_v51 }
 0x1d9   :  { %v2971_v10 = vsub.f32 %v4591_v55, %v2863_v6  ;;  %v4597_v55 = vld [vmem:[#allocation5_spill] sm:$0xff] }
 0x1da   :  { %v1068_v45 = vadd.f32 %v1067_v38, %v1005_v59  ;;  %v4593_v38 = vld [vmem:[#allocation3_spill] sm:$0xff]  ;;  %v2989_v47 = vsub.f32 %v4597_v55, %v2863_v6  ;;  %v4603_v55 = vld [vmem:[#allocation10_spill] sm:$0xff] }
 0x1db   :  { %4592 = vst [vmem:[#allocation2_spill] sm:$0xff] %v2971_v10 }
 0x1dc   :  { %v1069_v34 = vadd.f32 %v1068_v45, %v1006_v63  ;;  %v2977_v63 = vsub.f32 %v4593_v38, %v2863_v6  ;;  %4598 = vst [vmem:[#allocation5_spill] sm:$0xff] %v2989_v47  ;;  %v4599_v38 = vld [vmem:[#allocation6_spill] sm:$0xff] }
 0x1dd   :  { %v2995_v51 = vsub.f32 %v4599_v38, %v2863_v6  ;;  %v4604_v38 = vld [vmem:[#allocation12_spill] sm:$0xff] }
 0x1de   :  { %v1070_v62 = vadd.f32 %v1069_v34, %v1007_v3  ;;  %4594 = vst [vmem:[#allocation3_spill] sm:$0xff] %v2977_v63  ;;  %v4595_v3 = vld [vmem:[#allocation4_spill] sm:$0xff] }
 0x1df   :  { %v2983_v34 = vsub.f32 %v4595_v3, %v2863_v6  ;;  %4600 = vst [vmem:[#allocation6_spill] sm:$0xff] %v2995_v51  ;;  %v4601_v3 = vld [vmem:[#allocation8_spill] sm:$0xff] }
 0x1e0   :  { %v1071_v5 = vadd.f32 %v1070_v62, %v1008_v7  ;;  %v1012_v7 = vmul.f32 %v2971_v10, %v2971_v10  ;;  %v3001_v10 = vsub.f32 %v4601_v3, %v2863_v6  ;;  %v4606_v3 = vld [vmem:[#allocation13_spill] sm:$0xff] }
 0x1e1   :  { %4596 = vst [vmem:[#allocation4_spill] sm:$0xff] %v2983_v34 }
 0x1e2   :  { %v1072_v59 = vadd.f32 %v1071_v5, %v1009_v11  ;;  %v1013_v11 = vmul.f32 %v2977_v63, %v2977_v63  ;;  %4602 = vst [vmem:[#allocation8_spill] sm:$0xff] %v3001_v10  ;;  %v3007_v63 = vsub.f32 %v4603_v55, %v2863_v6  ;;  %v4607_v55 = vld [vmem:[#allocation14_spill] sm:$0xff] }
 0x1e4   :  { %v1073_v45 = vadd.f32 %v1072_v59, %v1010_v17  ;;  %v1014_v17 = vmul.f32 %v2983_v34, %v2983_v34  ;;  %v3013_v34 = vsub.f32 %v4604_v38, %v2863_v6  ;;  %v4608_v38 = vld [vmem:[#allocation15_spill] sm:$0xff] }
 0x1e6   :  { %v1074_v62 = vadd.f32 %v1073_v45, %v1011_v29  ;;  %v1015_v29 = vmul.f32 %v2989_v47, %v2989_v47  ;;  %4605 = vst [vmem:[#allocation10_spill] sm:$0xff] %v3013_v34  ;;  %v3019_v47 = vsub.f32 %v4606_v3, %v2863_v6  ;;  %v3037_v3 = vsub.f32 %v2814_v33, %v2863_v6 }
 0x1e8   :  { %v1075_v5 = vadd.f32 %v1074_v62, %v1012_v7  ;;  %v1016_v7 = vmul.f32 %v2995_v51, %v2995_v51  ;;  %v3025_v51 = vsub.f32 %v4607_v55, %v2863_v6  ;;  %v4609_v55 = vld [vmem:[#allocation16_spill] sm:$0xff]  ;;  %v1023_v33 = vmul.f32 %v3037_v3, %v3037_v3 }
 0x1ea   :  { %v1076_v59 = vadd.f32 %v1075_v5, %v1013_v11  ;;  %v1017_v11 = vmul.f32 %v3001_v10, %v3001_v10  ;;  %v3031_v10 = vsub.f32 %v4608_v38, %v2863_v6  ;;  %v3049_v38 = vsub.f32 %v2826_v57, %v2863_v6 }
 0x1ec   :  { %v1077_v45 = vadd.f32 %v1076_v59, %v1014_v17  ;;  %v1018_v17 = vmul.f32 %v3007_v63, %v3007_v63  ;;  %v1025_v57 = vmul.f32 %v3049_v38, %v3049_v38 }
 0x1ee   :  { %v1078_v62 = vadd.f32 %v1077_v45, %v1015_v29  ;;  %v1019_v29 = vmul.f32 %v3013_v34, %v3013_v34  ;;  %v3043_v34 = vsub.f32 %v4609_v55, %v2863_v6  ;;  %v3061_v55 = vsub.f32 %v2677_v20, %v2863_v6 }
 0x1f0   :  { %v1079_v5 = vadd.f32 %v1078_v62, %v1016_v7  ;;  %v1020_v7 = vmul.f32 %v3019_v47, %v3019_v47  ;;  %v1027_v20 = vmul.f32 %v3061_v55, %v3061_v55 }
 0x1f2   :  { %v1080_v59 = vadd.f32 %v1079_v5, %v1017_v11  ;;  %v1021_v11 = vmul.f32 %v3025_v51, %v3025_v51 }
 0x1f4   :  { %v1081_v45 = vadd.f32 %v1080_v59, %v1018_v17  ;;  %v1022_v17 = vmul.f32 %v3031_v10, %v3031_v10 }
 0x1f6   :  { %v1082_v62 = vadd.f32 %v1081_v45, %v1019_v29  ;;  %v3055_v45 = vsub.f32 %v2673_v16, %v2863_v6 }
 0x1f8   :  { %v1083_v5 = vadd.f32 %v1082_v62, %v1020_v7  ;;  %v1024_v7 = vmul.f32 %v3043_v34, %v3043_v34  ;;  %v1026_v16 = vmul.f32 %v3055_v45, %v3055_v45 }
 0x1fa   :  { %v1084_v59 = vadd.f32 %v1083_v5, %v1021_v11  ;;  %v3067_v5 = vsub.f32 %v2681_v24, %v2863_v6 }
 0x1fc   :  { %v1085_v29 = vadd.f32 %v1084_v59, %v1022_v17  ;;  %v3073_v59 = vsub.f32 %v2685_v28, %v2863_v6  ;;  %v1028_v24 = vmul.f32 %v3067_v5, %v3067_v5 }
 0x1fe   :  { %v1086_v62 = vadd.f32 %v1085_v29, %v1023_v33  ;;  %v3079_v29 = vsub.f32 %v2689_v32, %v2863_v6  ;;  %v1029_v28 = vmul.f32 %v3073_v59, %v3073_v59 }
 0x200   :  { %v1087_v11 = vadd.f32 %v1086_v62, %v1024_v7  ;;  %v3085_v62 = vsub.f32 %v2693_v36, %v2863_v6  ;;  %v1030_v32 = vmul.f32 %v3079_v29, %v3079_v29 }
 0x202   :  { %v1088_v17 = vadd.f32 %v1087_v11, %v1025_v57  ;;  %v3091_v11 = vsub.f32 %v2697_v40, %v2863_v6  ;;  %v1031_v36 = vmul.f32 %v3085_v62, %v3085_v62 }
 0x204   :  { %v1089_v33 = vadd.f32 %v1088_v17, %v1026_v16  ;;  %v3097_v17 = vsub.f32 %v2701_v44, %v2863_v6  ;;  %v1032_v40 = vmul.f32 %v3091_v11, %v3091_v11 }
 0x206   :  { %v1090_v7 = vadd.f32 %v1089_v33, %v1027_v20  ;;  %v3103_v33 = vsub.f32 %v2705_v48, %v2863_v6  ;;  %v1033_v44 = vmul.f32 %v3097_v17, %v3097_v17 }
 0x208   :  { %v1091_v57 = vadd.f32 %v1090_v7, %v1028_v24  ;;  %v3109_v7 = vsub.f32 %v2709_v52, %v2863_v6  ;;  %v1034_v48 = vmul.f32 %v3103_v33, %v3103_v33 }
 0x20a   :  { %v1092_v16 = vadd.f32 %v1091_v57, %v1029_v28  ;;  %v3115_v57 = vsub.f32 %v2713_v56, %v2863_v6  ;;  %v1035_v52 = vmul.f32 %v3109_v7, %v3109_v7 }
 0x20c   :  { %v1093_v20 = vadd.f32 %v1092_v16, %v1030_v32  ;;  %v3121_v16 = vsub.f32 %v2717_v60, %v2863_v6  ;;  %v1036_v56 = vmul.f32 %v3115_v57, %v3115_v57 }
 0x20e   :  { %v1094_v24 = vadd.f32 %v1093_v20, %v1031_v36  ;;  %v3127_v20 = vsub.f32 %v2721_v0, %v2863_v6  ;;  %v1037_v60 = vmul.f32 %v3121_v16, %v3121_v16 }
 0x210   :  { %v1095_v28 = vadd.f32 %v1094_v24, %v1032_v40  ;;  %v3133_v24 = vsub.f32 %v2725_v4, %v2863_v6  ;;  %v1038_v0 = vmul.f32 %v3127_v20, %v3127_v20 }
 0x212   :  { %v1096_v32 = vadd.f32 %v1095_v28, %v1033_v44  ;;  %v3139_v28 = vsub.f32 %v2729_v8, %v2863_v6  ;;  %v1039_v4 = vmul.f32 %v3133_v24, %v3133_v24 }
 0x214   :  { %v1097_v36 = vadd.f32 %v1096_v32, %v1034_v48  ;;  %v3145_v32 = vsub.f32 %v2733_v12, %v2863_v6  ;;  %v1040_v8 = vmul.f32 %v3139_v28, %v3139_v28 }
 0x216   :  { %v1098_v40 = vadd.f32 %v1097_v36, %v1035_v52  ;;  %v3151_v36 = vsub.f32 %v2737_v18, %v2863_v6  ;;  %v1041_v12 = vmul.f32 %v3145_v32, %v3145_v32 }
 0x218   :  { %v1099_v44 = vadd.f32 %v1098_v40, %v1036_v56  ;;  %4610 = vst [vmem:[#allocation12_spill] sm:$0xff] %v3151_v36  ;;  %v3157_v40 = vsub.f32 %v2744_v30, %v2863_v6  ;;  %v1042_v18 = vmul.f32 %v3151_v36, %v3151_v36 }
 0x21a   :  { %v1100_v48 = vadd.f32 %v1099_v44, %v1037_v60  ;;  %4611 = vst [vmem:[#allocation13_spill] sm:$0xff] %v3157_v40  ;;  %v3163_v44 = vsub.f32 %v2750_v42, %v2863_v6  ;;  %v1043_v30 = vmul.f32 %v3157_v40, %v3157_v40 }
 0x21c   :  { %v1101_v52 = vadd.f32 %v1100_v48, %v1038_v0  ;;  %4612 = vst [vmem:[#allocation14_spill] sm:$0xff] %v3163_v44  ;;  %v3169_v48 = vsub.f32 %v2756_v54, %v2863_v6  ;;  %v1044_v42 = vmul.f32 %v3163_v44, %v3163_v44 }
 0x21e   :  { %v1102_v56 = vadd.f32 %v1101_v52, %v1039_v4  ;;  %v3175_v52 = vsub.f32 %v2762_v2, %v2863_v6  ;;  %v1045_v54 = vmul.f32 %v3169_v48, %v3169_v48 }
 0x220   :  { %v1103_v60 = vadd.f32 %v1102_v56, %v1040_v8  ;;  %v3181_v56 = vsub.f32 %v2768_v14, %v2863_v6 }
 0x222   :  { %v1104_v0 = vadd.f32 %v1103_v60, %v1041_v12  ;;  %v4613_v60 = vld [vmem:[#allocation7_spill] sm:$0xff] }
 0x223   :  { %v984_v40 = vsub.f32 %v4613_v60, %v2863_v6  ;;  %v3201_v60 = vsub.f32 %v2792_v26, %v2863_v6 }
 0x224   :  { %v1105_v4 = vadd.f32 %v1104_v0, %v1042_v18  ;;  %v1046_v18 = vmul.f32 %v3175_v52, %v3175_v52  ;;  %v4614_v0 = vld [vmem:[#allocation9_spill] sm:$0xff] }
 0x225   :  { %v3191_v36 = vsub.f32 %v4614_v0, %v2863_v6  ;;  %4617 = vst [vmem:[#allocation16_spill] sm:$0xff] %v3201_v60  ;;  %v3207_v0 = vsub.f32 %v2798_v58, %v2863_v6  ;;  %v1051_v26 = vmul.f32 %v3201_v60, %v3201_v60 }
 0x226   :  { %v1106_v8 = vadd.f32 %v1105_v4, %v1043_v30  ;;  %v1047_v30 = vmul.f32 %v3181_v56, %v3181_v56  ;;  %v4615_v4 = vld [vmem:[#allocation11_spill] sm:$0xff] }
 0x227   :  { %v3197_v44 = vsub.f32 %v4615_v4, %v2863_v6  ;;  %4618 = vst [vmem:[#allocation7_spill] sm:$0xff] %v3207_v0  ;;  %v3213_v4 = vsub.f32 %v2804_v41, %v2863_v6  ;;  %v1052_v58 = vmul.f32 %v3207_v0, %v3207_v0 }
 0x228   :  { %v1107_v12 = vadd.f32 %v1106_v8, %v1044_v42  ;;  %v1048_v42 = vmul.f32 %v984_v40, %v984_v40 }
 0x229   :  { %4616 = vst [vmem:[#allocation15_spill] sm:$0xff] %v3197_v44  ;;  %4619 = vst [vmem:[#allocation9_spill] sm:$0xff] %v3213_v4  ;;  %v1053_v41 = vmul.f32 %v3213_v4, %v3213_v4 }
 0x22a   :  { %v1108_v2 = vadd.f32 %v1107_v12, %v1045_v54  ;;  %v1049_v54 = vmul.f32 %v3191_v36, %v3191_v36 }
 0x22c   :  { %v1109_v14 = vadd.f32 %v1108_v2, %v1046_v18  ;;  %v1050_v18 = vmul.f32 %v3197_v44, %v3197_v44 }
 0x22e   :  { %v1110_v8 = vadd.f32 %v1109_v14, %v1047_v30  ;;  %v3219_v14 = vsub.f32 %v2810_v53, %v2863_v6 }
 0x230   :  { %v1111_v12 = vadd.f32 %v1110_v8, %v1048_v42  ;;  %4620 = vst [vmem:[#allocation11_spill] sm:$0xff] %v3219_v14  ;;  %v3225_v8 = vsub.f32 %v2816_v13, %v2863_v6  ;;  %v1054_v53 = vmul.f32 %v3219_v14, %v3219_v14 }
 0x232   :  { %v1112_v2 = vadd.f32 %v1111_v12, %v1049_v54  ;;  %4621 = vst [vmem:[#allocation19_spill] sm:$0xff] %v3225_v8  ;;  %v3231_v12 = vsub.f32 %v2822_v49, %v2863_v6  ;;  %v1055_v13 = vmul.f32 %v3225_v8, %v3225_v8  ;;  %v1133_v8 = vlaneseq }
 0x234   :  { %v1113_v30 = vadd.f32 %v1112_v2, %v1050_v18  ;;  %v3237_v2 = vsub.f32 %v2828_v25, %v2863_v6 }
 0x236   :  { %v1114_v42 = vadd.f32 %v1113_v30, %v1051_v26  ;;  %4622 = vst [vmem:[#allocation20_spill] sm:$0xff] %v3237_v2  ;;  %v1056_v30 = vmul.f32 %v3231_v12, %v3231_v12  ;;  %v1057_v49 = vmul.f32 %v3237_v2, %v3237_v2 }
 0x238   :  { %v1115_v54 = vadd.f32 %v1114_v42, %v1052_v58 }
 0x23a   :  { %v1116_v18 = vadd.f32 %v1115_v54, %v1053_v41 }
 0x23c   :  { %v1117_v26 = vadd.f32 %v1116_v18, %v1054_v53  ;;  %v1134_v53 = vshrl.u32 %v1133_v8, 7  ;;  %v4624_v8 = vld [vmem:[#allocation17_spill] sm:$0xff] }
 0x23e   :  { %v1118_v58 = vadd.f32 %v1117_v26, %v1055_v13  ;;  %v1128_v13 = vld [vmem:[%s4505_s2] sm:$0x1]  ;;  %v1135_v2 = vsub.s32 0, %v1134_v53  ;;  %v4631_v53 = vld [vmem:[#allocation8_spill] sm:$0xff] }
 0x240   :  { %v1119_v42 = vadd.f32 %v1118_v58, %v1056_v30  ;;  %v4626_v58 = vld [vmem:[#allocation2_spill] sm:$0xff] }
 0x242   :  { %v1120_v4 = vadd.f32 %v1119_v42, %v1057_v49  ;;  %v4627_v49 = vld [vmem:[#allocation3_spill] sm:$0xff]  ;;  %v4628_v42 = vld [vmem:[#allocation4_spill] sm:$0xff] }
 0x244   :  { %v1121_v0 = vrot.slane %v1120_v4, 4 }
 0x246   :  { %v1122_v14 = vadd.f32 %v1121_v0, %v1120_v4 }
 0x248   :  { %v1123_v41 = vrot.slane %v1122_v14, 2 }
 0x24a   :  { %v1124_v54 = vadd.f32 %v1123_v41, %v1122_v14  ;;  %v4629_v41 = vld [vmem:[#allocation5_spill] sm:$0xff] }
 0x24c   :  { %v1125_v60 = vrot.slane %v1124_v54, 1 }
 0x24e   :  { %v1126_v6 = vadd.f32 %v1125_v60, %v1124_v54 }
 0x250   :  { %v1127_v25 = vmul.f32 0.001953125, %v1126_v6  ;;  %v4630_v6 = vld [vmem:[#allocation6_spill] sm:$0xff] }
 0x252   :  { %v1129_v44 = vadd.f32 1e-05, %v1127_v25 }
 0x254   :  { %2354 = vrsqrt.f32 %v1129_v44 }
 0x261   :  { %v2355_v18 = vpop.eup %2354 }
 0x262   :  { %v1131_v26 = vmul.f32 %v2355_v18, %v1128_v13 }
 0x264   :  { %v3248_v30 = vrot.slane %v1131_v26, %v1135_v2  ;;  %v4625_v2 = vld [vmem:[#allocation18_spill] sm:$0xff] }
 0x265   :  { %v4632_v26 = vld [vmem:[#allocation10_spill] sm:$0xff] }
 0x266   :  { %v3251_v0 = vmul.f32 %v3248_v30, %v984_v40  ;;  %v3255_v60 = vmul.f32 %v3248_v30, %v2867_v1  ;;  %v3259_v44 = vmul.f32 %v3248_v30, %v2871_v21  ;;  %v3263_v4 = vmul.f32 %v3248_v30, %v2875_v9 }
 0x267   :  { %v3267_v14 = vmul.f32 %v3248_v30, %v2883_v50  ;;  %v3271_v40 = vmul.f32 %v3248_v30, %v2887_v15  ;;  %v3275_v1 = vmul.f32 %v3248_v30, %v2893_v23  ;;  %v3279_v21 = vmul.f32 %v3248_v30, %v2899_v27 }
 0x268   :  { %4623 = vst [vmem:[#allocation21_spill] sm:$0xff] %v3251_v0  ;;  %v3283_v9 = vmul.f32 %v3248_v30, %v2905_v46  ;;  %v3287_v50 = vmul.f32 %v3248_v30, %v2911_v61  ;;  %v3291_v15 = vmul.f32 %v3248_v30, %v2917_v22  ;;  %v3295_v23 = vmul.f32 %v3248_v30, %v2923_v19  ;;  %v4642_v0 = vld [vmem:[#allocation16_spill] sm:$0xff] }
 0x269   :  { %v3299_v27 = vmul.f32 %v3248_v30, %v2929_v37  ;;  %v3303_v46 = vmul.f32 %v3248_v30, %v2935_v31  ;;  %v3307_v61 = vmul.f32 %v3248_v30, %v2941_v35  ;;  %v3311_v22 = vmul.f32 %v3248_v30, %v2947_v39 }
 0x26a   :  { %v3315_v19 = vmul.f32 %v3248_v30, %v2953_v43  ;;  %v3319_v37 = vmul.f32 %v3248_v30, %v4624_v8  ;;  %v3323_v31 = vmul.f32 %v3248_v30, %v4625_v2  ;;  %v3327_v35 = vmul.f32 %v3248_v30, %v4626_v58 }
 0x26b   :  { %v3331_v39 = vmul.f32 %v3248_v30, %v4627_v49  ;;  %v3335_v43 = vmul.f32 %v3248_v30, %v4628_v42  ;;  %v3339_v54 = vmul.f32 %v3248_v30, %v4629_v41  ;;  %v3343_v25 = vmul.f32 %v3248_v30, %v4630_v6  ;;  %v4633_v41 = vld [vmem:[#allocation12_spill] sm:$0xff]  ;;  %v4634_v6 = vld [vmem:[#allocation13_spill] sm:$0xff] }
 0x26c   :  { %v3347_v18 = vmul.f32 %v3248_v30, %v4631_v53  ;;  %v3351_v13 = vmul.f32 %v3248_v30, %v3007_v63  ;;  %v3355_v8 = vmul.f32 %v3248_v30, %v4632_v26  ;;  %v3359_v2 = vmul.f32 %v3248_v30, %v3019_v47  ;;  %v4635_v53 = vld [vmem:[#allocation14_spill] sm:$0xff] }
 0x26d   :  { %v3363_v58 = vmul.f32 %v3248_v30, %v3025_v51  ;;  %v3367_v49 = vmul.f32 %v3248_v30, %v3031_v10  ;;  %v3371_v63 = vmul.f32 %v3248_v30, %v3037_v3  ;;  %v3375_v42 = vmul.f32 %v3248_v30, %v3043_v34 }
 0x26e   :  { %v3379_v47 = vmul.f32 %v3248_v30, %v3049_v38  ;;  %v3383_v51 = vmul.f32 %v3248_v30, %v3055_v45  ;;  %v3387_v10 = vmul.f32 %v3248_v30, %v3061_v55  ;;  %v3391_v3 = vmul.f32 %v3248_v30, %v3067_v5 }
 0x26f   :  { %v3395_v34 = vmul.f32 %v3248_v30, %v3073_v59  ;;  %v3399_v38 = vmul.f32 %v3248_v30, %v3079_v29  ;;  %v3403_v45 = vmul.f32 %v3248_v30, %v3085_v62  ;;  %v3407_v55 = vmul.f32 %v3248_v30, %v3091_v11 }
 0x270   :  { %v3411_v5 = vmul.f32 %v3248_v30, %v3097_v17  ;;  %v3415_v59 = vmul.f32 %v3248_v30, %v3103_v33  ;;  %v3419_v29 = vmul.f32 %v3248_v30, %v3109_v7  ;;  %v3423_v62 = vmul.f32 %v3248_v30, %v3115_v57 }
 0x271   :  { %v3427_v11 = vmul.f32 %v3248_v30, %v3121_v16  ;;  %v3431_v17 = vmul.f32 %v3248_v30, %v3127_v20  ;;  %v3435_v33 = vmul.f32 %v3248_v30, %v3133_v24  ;;  %v3439_v7 = vmul.f32 %v3248_v30, %v3139_v28 }
 0x272   :  { %v3443_v57 = vmul.f32 %v3248_v30, %v3145_v32  ;;  %v3447_v16 = vmul.f32 %v3248_v30, %v4633_v41  ;;  %v3451_v20 = vmul.f32 %v3248_v30, %v4634_v6  ;;  %v3455_v24 = vmul.f32 %v3248_v30, %v4635_v53  ;;  %v3472_v41 = vld [vmem:[%s4506_s3] ss:$0 sm:$0xff]  ;;  %v4641_v53 = vld [vmem:[#allocation15_spill] sm:$0xff] }
 0x273   :  { %v3459_v28 = vmul.f32 %v3248_v30, %v3169_v48  ;;  %v3463_v32 = vmul.f32 %v3248_v30, %v3175_v52  ;;  %v3467_v26 = vmul.f32 %v3248_v30, %v3181_v56  ;;  %v3476_v6 = vmul.f32 %v3248_v30, %v3191_v36 }
 0x274   :  { %4636 = vst [vmem:[#allocation17_spill] sm:$0xff] %v3455_v24  ;;  %v3480_v48 = vmul.f32 %v3248_v30, %v4641_v53  ;;  %v3484_v52 = vmul.f32 %v3248_v30, %v4642_v0  ;;  %v4646_v24 = vld [vmem:[#allocation11_spill] sm:$0xff]  ;;  %v3504_v0 = vmul.f32 %v3248_v30, %v3231_v12  ;;  %v3524_v12 = vadd.f32 %v3472_v41, %v3267_v14 }
 0x275   :  { %4637 = vst [vmem:[#allocation18_spill] sm:$0xff] %v3459_v28  ;;  %4638 = vst [vmem:[#allocation2_spill] sm:$0xff] %v3463_v32  ;;  %v4644_v32 = vld [vmem:[#allocation7_spill] sm:$0xff]  ;;  %v3496_v36 = vmul.f32 %v3248_v30, %v4646_v24  ;;  %v3516_v24 = vadd.f32 %v3472_v41, %v3259_v44  ;;  %v3536_v44 = vadd.f32 %v3472_v41, %v3279_v21 }
 0x276   :  { %4639 = vst [vmem:[#allocation3_spill] sm:$0xff] %v3467_v26  ;;  %4640 = vst [vmem:[#allocation4_spill] sm:$0xff] %v3476_v6  ;;  %v3488_v56 = vmul.f32 %v3248_v30, %v4644_v32  ;;  %v4645_v26 = vld [vmem:[#allocation9_spill] sm:$0xff]  ;;  %v4647_v6 = vld [vmem:[#allocation19_spill] sm:$0xff]  ;;  %v3544_v14 = vadd.f32 %v3472_v41, %v3287_v50  ;;  %v3556_v21 = vadd.f32 %v3472_v41, %v3299_v27  ;;  %vm1276_vm5 = vcmp.gt.f32.partialorder %v3524_v12, 0.0 }
 0x277   :  { %4643 = vst [vmem:[#allocation5_spill] sm:$0xff] %v3484_v52  ;;  %v3492_v28 = vmul.f32 %v3248_v30, %v4645_v26  ;;  %v3500_v53 = vmul.f32 %v3248_v30, %v4647_v6  ;;  %v4648_v52 = vld [vmem:[#allocation20_spill] sm:$0xff]  ;;  %v3512_v26 = vadd.f32 %v3472_v41, %v3255_v60  ;;  %v3520_v6 = vadd.f32 %v3472_v41, %v3263_v4 }
 0x278   :  { %v3508_v32 = vmul.f32 %v3248_v30, %v4648_v52  ;;  %v3528_v30 = vadd.f32 %v3472_v41, %v3271_v40  ;;  %v3532_v60 = vadd.f32 %v3472_v41, %v3275_v1  ;;  %v3540_v4 = vadd.f32 %v3472_v41, %v3283_v9 }
 0x279   :  { %v3548_v40 = vadd.f32 %v3472_v41, %v3291_v15  ;;  %v3552_v1 = vadd.f32 %v3472_v41, %v3295_v23  ;;  %v3560_v9 = vadd.f32 %v3472_v41, %v3303_v46  ;;  %v3564_v50 = vadd.f32 %v3472_v41, %v3307_v61 }
 0x27a   :  { %v3568_v15 = vadd.f32 %v3472_v41, %v3311_v22  ;;  %v3572_v23 = vadd.f32 %v3472_v41, %v3315_v19  ;;  %v3576_v27 = vadd.f32 %v3472_v41, %v3319_v37  ;;  %v3580_v46 = vadd.f32 %v3472_v41, %v3323_v31 }
 0x27b   :  { %v3584_v61 = vadd.f32 %v3472_v41, %v3327_v35  ;;  %v3588_v22 = vadd.f32 %v3472_v41, %v3331_v39  ;;  %v3592_v19 = vadd.f32 %v3472_v41, %v3335_v43  ;;  %v3596_v37 = vadd.f32 %v3472_v41, %v3339_v54  ;;  %v4654_v52 = vld [vmem:[#allocation17_spill] sm:$0xff] }
 0x27c   :  { %v3600_v31 = vadd.f32 %v3472_v41, %v3343_v25  ;;  %v3604_v35 = vadd.f32 %v3472_v41, %v3347_v18  ;;  %v3608_v39 = vadd.f32 %v3472_v41, %v3351_v13  ;;  %v3612_v43 = vadd.f32 %v3472_v41, %v3355_v8 }
 0x27d   :  { %v3616_v54 = vadd.f32 %v3472_v41, %v3359_v2  ;;  %v3620_v25 = vadd.f32 %v3472_v41, %v3363_v58  ;;  %v3624_v18 = vadd.f32 %v3472_v41, %v3367_v49  ;;  %v3628_v13 = vadd.f32 %v3472_v41, %v3371_v63 }
 0x27e   :  { %v3632_v8 = vadd.f32 %v3472_v41, %v3375_v42  ;;  %v3636_v2 = vadd.f32 %v3472_v41, %v3379_v47  ;;  %v3640_v58 = vadd.f32 %v3472_v41, %v3383_v51  ;;  %v3644_v49 = vadd.f32 %v3472_v41, %v3387_v10 }
 0x27f   :  { %v3648_v63 = vadd.f32 %v3472_v41, %v3391_v3  ;;  %v3652_v42 = vadd.f32 %v3472_v41, %v3395_v34  ;;  %v3656_v47 = vadd.f32 %v3472_v41, %v3399_v38  ;;  %v3660_v51 = vadd.f32 %v3472_v41, %v3403_v45 }
 0x280   :  { %v3664_v10 = vadd.f32 %v3472_v41, %v3407_v55  ;;  %v3668_v3 = vadd.f32 %v3472_v41, %v3411_v5  ;;  %v3672_v34 = vadd.f32 %v3472_v41, %v3415_v59  ;;  %v3676_v38 = vadd.f32 %v3472_v41, %v3419_v29 }
 0x281   :  { %v3680_v45 = vadd.f32 %v3472_v41, %v3423_v62  ;;  %v3684_v55 = vadd.f32 %v3472_v41, %v3427_v11  ;;  %v3688_v5 = vadd.f32 %v3472_v41, %v3431_v17  ;;  %v3692_v59 = vadd.f32 %v3472_v41, %v3435_v33 }
 0x282   :  { %v3696_v29 = vadd.f32 %v3472_v41, %v3439_v7  ;;  %v3700_v62 = vadd.f32 %v3472_v41, %v3443_v57  ;;  %v3704_v11 = vadd.f32 %v3472_v41, %v3447_v16  ;;  %v3708_v17 = vadd.f32 %v3472_v41, %v3451_v20 }
 0x283   :  { %4649 = vst [vmem:[#allocation6_spill] sm:$0xff] %v3692_v59  ;;  %v3712_v33 = vadd.f32 %v3472_v41, %v4654_v52  ;;  %v4656_v59 = vld [vmem:[#allocation18_spill] sm:$0xff]  ;;  %vm1273_vm2 = vcmp.gt.f32.partialorder %v3512_v26, 0.0  ;;  %vm1274_vm3 = vcmp.gt.f32.partialorder %v3516_v24, 0.0  ;;  %vm1275_vm4 = vcmp.gt.f32.partialorder %v3520_v6, 0.0 }
 0x284   :  { %4650 = vst [vmem:[#allocation8_spill] sm:$0xff] %v3696_v29  ;;  %4651 = vst [vmem:[#allocation10_spill] sm:$0xff] %v3700_v62  ;;  %v3716_v7 = vadd.f32 %v3472_v41, %v4656_v59  ;;  %v4658_v29 = vld [vmem:[#allocation2_spill] sm:$0xff]  ;;  %v4660_v62 = vld [vmem:[#allocation3_spill] sm:$0xff]  ;;  %v3736_v59 = vadd.f32 %v3472_v41, %v3480_v48  ;;  %v3756_v48 = vadd.f32 %v3472_v41, %v3500_v53  ;;  %vm1277_vm6 = vcmp.gt.f32.partialorder %v3528_v30, 0.0 }
 0x285   :  { %4652 = vst [vmem:[#allocation12_spill] sm:$0xff] %v3704_v11  ;;  %4653 = vst [vmem:[#allocation13_spill] sm:$0xff] %v3708_v17  ;;  %v3720_v57 = vadd.f32 %v3472_v41, %v4658_v29  ;;  %v3724_v16 = vadd.f32 %v3472_v41, %v4660_v62  ;;  %v4662_v11 = vld [vmem:[#allocation21_spill] sm:$0xff]  ;;  %v4664_v17 = vld [vmem:[#allocation4_spill] sm:$0xff]  ;;  %v3744_v62 = vadd.f32 %v3472_v41, %v3488_v56  ;;  %vm1278_vm7 = vcmp.gt.f32.partialorder %v3532_v60, 0.0 }
 0x286   :  { %4655 = vst [vmem:[#allocation14_spill] sm:$0xff] %v3712_v33  ;;  %4657 = vst [vmem:[#allocation15_spill] sm:$0xff] %v3716_v7  ;;  %v3728_v20 = vadd.f32 %v3472_v41, %v4662_v11  ;;  %v3732_v52 = vadd.f32 %v3472_v41, %v4664_v17  ;;  %v4667_v7 = vld [vmem:[#allocation5_spill] sm:$0xff]  ;;  %v3748_v11 = vadd.f32 %v3472_v41, %v3492_v28  ;;  %vm1279_vm8 = vcmp.gt.f32.partialorder %v3536_v44, 0.0 }
 0x287   :  { %4659 = vst [vmem:[#allocation16_spill] sm:$0xff] %v3720_v57  ;;  %4661 = vst [vmem:[#allocation7_spill] sm:$0xff] %v3724_v16  ;;  %v3740_v29 = vadd.f32 %v3472_v41, %v4667_v7  ;;  %v3752_v17 = vadd.f32 %v3472_v41, %v3496_v36  ;;  %vm1280_vm9 = vcmp.gt.f32.partialorder %v3540_v4, 0.0  ;;  %vm1281_vm10 = vcmp.gt.f32.partialorder %v3544_v14, 0.0 }
 0x288   :  { %4663 = vst [vmem:[#allocation9_spill] sm:$0xff] %v3728_v20  ;;  %4665 = vst [vmem:[#allocation11_spill] sm:$0xff] %v3732_v52  ;;  %v3769_v28 = vadd.f32 %v3472_v41, %v3504_v0  ;;  %vm1282_vm11 = vcmp.gt.f32.partialorder %v3548_v40, 0.0  ;;  %v1337_v56 = vmul.f32 0.2, %v3512_v26  ;;  %v3777_v7 = vadd.f32 %v3472_v41, %v3508_v32 }
 0x289   :  { %4666 = vst [vmem:[#allocation19_spill] sm:$0xff] %v3736_v59  ;;  %4668 = vst [vmem:[#allocation20_spill] sm:$0xff] %v3740_v29  ;;  %v1338_v36 = vmul.f32 0.2, %v3516_v24  ;;  %v1339_v53 = vmul.f32 0.2, %v3520_v6 }
 0x28a   :  { %4669 = vst [vmem:[#allocation17_spill] sm:$0xff] %v3744_v62  ;;  %4670 = vst [vmem:[#allocation18_spill] sm:$0xff] %v3748_v11  ;;  %vm1283_vm12 = vcmp.gt.f32.partialorder %v3552_v1, 0.0  ;;  %v1342_v0 = vmul.f32 0.2, %v3532_v60  ;;  %vm1284_vm13 = vcmp.gt.f32.partialorder %v3556_v21, 0.0  ;;  %v3790_v41 = vsel %vm1273_vm2, %v3512_v26, %v1337_v56 }
 0x28b   :  { %4671 = vst [vmem:[#allocation2_spill] sm:$0xff] %v3752_v17  ;;  %4672 = vst [vmem:[#allocation3_spill] sm:$0xff] %v3756_v48  ;;  %v1340_v48 = vmul.f32 0.2, %v3524_v12  ;;  %v1341_v17 = vmul.f32 0.2, %v3528_v30  ;;  %v3801_v59 = vsel %vm1274_vm3, %v3516_v24, %v1338_v36 }
 0x28c   :  { %4673 = vst [vmem:[#allocation21_spill] sm:$0xff] %v3769_v28  ;;  %4674 = vst [vmem:[#allocation4_spill] sm:$0xff] %v3777_v7  ;;  %v1343_v28 = vmul.f32 0.2, %v3536_v44  ;;  %v1344_v11 = vmul.f32 0.2, %v3540_v4 }
 0x28d   :  { %v1345_v62 = vmul.f32 0.2, %v3544_v14  ;;  %4675 = vst [vmem:[#allocation5_spill] sm:$0xff] %v3790_v41  ;;  %vm1285_vm14 = vcmp.gt.f32.partialorder %v3560_v9, 0.0  ;;  %v1346_v32 = vmul.f32 0.2, %v3548_v40  ;;  %v3816_v41 = vsel %vm1275_vm4, %v3520_v6, %v1339_v53 }
 0x28e   :  { %v1347_v7 = vmul.f32 0.2, %v3552_v1  ;;  %v3796_v29 = vmul.f32 0.2, %v3556_v21  ;;  %4676 = vst [vmem:[#allocation22_spill] sm:$0xff] %v3801_v59  ;;  %vm1286_vm15 = vcmp.gt.f32.partialorder %v3564_v50, 0.0  ;;  %v3831_v20 = vsel %vm1276_vm5, %v3524_v12, %v1340_v48 }
 0x28f   :  { %v3805_v52 = vmul.f32 0.2, %v3560_v9  ;;  %v3808_v26 = vmul.f32 0.2, %v3564_v50  ;;  %v3811_v56 = vmul.f32 0.2, %v3568_v15 }
 0x290   :  { %4677 = vst [vmem:[#allocation23_spill] sm:$0xff] %v3816_v41  ;;  %vm1287_vm0 = vcmp.gt.f32.partialorder %v3568_v15, 0.0  ;;  %v3820_v24 = vmul.f32 0.2, %v3572_v23  ;;  %v3823_v36 = vmul.f32 0.2, %v3576_v27 }
 0x291   :  { %v3826_v59 = vmul.f32 0.2, %v3580_v46  ;;  %4679 = vst [vmem:[#allocation25_spill] sm:$0xff] %v3831_v20  ;;  %vm1288_vm1 = vcmp.gt.f32.partialorder %v3572_v23, 0.0  ;;  %v3835_v6 = vmul.f32 0.2, %v3584_v61 }
 0x292   :  { %v3838_v53 = vmul.f32 0.2, %v3588_v22  ;;  %v3841_v41 = vmul.f32 0.2, %v3592_v19  ;;  %vm1289_vm2 = vcmp.gt.f32.partialorder %v3576_v27, 0.0  ;;  %vm1290_vm3 = vcmp.gt.f32.partialorder %v3580_v46, 0.0 }
 0x293   :  { %4678 = vst [vmem:[#allocation24_spill] sm:$0xff] %v3826_v59  ;;  %v3846_v59 = vsel %vm1277_vm6, %v3528_v30, %v1341_v17  ;;  %v3850_v12 = vmul.f32 0.2, %v3596_v37  ;;  %v3853_v48 = vmul.f32 0.2, %v3600_v31  ;;  %vm1291_vm4 = vcmp.gt.f32.partialorder %v3584_v61, 0.0 }
 0x294   :  { %4680 = vst [vmem:[#allocation26_spill] sm:$0xff] %v3841_v41  ;;  %4681 = vst [vmem:[#allocation27_spill] sm:$0xff] %v3846_v59  ;;  %v3856_v20 = vmul.f32 0.2, %v3604_v35  ;;  %v3861_v41 = vsel %vm1278_vm7, %v3532_v60, %v1342_v0  ;;  %v3865_v30 = vmul.f32 0.2, %v3608_v39 }
 0x295   :  { %4683 = vst [vmem:[#allocation29_spill] sm:$0xff] %v3861_v41  ;;  %v3868_v17 = vmul.f32 0.2, %v3612_v43  ;;  %v3871_v59 = vmul.f32 0.2, %v3616_v54  ;;  %vm1292_vm5 = vcmp.gt.f32.partialorder %v3588_v22, 0.0 }
 0x296   :  { %4682 = vst [vmem:[#allocation28_spill] sm:$0xff] %v3856_v20  ;;  %v3876_v20 = vsel %vm1279_vm8, %v3536_v44, %v1343_v28  ;;  %v3880_v60 = vmul.f32 0.2, %v3620_v25  ;;  %v3883_v0 = vmul.f32 0.2, %v3624_v18  ;;  %vm1295_vm8 = vcmp.gt.f32.partialorder %v3600_v31, 0.0 }
 0x297   :  { %4684 = vst [vmem:[#allocation30_spill] sm:$0xff] %v3871_v59  ;;  %4685 = vst [vmem:[#allocation31_spill] sm:$0xff] %v3876_v20  ;;  %v3886_v41 = vmul.f32 0.2, %v3628_v13  ;;  %v3891_v59 = vsel %vm1280_vm9, %v3540_v4, %v1344_v11  ;;  %v3897_v44 = vmul.f32 0.2, %v3632_v8  ;;  %v3908_v4 = vsel %vm1281_vm10, %v3544_v14, %v1345_v62 }
 0x298   :  { %4686 = vst [vmem:[#allocation32_spill] sm:$0xff] %v3891_v59  ;;  %v3900_v28 = vmul.f32 0.2, %v3636_v2  ;;  %v3903_v20 = vmul.f32 0.2, %v3640_v58  ;;  %4688 = vst [vmem:[#allocation34_spill] sm:$0xff] %v3908_v4  ;;  %v3926_v14 = vsel %vm1282_vm11, %v3548_v40, %v1346_v32  ;;  %v3944_v40 = vsel %vm1283_vm12, %v3552_v1, %v1347_v7 }
 0x299   :  { %v3915_v11 = vmul.f32 0.2, %v3644_v49  ;;  %v3918_v59 = vmul.f32 0.2, %v3648_v63  ;;  %4690 = vst [vmem:[#allocation36_spill] sm:$0xff] %v3926_v14  ;;  %vm1299_vm10 = vcmp.gt.f32.partialorder %v3616_v54, 0.0  ;;  %v3963_v1 = vsel %vm1284_vm13, %v3556_v21, %v3796_v29 }
 0x29a   :  { %4687 = vst [vmem:[#allocation33_spill] sm:$0xff] %v3903_v20  ;;  %v3921_v20 = vmul.f32 0.2, %v3652_v42  ;;  %v3933_v62 = vmul.f32 0.2, %v3656_v47  ;;  %4692 = vst [vmem:[#allocation38_spill] sm:$0xff] %v3944_v40  ;;  %v3982_v21 = vsel %vm1285_vm14, %v3560_v9, %v3805_v52  ;;  %v4001_v9 = vsel %vm1286_vm15, %v3564_v50, %v3808_v26 }
 0x29b   :  { %v3936_v4 = vmul.f32 0.2, %v3660_v51  ;;  %vm1303_vm11 = vcmp.gt.f32.partialorder %v3632_v8, 0.0  ;;  %v3951_v32 = vmul.f32 0.2, %v3668_v3  ;;  %4695 = vst [vmem:[#allocation41_spill] sm:$0xff] %v3963_v1  ;;  %v4020_v50 = vsel %vm1287_vm0, %v3568_v15, %v3811_v56 }
 0x29c   :  { %4689 = vst [vmem:[#allocation35_spill] sm:$0xff] %v3921_v20  ;;  %v3939_v20 = vmul.f32 0.2, %v3664_v10  ;;  %v3954_v14 = vmul.f32 0.2, %v3672_v34  ;;  %vm1307_vm12 = vcmp.gt.f32.partialorder %v3648_v63, 0.0  ;;  %v4039_v15 = vsel %vm1288_vm1, %v3572_v23, %v3820_v24 }
 0x29d   :  { %v3970_v7 = vmul.f32 0.2, %v3680_v45  ;;  %v3973_v40 = vmul.f32 0.2, %v3684_v55  ;;  %4699 = vst [vmem:[#allocation45_spill] sm:$0xff] %v3982_v21  ;;  %vm1311_vm13 = vcmp.gt.f32.partialorder %v3664_v10, 0.0  ;;  %v4052_v23 = vsel %vm1289_vm2, %v3576_v27, %v3823_v36 }
 0x29e   :  { %4691 = vst [vmem:[#allocation37_spill] sm:$0xff] %v3939_v20  ;;  %4693 = vst [vmem:[#allocation39_spill] sm:$0xff] %v3954_v14  ;;  %v3957_v20 = vmul.f32 0.2, %v3676_v38  ;;  %v4700_v29 = vld [vmem:[#allocation6_spill] sm:$0xff]  ;;  %vm1315_vm14 = vcmp.gt.f32.partialorder %v3680_v45, 0.0 }
 0x29f   :  { %4696 = vst [vmem:[#allocation42_spill] sm:$0xff] %v3970_v7  ;;  %4697 = vst [vmem:[#allocation43_spill] sm:$0xff] %v3973_v40  ;;  %v3989_v1 = vmul.f32 0.2, %v4700_v29  ;;  %v4702_v40 = vld [vmem:[#allocation8_spill] sm:$0xff]  ;;  %v4712_v26 = vld [vmem:[#allocation15_spill] sm:$0xff] }
 0x2a0   :  { %4694 = vst [vmem:[#allocation40_spill] sm:$0xff] %v3957_v20  ;;  %v3976_v20 = vmul.f32 0.2, %v3688_v5  ;;  %v3992_v7 = vmul.f32 0.2, %v4702_v40  ;;  %4706 = vst [vmem:[#allocation46_spill] sm:$0xff] %v4001_v9 }
 0x2a1   :  { %4701 = vst [vmem:[#allocation6_spill] sm:$0xff] %v3989_v1  ;;  %v4707_v52 = vld [vmem:[#allocation12_spill] sm:$0xff]  ;;  %4711 = vst [vmem:[#allocation49_spill] sm:$0xff] %v4020_v50  ;;  %vm1319_vm15 = vcmp.gt.f32.partialorder %v4702_v40, 0.0  ;;  %v4027_v9 = vmul.f32 0.2, %v4712_v26 }
 0x2a2   :  { %4698 = vst [vmem:[#allocation44_spill] sm:$0xff] %v3976_v20  ;;  %4703 = vst [vmem:[#allocation8_spill] sm:$0xff] %v3992_v7  ;;  %v4704_v20 = vld [vmem:[#allocation10_spill] sm:$0xff]  ;;  %v4008_v21 = vmul.f32 0.2, %v4707_v52  ;;  %v4708_v7 = vld [vmem:[#allocation13_spill] sm:$0xff] }
 0x2a3   :  { %v3995_v14 = vmul.f32 0.2, %v4704_v20  ;;  %v4011_v1 = vmul.f32 0.2, %v4708_v7  ;;  %4713 = vst [vmem:[#allocation50_spill] sm:$0xff] %v4027_v9  ;;  %4716 = vst [vmem:[#allocation53_spill] sm:$0xff] %v4039_v15 }
 0x2a4   :  { %vm1323_vm0 = vcmp.gt.f32.partialorder %v3712_v33, 0.0  ;;  %v4717_v56 = vld [vmem:[#allocation9_spill] sm:$0xff]  ;;  %v4719_v7 = vld [vmem:[#allocation19_spill] sm:$0xff]  ;;  %4720 = vst [vmem:[#allocation54_spill] sm:$0xff] %v4052_v23  ;;  %v4721_v24 = vld [vmem:[#allocation20_spill] sm:$0xff]  ;;  %vm4731_vm9 = vcmp.gt.f32.partialorder %v3592_v19, 0.0 }
 0x2a5   :  { %4705 = vst [vmem:[#allocation10_spill] sm:$0xff] %v3995_v14  ;;  %4709 = vst [vmem:[#allocation47_spill] sm:$0xff] %v4011_v1  ;;  %v4014_v14 = vmul.f32 0.2, %v3712_v33  ;;  %v4030_v1 = vmul.f32 0.2, %v3720_v57 }
 0x2a6   :  { %v1391_v50 = vmul.f32 0.2, %v4717_v56  ;;  %vm1327_vm1 = vcmp.gt.f32.partialorder %v4717_v56, 0.0  ;;  %v1394_v15 = vmul.f32 0.2, %v4721_v24  ;;  %v4723_v26 = vld [vmem:[#allocation18_spill] sm:$0xff] }
 0x2a7   :  { %4710 = vst [vmem:[#allocation48_spill] sm:$0xff] %v4014_v14  ;;  %4714 = vst [vmem:[#allocation51_spill] sm:$0xff] %v4030_v1  ;;  %v4033_v14 = vmul.f32 0.2, %v3724_v16  ;;  %v4718_v1 = vld [vmem:[#allocation11_spill] sm:$0xff]  ;;  %v4722_v16 = vld [vmem:[#allocation17_spill] sm:$0xff] }
 0x2a8   :  { %v1392_v9 = vmul.f32 0.2, %v4718_v1  ;;  %v1395_v57 = vmul.f32 0.2, %v4722_v16  ;;  %v1396_v33 = vmul.f32 0.2, %v4723_v26 }
 0x2a9   :  { %4715 = vst [vmem:[#allocation52_spill] sm:$0xff] %v4033_v14  ;;  %v1393_v14 = vmul.f32 0.2, %v4719_v7  ;;  %v4724_v52 = vld [vmem:[#allocation24_spill] sm:$0xff]  ;;  %vm1331_vm2 = vcmp.gt.f32.partialorder %v4722_v16, 0.0  ;;  %v4726_v36 = vld [vmem:[#allocation2_spill] sm:$0xff] }
 0x2aa   :  { %v4065_v27 = vsel %vm1290_vm3, %v3580_v46, %v4724_v52  ;;  %vm1333_vm6 = vcmp.gt.f32.partialorder %v4726_v36, 0.0  ;;  %v4727_v23 = vld [vmem:[#allocation3_spill] sm:$0xff]  ;;  %v1397_v24 = vmul.f32 0.2, %v4726_v36  ;;  %v4728_v1 = vld [vmem:[#allocation21_spill] sm:$0xff]  ;;  %v4078_v46 = vsel %vm1291_vm4, %v3584_v61, %v3835_v6  ;;  %v4729_v52 = vld [vmem:[#allocation4_spill] sm:$0xff] }
 0x2ab   :  { %4725 = vst [vmem:[#allocation17_spill] sm:$0xff] %v4065_v27  ;;  %v1398_v7 = vmul.f32 0.2, %v4727_v23  ;;  %v1399_v56 = vmul.f32 0.2, %v4728_v1  ;;  %vm1335_vm3 = vcmp.gt.f32.partialorder %v4728_v1, 0.0  ;;  %v4087_v36 = vsel %vm1292_vm5, %v3588_v22, %v3838_v53 }
 0x2ac   :  { %vm1336_vm7 = vcmp.gt.f32.partialorder %v4729_v52, 0.0  ;;  %v1400_v27 = vmul.f32 0.2, %v4729_v52  ;;  %v4730_v23 = vld [vmem:[#allocation26_spill] sm:$0xff]  ;;  %vm4732_vm4 = vcmp.gt.f32.partialorder %v3596_v37, 0.0  ;;  %v4105_v6 = vsel %vm1295_vm8, %v3600_v31, %v3853_v48  ;;  %v4733_v22 = vld [vmem:[#allocation28_spill] sm:$0xff] }
 0x2ad   :  { %v4093_v26 = vsel %vm4731_vm9, %v3592_v19, %v4730_v23  ;;  %v4099_v61 = vsel %vm4732_vm4, %v3596_v37, %v3850_v12  ;;  %vm4734_vm5 = vcmp.gt.f32.partialorder %v3604_v35, 0.0  ;;  %vm4735_vm9 = vcmp.gt.f32.partialorder %v3608_v39, 0.0  ;;  %v4737_v31 = vld [vmem:[#allocation30_spill] sm:$0xff] }
 0x2ae   :  { %v4111_v53 = vsel %vm4734_vm5, %v3604_v35, %v4733_v22  ;;  %v4117_v19 = vsel %vm4735_vm9, %v3608_v39, %v3865_v30  ;;  %vm4736_vm4 = vcmp.gt.f32.partialorder %v3612_v43, 0.0  ;;  %v4129_v12 = vsel %vm1299_vm10, %v3616_v54, %v4737_v31  ;;  %v4771_v22 = vld [vmem:[#allocation14_spill] sm:$0xff] }
 0x2af   :  { %v4123_v37 = vsel %vm4736_vm4, %v3612_v43, %v3868_v17  ;;  %vm4738_vm8 = vcmp.gt.f32.partialorder %v3620_v25, 0.0  ;;  %vm4739_vm5 = vcmp.gt.f32.partialorder %v3624_v18, 0.0  ;;  %vm4740_vm9 = vcmp.gt.f32.partialorder %v3628_v13, 0.0 }
 0x2b0   :  { %v4135_v35 = vsel %vm4738_vm8, %v3620_v25, %v3880_v60  ;;  %v4141_v39 = vsel %vm4739_vm5, %v3624_v18, %v3883_v0  ;;  %v4147_v43 = vsel %vm4740_vm9, %v3628_v13, %v3886_v41  ;;  %v4153_v54 = vsel %vm1303_vm11, %v3632_v8, %v3897_v44  ;;  %v4742_v18 = vld [vmem:[#allocation33_spill] sm:$0xff] }
 0x2b1   :  { %vm4741_vm10 = vcmp.gt.f32.partialorder %v3636_v2, 0.0  ;;  %vm4743_vm4 = vcmp.gt.f32.partialorder %v3640_v58, 0.0  ;;  %vm4744_vm8 = vcmp.gt.f32.partialorder %v3644_v49, 0.0  ;;  %v4177_v8 = vsel %vm1307_vm12, %v3648_v63, %v3918_v59  ;;  %v4749_v63 = vld [vmem:[#allocation37_spill] sm:$0xff] }
 0x2b2   :  { %v4159_v25 = vsel %vm4741_vm10, %v3636_v2, %v3900_v28  ;;  %v4165_v48 = vsel %vm4743_vm4, %v3640_v58, %v4742_v18  ;;  %v4171_v13 = vsel %vm4744_vm8, %v3644_v49, %v3915_v11  ;;  %v4745_v2 = vld [vmem:[#allocation35_spill] sm:$0xff]  ;;  %vm4746_vm11 = vcmp.gt.f32.partialorder %v3652_v42, 0.0 }
 0x2b3   :  { %v4183_v41 = vsel %vm4746_vm11, %v3652_v42, %v4745_v2  ;;  %vm4747_vm5 = vcmp.gt.f32.partialorder %v3656_v47, 0.0  ;;  %vm4748_vm9 = vcmp.gt.f32.partialorder %v3660_v51, 0.0  ;;  %v4201_v59 = vsel %vm1311_vm13, %v3664_v10, %v4749_v63  ;;  %v4755_v10 = vld [vmem:[#allocation42_spill] sm:$0xff]  ;;  %v4773_v18 = vld [vmem:[#allocation15_spill] sm:$0xff]  ;;  %v4776_v63 = vld [vmem:[#allocation16_spill] sm:$0xff] }
 0x2b4   :  { %v4189_v58 = vsel %vm4747_vm5, %v3656_v47, %v3933_v62  ;;  %v4195_v49 = vsel %vm4748_vm9, %v3660_v51, %v3936_v4  ;;  %vm4750_vm12 = vcmp.gt.f32.partialorder %v3668_v3, 0.0  ;;  %v4751_v47 = vld [vmem:[#allocation39_spill] sm:$0xff]  ;;  %vm4752_vm10 = vcmp.gt.f32.partialorder %v3672_v34, 0.0  ;;  %v4753_v51 = vld [vmem:[#allocation40_spill] sm:$0xff] }
 0x2b5   :  { %v4207_v42 = vsel %vm4750_vm12, %v3668_v3, %v3951_v32  ;;  %v4213_v30 = vsel %vm4752_vm10, %v3672_v34, %v4751_v47  ;;  %vm4754_vm4 = vcmp.gt.f32.partialorder %v3676_v38, 0.0  ;;  %v4225_v60 = vsel %vm1315_vm14, %v3680_v45, %v4755_v10  ;;  %v4756_v3 = vld [vmem:[#allocation43_spill] sm:$0xff]  ;;  %v4758_v34 = vld [vmem:[#allocation44_spill] sm:$0xff] }
 0x2b6   :  { %v4219_v17 = vsel %vm4754_vm4, %v3676_v38, %v4753_v51  ;;  %vm4757_vm13 = vcmp.gt.f32.partialorder %v3684_v55, 0.0  ;;  %vm4759_vm8 = vcmp.gt.f32.partialorder %v3688_v5, 0.0  ;;  %v4760_v38 = vld [vmem:[#allocation6_spill] sm:$0xff]  ;;  %vm4761_vm11 = vcmp.gt.f32.partialorder %v4700_v29, 0.0  ;;  %v4762_v45 = vld [vmem:[#allocation8_spill] sm:$0xff]  ;;  %v4767_v32 = vld [vmem:[#allocation47_spill] sm:$0xff] }
 0x2b7   :  { %v4231_v0 = vsel %vm4757_vm13, %v3684_v55, %v4756_v3  ;;  %v4237_v44 = vsel %vm4759_vm8, %v3688_v5, %v4758_v34  ;;  %v4243_v28 = vsel %vm4761_vm11, %v4700_v29, %v4760_v38  ;;  %v4249_v4 = vsel %vm1319_vm15, %v4702_v40, %v4762_v45  ;;  %v4763_v55 = vld [vmem:[#allocation10_spill] sm:$0xff]  ;;  %v4765_v5 = vld [vmem:[#allocation12_spill] sm:$0xff]  ;;  %v4768_v29 = vld [vmem:[#allocation13_spill] sm:$0xff] }
 0x2b8   :  { %vm4764_vm14 = vcmp.gt.f32.partialorder %v4704_v20, 0.0  ;;  %vm4766_vm5 = vcmp.gt.f32.partialorder %v4765_v5, 0.0  ;;  %vm4769_vm9 = vcmp.gt.f32.partialorder %v4768_v29, 0.0  ;;  %v4770_v40 = vld [vmem:[#allocation48_spill] sm:$0xff]  ;;  %vm4774_vm15 = vcmp.gt.f32.partialorder %v4773_v18, 0.0  ;;  %v4779_v10 = vld [vmem:[#allocation7_spill] sm:$0xff] }
 0x2b9   :  { %v4255_v11 = vsel %vm4764_vm14, %v4704_v20, %v4763_v55  ;;  %v4261_v62 = vsel %vm4766_vm5, %v4765_v5, %v4008_v21  ;;  %v4267_v23 = vsel %vm4769_vm9, %v4768_v29, %v4767_v32  ;;  %v4273_v31 = vsel %vm1323_vm0, %v4771_v22, %v4770_v40  ;;  %v4772_v20 = vld [vmem:[#allocation50_spill] sm:$0xff]  ;;  %v4775_v21 = vld [vmem:[#allocation51_spill] sm:$0xff]  ;;  %v4778_v51 = vld [vmem:[#allocation52_spill] sm:$0xff] }
 0x2ba   :  { %v4279_v2 = vsel %vm4774_vm15, %v4773_v18, %v4772_v20  ;;  %vm4777_vm12 = vcmp.gt.f32.partialorder %v4776_v63, 0.0  ;;  %vm4780_vm10 = vcmp.gt.f32.partialorder %v4779_v10, 0.0  ;;  %v4781_v34 = vld [vmem:[#allocation9_spill] sm:$0xff]  ;;  %v4782_v45 = vld [vmem:[#allocation11_spill] sm:$0xff]  ;;  %v4786_v29 = vld [vmem:[#allocation20_spill] sm:$0xff] }
 0x2bb   :  { %v4285_v47 = vsel %vm4777_vm12, %v4776_v63, %v4775_v21  ;;  %v4291_v3 = vsel %vm4780_vm10, %v4779_v10, %v4778_v51  ;;  %v4296_v38 = vsel %vm1327_vm1, %v4781_v34, %v1391_v50  ;;  %vm4783_vm0 = vcmp.gt.f32.partialorder %v4782_v45, 0.0  ;;  %v4784_v5 = vld [vmem:[#allocation19_spill] sm:$0xff]  ;;  %v4788_v22 = vld [vmem:[#allocation18_spill] sm:$0xff]  ;;  %v4798_v51 = vld [vmem:[#allocation25_spill] sm:$0xff] }
 0x2bc   :  { %v4301_v55 = vsel %vm4783_vm0, %v4782_v45, %v1392_v9  ;;  %vm4785_vm4 = vcmp.gt.f32.partialorder %v4784_v5, 0.0  ;;  %vm4787_vm13 = vcmp.gt.f32.partialorder %v4786_v29, 0.0  ;;  %v4316_v50 = vsel %vm1331_vm2, %v4722_v16, %v1395_v57  ;;  %v4790_v20 = vld [vmem:[#allocation2_spill] sm:$0xff]  ;;  %v4791_v18 = vld [vmem:[#allocation3_spill] sm:$0xff]  ;;  %v4795_v16 = vld [vmem:[#allocation5_spill] sm:$0xff] }
 0x2bd   :  { %v4306_v32 = vsel %vm4785_vm4, %v4784_v5, %v1393_v14  ;;  %v4311_v40 = vsel %vm4787_vm13, %v4786_v29, %v1394_v15  ;;  %vm4789_vm1 = vcmp.gt.f32.partialorder %v4788_v22, 0.0  ;;  %v4326_v14 = vsel %vm1333_vm6, %v4790_v20, %v1397_v24  ;;  %v4796_v21 = vld [vmem:[#allocation22_spill] sm:$0xff]  ;;  %v4797_v24 = vld [vmem:[#allocation23_spill] sm:$0xff]  ;;  %v4800_v45 = vld [vmem:[#allocation29_spill] sm:$0xff] }
 0x2be   :  { %v4321_v9 = vsel %vm4789_vm1, %v4788_v22, %v1396_v33  ;;  %vm4792_vm8 = vcmp.gt.f32.partialorder %v4791_v18, 0.0  ;;  %v4336_v57 = vsel %vm1335_vm3, %v4728_v1, %v1399_v56  ;;  %v4341_v33 = vsel %vm1336_vm7, %v4729_v52, %v1400_v27  ;;  %v4799_v34 = vld [vmem:[#allocation27_spill] sm:$0xff]  ;;  %v4802_v29 = vld [vmem:[#allocation32_spill] sm:$0xff]  ;;  %v4803_v20 = vld [vmem:[#allocation34_spill] sm:$0xff] }
 0x2bf   :  { %v4331_v15 = vsel %vm4792_vm8, %v4791_v18, %v1398_v7  ;;  %4794 = vst [vmem:[#allocation21_spill] sm:$0xff] %v4336_v57  ;;  %v2030_v63 = vpack.c.bf16 %v4796_v21, %v4795_v16  ;;  %v2035_v10 = vpack.c.bf16 %v4798_v51, %v4797_v24  ;;  %v2040_v7 = vpack.c.bf16 %v4800_v45, %v4799_v34  ;;  %v4801_v5 = vld [vmem:[#allocation31_spill] sm:$0xff]  ;;  %v4804_v1 = vld [vmem:[#allocation36_spill] sm:$0xff]  ;;  %v4805_v18 = vld [vmem:[#allocation38_spill] sm:$0xff] }
 0x2c0   :  { %4793 = vst [vmem:[#allocation24_spill] sm:$0xff] %v4331_v15  ;;  %v2045_v22 = vpack.c.bf16 %v4802_v29, %v4801_v5  ;;  %v2050_v56 = vpack.c.bf16 %v4804_v1, %v4803_v20  ;;  %v4806_v57 = vld [vmem:[#allocation41_spill] sm:$0xff]  ;;  %v4808_v52 = vld [vmem:[#allocation46_spill] sm:$0xff] }
 0x2c1   :  { %v2055_v15 = vpack.c.bf16 %v4806_v57, %v4805_v18  ;;  %2031 = vst [vmem:[%s4507_s4] sm:$0xff] %v2030_v63   ;;  %2187 = vst [vmem:[%s4507_s4 + $0x8] sm:$0xff] %v2035_v10   ;;  %v4807_v27 = vld [vmem:[#allocation45_spill] sm:$0xff]  ;;  %v4811_v34 = vld [vmem:[#allocation54_spill] sm:$0xff]  ;;  %v2075_v57 = vpack.c.bf16 %v4087_v36, %v4078_v46  ;;  %v2080_v63 = vpack.c.bf16 %v4099_v61, %v4093_v26 }
 0x2c2   :  { %v2060_v16 = vpack.c.bf16 %v4808_v52, %v4807_v27  ;;  %v4809_v21 = vld [vmem:[#allocation49_spill] sm:$0xff]  ;;  %2188 = vst [vmem:[%s4507_s4 + $0x10] sm:$0xff] %v2040_v7   ;;  %2189 = vst [vmem:[%s4507_s4 + $0x18] sm:$0xff] %v2045_v22   ;;  %v2085_v36 = vpack.c.bf16 %v4111_v53, %v4105_v6  ;;  %v2090_v46 = vpack.c.bf16 %v4123_v37, %v4117_v19 }
 0x2c3   :  { %v4810_v24 = vld [vmem:[#allocation53_spill] sm:$0xff]  ;;  %2190 = vst [vmem:[%s4507_s4 + $0x20] sm:$0xff] %v2050_v56   ;;  %2191 = vst [vmem:[%s4507_s4 + $0x28] sm:$0xff] %v2055_v15   ;;  %v2095_v10 = vpack.c.bf16 %v4135_v35, %v4129_v12  ;;  %v2100_v26 = vpack.c.bf16 %v4147_v43, %v4141_v39  ;;  %v2105_v61 = vpack.c.bf16 %v4159_v25, %v4153_v54 }
 0x2c4   :  { %v2065_v51 = vpack.c.bf16 %v4810_v24, %v4809_v21  ;;  %v4812_v45 = vld [vmem:[#allocation17_spill] sm:$0xff]  ;;  %2192 = vst [vmem:[%s4507_s4 + $0x30] sm:$0xff] %v2060_v16   ;;  %2195 = vst [vmem:[%s4507_s4 + $0x48] sm:$0xff] %v2075_v57   ;;  %v2110_v6 = vpack.c.bf16 %v4171_v13, %v4165_v48  ;;  %v2115_v53 = vpack.c.bf16 %v4183_v41, %v4177_v8 }
 0x2c5   :  { %v2070_v5 = vpack.c.bf16 %v4812_v45, %v4811_v34  ;;  %2196 = vst [vmem:[%s4507_s4 + $0x50] sm:$0xff] %v2080_v63   ;;  %2197 = vst [vmem:[%s4507_s4 + $0x58] sm:$0xff] %v2085_v36   ;;  %v2120_v19 = vpack.c.bf16 %v4195_v49, %v4189_v58  ;;  %v2125_v37 = vpack.c.bf16 %v4207_v42, %v4201_v59 }
 0x2c6   :  { %2193 = vst [vmem:[%s4507_s4 + $0x38] sm:$0xff] %v2065_v51   ;;  %2198 = vst [vmem:[%s4507_s4 + $0x60] sm:$0xff] %v2090_v46   ;;  %v2130_v12 = vpack.c.bf16 %v4219_v17, %v4213_v30  ;;  %v2135_v35 = vpack.c.bf16 %v4231_v0, %v4225_v60  ;;  %v2140_v39 = vpack.c.bf16 %v4243_v28, %v4237_v44  ;;  %v4814_v59 = vld [vmem:[#allocation21_spill] sm:$0xff] }
 0x2c7   :  { %2194 = vst [vmem:[%s4507_s4 + $0x40] sm:$0xff] %v2070_v5   ;;  %2199 = vst [vmem:[%s4507_s4 + $0x68] sm:$0xff] %v2095_v10   ;;  %v2145_v43 = vpack.c.bf16 %v4255_v11, %v4249_v4  ;;  %v2150_v54 = vpack.c.bf16 %v4267_v23, %v4261_v62  ;;  %v2155_v25 = vpack.c.bf16 %v4279_v2, %v4273_v31  ;;  %v4813_v58 = vld [vmem:[#allocation24_spill] sm:$0xff] }
 0x2c8   :  { %2200 = vst [vmem:[%s4507_s4 + $0x70] sm:$0xff] %v2100_v26   ;;  %2201 = vst [vmem:[%s4507_s4 + $0x78] sm:$0xff] %v2105_v61   ;;  %v2160_v48 = vpack.c.bf16 %v4291_v3, %v4285_v47  ;;  %v2165_v13 = vpack.c.bf16 %v4301_v55, %v4296_v38  ;;  %v2170_v8 = vpack.c.bf16 %v4311_v40, %v4306_v32 }
 0x2c9   :  { %2202 = vst [vmem:[%s4507_s4 + $0x80] sm:$0xff] %v2110_v6   ;;  %2203 = vst [vmem:[%s4507_s4 + $0x88] sm:$0xff] %v2115_v53   ;;  %v2175_v41 = vpack.c.bf16 %v4321_v9, %v4316_v50  ;;  %v2180_v49 = vpack.c.bf16 %v4813_v58, %v4326_v14  ;;  %v2185_v42 = vpack.c.bf16 %v4341_v33, %v4814_v59 }
 0x2ca   :  { %2204 = vst [vmem:[%s4507_s4 + $0x90] sm:$0xff] %v2120_v19   ;;  %2205 = vst [vmem:[%s4507_s4 + $0x98] sm:$0xff] %v2125_v37  }
 0x2cb   :  { %2206 = vst [vmem:[%s4507_s4 + $0xa0] sm:$0xff] %v2130_v12   ;;  %2207 = vst [vmem:[%s4507_s4 + $0xa8] sm:$0xff] %v2135_v35  }
 0x2cc   :  { %2208 = vst [vmem:[%s4507_s4 + $0xb0] sm:$0xff] %v2140_v39   ;;  %2209 = vst [vmem:[%s4507_s4 + $0xb8] sm:$0xff] %v2145_v43  }
 0x2cd   :  { %2210 = vst [vmem:[%s4507_s4 + $0xc0] sm:$0xff] %v2150_v54   ;;  %2211 = vst [vmem:[%s4507_s4 + $0xc8] sm:$0xff] %v2155_v25  }
 0x2ce   :  { %2212 = vst [vmem:[%s4507_s4 + $0xd0] sm:$0xff] %v2160_v48   ;;  %2213 = vst [vmem:[%s4507_s4 + $0xd8] sm:$0xff] %v2165_v13  }
 0x2cf   :  { %2214 = vst [vmem:[%s4507_s4 + $0xe0] sm:$0xff] %v2170_v8   ;;  %2215 = vst [vmem:[%s4507_s4 + $0xe8] sm:$0xff] %v2175_v41  }
 0x2d0   :  { %2216 = vst [vmem:[%s4507_s4 + $0xf0] sm:$0xff] %v2180_v49   ;;  %2217 = vst [vmem:[%s4507_s4 + $0xf8] sm:$0xff] %v2185_v42  }

// kernel: discriminator_forward.6
= control target key start
LH: loop header
LB: loop body
LE: loop exit
PB: predicated region body
PF: predicated region fallthrough
CT: control target
= control target key end

     0   :  { %v1163_v0 = vmov 0   ;;  %vm402_vm0 = vcmask 130048   ;;  %s1484_s1 = inlined_call_operand.vmem [shape: bf16[400,128], index: 1, kind: input, shape index: {}]   ;;  %s1485_s0 = inlined_call_operand.vmem [shape: bf16[128,400], index: 0, kind: input, shape index: {}]   ;;  %s1486_s2 = inlined_call_operand.vmem [shape: f32[1,128], index: 2, kind: input, shape index: {}]   ;;  %s1487_s3 = inlined_call_operand.vmem [shape: f32[1,128], index: 3, kind: input, shape index: {}]   ;;  %s1488_s4 = inlined_call_operand.vmem [shape: bf16[128,128], index: 4, kind: output, shape index: {}]  }
   0x1   :  { %524 = vmatprep.subr.bf16.mxu1 %v1163_v0  ;;  %v1088_v1 = vld [vmem:[%s1484_s1 + $0x78] sm:$0xff]   ;;  %v1091_v4 = vld [vmem:[%s1484_s1 + $0x70] sm:$0xff]   ;;  %v1094_v7 = vld [vmem:[%s1484_s1 + $0x68] sm:$0xff]  }
   0x2   :  { %v1089_v2 = vld [vmem:[%s1484_s1 + $0xb8] sm:$0xff]   ;;  %1023 = vmatprep.subr.bf16.mxu0 %v1088_v1  ;;  %v1092_v5 = vld [vmem:[%s1484_s1 + $0xb0] sm:$0xff]   ;;  %v1095_v8 = vld [vmem:[%s1484_s1 + $0xa8] sm:$0xff]  }
   0x3   :  { %v1090_v3 = vld [vmem:[%s1484_s1 + $0x38] sm:$0xff]   ;;  %525 = vmatpush1.bf16.msra.mxu1 %v1089_v2  ;;  %v1093_v6 = vld [vmem:[%s1484_s1 + $0x30] sm:$0xff]   ;;  %v1096_v9 = vld [vmem:[%s1484_s1 + $0x28] sm:$0xff]  }
   0x4   :  { %1024 = vmatpush3.bf16.msra.mxu0 %v1090_v3  ;;  %526 = vmatprep.subr.bf16.mxu1 %v1163_v0  ;;  %v1097_v10 = vld [vmem:[%s1484_s1 + $0x60] sm:$0xff]   ;;  %v1100_v13 = vld [vmem:[%s1484_s1 + $0x58] sm:$0xff]   ;;  %v1103_v16 = vld [vmem:[%s1484_s1 + $0x50] sm:$0xff]  }
   0x5   :  { %1025 = vmatprep.subr.bf16.mxu0 %v1091_v4  ;;  %v1098_v11 = vld [vmem:[%s1484_s1 + $0xa0] sm:$0xff]   ;;  %v1101_v14 = vld [vmem:[%s1484_s1 + $0x98] sm:$0xff]   ;;  %v1104_v17 = vld [vmem:[%s1484_s1 + $0x90] sm:$0xff]  }
   0x6   :  { %v1099_v12 = vld [vmem:[%s1484_s1 + $0x20] sm:$0xff]   ;;  %v1102_v15 = vld [vmem:[%s1484_s1 + $0x18] sm:$0xff]   ;;  %v1105_v18 = vld [vmem:[%s1484_s1 + $0x10] sm:$0xff]  }
   0x7   :  { %527 = vmatpush1.bf16.msra.mxu1 %v1092_v5  ;;  %v1106_v19 = vld [vmem:[%s1484_s1 + $0x48] sm:$0xff]   ;;  %v1109_v22 = vld [vmem:[%s1484_s1 + $0x40] sm:$0xff]  }
   0x8   :  { %1026 = vmatpush3.bf16.msra.mxu0 %v1093_v6  ;;  %528 = vmatprep.subr.bf16.mxu1 %v1163_v0  ;;  %v1107_v20 = vld [vmem:[%s1484_s1 + $0x88] sm:$0xff]   ;;  %v1114_v23 = vld [vmem:[%s1485_s0 + $0x4] ss:$16 sps:$4 sm:$0xff]   ;;  %v1112_v27 = vld [vmem:[%s1485_s0] ss:$16 sps:$4 sm:$0xff]  }
   0x9   :  { %1027 = vmatprep.subr.bf16.mxu0 %v1094_v7  ;;  %v1108_v21 = vld [vmem:[%s1484_s1 + $0x8] sm:$0xff]   ;;  %v1110_v24 = vld [vmem:[%s1484_s1 + $0x80] sm:$0xff]   ;;  %459 = vmatprep.mubr.bf16.mxu0 %v1114_v23 }
   0xa   :  { %v1118_v25 = vld [vmem:[%s1485_s0 + $0xc] ss:$16 sps:$4 sm:$0xff]   ;;  %v1111_v26 = vld [vmem:[%s1484_s1] sm:$0xff]   ;;  %v1116_v30 = vld [vmem:[%s1485_s0 + $0x8] ss:$16 sps:$4 sm:$0xff]  }
   0xb   :  { %529 = vmatpush1.bf16.msra.mxu1 %v1095_v8  ;;  %935 = vmatprep.mubr.msk.bf16.mxu1 %vm402_vm0, %v1118_v25  ;;  %v1115_v28 = vld [vmem:[%s1484_s1 + $0xc0] sm:$0xff]   ;;  %v1122_v31 = vld [vmem:[%s1485_s0 + $0x2c] ss:$16 sps:$4 sm:$0xff]   ;;  %v1124_v34 = vld [vmem:[%s1485_s0 + $0x28] ss:$16 sps:$4 sm:$0xff]  }
   0xc   :  { %1028 = vmatpush3.bf16.msra.mxu0 %v1096_v9  ;;  %530 = vmatprep.subr.bf16.mxu1 %v1163_v0  ;;  %v1119_v29 = vld [vmem:[%s1485_s0 + $0x24] ss:$16 sps:$4 sm:$0xff]   ;;  %v1121_v32 = vld [vmem:[%s1485_s0 + $0x20] ss:$16 sps:$4 sm:$0xff]   ;;  %v1128_v35 = vld [vmem:[%s1485_s0 + $0x4c] ss:$16 sps:$4 sm:$0xff]  }
   0xd   :  { %1029 = vmatprep.subr.bf16.mxu0 %v1097_v10  ;;  %v1125_v33 = vld [vmem:[%s1485_s0 + $0x44] ss:$16 sps:$4 sm:$0xff]   ;;  %v1127_v36 = vld [vmem:[%s1485_s0 + $0x40] ss:$16 sps:$4 sm:$0xff]   ;;  %v1130_v38 = vld [vmem:[%s1485_s0 + $0x48] ss:$16 sps:$4 sm:$0xff]  }
   0xe   :  { %v1131_v37 = vld [vmem:[%s1485_s0 + $0x64] ss:$16 sps:$4 sm:$0xff]   ;;  %v1134_v39 = vld [vmem:[%s1485_s0 + $0x6c] ss:$16 sps:$4 sm:$0xff]   ;;  %v1133_v40 = vld [vmem:[%s1485_s0 + $0x60] ss:$16 sps:$4 sm:$0xff]  }
   0xf   :  { %531 = vmatpush1.bf16.msra.mxu1 %v1098_v11  ;;  %v1137_v41 = vld [vmem:[%s1485_s0 + $0x84] ss:$16 sps:$4 sm:$0xff]   ;;  %v1136_v42 = vld [vmem:[%s1485_s0 + $0x68] ss:$16 sps:$4 sm:$0xff]   ;;  %v1140_v43 = vld [vmem:[%s1485_s0 + $0x8c] ss:$16 sps:$4 sm:$0xff]  }
  0x10   :  { %1030 = vmatpush3.bf16.msra.mxu0 %v1099_v12  ;;  %532 = vmatprep.subr.bf16.mxu1 %v1163_v0  ;;  %v1139_v44 = vld [vmem:[%s1485_s0 + $0x80] ss:$16 sps:$4 sm:$0xff]   ;;  %v1143_v45 = vld [vmem:[%s1485_s0 + $0xa4] ss:$16 sps:$4 sm:$0xff]   ;;  %v1142_v46 = vld [vmem:[%s1485_s0 + $0x88] ss:$16 sps:$4 sm:$0xff]  }
  0x11   :  { %1031 = vmatprep.subr.bf16.mxu0 %v1100_v13  ;;  %v1146_v47 = vld [vmem:[%s1485_s0 + $0xac] ss:$16 sps:$4 sm:$0xff]   ;;  %v1145_v48 = vld [vmem:[%s1485_s0 + $0xa0] ss:$16 sps:$4 sm:$0xff]   ;;  %v1149_v49 = vld [vmem:[%s1485_s0 + $0xc4] ss:$16 sps:$4 sm:$0xff]  }
  0x12   :  { %v1148_v50 = vld [vmem:[%s1485_s0 + $0xa8] ss:$16 sps:$4 sm:$0xff]   ;;  %v1152_v51 = vld [vmem:[%s1485_s0 + $0xcc] ss:$16 sps:$4 sm:$0xff]   ;;  %v1151_v52 = vld [vmem:[%s1485_s0 + $0xc0] ss:$16 sps:$4 sm:$0xff]  }
  0x13   :  { %533 = vmatpush1.bf16.msra.mxu1 %v1101_v14  ;;  %v1155_v53 = vld [vmem:[%s1485_s0 + $0xe4] ss:$16 sps:$4 sm:$0xff]   ;;  %v1154_v54 = vld [vmem:[%s1485_s0 + $0xc8] ss:$16 sps:$4 sm:$0xff]   ;;  %v1158_v55 = vld [vmem:[%s1485_s0 + $0xec] ss:$16 sps:$4 sm:$0xff]  }
  0x14   :  { %1032 = vmatpush3.bf16.msra.mxu0 %v1102_v15  ;;  %534 = vmatprep.subr.bf16.mxu1 %v1163_v0  ;;  %v1157_v56 = vld [vmem:[%s1485_s0 + $0xe0] ss:$16 sps:$4 sm:$0xff]   ;;  %v1160_v57 = vld [vmem:[%s1485_s0 + $0xe8] ss:$16 sps:$4 sm:$0xff]  }
  0x15   :  { %1033 = vmatprep.subr.bf16.mxu0 %v1103_v16 }
  0x17   :  { %535 = vmatpush1.bf16.msra.mxu1 %v1104_v17 }
  0x18   :  { %1034 = vmatpush3.bf16.msra.mxu0 %v1105_v18  ;;  %536 = vmatprep.subr.bf16.mxu1 %v1163_v0 }
  0x19   :  { %1035 = vmatprep.subr.bf16.mxu0 %v1106_v19 }
  0x1b   :  { %537 = vmatpush1.bf16.msra.mxu1 %v1107_v20 }
  0x1c   :  { %1036 = vmatpush3.bf16.msra.mxu0 %v1108_v21  ;;  %538 = vmatprep.subr.bf16.mxu1 %v1163_v0 }
  0x1d   :  { %1037 = vmatprep.subr.bf16.mxu0 %v1109_v22 }
  0x1f   :  { %539 = vmatpush1.bf16.msra.mxu1 %v1110_v24 }
  0x20   :  { %1038 = vmatpush3.bf16.msra.mxu0 %v1111_v26  ;;  %554 = vmatprep.subr.bf16.mxu1 %v1163_v0 }
  0x23   :  { %460 = vmatmul.mubr.bf16.vlgmr.msra.gmra.mxu0 %v1112_v27  ;;  %555 = vmatpush2.bf16.msra.mxu1 %v1115_v28 }
  0x24   :  { %467 = vmatprep.mubr.bf16.mxu0 %v1119_v29 }
  0x26   :  { %557 = vmatmul.mubr.bf16.vlgmr.msra.gmra.mxu1 %v1116_v30 }
  0x27   :  { %936 = vmatprep.mubr.msk.bf16.mxu1 %vm402_vm0, %v1122_v31 }
  0x2b   :  { %468 = vmatmul.mubr.bf16.gmra.mxu0 %v1121_v32 }
  0x2c   :  { %475 = vmatprep.mubr.bf16.mxu0 %v1125_v33 }
  0x2e   :  { %565 = vmatmul.mubr.bf16.gmra.mxu1 %v1124_v34 }
  0x2f   :  { %937 = vmatprep.mubr.msk.bf16.mxu1 %vm402_vm0, %v1128_v35 }
  0x33   :  { %476 = vmatmul.mubr.bf16.gmra.mxu0 %v1127_v36 }
  0x34   :  { %483 = vmatprep.mubr.bf16.mxu0 %v1131_v37 }
  0x36   :  { %573 = vmatmul.mubr.bf16.gmra.mxu1 %v1130_v38 }
  0x37   :  { %938 = vmatprep.mubr.msk.bf16.mxu1 %vm402_vm0, %v1134_v39 }
  0x3b   :  { %484 = vmatmul.mubr.bf16.gmra.mxu0 %v1133_v40 }
  0x3c   :  { %491 = vmatprep.mubr.bf16.mxu0 %v1137_v41 }
  0x3e   :  { %581 = vmatmul.mubr.bf16.gmra.mxu1 %v1136_v42 }
  0x3f   :  { %939 = vmatprep.mubr.msk.bf16.mxu1 %vm402_vm0, %v1140_v43 }
  0x43   :  { %492 = vmatmul.mubr.bf16.gmra.mxu0 %v1139_v44 }
  0x44   :  { %499 = vmatprep.mubr.bf16.mxu0 %v1143_v45 }
  0x46   :  { %589 = vmatmul.mubr.bf16.gmra.mxu1 %v1142_v46 }
  0x47   :  { %940 = vmatprep.mubr.msk.bf16.mxu1 %vm402_vm0, %v1146_v47 }
  0x4b   :  { %500 = vmatmul.mubr.bf16.gmra.mxu0 %v1145_v48 }
  0x4c   :  { %507 = vmatprep.mubr.bf16.mxu0 %v1149_v49 }
  0x4e   :  { %597 = vmatmul.mubr.bf16.gmra.mxu1 %v1148_v50 }
  0x4f   :  { %941 = vmatprep.mubr.msk.bf16.mxu1 %vm402_vm0, %v1152_v51 }
  0x53   :  { %508 = vmatmul.mubr.bf16.gmra.mxu0 %v1151_v52 }
  0x54   :  { %515 = vmatprep.mubr.bf16.mxu0 %v1155_v53 }
  0x56   :  { %605 = vmatmul.mubr.bf16.gmra.mxu1 %v1154_v54 }
  0x57   :  { %942 = vmatprep.mubr.msk.bf16.mxu1 %vm402_vm0, %v1158_v55 }
  0x5b   :  { %516 = vmatmul.mubr.bf16.gmra.mxu0 %v1157_v56 }
  0x5e   :  { %613 = vmatmul.mubr.bf16.gmra.mxu1 %v1160_v57 }
  0xe3   :  { %v1039_v58 = vpop.f32.mrf.mxu0 }
  0xe5   :  { %v1040_v59 = vpop.f32.mrf.mxu0 }
  0xe6   :  { %v558_v60 = vpop.f32.mrf.mxu1  ;;  %v1041_v27 = vadd.f32 %v1040_v59, %v1039_v58 }
  0xe7   :  { %v1042_v61 = vpop.f32.mrf.mxu0 }
  0xe8   :  { %v560_v62 = vpop.f32.mrf.mxu1  ;;  %v1379_v35 = vadd.f32 %v1041_v27, %v558_v60 }
  0xe9   :  { %v1043_v63 = vpop.f32.mrf.mxu0 }
  0xea   :  { %v561_v0 = vpop.f32.mrf.mxu1  ;;  %v1044_v24 = vadd.f32 %v1043_v63, %v1042_v61 }
  0xeb   :  { %v1045_v1 = vpop.f32.mrf.mxu0 }
  0xec   :  { %v563_v2 = vpop.f32.mrf.mxu1  ;;  %v1377_v31 = vadd.f32 %v1044_v24, %v561_v0 }
  0xed   :  { %v1046_v3 = vpop.f32.mrf.mxu0 }
  0xee   :  { %v566_v4 = vpop.f32.mrf.mxu1  ;;  %v1047_v28 = vadd.f32 %v1046_v3, %v1045_v1  ;;  %v621_v40 = vadd.f32 %v1377_v31, %v1379_v35 }
  0xef   :  { %v1048_v5 = vpop.f32.mrf.mxu0 }
  0xf0   :  { %v568_v6 = vpop.f32.mrf.mxu1  ;;  %v1381_v36 = vadd.f32 %v1047_v28, %v566_v4 }
  0xf1   :  { %v1049_v7 = vpop.f32.mrf.mxu0 }
  0xf2   :  { %v569_v8 = vpop.f32.mrf.mxu1  ;;  %v1050_v32 = vadd.f32 %v1049_v7, %v1048_v5  ;;  %v622_v45 = vadd.f32 %v621_v40, %v1381_v36 }
  0xf3   :  { %v1051_v9 = vpop.f32.mrf.mxu0 }
  0xf4   :  { %v571_v10 = vpop.f32.mrf.mxu1  ;;  %v1385_v41 = vadd.f32 %v1050_v32, %v569_v8 }
  0xf5   :  { %v1052_v11 = vpop.f32.mrf.mxu0 }
  0xf6   :  { %v574_v12 = vpop.f32.mrf.mxu1  ;;  %v1053_v37 = vadd.f32 %v1052_v11, %v1051_v9  ;;  %v623_v50 = vadd.f32 %v622_v45, %v1385_v41 }
  0xf7   :  { %v1054_v13 = vpop.f32.mrf.mxu0 }
  0xf8   :  { %v576_v14 = vpop.f32.mrf.mxu1  ;;  %v1388_v46 = vadd.f32 %v1053_v37, %v574_v12 }
  0xf9   :  { %v1055_v15 = vpop.f32.mrf.mxu0 }
  0xfa   :  { %v577_v16 = vpop.f32.mrf.mxu1  ;;  %v1056_v42 = vadd.f32 %v1055_v15, %v1054_v13  ;;  %v624_v55 = vadd.f32 %v623_v50, %v1388_v46 }
  0xfb   :  { %v1057_v17 = vpop.f32.mrf.mxu0 }
  0xfc   :  { %v579_v18 = vpop.f32.mrf.mxu1  ;;  %v1391_v51 = vadd.f32 %v1056_v42, %v577_v16 }
  0xfd   :  { %v1058_v19 = vpop.f32.mrf.mxu0 }
  0xfe   :  { %v582_v20 = vpop.f32.mrf.mxu1  ;;  %v1059_v47 = vadd.f32 %v1058_v19, %v1057_v17  ;;  %v625_v60 = vadd.f32 %v624_v55, %v1391_v51 }
  0xff   :  { %v1060_v21 = vpop.f32.mrf.mxu0 }
 0x100   :  { %v584_v22 = vpop.f32.mrf.mxu1  ;;  %v1394_v56 = vadd.f32 %v1059_v47, %v582_v20 }
 0x101   :  { %v1061_v23 = vpop.f32.mrf.mxu0 }
 0x102   :  { %v585_v25 = vpop.f32.mrf.mxu1  ;;  %v1062_v52 = vadd.f32 %v1061_v23, %v1060_v21  ;;  %v626_v1 = vadd.f32 %v625_v60, %v1394_v56 }
 0x103   :  { %v1063_v26 = vpop.f32.mrf.mxu0 }
 0x104   :  { %v587_v29 = vpop.f32.mrf.mxu1  ;;  %v1397_v61 = vadd.f32 %v1062_v52, %v585_v25 }
 0x105   :  { %v1064_v30 = vpop.f32.mrf.mxu0 }
 0x106   :  { %v590_v33 = vpop.f32.mrf.mxu1  ;;  %v1065_v57 = vadd.f32 %v1064_v30, %v1063_v26  ;;  %v627_v6 = vadd.f32 %v626_v1, %v1397_v61 }
 0x107   :  { %v1066_v34 = vpop.f32.mrf.mxu0 }
 0x108   :  { %v592_v38 = vpop.f32.mrf.mxu1  ;;  %v1400_v2 = vadd.f32 %v1065_v57, %v590_v33 }
 0x109   :  { %v1067_v39 = vpop.f32.mrf.mxu0 }
 0x10a   :  { %v593_v43 = vpop.f32.mrf.mxu1  ;;  %v1068_v62 = vadd.f32 %v1067_v39, %v1066_v34  ;;  %v628_v11 = vadd.f32 %v627_v6, %v1400_v2 }
 0x10b   :  { %v1069_v44 = vpop.f32.mrf.mxu0 }
 0x10c   :  { %v595_v48 = vpop.f32.mrf.mxu1  ;;  %v594_v7 = vadd.f32 %v1068_v62, %v593_v43 }
 0x10d   :  { %v1070_v49 = vpop.f32.mrf.mxu0 }
 0x10e   :  { %v598_v53 = vpop.f32.mrf.mxu1  ;;  %v1071_v3 = vadd.f32 %v1070_v49, %v1069_v44  ;;  %v629_v16 = vadd.f32 %v628_v11, %v594_v7 }
 0x10f   :  { %v1072_v54 = vpop.f32.mrf.mxu0 }
 0x110   :  { %v600_v58 = vpop.f32.mrf.mxu1  ;;  %v599_v12 = vadd.f32 %v1071_v3, %v598_v53 }
 0x111   :  { %v1073_v59 = vpop.f32.mrf.mxu0 }
 0x112   :  { %v601_v63 = vpop.f32.mrf.mxu1  ;;  %v1074_v8 = vadd.f32 %v1073_v59, %v1072_v54  ;;  %v630_v21 = vadd.f32 %v629_v16, %v599_v12 }
 0x113   :  { %v1075_v0 = vpop.f32.mrf.mxu0 }
 0x114   :  { %v603_v4 = vpop.f32.mrf.mxu1  ;;  %v602_v17 = vadd.f32 %v1074_v8, %v601_v63 }
 0x115   :  { %v1076_v5 = vpop.f32.mrf.mxu0 }
 0x116   :  { %v606_v9 = vpop.f32.mrf.mxu1  ;;  %v1077_v13 = vadd.f32 %v1076_v5, %v1075_v0  ;;  %v631_v25 = vadd.f32 %v630_v21, %v602_v17 }
 0x117   :  { %v1078_v10 = vpop.f32.mrf.mxu0 }
 0x118   :  { %v608_v14 = vpop.f32.mrf.mxu1  ;;  %v607_v22 = vadd.f32 %v1077_v13, %v606_v9 }
 0x119   :  { %v1079_v15 = vpop.f32.mrf.mxu0 }
 0x11a   :  { %v1080_v18 = vadd.f32 %v1079_v15, %v1078_v10  ;;  %v609_v19 = vpop.f32.mrf.mxu1  ;;  %v632_v30 = vadd.f32 %v631_v25, %v607_v22 }
 0x11b   :  { %v1081_v20 = vpop.f32.mrf.mxu0 }
 0x11c   :  { %v611_v23 = vpop.f32.mrf.mxu1  ;;  %v610_v26 = vadd.f32 %v1080_v18, %v609_v19 }
 0x11d   :  { %v1082_v24 = vpop.f32.mrf.mxu0 }
 0x11e   :  { %v1083_v27 = vadd.f32 %v1082_v24, %v1081_v20  ;;  %v614_v28 = vpop.f32.mrf.mxu1  ;;  %v633_v37 = vadd.f32 %v632_v30, %v610_v26 }
 0x11f   :  { %v1084_v29 = vpop.f32.mrf.mxu0 }
 0x120   :  { %v615_v32 = vadd.f32 %v1083_v27, %v614_v28  ;;  %v616_v33 = vpop.f32.mrf.mxu1 }
 0x121   :  { %v1085_v34 = vpop.f32.mrf.mxu0 }
 0x122   :  { %v1086_v38 = vadd.f32 %v1085_v34, %v1084_v29  ;;  %v617_v39 = vpop.f32.mrf.mxu1  ;;  %v634_v40 = vadd.f32 %v633_v37, %v615_v32 }
 0x124   :  { %v618_v42 = vadd.f32 %v1086_v38, %v617_v39  ;;  %v619_v43 = vpop.f32.mrf.mxu1 }
 0x126   :  { %v635_v44 = vadd.f32 %v634_v40, %v618_v42 }
 0x128   :  { %v636_v45 = vrot.slane %v635_v44, 4 }
 0x12a   :  { %v637_v47 = vadd.f32 %v636_v45, %v635_v44 }
 0x12c   :  { %v638_v48 = vrot.slane %v637_v47, 2 }
 0x12e   :  { %v639_v49 = vadd.f32 %v638_v48, %v637_v47 }
 0x130   :  { %v640_v50 = vrot.slane %v639_v49, 1 }
 0x132   :  { %v641_v52 = vadd.f32 %v640_v50, %v639_v49 }
 0x134   :  { %v642_v53 = vmul.f32 0.0078125, %v641_v52 }
 0x136   :  { %v1405_v54 = vsub.f32 %v1379_v35, %v642_v53  ;;  %v1408_v55 = vsub.f32 %v1377_v31, %v642_v53  ;;  %v1411_v57 = vsub.f32 %v1381_v36, %v642_v53  ;;  %v1418_v60 = vsub.f32 %v1385_v41, %v642_v53 }
 0x137   :  { %v1421_v62 = vsub.f32 %v1388_v46, %v642_v53  ;;  %v648_v63 = vsub.f32 %v1391_v51, %v642_v53  ;;  %v649_v1 = vsub.f32 %v1394_v56, %v642_v53  ;;  %v650_v4 = vsub.f32 %v1397_v61, %v642_v53 }
 0x138   :  { %v659_v58 = vmul.f32 %v1405_v54, %v1405_v54  ;;  %v660_v59 = vmul.f32 %v1408_v55, %v1408_v55  ;;  %v661_v35 = vmul.f32 %v1411_v57, %v1411_v57  ;;  %v662_v36 = vmul.f32 %v1418_v60, %v1418_v60 }
 0x139   :  { %v663_v3 = vmul.f32 %v1421_v62, %v1421_v62  ;;  %v664_v46 = vmul.f32 %v648_v63, %v648_v63  ;;  %v651_v6 = vsub.f32 %v1400_v2, %v642_v53  ;;  %v665_v8 = vmul.f32 %v649_v1, %v649_v1 }
 0x13a   :  { %v675_v31 = vadd.f32 %v660_v59, %v659_v58  ;;  %v652_v10 = vsub.f32 %v594_v7, %v642_v53  ;;  %v666_v51 = vmul.f32 %v650_v4, %v650_v4  ;;  %v653_v13 = vsub.f32 %v599_v12, %v642_v53 }
 0x13b   :  { %v667_v14 = vmul.f32 %v651_v6, %v651_v6  ;;  %v654_v16 = vsub.f32 %v602_v17, %v642_v53  ;;  %v655_v19 = vsub.f32 %v607_v22, %v642_v53  ;;  %v656_v23 = vsub.f32 %v610_v26, %v642_v53 }
 0x13c   :  { %v676_v0 = vadd.f32 %v675_v31, %v661_v35  ;;  %v668_v56 = vmul.f32 %v652_v10, %v652_v10  ;;  %v669_v20 = vmul.f32 %v653_v13, %v653_v13  ;;  %v657_v25 = vsub.f32 %v615_v32, %v642_v53 }
 0x13d   :  { %v670_v61 = vmul.f32 %v654_v16, %v654_v16  ;;  %v671_v27 = vmul.f32 %v655_v19, %v655_v19  ;;  %v658_v28 = vsub.f32 %v618_v42, %v642_v53  ;;  %v672_v29 = vmul.f32 %v656_v23, %v656_v23  ;;  %v697_v42 = vld [vmem:[%s1486_s2] sm:$0x1] }
 0x13e   :  { %v677_v41 = vadd.f32 %v676_v0, %v662_v36  ;;  %v673_v30 = vmul.f32 %v657_v25, %v657_v25  ;;  %v702_v32 = vlaneseq }
 0x13f   :  { %v674_v12 = vmul.f32 %v658_v28, %v658_v28 }
 0x140   :  { %v678_v5 = vadd.f32 %v677_v41, %v663_v3  ;;  %v703_v45 = vshrl.u32 %v702_v32, 7  ;;  %v943_v3 = vld [vmem:[%s1487_s3] ss:$0 sm:$0xff] }
 0x142   :  { %v679_v9 = vadd.f32 %v678_v5, %v664_v46  ;;  %v704_v47 = vsub.s32 0, %v703_v45 }
 0x144   :  { %v680_v11 = vadd.f32 %v679_v9, %v665_v8 }
 0x146   :  { %v681_v15 = vadd.f32 %v680_v11, %v666_v51 }
 0x148   :  { %v682_v18 = vadd.f32 %v681_v15, %v667_v14 }
 0x14a   :  { %v683_v21 = vadd.f32 %v682_v18, %v668_v56 }
 0x14c   :  { %v684_v24 = vadd.f32 %v683_v21, %v669_v20 }
 0x14e   :  { %v685_v2 = vadd.f32 %v684_v24, %v670_v61 }
 0x150   :  { %v686_v7 = vadd.f32 %v685_v2, %v671_v27 }
 0x152   :  { %v687_v33 = vadd.f32 %v686_v7, %v672_v29 }
 0x154   :  { %v688_v34 = vadd.f32 %v687_v33, %v673_v30 }
 0x156   :  { %v689_v37 = vadd.f32 %v688_v34, %v674_v12 }
 0x158   :  { %v690_v17 = vrot.slane %v689_v37, 4 }
 0x15a   :  { %v691_v38 = vadd.f32 %v690_v17, %v689_v37 }
 0x15c   :  { %v692_v39 = vrot.slane %v691_v38, 2 }
 0x15e   :  { %v693_v22 = vadd.f32 %v692_v39, %v691_v38 }
 0x160   :  { %v694_v40 = vrot.slane %v693_v22, 1 }
 0x162   :  { %v695_v43 = vadd.f32 %v694_v40, %v693_v22 }
 0x164   :  { %v696_v26 = vmul.f32 0.0078125, %v695_v43 }
 0x166   :  { %v698_v44 = vadd.f32 1e-05, %v696_v26 }
 0x168   :  { %1161 = vrsqrt.f32 %v698_v44 }
 0x175   :  { %v1162_v48 = vpop.eup %1161 }
 0x176   :  { %v700_v49 = vmul.f32 %v1162_v48, %v697_v42 }
 0x178   :  { %v705_v50 = vrot.slane %v700_v49, %v704_v47 }
 0x17a   :  { %v707_v52 = vmul.f32 %v705_v50, %v1405_v54  ;;  %v708_v53 = vmul.f32 %v705_v50, %v1408_v55  ;;  %v709_v58 = vmul.f32 %v705_v50, %v1411_v57  ;;  %v710_v59 = vmul.f32 %v705_v50, %v1418_v60 }
 0x17b   :  { %v711_v35 = vmul.f32 %v705_v50, %v1421_v62  ;;  %v712_v31 = vmul.f32 %v705_v50, %v648_v63  ;;  %v713_v36 = vmul.f32 %v705_v50, %v649_v1  ;;  %v714_v0 = vmul.f32 %v705_v50, %v650_v4 }
 0x17c   :  { %v715_v41 = vmul.f32 %v705_v50, %v651_v6  ;;  %v716_v46 = vmul.f32 %v705_v50, %v652_v10  ;;  %v717_v5 = vmul.f32 %v705_v50, %v653_v13  ;;  %v718_v8 = vmul.f32 %v705_v50, %v654_v16 }
 0x17d   :  { %v719_v54 = vmul.f32 %v705_v50, %v655_v19  ;;  %v720_v9 = vmul.f32 %v705_v50, %v656_v23  ;;  %v721_v55 = vmul.f32 %v705_v50, %v657_v25  ;;  %v722_v51 = vmul.f32 %v705_v50, %v658_v28 }
 0x17e   :  { %v730_v57 = vadd.f32 %v943_v3, %v707_v52  ;;  %v731_v11 = vadd.f32 %v943_v3, %v708_v53  ;;  %v732_v60 = vadd.f32 %v943_v3, %v709_v58  ;;  %v733_v14 = vadd.f32 %v943_v3, %v710_v59 }
 0x17f   :  { %v734_v62 = vadd.f32 %v943_v3, %v711_v35  ;;  %v735_v63 = vadd.f32 %v943_v3, %v712_v31  ;;  %v736_v1 = vadd.f32 %v943_v3, %v713_v36  ;;  %v737_v4 = vadd.f32 %v943_v3, %v714_v0 }
 0x180   :  { %v738_v15 = vadd.f32 %v943_v3, %v715_v41  ;;  %v739_v56 = vadd.f32 %v943_v3, %v716_v46  ;;  %v740_v18 = vadd.f32 %v943_v3, %v717_v5  ;;  %v741_v20 = vadd.f32 %v943_v3, %v718_v8 }
 0x181   :  { %v742_v6 = vadd.f32 %v943_v3, %v719_v54  ;;  %v743_v10 = vadd.f32 %v943_v3, %v720_v9  ;;  %v744_v13 = vadd.f32 %v943_v3, %v721_v55  ;;  %v745_v16 = vadd.f32 %v943_v3, %v722_v51 }
 0x182   :  { %vm746_vm1 = vcmp.gt.f32.partialorder %v730_v57, 0.0  ;;  %vm747_vm2 = vcmp.gt.f32.partialorder %v731_v11, 0.0  ;;  %vm748_vm3 = vcmp.gt.f32.partialorder %v732_v60, 0.0  ;;  %vm749_vm4 = vcmp.gt.f32.partialorder %v733_v14, 0.0 }
 0x183   :  { %vm750_vm5 = vcmp.gt.f32.partialorder %v734_v62, 0.0  ;;  %vm751_vm6 = vcmp.gt.f32.partialorder %v735_v63, 0.0  ;;  %vm752_vm7 = vcmp.gt.f32.partialorder %v736_v1, 0.0  ;;  %vm753_vm8 = vcmp.gt.f32.partialorder %v737_v4, 0.0 }
 0x184   :  { %vm754_vm9 = vcmp.gt.f32.partialorder %v738_v15, 0.0  ;;  %vm755_vm10 = vcmp.gt.f32.partialorder %v739_v56, 0.0  ;;  %vm756_vm11 = vcmp.gt.f32.partialorder %v740_v18, 0.0  ;;  %vm757_vm12 = vcmp.gt.f32.partialorder %v741_v20, 0.0 }
 0x185   :  { %vm758_vm13 = vcmp.gt.f32.partialorder %v742_v6, 0.0  ;;  %vm759_vm14 = vcmp.gt.f32.partialorder %v743_v10, 0.0  ;;  %vm760_vm15 = vcmp.gt.f32.partialorder %v744_v13, 0.0  ;;  %vm761_vm0 = vcmp.gt.f32.partialorder %v745_v16, 0.0 }
 0x186   :  { %v762_v19 = vmul.f32 0.2, %v730_v57  ;;  %v763_v21 = vmul.f32 0.2, %v731_v11  ;;  %v764_v23 = vmul.f32 0.2, %v732_v60 }
 0x187   :  { %v765_v61 = vmul.f32 0.2, %v733_v14  ;;  %v766_v24 = vmul.f32 0.2, %v734_v62  ;;  %v767_v25 = vmul.f32 0.2, %v735_v63 }
 0x188   :  { %v768_v27 = vmul.f32 0.2, %v736_v1  ;;  %v769_v2 = vmul.f32 0.2, %v737_v4  ;;  %v770_v28 = vmul.f32 0.2, %v738_v15  ;;  %v778_v29 = vsel %vm746_vm1, %v730_v57, %v762_v19 }
 0x189   :  { %v771_v7 = vmul.f32 0.2, %v739_v56  ;;  %v772_v30 = vmul.f32 0.2, %v740_v18  ;;  %v773_v33 = vmul.f32 0.2, %v741_v20  ;;  %v779_v12 = vsel %vm747_vm2, %v731_v11, %v763_v21 }
 0x18a   :  { %v774_v34 = vmul.f32 0.2, %v742_v6  ;;  %v775_v37 = vmul.f32 0.2, %v743_v10  ;;  %v776_v17 = vmul.f32 0.2, %v744_v13  ;;  %v780_v38 = vsel %vm748_vm3, %v732_v60, %v764_v23 }
 0x18b   :  { %v777_v39 = vmul.f32 0.2, %v745_v16  ;;  %v781_v22 = vsel %vm749_vm4, %v733_v14, %v765_v61  ;;  %v782_v40 = vsel %vm750_vm5, %v734_v62, %v766_v24  ;;  %v783_v43 = vsel %vm751_vm6, %v735_v63, %v767_v25 }
 0x18c   :  { %v784_v26 = vsel %vm752_vm7, %v736_v1, %v768_v27  ;;  %v785_v44 = vsel %vm753_vm8, %v737_v4, %v769_v2  ;;  %v786_v32 = vsel %vm754_vm9, %v738_v15, %v770_v28  ;;  %v787_v45 = vsel %vm755_vm10, %v739_v56, %v771_v7 }
 0x18d   :  { %v788_v42 = vsel %vm756_vm11, %v740_v18, %v772_v30  ;;  %v789_v47 = vsel %vm757_vm12, %v741_v20, %v773_v33  ;;  %v790_v48 = vsel %vm758_vm13, %v742_v6, %v774_v34  ;;  %v791_v49 = vsel %vm759_vm14, %v743_v10, %v775_v37 }
 0x18e   :  { %v792_v50 = vsel %vm760_vm15, %v744_v13, %v776_v17  ;;  %v793_v52 = vsel %vm761_vm0, %v745_v16, %v777_v39  ;;  %v979_v53 = vpack.c.bf16 %v779_v12, %v778_v29  ;;  %v984_v58 = vpack.c.bf16 %v781_v22, %v780_v38 }
 0x18f   :  { %v989_v59 = vpack.c.bf16 %v783_v43, %v782_v40  ;;  %v994_v35 = vpack.c.bf16 %v785_v44, %v784_v26  ;;  %v999_v31 = vpack.c.bf16 %v787_v45, %v786_v32  ;;  %v1004_v36 = vpack.c.bf16 %v789_v47, %v788_v42 }
 0x190   :  { %980 = vst [vmem:[%s1488_s4] sm:$0xff] %v979_v53   ;;  %1016 = vst [vmem:[%s1488_s4 + $0x8] sm:$0xff] %v984_v58   ;;  %v1009_v0 = vpack.c.bf16 %v791_v49, %v790_v48  ;;  %v1014_v3 = vpack.c.bf16 %v793_v52, %v792_v50 }
 0x191   :  { %1017 = vst [vmem:[%s1488_s4 + $0x10] sm:$0xff] %v989_v59   ;;  %1018 = vst [vmem:[%s1488_s4 + $0x18] sm:$0xff] %v994_v35  }
 0x192   :  { %1019 = vst [vmem:[%s1488_s4 + $0x20] sm:$0xff] %v999_v31   ;;  %1020 = vst [vmem:[%s1488_s4 + $0x28] sm:$0xff] %v1004_v36  }
 0x193   :  { %1021 = vst [vmem:[%s1488_s4 + $0x30] sm:$0xff] %v1009_v0   ;;  %1022 = vst [vmem:[%s1488_s4 + $0x38] sm:$0xff] %v1014_v3  }

// kernel: discriminator_forward.7
= control target key start
LH: loop header
LB: loop body
LE: loop exit
PB: predicated region body
PF: predicated region fallthrough
CT: control target
= control target key end

     0   :  { %vm515_vm0 = vcmask 261120   ;;  %vm1148_vm1 = vmmov 0   ;;  %vm718_vm2 = vcmask 523264   ;;  %vm874_vm7 = vcmask 517120   ;;  %s1424_s1 = inlined_call_operand.vmem [shape: bf16[800,64], index: 1, kind: input, shape index: {}]   ;;  %s1425_s0 = inlined_call_operand.vmem [shape: bf16[32,800], index: 0, kind: input, shape index: {}]   ;;  %s1426_s2 = inlined_call_operand.vmem [shape: f32[1,64], index: 2, kind: input, shape index: {}]   ;;  %s1427_s3 = inlined_call_operand.vmem [shape: f32[1,64], index: 3, kind: input, shape index: {}]   ;;  %s1428_s4 = inlined_call_operand.vmem [shape: f32[32,64], index: 4, kind: input, shape index: {}]   ;;  %s1429_s5 = inlined_call_operand.vmem [shape: f32[2,32], index: 5, kind: input, shape index: {}]   ;;  %s1430_s6 = inlined_call_operand.<no memory space> [shape: f32[1,1], index: 6, kind: input, shape index: {}]   ;;  %s1431_s7 = inlined_call_operand.vmem [shape: f32[2,1], index: 7, kind: output, shape index: {}]  }
   0x1   :  { %v1075_v0 = vld [vmem:[%s1424_s1 + $0x78] sm:$0xff]   ;;  %v1079_v4 = vld [vmem:[%s1424_s1 + $0x70] sm:$0xff]   ;;  %v1083_v8 = vld [vmem:[%s1424_s1 + $0x68] sm:$0xff]   ;;  %vm886_vm8 = vcmask 1024  }
   0x2   :  { %v1076_v1 = vld [vmem:[%s1424_s1 + $0xf8] sm:$0xff]   ;;  %961 = vmatprep.subr.bf16.mxu0 %v1075_v0  ;;  %v1080_v5 = vld [vmem:[%s1424_s1 + $0xf0] sm:$0xff]   ;;  %v1084_v9 = vld [vmem:[%s1424_s1 + $0xe8] sm:$0xff]   ;;  %v1147_v0 = vmov 0.0  }
   0x3   :  { %v1077_v2 = vld [vmem:[%s1424_s1 + $0x38] sm:$0xff]   ;;  %989 = vmatprep.subr.bf16.mxu1 %v1076_v1  ;;  %v1081_v6 = vld [vmem:[%s1424_s1 + $0x30] sm:$0xff]   ;;  %v1085_v10 = vld [vmem:[%s1424_s1 + $0x28] sm:$0xff]  }
   0x4   :  { %v1078_v3 = vld [vmem:[%s1424_s1 + $0xb8] sm:$0xff]   ;;  %962 = vmatpush3.bf16.msra.mxu0 %v1077_v2  ;;  %v1082_v7 = vld [vmem:[%s1424_s1 + $0xb0] sm:$0xff]   ;;  %v1086_v11 = vld [vmem:[%s1424_s1 + $0xa8] sm:$0xff]  }
   0x5   :  { %990 = vmatpush3.bf16.msra.mxu1 %v1078_v3  ;;  %963 = vmatprep.subr.bf16.mxu0 %v1079_v4  ;;  %v1087_v12 = vld [vmem:[%s1424_s1 + $0x60] sm:$0xff]   ;;  %v1091_v16 = vld [vmem:[%s1424_s1 + $0x58] sm:$0xff]   ;;  %v1095_v20 = vld [vmem:[%s1424_s1 + $0x50] sm:$0xff]  }
   0x6   :  { %991 = vmatprep.subr.bf16.mxu1 %v1080_v5  ;;  %v1088_v13 = vld [vmem:[%s1424_s1 + $0xe0] sm:$0xff]   ;;  %v1092_v17 = vld [vmem:[%s1424_s1 + $0xd8] sm:$0xff]   ;;  %v1096_v21 = vld [vmem:[%s1424_s1 + $0xd0] sm:$0xff]  }
   0x7   :  { %v1089_v14 = vld [vmem:[%s1424_s1 + $0x20] sm:$0xff]   ;;  %v1093_v18 = vld [vmem:[%s1424_s1 + $0x18] sm:$0xff]   ;;  %v1097_v22 = vld [vmem:[%s1424_s1 + $0x10] sm:$0xff]  }
   0x8   :  { %964 = vmatpush3.bf16.msra.mxu0 %v1081_v6  ;;  %v1090_v15 = vld [vmem:[%s1424_s1 + $0xa0] sm:$0xff]   ;;  %v1094_v19 = vld [vmem:[%s1424_s1 + $0x98] sm:$0xff]   ;;  %v1098_v23 = vld [vmem:[%s1424_s1 + $0x90] sm:$0xff]  }
   0x9   :  { %992 = vmatpush3.bf16.msra.mxu1 %v1082_v7  ;;  %965 = vmatprep.subr.bf16.mxu0 %v1083_v8  ;;  %v1099_v24 = vld [vmem:[%s1424_s1 + $0x48] sm:$0xff]   ;;  %v1103_v28 = vld [vmem:[%s1424_s1 + $0x40] sm:$0xff]   ;;  %v1113_v36 = vld [vmem:[%s1424_s1 + $0x178] sm:$0xff]  }
   0xa   :  { %993 = vmatprep.subr.bf16.mxu1 %v1084_v9  ;;  %v1100_v25 = vld [vmem:[%s1424_s1 + $0xc8] sm:$0xff]   ;;  %v1104_v29 = vld [vmem:[%s1424_s1 + $0xc0] sm:$0xff]   ;;  %v1114_v37 = vld [vmem:[%s1424_s1 + $0x138] sm:$0xff]  }
   0xb   :  { %v1101_v26 = vld [vmem:[%s1424_s1 + $0x8] sm:$0xff]   ;;  %v1105_v30 = vld [vmem:[%s1424_s1] sm:$0xff]   ;;  %v1115_v38 = vld [vmem:[%s1424_s1 + $0x170] sm:$0xff]  }
   0xc   :  { %966 = vmatpush3.bf16.msra.mxu0 %v1085_v10  ;;  %v1102_v27 = vld [vmem:[%s1424_s1 + $0x88] sm:$0xff]   ;;  %v1106_v31 = vld [vmem:[%s1424_s1 + $0x80] sm:$0xff]   ;;  %v1116_v39 = vld [vmem:[%s1424_s1 + $0x130] sm:$0xff]  }
   0xd   :  { %994 = vmatpush3.bf16.msra.mxu1 %v1086_v11  ;;  %967 = vmatprep.subr.bf16.mxu0 %v1087_v12  ;;  %v1107_v32 = vld [vmem:[%s1425_s0] ss:$28 sps:$4 sm:$0xff]   ;;  %v1110_v34 = vld [vmem:[%s1425_s0 + $0x8] ss:$28 sps:$4 sm:$0xff]   ;;  %v1127_v47 = vld [vmem:[%s1425_s0 + $0x38] ss:$28 sps:$4 sm:$0xff]  }
   0xe   :  { %995 = vmatprep.subr.bf16.mxu1 %v1088_v13  ;;  %v1109_v33 = vld [vmem:[%s1425_s0 + $0x4] ss:$28 sps:$4 sm:$0xff]   ;;  %v1112_v35 = vld [vmem:[%s1425_s0 + $0xc] ss:$28 sps:$4 sm:$0xff]   ;;  %v1122_v44 = vld [vmem:[%s1425_s0 + $0x3c] ss:$28 sps:$4 sm:$0xff]  }
   0xf   :  { %554 = vmatprep.mubr.bf16.mxu0 %v1109_v33  ;;  %603 = vmatprep.mubr.bf16.mxu1 %v1112_v35  ;;  %v1117_v40 = vld [vmem:[%s1424_s1 + $0x168] sm:$0xff]   ;;  %v1119_v42 = vld [vmem:[%s1424_s1 + $0x160] sm:$0xff]   ;;  %v1121_v46 = vld [vmem:[%s1424_s1 + $0x158] sm:$0xff]  }
  0x10   :  { %968 = vmatpush3.bf16.msra.mxu0 %v1089_v14  ;;  %v1118_v41 = vld [vmem:[%s1424_s1 + $0x128] sm:$0xff]   ;;  %v1120_v43 = vld [vmem:[%s1424_s1 + $0x120] sm:$0xff]   ;;  %v1126_v49 = vld [vmem:[%s1424_s1 + $0x118] sm:$0xff]  }
  0x11   :  { %996 = vmatpush3.bf16.msra.mxu1 %v1090_v15  ;;  %969 = vmatprep.subr.bf16.mxu0 %v1091_v16  ;;  %v1124_v45 = vld [vmem:[%s1425_s0 + $0x44] ss:$28 sps:$4 sm:$0xff]   ;;  %v1129_v50 = vld [vmem:[%s1424_s1 + $0x150] sm:$0xff]   ;;  %v1132_v51 = vld [vmem:[%s1424_s1 + $0x188] sm:$0xff]  }
  0x12   :  { %997 = vmatprep.subr.bf16.mxu1 %v1092_v17  ;;  %v1128_v48 = vld [vmem:[%s1425_s0 + $0x40] ss:$28 sps:$4 sm:$0xff]   ;;  %v1130_v52 = vld [vmem:[%s1424_s1 + $0x110] sm:$0xff]   ;;  %v1131_v53 = vld [vmem:[%s1424_s1 + $0x148] sm:$0xff]  }
  0x13   :  { %v1136_v54 = vld [vmem:[%s1424_s1 + $0x180] sm:$0xff]   ;;  %v1133_v55 = vld [vmem:[%s1424_s1 + $0x108] sm:$0xff]   ;;  %v1139_v56 = vld [vmem:[%s1425_s0 + $0x14] ss:$28 sps:$4 sm:$0xff]  }
  0x14   :  { %970 = vmatpush3.bf16.msra.mxu0 %v1093_v18  ;;  %v1140_v57 = vld [vmem:[%s1425_s0 + $0x18] ss:$28 sps:$4 sm:$0xff]   ;;  %v1141_v58 = vld [vmem:[%s1425_s0 + $0x50] ss:$28 sps:$4 sm:$0xff]   ;;  %v1134_v59 = vld [vmem:[%s1424_s1 + $0x140] sm:$0xff]  }
  0x15   :  { %998 = vmatpush3.bf16.msra.mxu1 %v1094_v19  ;;  %971 = vmatprep.subr.bf16.mxu0 %v1095_v20  ;;  %v1135_v60 = vld [vmem:[%s1424_s1 + $0x100] sm:$0xff]   ;;  %v1137_v61 = vld [vmem:[%s1425_s0 + $0x10] ss:$28 sps:$4 sm:$0xff]  }
  0x16   :  { %999 = vmatprep.subr.bf16.mxu1 %v1096_v21  ;;  %v1142_v62 = vld [vmem:[%s1425_s0 + $0x4c] ss:$28 sps:$4 sm:$0xff]  }
  0x17   :  { %v1144_v63 = vld [vmem:[%s1425_s0 + $0x48] ss:$28 sps:$4 sm:$0xff]  }
  0x18   :  { %972 = vmatpush3.bf16.msra.mxu0 %v1097_v22 }
  0x19   :  { %1000 = vmatpush3.bf16.msra.mxu1 %v1098_v23  ;;  %973 = vmatprep.subr.bf16.mxu0 %v1099_v24 }
  0x1a   :  { %1001 = vmatprep.subr.bf16.mxu1 %v1100_v25 }
  0x1c   :  { %974 = vmatpush3.bf16.msra.mxu0 %v1101_v26 }
  0x1d   :  { %1002 = vmatpush3.bf16.msra.mxu1 %v1102_v27  ;;  %975 = vmatprep.subr.bf16.mxu0 %v1103_v28 }
  0x1e   :  { %1003 = vmatprep.subr.bf16.mxu1 %v1104_v29 }
  0x20   :  { %976 = vmatpush3.bf16.msra.mxu0 %v1105_v30 }
  0x21   :  { %1004 = vmatpush3.bf16.msra.mxu1 %v1106_v31  ;;  %1017 = vmatprep.subr.bf16.mxu0 %v1113_v36 }
  0x22   :  { %1054 = vmatprep.subr.bf16.mxu1 %v1132_v51 }
  0x23   :  { %555 = vmatmul.mubr.bf16.vlgmr.msra.gmra.mxu0 %v1107_v32 }
  0x24   :  { %604 = vmatmul.mubr.bf16.vlgmr.msra.gmra.mxu1 %v1110_v34  ;;  %1018 = vmatpush3.bf16.msra.mxu0 %v1114_v37 }
  0x25   :  { %1019 = vmatprep.subr.bf16.mxu0 %v1115_v38  ;;  %562 = vmatprep.mubr.bf16.mxu0 %v1122_v44 }
  0x26   :  { %611 = vmatprep.mubr.bf16.mxu1 %v1124_v45  ;;  %1055 = vmatpush3.bf16.msra.mxu1 %v1132_v51 }
  0x27   :  { %1056 = vmatprep.subr.bf16.mxu1 %v1136_v54 }
  0x28   :  { %1020 = vmatpush3.bf16.msra.mxu0 %v1116_v39 }
  0x29   :  { %1021 = vmatprep.subr.bf16.mxu0 %v1117_v40 }
  0x2a   :  { %1057 = vmatpush3.bf16.msra.mxu1 %v1136_v54 }
  0x2b   :  { %563 = vmatmul.mubr.bf16.gmra.mxu0 %v1127_v47  ;;  %1062 = vmatprep.subr.mxu1 %v1147_v0 }
  0x2c   :  { %1022 = vmatpush3.bf16.msra.mxu0 %v1118_v41  ;;  %612 = vmatmul.mubr.bf16.gmra.mxu1 %v1128_v48 }
  0x2d   :  { %1023 = vmatprep.subr.bf16.mxu0 %v1119_v42  ;;  %652 = vmatprep.mubr.bf16.mxu0 %v1139_v56 }
  0x2e   :  { %1058 = vmatprep.mubr.msk.bf16.mxu1 %vm515_vm0, %v1140_v57 }
  0x30   :  { %1024 = vmatpush3.bf16.msra.mxu0 %v1120_v43 }
  0x31   :  { %1025 = vmatprep.subr.bf16.mxu0 %v1121_v46 }
  0x34   :  { %1026 = vmatpush3.bf16.msra.mxu0 %v1126_v49  ;;  %1059 = vmatmul.mubr.msk.bf16.vlgmr.msra.gmra.mxu1 %vm515_vm0, %v1141_v58 }
  0x35   :  { %1027 = vmatprep.subr.bf16.mxu0 %v1129_v50  ;;  %1070 = vmatprep.mubr.msk.f32.mxu1 %vm1148_vm1, %v1147_v0 }
  0x38   :  { %1028 = vmatpush3.bf16.msra.mxu0 %v1130_v52 }
  0x39   :  { %1029 = vmatprep.subr.bf16.mxu0 %v1131_v53 }
  0x3c   :  { %1030 = vmatpush3.bf16.msra.mxu0 %v1133_v55 }
  0x3d   :  { %1031 = vmatprep.subr.bf16.mxu0 %v1134_v59 }
  0x40   :  { %1032 = vmatpush3.bf16.msra.mxu0 %v1135_v60 }
  0x43   :  { %653 = vmatmul.mubr.bf16.vlgmr.msra.gmra.mxu0 %v1137_v61 }
  0x44   :  { %660 = vmatprep.mubr.bf16.mxu0 %v1142_v62 }
  0x4b   :  { %661 = vmatmul.mubr.bf16.gmra.mxu0 %v1144_v63 }
  0xe3   :  { %v977_v2 = vpop.f32.mrf.mxu0 }
  0xe4   :  { %v1005_v1 = vpop.f32.mrf.mxu1 }
  0xe5   :  { %v978_v4 = vpop.f32.mrf.mxu0 }
  0xe6   :  { %v1006_v3 = vpop.f32.mrf.mxu1  ;;  %v979_v21 = vadd.f32 %v978_v4, %v977_v2 }
  0xe7   :  { %v980_v6 = vpop.f32.mrf.mxu0  ;;  %v1007_v22 = vadd.f32 %v1006_v3, %v1005_v1 }
  0xe8   :  { %v1008_v5 = vpop.f32.mrf.mxu1 }
  0xe9   :  { %v981_v8 = vpop.f32.mrf.mxu0  ;;  %v606_v31 = vadd.f32 %v1007_v22, %v979_v21 }
  0xea   :  { %v1009_v7 = vpop.f32.mrf.mxu1  ;;  %v982_v23 = vadd.f32 %v981_v8, %v980_v6 }
  0xeb   :  { %v983_v10 = vpop.f32.mrf.mxu0  ;;  %v1010_v24 = vadd.f32 %v1009_v7, %v1008_v5 }
  0xec   :  { %v1011_v9 = vpop.f32.mrf.mxu1 }
  0xed   :  { %v984_v12 = vpop.f32.mrf.mxu0  ;;  %v609_v32 = vadd.f32 %v1010_v24, %v982_v23 }
  0xee   :  { %v1012_v11 = vpop.f32.mrf.mxu1  ;;  %v985_v27 = vadd.f32 %v984_v12, %v983_v10 }
  0xef   :  { %v986_v14 = vpop.f32.mrf.mxu0  ;;  %v1013_v28 = vadd.f32 %v1012_v11, %v1011_v9 }
  0xf0   :  { %v1014_v13 = vpop.f32.mrf.mxu1 }
  0xf1   :  { %v987_v16 = vpop.f32.mrf.mxu0  ;;  %v614_v37 = vadd.f32 %v1013_v28, %v985_v27  ;;  %v760_v27 = vlaneseq }
  0xf2   :  { %v1015_v15 = vpop.f32.mrf.mxu1  ;;  %v988_v40 = vadd.f32 %v987_v16, %v986_v14 }
  0xf3   :  { %v1016_v41 = vadd.f32 %v1015_v15, %v1014_v13  ;;  %v761_v28 = vshrl.u32 %v760_v27, 7 }
  0xf4   :  { %v1060_v17 = vpop.f32.mrf.mxu1 }
  0xf5   :  { %v617_v48 = vadd.f32 %v1016_v41, %v988_v40 }
  0xf6   :  { %v703_v20 = vpop.f32.mrf.mxu1 }
  0xf8   :  { %v1061_v30 = vpop.f32.mrf.mxu1 }
  0xfa   :  { %v706_v38 = vpop.f32.mrf.mxu1 }
 0x103   :  { %v1033_v18 = vpop.f32.mrf.mxu0 }
 0x105   :  { %v1034_v19 = vpop.f32.mrf.mxu0 }
 0x106   :  { %v1035_v26 = vadd.f32 %v1034_v19, %v1033_v18 }
 0x107   :  { %v1036_v25 = vpop.f32.mrf.mxu0 }
 0x108   :  { %v655_v35 = vadd.f32 %v1035_v26, %v606_v31 }
 0x109   :  { %v1037_v29 = vpop.f32.mrf.mxu0 }
 0x10a   :  { %v1038_v33 = vadd.f32 %v1037_v29, %v1036_v25  ;;  %v704_v45 = vadd.f32 %v703_v20, %v655_v35  ;;  %v755_v29 = vld [vmem:[%s1426_s2] sm:$0x1] }
 0x10b   :  { %v1039_v34 = vpop.f32.mrf.mxu0 }
 0x10c   :  { %v658_v36 = vadd.f32 %v1038_v33, %v609_v32  ;;  %v719_v52 = vsel %vm718_vm2, %v704_v45, 0.0 }
 0x10d   :  { %v1040_v39 = vpop.f32.mrf.mxu0 }
 0x10e   :  { %v707_v42 = vadd.f32 %v706_v38, %v658_v36  ;;  %v1041_v43 = vadd.f32 %v1040_v39, %v1039_v34  ;;  %v958_v34 = vld [vmem:[%s1427_s3] ss:$0 sm:$0xff] }
 0x10f   :  { %v1042_v44 = vpop.f32.mrf.mxu0 }
 0x110   :  { %v663_v46 = vadd.f32 %v1041_v43, %v614_v37  ;;  %v720_v49 = vsel %vm718_vm2, %v707_v42, 0.0  ;;  %v795_v43 = vld [vmem:[%s1428_s4 + $0x18] sm:$0xff] }
 0x111   :  { %v1043_v47 = vpop.f32.mrf.mxu0  ;;  %v721_v55 = vadd.f32 %v720_v49, %v719_v52  ;;  %v794_v49 = vld [vmem:[%s1428_s4 + $0x10] sm:$0xff] }
 0x112   :  { %v712_v50 = vadd.f32 %v1060_v17, %v663_v46  ;;  %v1044_v51 = vadd.f32 %v1043_v47, %v1042_v44 }
 0x114   :  { %v722_v53 = vsel %vm718_vm2, %v712_v50, 0.0  ;;  %v666_v54 = vadd.f32 %v1044_v51, %v617_v48 }
 0x115   :  { %v723_v57 = vadd.f32 %v722_v53, %v721_v55  ;;  %v793_v53 = vld [vmem:[%s1428_s4 + $0x8] sm:$0xff] }
 0x116   :  { %v715_v56 = vadd.f32 %v1061_v30, %v666_v54  ;;  %v762_v30 = vsub.s32 0, %v761_v28 }
 0x118   :  { %v724_v58 = vsel %vm718_vm2, %v715_v56, 0.0 }
 0x119   :  { %v725_v59 = vadd.f32 %v724_v58, %v723_v57 }
 0x11b   :  { %v726_v60 = vrot.slane %v725_v59, 4 }
 0x11d   :  { %v727_v61 = vadd.f32 %v726_v60, %v725_v59  ;;  %v800_v59 = vld [vmem:[%s1429_s5] sm:$0x3]  ;;  %v12_v60 = vstv %s1430_s6 }
 0x11e   :  { %13 = vst [vmem:[#allocation2] sm:$0x1] %v12_v60 }
 0x11f   :  { %v728_v62 = vrot.slane %v727_v61, 2 }
 0x121   :  { %v729_v63 = vadd.f32 %v728_v62, %v727_v61 }
 0x123   :  { %v730_v1 = vrot.slane %v729_v63, 1 }
 0x125   :  { %v731_v2 = vadd.f32 %v730_v1, %v729_v63  ;;  %v960_v1 = vld [vmem:[#allocation2] ss:$0 sm:$0xff] }
 0x127   :  { %v732_v3 = vmul.f32 0.03125, %v731_v2 }
 0x129   :  { %v733_v4 = vsub.f32 %v704_v45, %v732_v3  ;;  %v734_v5 = vsub.f32 %v707_v42, %v732_v3  ;;  %v735_v6 = vsub.f32 %v712_v50, %v732_v3  ;;  %v736_v7 = vsub.f32 %v715_v56, %v732_v3  ;;  %v792_v56 = vld [vmem:[%s1428_s4] sm:$0xff] }
 0x12b   :  { %v737_v8 = vmul.f32 %v733_v4, %v733_v4  ;;  %v738_v9 = vmul.f32 %v734_v5, %v734_v5  ;;  %v739_v10 = vmul.f32 %v735_v6, %v735_v6  ;;  %v740_v11 = vmul.f32 %v736_v7, %v736_v7 }
 0x12d   :  { %v741_v12 = vsel %vm718_vm2, %v737_v8, 0.0  ;;  %v742_v13 = vsel %vm718_vm2, %v738_v9, 0.0  ;;  %v744_v15 = vsel %vm718_vm2, %v739_v10, 0.0  ;;  %v746_v17 = vsel %vm718_vm2, %v740_v11, 0.0 }
 0x12e   :  { %v743_v14 = vadd.f32 %v742_v13, %v741_v12 }
 0x130   :  { %v745_v16 = vadd.f32 %v744_v15, %v743_v14 }
 0x132   :  { %v747_v18 = vadd.f32 %v746_v17, %v745_v16 }
 0x134   :  { %v748_v19 = vrot.slane %v747_v18, 4 }
 0x136   :  { %v749_v20 = vadd.f32 %v748_v19, %v747_v18 }
 0x138   :  { %v750_v21 = vrot.slane %v749_v20, 2 }
 0x13a   :  { %v751_v22 = vadd.f32 %v750_v21, %v749_v20 }
 0x13c   :  { %v752_v23 = vrot.slane %v751_v22, 1 }
 0x13e   :  { %v753_v24 = vadd.f32 %v752_v23, %v751_v22 }
 0x140   :  { %v754_v25 = vmul.f32 0.03125, %v753_v24 }
 0x142   :  { %v756_v26 = vadd.f32 1e-05, %v754_v25 }
 0x144   :  { %1145 = vrsqrt.f32 %v756_v26 }
 0x151   :  { %v1146_v31 = vpop.eup %1145 }
 0x152   :  { %v758_v32 = vmul.f32 %v1146_v31, %v755_v29 }
 0x154   :  { %v763_v33 = vrot.slane %v758_v32, %v762_v30 }
 0x156   :  { %v768_v35 = vmul.f32 %v763_v33, %v736_v7  ;;  %v767_v36 = vmul.f32 %v763_v33, %v735_v6  ;;  %v766_v37 = vmul.f32 %v763_v33, %v734_v5  ;;  %v765_v38 = vmul.f32 %v763_v33, %v733_v4 }
 0x158   :  { %v779_v39 = vadd.f32 %v958_v34, %v768_v35  ;;  %v778_v40 = vadd.f32 %v958_v34, %v767_v36  ;;  %v777_v41 = vadd.f32 %v958_v34, %v766_v37  ;;  %v776_v42 = vadd.f32 %v958_v34, %v765_v38 }
 0x15a   :  { %vm783_vm3 = vcmp.gt.f32.partialorder %v779_v39, 0.0  ;;  %v787_v44 = vmul.f32 0.2, %v779_v39  ;;  %vm782_vm4 = vcmp.gt.f32.partialorder %v778_v40, 0.0  ;;  %v786_v45 = vmul.f32 0.2, %v778_v40 }
 0x15b   :  { %vm781_vm5 = vcmp.gt.f32.partialorder %v777_v41, 0.0  ;;  %v785_v46 = vmul.f32 0.2, %v777_v41  ;;  %v784_v50 = vmul.f32 0.2, %v776_v42  ;;  %vm780_vm6 = vcmp.gt.f32.partialorder %v776_v42, 0.0 }
 0x15c   :  { %v791_v47 = vsel %vm783_vm3, %v779_v39, %v787_v44  ;;  %v790_v48 = vsel %vm782_vm4, %v778_v40, %v786_v45 }
 0x15d   :  { %v799_v51 = vmul.f32 %v795_v43, %v791_v47  ;;  %v789_v52 = vsel %vm781_vm5, %v777_v41, %v785_v46  ;;  %v798_v54 = vmul.f32 %v794_v49, %v790_v48  ;;  %v788_v55 = vsel %vm780_vm6, %v776_v42, %v784_v50 }
 0x15e   :  { %v797_v57 = vmul.f32 %v793_v53, %v789_v52  ;;  %v796_v58 = vmul.f32 %v792_v56, %v788_v55 }
 0x15f   :  { %1063 = vmatpush3.msra.mxu1 %v799_v51 }
 0x160   :  { %1064 = vmatprep.subr.mxu1 %v1147_v0 }
 0x161   :  { %1065 = vmatpush3.msra.mxu1 %v798_v54 }
 0x162   :  { %1066 = vmatprep.subr.mxu1 %v1147_v0 }
 0x163   :  { %1067 = vmatpush3.msra.mxu1 %v797_v57 }
 0x164   :  { %1068 = vmatprep.subr.mxu1 %v1147_v0 }
 0x165   :  { %1069 = vmatpush3.msra.mxu1 %v796_v58 }
 0x166   :  { %1071 = vmatmul.mubr.msk.f32.vlgmr.msra.gmra.mxu1 %vm515_vm0, %v800_v59 }
 0x226   :  { %v870_v61 = vpop.f32.mrf.mxu1 }
 0x227   :  { %v875_v62 = vsel %vm874_vm7, %v870_v61, 0.0 }
 0x228   :  { %v1072_v63 = vpop.f32.mrf.mxu1  ;;  %876 = vadd.xlane.f32.xlu0 %v875_v62 }
 0x2b1   :  { %v877_v2 = vpop.xlane.xlu0 %876 }
 0x2b2   :  { %v885_v3 = vadd.f32 %v960_v1, %v877_v2 }
 0x2b4   :  { %887 = vst.msk [vmem:[%s1431_s7] sm:$0x3] %vm886_vm8, %v885_v3 }

</bundles_post_ra>
